<compile_context>
chip_gen: v5e
topology: v5e:2x2
jax: 0.10.0
libtpu: 0.0.40
codegen_flags: <defaults>
</compile_context>

<pallas_src>
import jax
import jax.numpy as jnp
import numpy as np
from jax.experimental import pallas as pl
from jax.experimental.pallas import tpu as pltpu

# ---- configuration (layer index 0 from the reference file) ----
INPUT_DIM = 1
STATE_DIM = 20
CAUSE_DIM = 20
STATE_SIZE = 16
CAUSE_SIZE = 8
KSIZE = {'A': 3, 'B': 2, 'C': 2}
KSTRIDE = {'A': 1, 'B': 2, 'C': 2}
PADDING = {'A': 1, 'B': 0, 'C': 0}
GAMMA = 1.0          # self.gamma (non-trainable, fixed to 1.0)

# ---- kernel tiling constants ----
_TH = 8                               # image rows (H) per conv matmul chunk -> 128 flat rows
_K_PAD = 256                          # im2col depth 9*20=180 zero-padded to 2 lane tiles
_W_OFF = 8                            # sublane-aligned column where the h1 interior starts
_W_SCR = 32                           # padded W extent of the h1 scratch (>= _W_OFF + 16 + 1)
_S = KSTRIDE['B']                     # 2: xt spatial blocking factor (== B/C deconv stride)
_PREC = jax.lax.Precision.DEFAULT     # single-pass bf16 MXU operands, f32 accumulation


# ------------------------- fused Pallas kernel -------------------------

def _fused_layer_kernel(xp1_ref, xtb_ref, utf_ref,
                        wA0_ref, wA2_ref, wB2_ref, wC2_ref,
                        pf_ref, ps_ref, cs_ref,
                        h1p_ref):
    """Whole forward pass in one kernel; all intermediates stay in VMEM.

    xp1_ref : (B, H+2, W+2, C)      zero-padded xt_1, NHWC
    xtb_ref : (B*Hc*Hc, S*S*C)      xt, 2x2-blocked to match the B-deconv layout
    utf_ref : (B*Hc*Hc, Cc)         ut, NHWC flattened
    wA0/wA2 : (256, C)              im2col conv weights (K zero-padded 180->256)
    wB2     : (Cc, S*S*C)           B deconv as a plain matmul
    wC2     : (S*S*C, S*S*4*Co)     block-diagonal C deconv weight
    pf_ref  : (B*Hc*Hc, S*S*4*Co)   C(xt), blocked layout (un-blocked in wrapper)
    ps_ref  : (B, H, W, C)          A(xt_1) + xt_1, NHWC
    cs_ref  : (B*Hc*Hc, S*S*C)      gamma * xt, blocked layout
    h1p_ref : (B, H+2, _W_SCR, C)   scratch: zero-padded relu(A0(xt_1))
    """
    B, Hp, Wp, C = xp1_ref.shape
    H, W = Hp - 2, Wp - 2
    RT = _TH * W                       # 128 rows per conv chunk
    n_chunks = (B * H) // _TH          # 4

    def conv3x3_chunk(src_ref, b0, h0, col0, w_ref):
        # im2col for one 128-row chunk: 9 taps concatenated lane-wise (K=180,
        # padded to 256) -> a single lane-dense MXU matmul.
        pieces = []
        for dy in range(3):
            for dx in range(3):
                p = src_ref[b0, h0 + dy:h0 + dy + _TH, col0 + dx:col0 + dx + W, :]
                pieces.append(p.reshape(RT, C))
        pieces.append(jnp.zeros((RT, _K_PAD - 9 * C), jnp.float32))
        im2col = jnp.concatenate(pieces, axis=-1)                  # (128, 256)
        return jnp.dot(im2col, w_ref[...],
                       preferred_element_type=jnp.float32, precision=_PREC)

    # ---- B deconv + gamma + cause_state, fully fused on a lane-dense 2-D layout ----
    yb = jnp.dot(utf_ref[...], wB2_ref[...],
                 preferred_element_type=jnp.float32, precision=_PREC)      # (128, 80)
    gamma = (1.0 + jnp.exp(-yb)) * (0.5 * GAMMA)
    cs_ref[...] = gamma * xtb_ref[...]

    # ---- C deconv: block-diagonal weight handles all 4 xt sub-pixels at once ----
    pf_ref[...] = jnp.dot(xtb_ref[...], wC2_ref[...],
                          preferred_element_type=jnp.float32, precision=_PREC)  # (128, 16)

    # ---- A: conv3x3 -> relu -> conv3x3 -> relu (+ residual), row-tiled to 128 ----
    h1p_ref[...] = jnp.zeros_like(h1p_ref)          # zero border for the second conv
    for c in range(n_chunks):                       # stage 1: h1 = relu(A0 * xt_1)
        b0, h0 = divmod(c * _TH, H)
        acc = conv3x3_chunk(xp1_ref, b0, h0, 0, wA0_ref)
        h1p_ref[b0, 1 + h0:1 + h0 + _TH, _W_OFF:_W_OFF + W, :] = (
            jnp.maximum(acc, 0.0).reshape(_TH, W, C))
    for c in range(n_chunks):                       # stage 2: ps = relu(A2 * h1) + xt_1
        b0, h0 = divmod(c * _TH, H)
        acc = conv3x3_chunk(h1p_ref, b0, h0, _W_OFF - 1, wA2_ref)
        res = xp1_ref[b0, 1 + h0:1 + h0 + _TH, 1:1 + W, :]         # unpadded xt_1 rows
        ps_ref[b0, h0:h0 + _TH, :, :] = (
            jnp.maximum(acc, 0.0).reshape(_TH, W, C) + res)


# ------------------------- wrappers -------------------------

def pack_params(params):
    """One-time re-layout of the weights into the lane-dense shapes the fused
    kernel consumes (hoisted out of the per-call path)."""
    C, Cc, Co = STATE_DIM, CAUSE_DIM, INPUT_DIM
    kB, kC = KSIZE['B'], KSIZE['C']

    def pack_conv_a(w_hwio):
        w = jnp.asarray(w_hwio, jnp.float32).reshape(9 * C, C)     # (180, 20)
        return jnp.pad(w, ((0, _K_PAD - 9 * C), (0, 0)))           # (256, 20)

    wB2 = jnp.transpose(jnp.asarray(params['B_w'], jnp.float32),
                        (0, 2, 3, 1)).reshape(Cc, kB * kB * C)     # (20, 80)
    wC = jnp.transpose(jnp.asarray(params['C_w'], jnp.float32),
                       (0, 2, 3, 1)).reshape(C, kC * kC * Co)      # (20, 4)
    wC_blk = jnp.kron(jnp.eye(_S * _S, dtype=jnp.float32), wC)     # (80, 16) block-diag
    return {'wA0': pack_conv_a(params['A0_w']),
            'wA2': pack_conv_a(params['A2_w']),
            'wB2': wB2,
            'wC2': wC_blk}


def layer_forward(packed, xt_1, xt, ut):
    """Pallas implementation of layer.forward(xt_1, xt, ut). NCHW in / NCHW out."""
    B = xt_1.shape[0]
    C, Cc, Co = STATE_DIM, CAUSE_DIM, INPUT_DIM
    H, Hc = STATE_SIZE, CAUSE_SIZE
    kC = KSIZE['C']
    S = _S
    assert H == S * Hc and H % _TH == 0 and (B * H) % _TH == 0

    # --- boundary layout glue only (fused by XLA into the surrounding jit) ---
    xp1 = jnp.pad(jnp.transpose(xt_1, (0, 2, 3, 1)).astype(jnp.float32),
                  ((0, 0), (1, 1), (1, 1), (0, 0)))                        # (B, 18, 18, C)
    xtb = (xt.astype(jnp.float32)
             .reshape(B, C, Hc, S, Hc, S)
             .transpose(0, 2, 4, 3, 5, 1)
             .reshape(B * Hc * Hc, S * S * C))                             # (128, 80)
    utf = (jnp.transpose(ut, (0, 2, 3, 1)).astype(jnp.float32)
              .reshape(B * Hc * Hc, Cc))                                   # (128, 20)

    vmem = pl.BlockSpec(memory_space=pltpu.MemorySpace.VMEM)
    pf2, ps_h, cs2 = pl.pallas_call(
        _fused_layer_kernel,
        out_shape=(jax.ShapeDtypeStruct((B * Hc * Hc, S * S * kC * kC * Co), jnp.float32),
                   jax.ShapeDtypeStruct((B, H, H, C), jnp.float32),
                   jax.ShapeDtypeStruct((B * Hc * Hc, S * S * C), jnp.float32)),
        in_specs=[vmem] * 7,
        out_specs=(vmem, vmem, vmem),
        scratch_shapes=[pltpu.VMEM((B, H + 2, _W_SCR, C), jnp.float32)],
        # Note: total working set < 1 MiB, so a single grid-less program is fine on
        # v5e/v6e/v7x; add a ("parallel",) batch grid axis if batch grows (v7x 2 TCs).
    )(xp1, xtb, utf, packed['wA0'], packed['wA2'], packed['wB2'], packed['wC2'])

    # --- un-block the lane-dense kernel outputs back to NCHW (boundary glue) ---
    pf = (pf2.reshape(B, Hc, Hc, S, S, kC, kC, Co)
             .transpose(0, 7, 1, 3, 5, 2, 4, 6)
             .reshape(B, Co, S * kC * Hc, S * kC * Hc))                    # (B, 1, 32, 32)
    ps = jnp.transpose(ps_h, (0, 3, 1, 2))                                 # (B, 20, 16, 16)
    cs = (cs2.reshape(B, Hc, Hc, S, S, C)
             .transpose(0, 5, 1, 3, 2, 4)
             .reshape(B, C, S * Hc, S * Hc))                               # (B, 20, 16, 16)
    return pf, ps, cs


# ------------------------- pure-JAX reference -------------------------

def _reference_forward(params, xt_1, xt, ut):
    prec = jax.lax.Precision.DEFAULT   # same MXU precision policy as the kernel
    xt1_h = jnp.transpose(xt_1, (0, 2, 3, 1))
    xt_h = jnp.transpose(xt, (0, 2, 3, 1))
    ut_h = jnp.transpose(ut, (0, 2, 3, 1))

    def conv3x3(x, w):
        return jax.lax.conv_general_dilated(
            x, w, (1, 1), ((1, 1), (1, 1)),
            dimension_numbers=('NHWC', 'HWIO', 'NHWC'), precision=prec)

    def deconv(x, w_pt):
        B, H, W, Ci = x.shape
        _, Co, kH, kW = w_pt.shape
        out = jnp.zeros((B, H * kH, W * kW, Co), jnp.float32)
        for ky in range(kH):
            for kx in range(kW):
                c = jnp.einsum('bhwc,cd->bhwd', x, w_pt[:, :, ky, kx], precision=prec)
                out = out.at[:, ky::kH, kx::kW, :].set(c)
        return out

    pf = deconv(xt_h, params['C_w'])
    h1 = jax.nn.relu(conv3x3(xt1_h, params['A0_w']))
    ps = jax.nn.relu(conv3x3(h1, params['A2_w'])) + xt1_h
    gamma = GAMMA * (1.0 + jnp.exp(-deconv(ut_h, params['B_w']))) / 2.0
    cs = gamma * xt_h
    to_nchw = lambda a: jnp.transpose(a, (0, 3, 1, 2))
    return to_nchw(pf), to_nchw(ps), to_nchw(cs)


# ------------------------- main -------------------------

if __name__ == "__main__":
    key = jax.random.PRNGKey(0)
    k1, k2, k3, k4, k5, k6, k7 = jax.random.split(key, 7)
    B = 2

    # Deterministic synthetic parameters (same init ranges as the PyTorch module).
    # Conv weights in HWIO; ConvTranspose weights in PyTorch (Cin, Cout, kH, kW).
    params = {
        'A0_w': jax.random.uniform(k1, (3, 3, STATE_DIM, STATE_DIM),
                                   jnp.float32, -0.01, 0.01),
        'A2_w': jax.random.uniform(k2, (3, 3, STATE_DIM, STATE_DIM),
                                   jnp.float32, -0.01, 0.01),
        'B_w': jax.random.uniform(k3, (CAUSE_DIM, STATE_DIM, KSIZE['B'], KSIZE['B']),
                                  jnp.float32, -0.1, 0.1),
        'C_w': jax.random.uniform(k4, (STATE_DIM, INPUT_DIM, KSIZE['C'], KSIZE['C']),
                                  jnp.float32, -0.1, 0.1),
    }

    xt_1 = jax.random.normal(k5, (B, STATE_DIM, STATE_SIZE, STATE_SIZE), jnp.float32)
    xt = jax.random.normal(k6, (B, STATE_DIM, STATE_SIZE, STATE_SIZE), jnp.float32)
    ut = jax.random.normal(k7, (B, CAUSE_DIM, CAUSE_SIZE, CAUSE_SIZE), jnp.float32)

    packed = pack_params(params)          # one-time weight re-layout (outside jit path)
    fwd = jax.jit(layer_forward)
    pf, ps, cs = jax.block_until_ready(fwd(packed, xt_1, xt, ut))

    assert pf.shape == (B, INPUT_DIM, 2 * STATE_SIZE, 2 * STATE_SIZE)
    assert ps.shape == (B, STATE_DIM, STATE_SIZE, STATE_SIZE)
    assert cs.shape == (B, STATE_DIM, STATE_SIZE, STATE_SIZE)

    pf_r, ps_r, cs_r = _reference_forward(params, xt_1, xt, ut)
    # 2e-3 tolerance covers single-pass bf16 MXU operand rounding (Precision.DEFAULT).
    np.testing.assert_allclose(np.asarray(pf), np.asarray(pf_r), rtol=2e-3, atol=2e-3)
    np.testing.assert_allclose(np.asarray(ps), np.asarray(ps_r), rtol=2e-3, atol=2e-3)
    np.testing.assert_allclose(np.asarray(cs), np.asarray(cs_r), rtol=2e-3, atol=2e-3)

    print("KERNEL_OK")
</pallas_src>

<mosaic_0001>
module attributes {stable_mosaic.version = 11 : i64} {
  func.func @_fused_layer_kernel(%arg0: memref<2x18x18x20xf32, #tpu.memory_space<vmem>>, %arg1: memref<128x80xf32, #tpu.memory_space<vmem>>, %arg2: memref<128x20xf32, #tpu.memory_space<vmem>>, %arg3: memref<256x20xf32, #tpu.memory_space<vmem>>, %arg4: memref<256x20xf32, #tpu.memory_space<vmem>>, %arg5: memref<20x80xf32, #tpu.memory_space<vmem>>, %arg6: memref<80x16xf32, #tpu.memory_space<vmem>>, %arg7: memref<128x16xf32, #tpu.memory_space<vmem>>, %arg8: memref<2x16x16x20xf32, #tpu.memory_space<vmem>>, %arg9: memref<128x80xf32, #tpu.memory_space<vmem>>, %arg10: memref<2x18x32x20xf32, #tpu.memory_space<vmem>>) attributes {dimension_semantics = [], scalar_prefetch = 0 : i64, scratch_operands = 1 : i64, tpu.core_type = #tpu.core_type<tc>} {
    %c0 = arith.constant 0 : index
    %c0_0 = arith.constant 0 : index
    %0 = vector.load %arg2[%c0, %c0_0] : memref<128x20xf32, #tpu.memory_space<vmem>>, vector<128x20xf32>
    %c0_1 = arith.constant 0 : index
    %c0_2 = arith.constant 0 : index
    %1 = vector.load %arg5[%c0_1, %c0_2] : memref<20x80xf32, #tpu.memory_space<vmem>>, vector<20x80xf32>
    %cst = arith.constant dense<0.000000e+00> : vector<128x80xf32>
    %2 = tpu.matmul %0, %1, %cst {dimension_numbers = #tpu.dot_dimension_numbers<[1], [0], [0], [1], [0, 0, 1, 1], [], []>} : vector<128x20xf32>, vector<20x80xf32>, vector<128x80xf32> -> vector<128x80xf32>
    %cst_3 = arith.constant 0.000000e+00 : f32
    %3 = vector.broadcast %cst_3 : f32 to vector<128x80xf32>
    %4 = arith.subf %3, %2 : vector<128x80xf32>
    %5 = math.exp %4 : vector<128x80xf32>
    %cst_4 = arith.constant 1.000000e+00 : f32
    %6 = vector.broadcast %cst_4 : f32 to vector<128x80xf32>
    %7 = arith.addf %6, %5 : vector<128x80xf32>
    %cst_5 = arith.constant 5.000000e-01 : f32
    %8 = vector.broadcast %cst_5 : f32 to vector<128x80xf32>
    %9 = arith.mulf %7, %8 : vector<128x80xf32>
    %c0_6 = arith.constant 0 : index
    %c0_7 = arith.constant 0 : index
    %10 = vector.load %arg1[%c0_6, %c0_7] : memref<128x80xf32, #tpu.memory_space<vmem>>, vector<128x80xf32>
    %11 = arith.mulf %9, %10 : vector<128x80xf32>
    %c0_8 = arith.constant 0 : index
    %c0_9 = arith.constant 0 : index
    %12 = vector.load %arg9[%c0_8, %c0_9] : memref<128x80xf32, #tpu.memory_space<vmem>>, vector<128x80xf32>
    tpu.vector_store %arg9[%c0_8, %c0_9], %11 {strides = array<i32>} : memref<128x80xf32, #tpu.memory_space<vmem>>, vector<128x80xf32>,
    %c0_10 = arith.constant 0 : index
    %c0_11 = arith.constant 0 : index
    %13 = vector.load %arg1[%c0_10, %c0_11] : memref<128x80xf32, #tpu.memory_space<vmem>>, vector<128x80xf32>
    %c0_12 = arith.constant 0 : index
    %c0_13 = arith.constant 0 : index
    %14 = vector.load %arg6[%c0_12, %c0_13] : memref<80x16xf32, #tpu.memory_space<vmem>>, vector<80x16xf32>
    %cst_14 = arith.constant dense<0.000000e+00> : vector<128x16xf32>
    %15 = tpu.matmul %13, %14, %cst_14 {dimension_numbers = #tpu.dot_dimension_numbers<[1], [0], [0], [1], [0, 0, 1, 1], [], []>} : vector<128x80xf32>, vector<80x16xf32>, vector<128x16xf32> -> vector<128x16xf32>
    %c0_15 = arith.constant 0 : index
    %c0_16 = arith.constant 0 : index
    %16 = vector.load %arg7[%c0_15, %c0_16] : memref<128x16xf32, #tpu.memory_space<vmem>>, vector<128x16xf32>
    tpu.vector_store %arg7[%c0_15, %c0_16], %15 {strides = array<i32>} : memref<128x16xf32, #tpu.memory_space<vmem>>, vector<128x16xf32>,
    %cst_17 = arith.constant 0.000000e+00 : f32
    %17 = vector.broadcast %cst_17 : f32 to vector<2x18x32x20xf32>
    %c0_18 = arith.constant 0 : index
    %c0_19 = arith.constant 0 : index
    %c0_20 = arith.constant 0 : index
    %c0_21 = arith.constant 0 : index
    %18 = vector.load %arg10[%c0_18, %c0_19, %c0_20, %c0_21] : memref<2x18x32x20xf32, #tpu.memory_space<vmem>>, vector<2x18x32x20xf32>
    tpu.vector_store %arg10[%c0_18, %c0_19, %c0_20, %c0_21], %17 {strides = array<i32>} : memref<2x18x32x20xf32, #tpu.memory_space<vmem>>, vector<2x18x32x20xf32>,
    %c0_22 = arith.constant 0 : index
    %c0_23 = arith.constant 0 : index
    %c0_24 = arith.constant 0 : index
    %c0_25 = arith.constant 0 : index
    %19 = vector.load %arg0[%c0_22, %c0_23, %c0_24, %c0_25] : memref<2x18x18x20xf32, #tpu.memory_space<vmem>>, vector<1x8x16x20xf32>
    %20 = vector.shape_cast %19 : vector<1x8x16x20xf32> to vector<8x16x20xf32>
    %21 = vector.shape_cast %20 : vector<8x16x20xf32> to vector<128x20xf32>
    %c0_26 = arith.constant 0 : index
    %c0_27 = arith.constant 0 : index
    %c1 = arith.constant 1 : index
    %c0_28 = arith.constant 0 : index
    %22 = vector.load %arg0[%c0_26, %c0_27, %c1, %c0_28] : memref<2x18x18x20xf32, #tpu.memory_space<vmem>>, vector<1x8x16x20xf32>
    %23 = vector.shape_cast %22 : vector<1x8x16x20xf32> to vector<8x16x20xf32>
    %24 = vector.shape_cast %23 : vector<8x16x20xf32> to vector<128x20xf32>
    %c0_29 = arith.constant 0 : index
    %c0_30 = arith.constant 0 : index
    %c2 = arith.constant 2 : index
    %c0_31 = arith.constant 0 : index
    %25 = vector.load %arg0[%c0_29, %c0_30, %c2, %c0_31] : memref<2x18x18x20xf32, #tpu.memory_space<vmem>>, vector<1x8x16x20xf32>
    %26 = vector.shape_cast %25 : vector<1x8x16x20xf32> to vector<8x16x20xf32>
    %27 = vector.shape_cast %26 : vector<8x16x20xf32> to vector<128x20xf32>
    %c0_32 = arith.constant 0 : index
    %c1_33 = arith.constant 1 : index
    %c0_34 = arith.constant 0 : index
    %c0_35 = arith.constant 0 : index
    %28 = vector.load %arg0[%c0_32, %c1_33, %c0_34, %c0_35] : memref<2x18x18x20xf32, #tpu.memory_space<vmem>>, vector<1x8x16x20xf32>
    %29 = vector.shape_cast %28 : vector<1x8x16x20xf32> to vector<8x16x20xf32>
    %30 = vector.shape_cast %29 : vector<8x16x20xf32> to vector<128x20xf32>
    %c0_36 = arith.constant 0 : index
    %c1_37 = arith.constant 1 : index
    %c1_38 = arith.constant 1 : index
    %c0_39 = arith.constant 0 : index
    %31 = vector.load %arg0[%c0_36, %c1_37, %c1_38, %c0_39] : memref<2x18x18x20xf32, #tpu.memory_space<vmem>>, vector<1x8x16x20xf32>
    %32 = vector.shape_cast %31 : vector<1x8x16x20xf32> to vector<8x16x20xf32>
    %33 = vector.shape_cast %32 : vector<8x16x20xf32> to vector<128x20xf32>
    %c0_40 = arith.constant 0 : index
    %c1_41 = arith.constant 1 : index
    %c2_42 = arith.constant 2 : index
    %c0_43 = arith.constant 0 : index
    %34 = vector.load %arg0[%c0_40, %c1_41, %c2_42, %c0_43] : memref<2x18x18x20xf32, #tpu.memory_space<vmem>>, vector<1x8x16x20xf32>
    %35 = vector.shape_cast %34 : vector<1x8x16x20xf32> to vector<8x16x20xf32>
    %36 = vector.shape_cast %35 : vector<8x16x20xf32> to vector<128x20xf32>
    %c0_44 = arith.constant 0 : index
    %c2_45 = arith.constant 2 : index
    %c0_46 = arith.constant 0 : index
    %c0_47 = arith.constant 0 : index
    %37 = vector.load %arg0[%c0_44, %c2_45, %c0_46, %c0_47] : memref<2x18x18x20xf32, #tpu.memory_space<vmem>>, vector<1x8x16x20xf32>
    %38 = vector.shape_cast %37 : vector<1x8x16x20xf32> to vector<8x16x20xf32>
    %39 = vector.shape_cast %38 : vector<8x16x20xf32> to vector<128x20xf32>
    %c0_48 = arith.constant 0 : index
    %c2_49 = arith.constant 2 : index
    %c1_50 = arith.constant 1 : index
    %c0_51 = arith.constant 0 : index
    %40 = vector.load %arg0[%c0_48, %c2_49, %c1_50, %c0_51] : memref<2x18x18x20xf32, #tpu.memory_space<vmem>>, vector<1x8x16x20xf32>
    %41 = vector.shape_cast %40 : vector<1x8x16x20xf32> to vector<8x16x20xf32>
    %42 = vector.shape_cast %41 : vector<8x16x20xf32> to vector<128x20xf32>
    %c0_52 = arith.constant 0 : index
    %c2_53 = arith.constant 2 : index
    %c2_54 = arith.constant 2 : index
    %c0_55 = arith.constant 0 : index
    %43 = vector.load %arg0[%c0_52, %c2_53, %c2_54, %c0_55] : memref<2x18x18x20xf32, #tpu.memory_space<vmem>>, vector<1x8x16x20xf32>
    %44 = vector.shape_cast %43 : vector<1x8x16x20xf32> to vector<8x16x20xf32>
    %45 = vector.shape_cast %44 : vector<8x16x20xf32> to vector<128x20xf32>
    %cst_56 = arith.constant 0.000000e+00 : f32
    %46 = vector.broadcast %cst_56 : f32 to vector<128x76xf32>
    %47 = tpu.concatenate %21, %24, %27, %30, %33, %36, %39, %42, %45, %46 in 1 : vector<128x20xf32>, vector<128x20xf32>, vector<128x20xf32>, vector<128x20xf32>, vector<128x20xf32>, vector<128x20xf32>, vector<128x20xf32>, vector<128x20xf32>, vector<128x20xf32>, vector<128x76xf32> -> vector<128x256xf32>
    %c0_57 = arith.constant 0 : index
    %c0_58 = arith.constant 0 : index
    %48 = vector.load %arg3[%c0_57, %c0_58] : memref<256x20xf32, #tpu.memory_space<vmem>>, vector<256x20xf32>
    %cst_59 = arith.constant dense<0.000000e+00> : vector<128x20xf32>
    %49 = tpu.matmul %47, %48, %cst_59 {dimension_numbers = #tpu.dot_dimension_numbers<[1], [0], [0], [1], [0, 0, 1, 1], [], []>} : vector<128x256xf32>, vector<256x20xf32>, vector<128x20xf32> -> vector<128x20xf32>
    %cst_60 = arith.constant 0.000000e+00 : f32
    %50 = vector.broadcast %cst_60 : f32 to vector<128x20xf32>
    %51 = arith.maximumf %49, %50 : vector<128x20xf32>
    %52 = vector.shape_cast %51 : vector<128x20xf32> to vector<8x16x20xf32>
    %c0_61 = arith.constant 0 : index
    %c1_62 = arith.constant 1 : index
    %c8 = arith.constant 8 : index
    %c0_63 = arith.constant 0 : index
    %53 = vector.load %arg10[%c0_61, %c1_62, %c8, %c0_63] : memref<2x18x32x20xf32, #tpu.memory_space<vmem>>, vector<1x8x16x20xf32>
    %54 = vector.shape_cast %53 : vector<1x8x16x20xf32> to vector<8x16x20xf32>
    %55 = vector.shape_cast %52 : vector<8x16x20xf32> to vector<1x8x16x20xf32>
    tpu.vector_store %arg10[%c0_61, %c1_62, %c8, %c0_63], %55 {strides = array<i32>} : memref<2x18x32x20xf32, #tpu.memory_space<vmem>>, vector<1x8x16x20xf32>,
    %c0_64 = arith.constant 0 : index
    %c8_65 = arith.constant 8 : index
    %c0_66 = arith.constant 0 : index
    %c0_67 = arith.constant 0 : index
    %56 = vector.load %arg0[%c0_64, %c8_65, %c0_66, %c0_67] : memref<2x18x18x20xf32, #tpu.memory_space<vmem>>, vector<1x8x16x20xf32>
    %57 = vector.shape_cast %56 : vector<1x8x16x20xf32> to vector<8x16x20xf32>
    %58 = vector.shape_cast %57 : vector<8x16x20xf32> to vector<128x20xf32>
    %c0_68 = arith.constant 0 : index
    %c8_69 = arith.constant 8 : index
    %c1_70 = arith.constant 1 : index
    %c0_71 = arith.constant 0 : index
    %59 = vector.load %arg0[%c0_68, %c8_69, %c1_70, %c0_71] : memref<2x18x18x20xf32, #tpu.memory_space<vmem>>, vector<1x8x16x20xf32>
    %60 = vector.shape_cast %59 : vector<1x8x16x20xf32> to vector<8x16x20xf32>
    %61 = vector.shape_cast %60 : vector<8x16x20xf32> to vector<128x20xf32>
    %c0_72 = arith.constant 0 : index
    %c8_73 = arith.constant 8 : index
    %c2_74 = arith.constant 2 : index
    %c0_75 = arith.constant 0 : index
    %62 = vector.load %arg0[%c0_72, %c8_73, %c2_74, %c0_75] : memref<2x18x18x20xf32, #tpu.memory_space<vmem>>, vector<1x8x16x20xf32>
    %63 = vector.shape_cast %62 : vector<1x8x16x20xf32> to vector<8x16x20xf32>
    %64 = vector.shape_cast %63 : vector<8x16x20xf32> to vector<128x20xf32>
    %c0_76 = arith.constant 0 : index
    %c9 = arith.constant 9 : index
    %c0_77 = arith.constant 0 : index
    %c0_78 = arith.constant 0 : index
    %65 = vector.load %arg0[%c0_76, %c9, %c0_77, %c0_78] : memref<2x18x18x20xf32, #tpu.memory_space<vmem>>, vector<1x8x16x20xf32>
    %66 = vector.shape_cast %65 : vector<1x8x16x20xf32> to vector<8x16x20xf32>
    %67 = vector.shape_cast %66 : vector<8x16x20xf32> to vector<128x20xf32>
    %c0_79 = arith.constant 0 : index
    %c9_80 = arith.constant 9 : index
    %c1_81 = arith.constant 1 : index
    %c0_82 = arith.constant 0 : index
    %68 = vector.load %arg0[%c0_79, %c9_80, %c1_81, %c0_82] : memref<2x18x18x20xf32, #tpu.memory_space<vmem>>, vector<1x8x16x20xf32>
    %69 = vector.shape_cast %68 : vector<1x8x16x20xf32> to vector<8x16x20xf32>
    %70 = vector.shape_cast %69 : vector<8x16x20xf32> to vector<128x20xf32>
    %c0_83 = arith.constant 0 : index
    %c9_84 = arith.constant 9 : index
    %c2_85 = arith.constant 2 : index
    %c0_86 = arith.constant 0 : index
    %71 = vector.load %arg0[%c0_83, %c9_84, %c2_85, %c0_86] : memref<2x18x18x20xf32, #tpu.memory_space<vmem>>, vector<1x8x16x20xf32>
    %72 = vector.shape_cast %71 : vector<1x8x16x20xf32> to vector<8x16x20xf32>
    %73 = vector.shape_cast %72 : vector<8x16x20xf32> to vector<128x20xf32>
    %c0_87 = arith.constant 0 : index
    %c10 = arith.constant 10 : index
    %c0_88 = arith.constant 0 : index
    %c0_89 = arith.constant 0 : index
    %74 = vector.load %arg0[%c0_87, %c10, %c0_88, %c0_89] : memref<2x18x18x20xf32, #tpu.memory_space<vmem>>, vector<1x8x16x20xf32>
    %75 = vector.shape_cast %74 : vector<1x8x16x20xf32> to vector<8x16x20xf32>
    %76 = vector.shape_cast %75 : vector<8x16x20xf32> to vector<128x20xf32>
    %c0_90 = arith.constant 0 : index
    %c10_91 = arith.constant 10 : index
    %c1_92 = arith.constant 1 : index
    %c0_93 = arith.constant 0 : index
    %77 = vector.load %arg0[%c0_90, %c10_91, %c1_92, %c0_93] : memref<2x18x18x20xf32, #tpu.memory_space<vmem>>, vector<1x8x16x20xf32>
    %78 = vector.shape_cast %77 : vector<1x8x16x20xf32> to vector<8x16x20xf32>
    %79 = vector.shape_cast %78 : vector<8x16x20xf32> to vector<128x20xf32>
    %c0_94 = arith.constant 0 : index
    %c10_95 = arith.constant 10 : index
    %c2_96 = arith.constant 2 : index
    %c0_97 = arith.constant 0 : index
    %80 = vector.load %arg0[%c0_94, %c10_95, %c2_96, %c0_97] : memref<2x18x18x20xf32, #tpu.memory_space<vmem>>, vector<1x8x16x20xf32>
    %81 = vector.shape_cast %80 : vector<1x8x16x20xf32> to vector<8x16x20xf32>
    %82 = vector.shape_cast %81 : vector<8x16x20xf32> to vector<128x20xf32>
    %cst_98 = arith.constant 0.000000e+00 : f32
    %83 = vector.broadcast %cst_98 : f32 to vector<128x76xf32>
    %84 = tpu.concatenate %58, %61, %64, %67, %70, %73, %76, %79, %82, %83 in 1 : vector<128x20xf32>, vector<128x20xf32>, vector<128x20xf32>, vector<128x20xf32>, vector<128x20xf32>, vector<128x20xf32>, vector<128x20xf32>, vector<128x20xf32>, vector<128x20xf32>, vector<128x76xf32> -> vector<128x256xf32>
    %c0_99 = arith.constant 0 : index
    %c0_100 = arith.constant 0 : index
    %85 = vector.load %arg3[%c0_99, %c0_100] : memref<256x20xf32, #tpu.memory_space<vmem>>, vector<256x20xf32>
    %cst_101 = arith.constant dense<0.000000e+00> : vector<128x20xf32>
    %86 = tpu.matmul %84, %85, %cst_101 {dimension_numbers = #tpu.dot_dimension_numbers<[1], [0], [0], [1], [0, 0, 1, 1], [], []>} : vector<128x256xf32>, vector<256x20xf32>, vector<128x20xf32> -> vector<128x20xf32>
    %cst_102 = arith.constant 0.000000e+00 : f32
    %87 = vector.broadcast %cst_102 : f32 to vector<128x20xf32>
    %88 = arith.maximumf %86, %87 : vector<128x20xf32>
    %89 = vector.shape_cast %88 : vector<128x20xf32> to vector<8x16x20xf32>
    %c0_103 = arith.constant 0 : index
    %c9_104 = arith.constant 9 : index
    %c8_105 = arith.constant 8 : index
    %c0_106 = arith.constant 0 : index
    %90 = vector.load %arg10[%c0_103, %c9_104, %c8_105, %c0_106] : memref<2x18x32x20xf32, #tpu.memory_space<vmem>>, vector<1x8x16x20xf32>
    %91 = vector.shape_cast %90 : vector<1x8x16x20xf32> to vector<8x16x20xf32>
    %92 = vector.shape_cast %89 : vector<8x16x20xf32> to vector<1x8x16x20xf32>
    tpu.vector_store %arg10[%c0_103, %c9_104, %c8_105, %c0_106], %92 {strides = array<i32>} : memref<2x18x32x20xf32, #tpu.memory_space<vmem>>, vector<1x8x16x20xf32>,
    %c1_107 = arith.constant 1 : index
    %c0_108 = arith.constant 0 : index
    %c0_109 = arith.constant 0 : index
    %c0_110 = arith.constant 0 : index
    %93 = vector.load %arg0[%c1_107, %c0_108, %c0_109, %c0_110] : memref<2x18x18x20xf32, #tpu.memory_space<vmem>>, vector<1x8x16x20xf32>
    %94 = vector.shape_cast %93 : vector<1x8x16x20xf32> to vector<8x16x20xf32>
    %95 = vector.shape_cast %94 : vector<8x16x20xf32> to vector<128x20xf32>
    %c1_111 = arith.constant 1 : index
    %c0_112 = arith.constant 0 : index
    %c1_113 = arith.constant 1 : index
    %c0_114 = arith.constant 0 : index
    %96 = vector.load %arg0[%c1_111, %c0_112, %c1_113, %c0_114] : memref<2x18x18x20xf32, #tpu.memory_space<vmem>>, vector<1x8x16x20xf32>
    %97 = vector.shape_cast %96 : vector<1x8x16x20xf32> to vector<8x16x20xf32>
    %98 = vector.shape_cast %97 : vector<8x16x20xf32> to vector<128x20xf32>
    %c1_115 = arith.constant 1 : index
    %c0_116 = arith.constant 0 : index
    %c2_117 = arith.constant 2 : index
    %c0_118 = arith.constant 0 : index
    %99 = vector.load %arg0[%c1_115, %c0_116, %c2_117, %c0_118] : memref<2x18x18x20xf32, #tpu.memory_space<vmem>>, vector<1x8x16x20xf32>
    %100 = vector.shape_cast %99 : vector<1x8x16x20xf32> to vector<8x16x20xf32>
    %101 = vector.shape_cast %100 : vector<8x16x20xf32> to vector<128x20xf32>
    %c1_119 = arith.constant 1 : index
    %c1_120 = arith.constant 1 : index
    %c0_121 = arith.constant 0 : index
    %c0_122 = arith.constant 0 : index
    %102 = vector.load %arg0[%c1_119, %c1_120, %c0_121, %c0_122] : memref<2x18x18x20xf32, #tpu.memory_space<vmem>>, vector<1x8x16x20xf32>
    %103 = vector.shape_cast %102 : vector<1x8x16x20xf32> to vector<8x16x20xf32>
    %104 = vector.shape_cast %103 : vector<8x16x20xf32> to vector<128x20xf32>
    %c1_123 = arith.constant 1 : index
    %c1_124 = arith.constant 1 : index
    %c1_125 = arith.constant 1 : index
    %c0_126 = arith.constant 0 : index
    %105 = vector.load %arg0[%c1_123, %c1_124, %c1_125, %c0_126] : memref<2x18x18x20xf32, #tpu.memory_space<vmem>>, vector<1x8x16x20xf32>
    %106 = vector.shape_cast %105 : vector<1x8x16x20xf32> to vector<8x16x20xf32>
    %107 = vector.shape_cast %106 : vector<8x16x20xf32> to vector<128x20xf32>
    %c1_127 = arith.constant 1 : index
    %c1_128 = arith.constant 1 : index
    %c2_129 = arith.constant 2 : index
    %c0_130 = arith.constant 0 : index
    %108 = vector.load %arg0[%c1_127, %c1_128, %c2_129, %c0_130] : memref<2x18x18x20xf32, #tpu.memory_space<vmem>>, vector<1x8x16x20xf32>
    %109 = vector.shape_cast %108 : vector<1x8x16x20xf32> to vector<8x16x20xf32>
    %110 = vector.shape_cast %109 : vector<8x16x20xf32> to vector<128x20xf32>
    %c1_131 = arith.constant 1 : index
    %c2_132 = arith.constant 2 : index
    %c0_133 = arith.constant 0 : index
    %c0_134 = arith.constant 0 : index
    %111 = vector.load %arg0[%c1_131, %c2_132, %c0_133, %c0_134] : memref<2x18x18x20xf32, #tpu.memory_space<vmem>>, vector<1x8x16x20xf32>
    %112 = vector.shape_cast %111 : vector<1x8x16x20xf32> to vector<8x16x20xf32>
    %113 = vector.shape_cast %112 : vector<8x16x20xf32> to vector<128x20xf32>
    %c1_135 = arith.constant 1 : index
    %c2_136 = arith.constant 2 : index
    %c1_137 = arith.constant 1 : index
    %c0_138 = arith.constant 0 : index
    %114 = vector.load %arg0[%c1_135, %c2_136, %c1_137, %c0_138] : memref<2x18x18x20xf32, #tpu.memory_space<vmem>>, vector<1x8x16x20xf32>
    %115 = vector.shape_cast %114 : vector<1x8x16x20xf32> to vector<8x16x20xf32>
    %116 = vector.shape_cast %115 : vector<8x16x20xf32> to vector<128x20xf32>
    %c1_139 = arith.constant 1 : index
    %c2_140 = arith.constant 2 : index
    %c2_141 = arith.constant 2 : index
    %c0_142 = arith.constant 0 : index
    %117 = vector.load %arg0[%c1_139, %c2_140, %c2_141, %c0_142] : memref<2x18x18x20xf32, #tpu.memory_space<vmem>>, vector<1x8x16x20xf32>
    %118 = vector.shape_cast %117 : vector<1x8x16x20xf32> to vector<8x16x20xf32>
    %119 = vector.shape_cast %118 : vector<8x16x20xf32> to vector<128x20xf32>
    %cst_143 = arith.constant 0.000000e+00 : f32
    %120 = vector.broadcast %cst_143 : f32 to vector<128x76xf32>
    %121 = tpu.concatenate %95, %98, %101, %104, %107, %110, %113, %116, %119, %120 in 1 : vector<128x20xf32>, vector<128x20xf32>, vector<128x20xf32>, vector<128x20xf32>, vector<128x20xf32>, vector<128x20xf32>, vector<128x20xf32>, vector<128x20xf32>, vector<128x20xf32>, vector<128x76xf32> -> vector<128x256xf32>
    %c0_144 = arith.constant 0 : index
    %c0_145 = arith.constant 0 : index
    %122 = vector.load %arg3[%c0_144, %c0_145] : memref<256x20xf32, #tpu.memory_space<vmem>>, vector<256x20xf32>
    %cst_146 = arith.constant dense<0.000000e+00> : vector<128x20xf32>
    %123 = tpu.matmul %121, %122, %cst_146 {dimension_numbers = #tpu.dot_dimension_numbers<[1], [0], [0], [1], [0, 0, 1, 1], [], []>} : vector<128x256xf32>, vector<256x20xf32>, vector<128x20xf32> -> vector<128x20xf32>
    %cst_147 = arith.constant 0.000000e+00 : f32
    %124 = vector.broadcast %cst_147 : f32 to vector<128x20xf32>
    %125 = arith.maximumf %123, %124 : vector<128x20xf32>
    %126 = vector.shape_cast %125 : vector<128x20xf32> to vector<8x16x20xf32>
    %c1_148 = arith.constant 1 : index
    %c1_149 = arith.constant 1 : index
    %c8_150 = arith.constant 8 : index
    %c0_151 = arith.constant 0 : index
    %127 = vector.load %arg10[%c1_148, %c1_149, %c8_150, %c0_151] : memref<2x18x32x20xf32, #tpu.memory_space<vmem>>, vector<1x8x16x20xf32>
    %128 = vector.shape_cast %127 : vector<1x8x16x20xf32> to vector<8x16x20xf32>
    %129 = vector.shape_cast %126 : vector<8x16x20xf32> to vector<1x8x16x20xf32>
    tpu.vector_store %arg10[%c1_148, %c1_149, %c8_150, %c0_151], %129 {strides = array<i32>} : memref<2x18x32x20xf32, #tpu.memory_space<vmem>>, vector<1x8x16x20xf32>,
    %c1_152 = arith.constant 1 : index
    %c8_153 = arith.constant 8 : index
    %c0_154 = arith.constant 0 : index
    %c0_155 = arith.constant 0 : index
    %130 = vector.load %arg0[%c1_152, %c8_153, %c0_154, %c0_155] : memref<2x18x18x20xf32, #tpu.memory_space<vmem>>, vector<1x8x16x20xf32>
    %131 = vector.shape_cast %130 : vector<1x8x16x20xf32> to vector<8x16x20xf32>
    %132 = vector.shape_cast %131 : vector<8x16x20xf32> to vector<128x20xf32>
    %c1_156 = arith.constant 1 : index
    %c8_157 = arith.constant 8 : index
    %c1_158 = arith.constant 1 : index
    %c0_159 = arith.constant 0 : index
    %133 = vector.load %arg0[%c1_156, %c8_157, %c1_158, %c0_159] : memref<2x18x18x20xf32, #tpu.memory_space<vmem>>, vector<1x8x16x20xf32>
    %134 = vector.shape_cast %133 : vector<1x8x16x20xf32> to vector<8x16x20xf32>
    %135 = vector.shape_cast %134 : vector<8x16x20xf32> to vector<128x20xf32>
    %c1_160 = arith.constant 1 : index
    %c8_161 = arith.constant 8 : index
    %c2_162 = arith.constant 2 : index
    %c0_163 = arith.constant 0 : index
    %136 = vector.load %arg0[%c1_160, %c8_161, %c2_162, %c0_163] : memref<2x18x18x20xf32, #tpu.memory_space<vmem>>, vector<1x8x16x20xf32>
    %137 = vector.shape_cast %136 : vector<1x8x16x20xf32> to vector<8x16x20xf32>
    %138 = vector.shape_cast %137 : vector<8x16x20xf32> to vector<128x20xf32>
    %c1_164 = arith.constant 1 : index
    %c9_165 = arith.constant 9 : index
    %c0_166 = arith.constant 0 : index
    %c0_167 = arith.constant 0 : index
    %139 = vector.load %arg0[%c1_164, %c9_165, %c0_166, %c0_167] : memref<2x18x18x20xf32, #tpu.memory_space<vmem>>, vector<1x8x16x20xf32>
    %140 = vector.shape_cast %139 : vector<1x8x16x20xf32> to vector<8x16x20xf32>
    %141 = vector.shape_cast %140 : vector<8x16x20xf32> to vector<128x20xf32>
    %c1_168 = arith.constant 1 : index
    %c9_169 = arith.constant 9 : index
    %c1_170 = arith.constant 1 : index
    %c0_171 = arith.constant 0 : index
    %142 = vector.load %arg0[%c1_168, %c9_169, %c1_170, %c0_171] : memref<2x18x18x20xf32, #tpu.memory_space<vmem>>, vector<1x8x16x20xf32>
    %143 = vector.shape_cast %142 : vector<1x8x16x20xf32> to vector<8x16x20xf32>
    %144 = vector.shape_cast %143 : vector<8x16x20xf32> to vector<128x20xf32>
    %c1_172 = arith.constant 1 : index
    %c9_173 = arith.constant 9 : index
    %c2_174 = arith.constant 2 : index
    %c0_175 = arith.constant 0 : index
    %145 = vector.load %arg0[%c1_172, %c9_173, %c2_174, %c0_175] : memref<2x18x18x20xf32, #tpu.memory_space<vmem>>, vector<1x8x16x20xf32>
    %146 = vector.shape_cast %145 : vector<1x8x16x20xf32> to vector<8x16x20xf32>
    %147 = vector.shape_cast %146 : vector<8x16x20xf32> to vector<128x20xf32>
    %c1_176 = arith.constant 1 : index
    %c10_177 = arith.constant 10 : index
    %c0_178 = arith.constant 0 : index
    %c0_179 = arith.constant 0 : index
    %148 = vector.load %arg0[%c1_176, %c10_177, %c0_178, %c0_179] : memref<2x18x18x20xf32, #tpu.memory_space<vmem>>, vector<1x8x16x20xf32>
    %149 = vector.shape_cast %148 : vector<1x8x16x20xf32> to vector<8x16x20xf32>
    %150 = vector.shape_cast %149 : vector<8x16x20xf32> to vector<128x20xf32>
    %c1_180 = arith.constant 1 : index
    %c10_181 = arith.constant 10 : index
    %c1_182 = arith.constant 1 : index
    %c0_183 = arith.constant 0 : index
    %151 = vector.load %arg0[%c1_180, %c10_181, %c1_182, %c0_183] : memref<2x18x18x20xf32, #tpu.memory_space<vmem>>, vector<1x8x16x20xf32>
    %152 = vector.shape_cast %151 : vector<1x8x16x20xf32> to vector<8x16x20xf32>
    %153 = vector.shape_cast %152 : vector<8x16x20xf32> to vector<128x20xf32>
    %c1_184 = arith.constant 1 : index
    %c10_185 = arith.constant 10 : index
    %c2_186 = arith.constant 2 : index
    %c0_187 = arith.constant 0 : index
    %154 = vector.load %arg0[%c1_184, %c10_185, %c2_186, %c0_187] : memref<2x18x18x20xf32, #tpu.memory_space<vmem>>, vector<1x8x16x20xf32>
    %155 = vector.shape_cast %154 : vector<1x8x16x20xf32> to vector<8x16x20xf32>
    %156 = vector.shape_cast %155 : vector<8x16x20xf32> to vector<128x20xf32>
    %cst_188 = arith.constant 0.000000e+00 : f32
    %157 = vector.broadcast %cst_188 : f32 to vector<128x76xf32>
    %158 = tpu.concatenate %132, %135, %138, %141, %144, %147, %150, %153, %156, %157 in 1 : vector<128x20xf32>, vector<128x20xf32>, vector<128x20xf32>, vector<128x20xf32>, vector<128x20xf32>, vector<128x20xf32>, vector<128x20xf32>, vector<128x20xf32>, vector<128x20xf32>, vector<128x76xf32> -> vector<128x256xf32>
    %c0_189 = arith.constant 0 : index
    %c0_190 = arith.constant 0 : index
    %159 = vector.load %arg3[%c0_189, %c0_190] : memref<256x20xf32, #tpu.memory_space<vmem>>, vector<256x20xf32>
    %cst_191 = arith.constant dense<0.000000e+00> : vector<128x20xf32>
    %160 = tpu.matmul %158, %159, %cst_191 {dimension_numbers = #tpu.dot_dimension_numbers<[1], [0], [0], [1], [0, 0, 1, 1], [], []>} : vector<128x256xf32>, vector<256x20xf32>, vector<128x20xf32> -> vector<128x20xf32>
    %cst_192 = arith.constant 0.000000e+00 : f32
    %161 = vector.broadcast %cst_192 : f32 to vector<128x20xf32>
    %162 = arith.maximumf %160, %161 : vector<128x20xf32>
    %163 = vector.shape_cast %162 : vector<128x20xf32> to vector<8x16x20xf32>
    %c1_193 = arith.constant 1 : index
    %c9_194 = arith.constant 9 : index
    %c8_195 = arith.constant 8 : index
    %c0_196 = arith.constant 0 : index
    %164 = vector.load %arg10[%c1_193, %c9_194, %c8_195, %c0_196] : memref<2x18x32x20xf32, #tpu.memory_space<vmem>>, vector<1x8x16x20xf32>
    %165 = vector.shape_cast %164 : vector<1x8x16x20xf32> to vector<8x16x20xf32>
    %166 = vector.shape_cast %163 : vector<8x16x20xf32> to vector<1x8x16x20xf32>
    tpu.vector_store %arg10[%c1_193, %c9_194, %c8_195, %c0_196], %166 {strides = array<i32>} : memref<2x18x32x20xf32, #tpu.memory_space<vmem>>, vector<1x8x16x20xf32>,
    %c0_197 = arith.constant 0 : index
    %c0_198 = arith.constant 0 : index
    %c7 = arith.constant 7 : index
    %c0_199 = arith.constant 0 : index
    %167 = vector.load %arg10[%c0_197, %c0_198, %c7, %c0_199] : memref<2x18x32x20xf32, #tpu.memory_space<vmem>>, vector<1x8x16x20xf32>
    %168 = vector.shape_cast %167 : vector<1x8x16x20xf32> to vector<8x16x20xf32>
    %169 = vector.shape_cast %168 : vector<8x16x20xf32> to vector<128x20xf32>
    %c0_200 = arith.constant 0 : index
    %c0_201 = arith.constant 0 : index
    %c8_202 = arith.constant 8 : index
    %c0_203 = arith.constant 0 : index
    %170 = vector.load %arg10[%c0_200, %c0_201, %c8_202, %c0_203] : memref<2x18x32x20xf32, #tpu.memory_space<vmem>>, vector<1x8x16x20xf32>
    %171 = vector.shape_cast %170 : vector<1x8x16x20xf32> to vector<8x16x20xf32>
    %172 = vector.shape_cast %171 : vector<8x16x20xf32> to vector<128x20xf32>
    %c0_204 = arith.constant 0 : index
    %c0_205 = arith.constant 0 : index
    %c9_206 = arith.constant 9 : index
    %c0_207 = arith.constant 0 : index
    %173 = vector.load %arg10[%c0_204, %c0_205, %c9_206, %c0_207] : memref<2x18x32x20xf32, #tpu.memory_space<vmem>>, vector<1x8x16x20xf32>
    %174 = vector.shape_cast %173 : vector<1x8x16x20xf32> to vector<8x16x20xf32>
    %175 = vector.shape_cast %174 : vector<8x16x20xf32> to vector<128x20xf32>
    %c0_208 = arith.constant 0 : index
    %c1_209 = arith.constant 1 : index
    %c7_210 = arith.constant 7 : index
    %c0_211 = arith.constant 0 : index
    %176 = vector.load %arg10[%c0_208, %c1_209, %c7_210, %c0_211] : memref<2x18x32x20xf32, #tpu.memory_space<vmem>>, vector<1x8x16x20xf32>
    %177 = vector.shape_cast %176 : vector<1x8x16x20xf32> to vector<8x16x20xf32>
    %178 = vector.shape_cast %177 : vector<8x16x20xf32> to vector<128x20xf32>
    %c0_212 = arith.constant 0 : index
    %c1_213 = arith.constant 1 : index
    %c8_214 = arith.constant 8 : index
    %c0_215 = arith.constant 0 : index
    %179 = vector.load %arg10[%c0_212, %c1_213, %c8_214, %c0_215] : memref<2x18x32x20xf32, #tpu.memory_space<vmem>>, vector<1x8x16x20xf32>
    %180 = vector.shape_cast %179 : vector<1x8x16x20xf32> to vector<8x16x20xf32>
    %181 = vector.shape_cast %180 : vector<8x16x20xf32> to vector<128x20xf32>
    %c0_216 = arith.constant 0 : index
    %c1_217 = arith.constant 1 : index
    %c9_218 = arith.constant 9 : index
    %c0_219 = arith.constant 0 : index
    %182 = vector.load %arg10[%c0_216, %c1_217, %c9_218, %c0_219] : memref<2x18x32x20xf32, #tpu.memory_space<vmem>>, vector<1x8x16x20xf32>
    %183 = vector.shape_cast %182 : vector<1x8x16x20xf32> to vector<8x16x20xf32>
    %184 = vector.shape_cast %183 : vector<8x16x20xf32> to vector<128x20xf32>
    %c0_220 = arith.constant 0 : index
    %c2_221 = arith.constant 2 : index
    %c7_222 = arith.constant 7 : index
    %c0_223 = arith.constant 0 : index
    %185 = vector.load %arg10[%c0_220, %c2_221, %c7_222, %c0_223] : memref<2x18x32x20xf32, #tpu.memory_space<vmem>>, vector<1x8x16x20xf32>
    %186 = vector.shape_cast %185 : vector<1x8x16x20xf32> to vector<8x16x20xf32>
    %187 = vector.shape_cast %186 : vector<8x16x20xf32> to vector<128x20xf32>
    %c0_224 = arith.constant 0 : index
    %c2_225 = arith.constant 2 : index
    %c8_226 = arith.constant 8 : index
    %c0_227 = arith.constant 0 : index
    %188 = vector.load %arg10[%c0_224, %c2_225, %c8_226, %c0_227] : memref<2x18x32x20xf32, #tpu.memory_space<vmem>>, vector<1x8x16x20xf32>
    %189 = vector.shape_cast %188 : vector<1x8x16x20xf32> to vector<8x16x20xf32>
    %190 = vector.shape_cast %189 : vector<8x16x20xf32> to vector<128x20xf32>
    %c0_228 = arith.constant 0 : index
    %c2_229 = arith.constant 2 : index
    %c9_230 = arith.constant 9 : index
    %c0_231 = arith.constant 0 : index
    %191 = vector.load %arg10[%c0_228, %c2_229, %c9_230, %c0_231] : memref<2x18x32x20xf32, #tpu.memory_space<vmem>>, vector<1x8x16x20xf32>
    %192 = vector.shape_cast %191 : vector<1x8x16x20xf32> to vector<8x16x20xf32>
    %193 = vector.shape_cast %192 : vector<8x16x20xf32> to vector<128x20xf32>
    %cst_232 = arith.constant 0.000000e+00 : f32
    %194 = vector.broadcast %cst_232 : f32 to vector<128x76xf32>
    %195 = tpu.concatenate %169, %172, %175, %178, %181, %184, %187, %190, %193, %194 in 1 : vector<128x20xf32>, vector<128x20xf32>, vector<128x20xf32>, vector<128x20xf32>, vector<128x20xf32>, vector<128x20xf32>, vector<128x20xf32>, vector<128x20xf32>, vector<128x20xf32>, vector<128x76xf32> -> vector<128x256xf32>
    %c0_233 = arith.constant 0 : index
    %c0_234 = arith.constant 0 : index
    %196 = vector.load %arg4[%c0_233, %c0_234] : memref<256x20xf32, #tpu.memory_space<vmem>>, vector<256x20xf32>
    %cst_235 = arith.constant dense<0.000000e+00> : vector<128x20xf32>
    %197 = tpu.matmul %195, %196, %cst_235 {dimension_numbers = #tpu.dot_dimension_numbers<[1], [0], [0], [1], [0, 0, 1, 1], [], []>} : vector<128x256xf32>, vector<256x20xf32>, vector<128x20xf32> -> vector<128x20xf32>
    %c0_236 = arith.constant 0 : index
    %c1_237 = arith.constant 1 : index
    %c1_238 = arith.constant 1 : index
    %c0_239 = arith.constant 0 : index
    %198 = vector.load %arg0[%c0_236, %c1_237, %c1_238, %c0_239] : memref<2x18x18x20xf32, #tpu.memory_space<vmem>>, vector<1x8x16x20xf32>
    %199 = vector.shape_cast %198 : vector<1x8x16x20xf32> to vector<8x16x20xf32>
    %cst_240 = arith.constant 0.000000e+00 : f32
    %200 = vector.broadcast %cst_240 : f32 to vector<128x20xf32>
    %201 = arith.maximumf %197, %200 : vector<128x20xf32>
    %202 = vector.shape_cast %201 : vector<128x20xf32> to vector<8x16x20xf32>
    %203 = arith.addf %202, %199 : vector<8x16x20xf32>
    %c0_241 = arith.constant 0 : index
    %c0_242 = arith.constant 0 : index
    %c0_243 = arith.constant 0 : index
    %c0_244 = arith.constant 0 : index
    %204 = vector.load %arg8[%c0_241, %c0_242, %c0_243, %c0_244] : memref<2x16x16x20xf32, #tpu.memory_space<vmem>>, vector<1x8x16x20xf32>
    %205 = vector.shape_cast %204 : vector<1x8x16x20xf32> to vector<8x16x20xf32>
    %206 = vector.shape_cast %203 : vector<8x16x20xf32> to vector<1x8x16x20xf32>
    tpu.vector_store %arg8[%c0_241, %c0_242, %c0_243, %c0_244], %206 {strides = array<i32>} : memref<2x16x16x20xf32, #tpu.memory_space<vmem>>, vector<1x8x16x20xf32>,
    %c0_245 = arith.constant 0 : index
    %c8_246 = arith.constant 8 : index
    %c7_247 = arith.constant 7 : index
    %c0_248 = arith.constant 0 : index
    %207 = vector.load %arg10[%c0_245, %c8_246, %c7_247, %c0_248] : memref<2x18x32x20xf32, #tpu.memory_space<vmem>>, vector<1x8x16x20xf32>
    %208 = vector.shape_cast %207 : vector<1x8x16x20xf32> to vector<8x16x20xf32>
    %209 = vector.shape_cast %208 : vector<8x16x20xf32> to vector<128x20xf32>
    %c0_249 = arith.constant 0 : index
    %c8_250 = arith.constant 8 : index
    %c8_251 = arith.constant 8 : index
    %c0_252 = arith.constant 0 : index
    %210 = vector.load %arg10[%c0_249, %c8_250, %c8_251, %c0_252] : memref<2x18x32x20xf32, #tpu.memory_space<vmem>>, vector<1x8x16x20xf32>
    %211 = vector.shape_cast %210 : vector<1x8x16x20xf32> to vector<8x16x20xf32>
    %212 = vector.shape_cast %211 : vector<8x16x20xf32> to vector<128x20xf32>
    %c0_253 = arith.constant 0 : index
    %c8_254 = arith.constant 8 : index
    %c9_255 = arith.constant 9 : index
    %c0_256 = arith.constant 0 : index
    %213 = vector.load %arg10[%c0_253, %c8_254, %c9_255, %c0_256] : memref<2x18x32x20xf32, #tpu.memory_space<vmem>>, vector<1x8x16x20xf32>
    %214 = vector.shape_cast %213 : vector<1x8x16x20xf32> to vector<8x16x20xf32>
    %215 = vector.shape_cast %214 : vector<8x16x20xf32> to vector<128x20xf32>
    %c0_257 = arith.constant 0 : index
    %c9_258 = arith.constant 9 : index
    %c7_259 = arith.constant 7 : index
    %c0_260 = arith.constant 0 : index
    %216 = vector.load %arg10[%c0_257, %c9_258, %c7_259, %c0_260] : memref<2x18x32x20xf32, #tpu.memory_space<vmem>>, vector<1x8x16x20xf32>
    %217 = vector.shape_cast %216 : vector<1x8x16x20xf32> to vector<8x16x20xf32>
    %218 = vector.shape_cast %217 : vector<8x16x20xf32> to vector<128x20xf32>
    %c0_261 = arith.constant 0 : index
    %c9_262 = arith.constant 9 : index
    %c8_263 = arith.constant 8 : index
    %c0_264 = arith.constant 0 : index
    %219 = vector.load %arg10[%c0_261, %c9_262, %c8_263, %c0_264] : memref<2x18x32x20xf32, #tpu.memory_space<vmem>>, vector<1x8x16x20xf32>
    %220 = vector.shape_cast %219 : vector<1x8x16x20xf32> to vector<8x16x20xf32>
    %221 = vector.shape_cast %220 : vector<8x16x20xf32> to vector<128x20xf32>
    %c0_265 = arith.constant 0 : index
    %c9_266 = arith.constant 9 : index
    %c9_267 = arith.constant 9 : index
    %c0_268 = arith.constant 0 : index
    %222 = vector.load %arg10[%c0_265, %c9_266, %c9_267, %c0_268] : memref<2x18x32x20xf32, #tpu.memory_space<vmem>>, vector<1x8x16x20xf32>
    %223 = vector.shape_cast %222 : vector<1x8x16x20xf32> to vector<8x16x20xf32>
    %224 = vector.shape_cast %223 : vector<8x16x20xf32> to vector<128x20xf32>
    %c0_269 = arith.constant 0 : index
    %c10_270 = arith.constant 10 : index
    %c7_271 = arith.constant 7 : index
    %c0_272 = arith.constant 0 : index
    %225 = vector.load %arg10[%c0_269, %c10_270, %c7_271, %c0_272] : memref<2x18x32x20xf32, #tpu.memory_space<vmem>>, vector<1x8x16x20xf32>
    %226 = vector.shape_cast %225 : vector<1x8x16x20xf32> to vector<8x16x20xf32>
    %227 = vector.shape_cast %226 : vector<8x16x20xf32> to vector<128x20xf32>
    %c0_273 = arith.constant 0 : index
    %c10_274 = arith.constant 10 : index
    %c8_275 = arith.constant 8 : index
    %c0_276 = arith.constant 0 : index
    %228 = vector.load %arg10[%c0_273, %c10_274, %c8_275, %c0_276] : memref<2x18x32x20xf32, #tpu.memory_space<vmem>>, vector<1x8x16x20xf32>
    %229 = vector.shape_cast %228 : vector<1x8x16x20xf32> to vector<8x16x20xf32>
    %230 = vector.shape_cast %229 : vector<8x16x20xf32> to vector<128x20xf32>
    %c0_277 = arith.constant 0 : index
    %c10_278 = arith.constant 10 : index
    %c9_279 = arith.constant 9 : index
    %c0_280 = arith.constant 0 : index
    %231 = vector.load %arg10[%c0_277, %c10_278, %c9_279, %c0_280] : memref<2x18x32x20xf32, #tpu.memory_space<vmem>>, vector<1x8x16x20xf32>
    %232 = vector.shape_cast %231 : vector<1x8x16x20xf32> to vector<8x16x20xf32>
    %233 = vector.shape_cast %232 : vector<8x16x20xf32> to vector<128x20xf32>
    %cst_281 = arith.constant 0.000000e+00 : f32
    %234 = vector.broadcast %cst_281 : f32 to vector<128x76xf32>
    %235 = tpu.concatenate %209, %212, %215, %218, %221, %224, %227, %230, %233, %234 in 1 : vector<128x20xf32>, vector<128x20xf32>, vector<128x20xf32>, vector<128x20xf32>, vector<128x20xf32>, vector<128x20xf32>, vector<128x20xf32>, vector<128x20xf32>, vector<128x20xf32>, vector<128x76xf32> -> vector<128x256xf32>
    %c0_282 = arith.constant 0 : index
    %c0_283 = arith.constant 0 : index
    %236 = vector.load %arg4[%c0_282, %c0_283] : memref<256x20xf32, #tpu.memory_space<vmem>>, vector<256x20xf32>
    %cst_284 = arith.constant dense<0.000000e+00> : vector<128x20xf32>
    %237 = tpu.matmul %235, %236, %cst_284 {dimension_numbers = #tpu.dot_dimension_numbers<[1], [0], [0], [1], [0, 0, 1, 1], [], []>} : vector<128x256xf32>, vector<256x20xf32>, vector<128x20xf32> -> vector<128x20xf32>
    %c0_285 = arith.constant 0 : index
    %c9_286 = arith.constant 9 : index
    %c1_287 = arith.constant 1 : index
    %c0_288 = arith.constant 0 : index
    %238 = vector.load %arg0[%c0_285, %c9_286, %c1_287, %c0_288] : memref<2x18x18x20xf32, #tpu.memory_space<vmem>>, vector<1x8x16x20xf32>
    %239 = vector.shape_cast %238 : vector<1x8x16x20xf32> to vector<8x16x20xf32>
    %cst_289 = arith.constant 0.000000e+00 : f32
    %240 = vector.broadcast %cst_289 : f32 to vector<128x20xf32>
    %241 = arith.maximumf %237, %240 : vector<128x20xf32>
    %242 = vector.shape_cast %241 : vector<128x20xf32> to vector<8x16x20xf32>
    %243 = arith.addf %242, %239 : vector<8x16x20xf32>
    %c0_290 = arith.constant 0 : index
    %c8_291 = arith.constant 8 : index
    %c0_292 = arith.constant 0 : index
    %c0_293 = arith.constant 0 : index
    %244 = vector.load %arg8[%c0_290, %c8_291, %c0_292, %c0_293] : memref<2x16x16x20xf32, #tpu.memory_space<vmem>>, vector<1x8x16x20xf32>
    %245 = vector.shape_cast %244 : vector<1x8x16x20xf32> to vector<8x16x20xf32>
    %246 = vector.shape_cast %243 : vector<8x16x20xf32> to vector<1x8x16x20xf32>
    tpu.vector_store %arg8[%c0_290, %c8_291, %c0_292, %c0_293], %246 {strides = array<i32>} : memref<2x16x16x20xf32, #tpu.memory_space<vmem>>, vector<1x8x16x20xf32>,
    %c1_294 = arith.constant 1 : index
    %c0_295 = arith.constant 0 : index
    %c7_296 = arith.constant 7 : index
    %c0_297 = arith.constant 0 : index
    %247 = vector.load %arg10[%c1_294, %c0_295, %c7_296, %c0_297] : memref<2x18x32x20xf32, #tpu.memory_space<vmem>>, vector<1x8x16x20xf32>
    %248 = vector.shape_cast %247 : vector<1x8x16x20xf32> to vector<8x16x20xf32>
    %249 = vector.shape_cast %248 : vector<8x16x20xf32> to vector<128x20xf32>
    %c1_298 = arith.constant 1 : index
    %c0_299 = arith.constant 0 : index
    %c8_300 = arith.constant 8 : index
    %c0_301 = arith.constant 0 : index
    %250 = vector.load %arg10[%c1_298, %c0_299, %c8_300, %c0_301] : memref<2x18x32x20xf32, #tpu.memory_space<vmem>>, vector<1x8x16x20xf32>
    %251 = vector.shape_cast %250 : vector<1x8x16x20xf32> to vector<8x16x20xf32>
    %252 = vector.shape_cast %251 : vector<8x16x20xf32> to vector<128x20xf32>
    %c1_302 = arith.constant 1 : index
    %c0_303 = arith.constant 0 : index
    %c9_304 = arith.constant 9 : index
    %c0_305 = arith.constant 0 : index
    %253 = vector.load %arg10[%c1_302, %c0_303, %c9_304, %c0_305] : memref<2x18x32x20xf32, #tpu.memory_space<vmem>>, vector<1x8x16x20xf32>
    %254 = vector.shape_cast %253 : vector<1x8x16x20xf32> to vector<8x16x20xf32>
    %255 = vector.shape_cast %254 : vector<8x16x20xf32> to vector<128x20xf32>
    %c1_306 = arith.constant 1 : index
    %c1_307 = arith.constant 1 : index
    %c7_308 = arith.constant 7 : index
    %c0_309 = arith.constant 0 : index
    %256 = vector.load %arg10[%c1_306, %c1_307, %c7_308, %c0_309] : memref<2x18x32x20xf32, #tpu.memory_space<vmem>>, vector<1x8x16x20xf32>
    %257 = vector.shape_cast %256 : vector<1x8x16x20xf32> to vector<8x16x20xf32>
    %258 = vector.shape_cast %257 : vector<8x16x20xf32> to vector<128x20xf32>
    %c1_310 = arith.constant 1 : index
    %c1_311 = arith.constant 1 : index
    %c8_312 = arith.constant 8 : index
    %c0_313 = arith.constant 0 : index
    %259 = vector.load %arg10[%c1_310, %c1_311, %c8_312, %c0_313] : memref<2x18x32x20xf32, #tpu.memory_space<vmem>>, vector<1x8x16x20xf32>
    %260 = vector.shape_cast %259 : vector<1x8x16x20xf32> to vector<8x16x20xf32>
    %261 = vector.shape_cast %260 : vector<8x16x20xf32> to vector<128x20xf32>
    %c1_314 = arith.constant 1 : index
    %c1_315 = arith.constant 1 : index
    %c9_316 = arith.constant 9 : index
    %c0_317 = arith.constant 0 : index
    %262 = vector.load %arg10[%c1_314, %c1_315, %c9_316, %c0_317] : memref<2x18x32x20xf32, #tpu.memory_space<vmem>>, vector<1x8x16x20xf32>
    %263 = vector.shape_cast %262 : vector<1x8x16x20xf32> to vector<8x16x20xf32>
    %264 = vector.shape_cast %263 : vector<8x16x20xf32> to vector<128x20xf32>
    %c1_318 = arith.constant 1 : index
    %c2_319 = arith.constant 2 : index
    %c7_320 = arith.constant 7 : index
    %c0_321 = arith.constant 0 : index
    %265 = vector.load %arg10[%c1_318, %c2_319, %c7_320, %c0_321] : memref<2x18x32x20xf32, #tpu.memory_space<vmem>>, vector<1x8x16x20xf32>
    %266 = vector.shape_cast %265 : vector<1x8x16x20xf32> to vector<8x16x20xf32>
    %267 = vector.shape_cast %266 : vector<8x16x20xf32> to vector<128x20xf32>
    %c1_322 = arith.constant 1 : index
    %c2_323 = arith.constant 2 : index
    %c8_324 = arith.constant 8 : index
    %c0_325 = arith.constant 0 : index
    %268 = vector.load %arg10[%c1_322, %c2_323, %c8_324, %c0_325] : memref<2x18x32x20xf32, #tpu.memory_space<vmem>>, vector<1x8x16x20xf32>
    %269 = vector.shape_cast %268 : vector<1x8x16x20xf32> to vector<8x16x20xf32>
    %270 = vector.shape_cast %269 : vector<8x16x20xf32> to vector<128x20xf32>
    %c1_326 = arith.constant 1 : index
    %c2_327 = arith.constant 2 : index
    %c9_328 = arith.constant 9 : index
    %c0_329 = arith.constant 0 : index
    %271 = vector.load %arg10[%c1_326, %c2_327, %c9_328, %c0_329] : memref<2x18x32x20xf32, #tpu.memory_space<vmem>>, vector<1x8x16x20xf32>
    %272 = vector.shape_cast %271 : vector<1x8x16x20xf32> to vector<8x16x20xf32>
    %273 = vector.shape_cast %272 : vector<8x16x20xf32> to vector<128x20xf32>
    %cst_330 = arith.constant 0.000000e+00 : f32
    %274 = vector.broadcast %cst_330 : f32 to vector<128x76xf32>
    %275 = tpu.concatenate %249, %252, %255, %258, %261, %264, %267, %270, %273, %274 in 1 : vector<128x20xf32>, vector<128x20xf32>, vector<128x20xf32>, vector<128x20xf32>, vector<128x20xf32>, vector<128x20xf32>, vector<128x20xf32>, vector<128x20xf32>, vector<128x20xf32>, vector<128x76xf32> -> vector<128x256xf32>
    %c0_331 = arith.constant 0 : index
    %c0_332 = arith.constant 0 : index
    %276 = vector.load %arg4[%c0_331, %c0_332] : memref<256x20xf32, #tpu.memory_space<vmem>>, vector<256x20xf32>
    %cst_333 = arith.constant dense<0.000000e+00> : vector<128x20xf32>
    %277 = tpu.matmul %275, %276, %cst_333 {dimension_numbers = #tpu.dot_dimension_numbers<[1], [0], [0], [1], [0, 0, 1, 1], [], []>} : vector<128x256xf32>, vector<256x20xf32>, vector<128x20xf32> -> vector<128x20xf32>
    %c1_334 = arith.constant 1 : index
    %c1_335 = arith.constant 1 : index
    %c1_336 = arith.constant 1 : index
    %c0_337 = arith.constant 0 : index
    %278 = vector.load %arg0[%c1_334, %c1_335, %c1_336, %c0_337] : memref<2x18x18x20xf32, #tpu.memory_space<vmem>>, vector<1x8x16x20xf32>
    %279 = vector.shape_cast %278 : vector<1x8x16x20xf32> to vector<8x16x20xf32>
    %cst_338 = arith.constant 0.000000e+00 : f32
    %280 = vector.broadcast %cst_338 : f32 to vector<128x20xf32>
    %281 = arith.maximumf %277, %280 : vector<128x20xf32>
    %282 = vector.shape_cast %281 : vector<128x20xf32> to vector<8x16x20xf32>
    %283 = arith.addf %282, %279 : vector<8x16x20xf32>
    %c1_339 = arith.constant 1 : index
    %c0_340 = arith.constant 0 : index
    %c0_341 = arith.constant 0 : index
    %c0_342 = arith.constant 0 : index
    %284 = vector.load %arg8[%c1_339, %c0_340, %c0_341, %c0_342] : memref<2x16x16x20xf32, #tpu.memory_space<vmem>>, vector<1x8x16x20xf32>
    %285 = vector.shape_cast %284 : vector<1x8x16x20xf32> to vector<8x16x20xf32>
    %286 = vector.shape_cast %283 : vector<8x16x20xf32> to vector<1x8x16x20xf32>
    tpu.vector_store %arg8[%c1_339, %c0_340, %c0_341, %c0_342], %286 {strides = array<i32>} : memref<2x16x16x20xf32, #tpu.memory_space<vmem>>, vector<1x8x16x20xf32>,
    %c1_343 = arith.constant 1 : index
    %c8_344 = arith.constant 8 : index
    %c7_345 = arith.constant 7 : index
    %c0_346 = arith.constant 0 : index
    %287 = vector.load %arg10[%c1_343, %c8_344, %c7_345, %c0_346] : memref<2x18x32x20xf32, #tpu.memory_space<vmem>>, vector<1x8x16x20xf32>
    %288 = vector.shape_cast %287 : vector<1x8x16x20xf32> to vector<8x16x20xf32>
    %289 = vector.shape_cast %288 : vector<8x16x20xf32> to vector<128x20xf32>
    %c1_347 = arith.constant 1 : index
    %c8_348 = arith.constant 8 : index
    %c8_349 = arith.constant 8 : index
    %c0_350 = arith.constant 0 : index
    %290 = vector.load %arg10[%c1_347, %c8_348, %c8_349, %c0_350] : memref<2x18x32x20xf32, #tpu.memory_space<vmem>>, vector<1x8x16x20xf32>
    %291 = vector.shape_cast %290 : vector<1x8x16x20xf32> to vector<8x16x20xf32>
    %292 = vector.shape_cast %291 : vector<8x16x20xf32> to vector<128x20xf32>
    %c1_351 = arith.constant 1 : index
    %c8_352 = arith.constant 8 : index
    %c9_353 = arith.constant 9 : index
    %c0_354 = arith.constant 0 : index
    %293 = vector.load %arg10[%c1_351, %c8_352, %c9_353, %c0_354] : memref<2x18x32x20xf32, #tpu.memory_space<vmem>>, vector<1x8x16x20xf32>
    %294 = vector.shape_cast %293 : vector<1x8x16x20xf32> to vector<8x16x20xf32>
    %295 = vector.shape_cast %294 : vector<8x16x20xf32> to vector<128x20xf32>
    %c1_355 = arith.constant 1 : index
    %c9_356 = arith.constant 9 : index
    %c7_357 = arith.constant 7 : index
    %c0_358 = arith.constant 0 : index
    %296 = vector.load %arg10[%c1_355, %c9_356, %c7_357, %c0_358] : memref<2x18x32x20xf32, #tpu.memory_space<vmem>>, vector<1x8x16x20xf32>
    %297 = vector.shape_cast %296 : vector<1x8x16x20xf32> to vector<8x16x20xf32>
    %298 = vector.shape_cast %297 : vector<8x16x20xf32> to vector<128x20xf32>
    %c1_359 = arith.constant 1 : index
    %c9_360 = arith.constant 9 : index
    %c8_361 = arith.constant 8 : index
    %c0_362 = arith.constant 0 : index
    %299 = vector.load %arg10[%c1_359, %c9_360, %c8_361, %c0_362] : memref<2x18x32x20xf32, #tpu.memory_space<vmem>>, vector<1x8x16x20xf32>
    %300 = vector.shape_cast %299 : vector<1x8x16x20xf32> to vector<8x16x20xf32>
    %301 = vector.shape_cast %300 : vector<8x16x20xf32> to vector<128x20xf32>
    %c1_363 = arith.constant 1 : index
    %c9_364 = arith.constant 9 : index
    %c9_365 = arith.constant 9 : index
    %c0_366 = arith.constant 0 : index
    %302 = vector.load %arg10[%c1_363, %c9_364, %c9_365, %c0_366] : memref<2x18x32x20xf32, #tpu.memory_space<vmem>>, vector<1x8x16x20xf32>
    %303 = vector.shape_cast %302 : vector<1x8x16x20xf32> to vector<8x16x20xf32>
    %304 = vector.shape_cast %303 : vector<8x16x20xf32> to vector<128x20xf32>
    %c1_367 = arith.constant 1 : index
    %c10_368 = arith.constant 10 : index
    %c7_369 = arith.constant 7 : index
    %c0_370 = arith.constant 0 : index
    %305 = vector.load %arg10[%c1_367, %c10_368, %c7_369, %c0_370] : memref<2x18x32x20xf32, #tpu.memory_space<vmem>>, vector<1x8x16x20xf32>
    %306 = vector.shape_cast %305 : vector<1x8x16x20xf32> to vector<8x16x20xf32>
    %307 = vector.shape_cast %306 : vector<8x16x20xf32> to vector<128x20xf32>
    %c1_371 = arith.constant 1 : index
    %c10_372 = arith.constant 10 : index
    %c8_373 = arith.constant 8 : index
    %c0_374 = arith.constant 0 : index
    %308 = vector.load %arg10[%c1_371, %c10_372, %c8_373, %c0_374] : memref<2x18x32x20xf32, #tpu.memory_space<vmem>>, vector<1x8x16x20xf32>
    %309 = vector.shape_cast %308 : vector<1x8x16x20xf32> to vector<8x16x20xf32>
    %310 = vector.shape_cast %309 : vector<8x16x20xf32> to vector<128x20xf32>
    %c1_375 = arith.constant 1 : index
    %c10_376 = arith.constant 10 : index
    %c9_377 = arith.constant 9 : index
    %c0_378 = arith.constant 0 : index
    %311 = vector.load %arg10[%c1_375, %c10_376, %c9_377, %c0_378] : memref<2x18x32x20xf32, #tpu.memory_space<vmem>>, vector<1x8x16x20xf32>
    %312 = vector.shape_cast %311 : vector<1x8x16x20xf32> to vector<8x16x20xf32>
    %313 = vector.shape_cast %312 : vector<8x16x20xf32> to vector<128x20xf32>
    %cst_379 = arith.constant 0.000000e+00 : f32
    %314 = vector.broadcast %cst_379 : f32 to vector<128x76xf32>
    %315 = tpu.concatenate %289, %292, %295, %298, %301, %304, %307, %310, %313, %314 in 1 : vector<128x20xf32>, vector<128x20xf32>, vector<128x20xf32>, vector<128x20xf32>, vector<128x20xf32>, vector<128x20xf32>, vector<128x20xf32>, vector<128x20xf32>, vector<128x20xf32>, vector<128x76xf32> -> vector<128x256xf32>
    %c0_380 = arith.constant 0 : index
    %c0_381 = arith.constant 0 : index
    %316 = vector.load %arg4[%c0_380, %c0_381] : memref<256x20xf32, #tpu.memory_space<vmem>>, vector<256x20xf32>
    %cst_382 = arith.constant dense<0.000000e+00> : vector<128x20xf32>
    %317 = tpu.matmul %315, %316, %cst_382 {dimension_numbers = #tpu.dot_dimension_numbers<[1], [0], [0], [1], [0, 0, 1, 1], [], []>} : vector<128x256xf32>, vector<256x20xf32>, vector<128x20xf32> -> vector<128x20xf32>
    %c1_383 = arith.constant 1 : index
    %c9_384 = arith.constant 9 : index
    %c1_385 = arith.constant 1 : index
    %c0_386 = arith.constant 0 : index
    %318 = vector.load %arg0[%c1_383, %c9_384, %c1_385, %c0_386] : memref<2x18x18x20xf32, #tpu.memory_space<vmem>>, vector<1x8x16x20xf32>
    %319 = vector.shape_cast %318 : vector<1x8x16x20xf32> to vector<8x16x20xf32>
    %cst_387 = arith.constant 0.000000e+00 : f32
    %320 = vector.broadcast %cst_387 : f32 to vector<128x20xf32>
    %321 = arith.maximumf %317, %320 : vector<128x20xf32>
    %322 = vector.shape_cast %321 : vector<128x20xf32> to vector<8x16x20xf32>
    %323 = arith.addf %322, %319 : vector<8x16x20xf32>
    %c1_388 = arith.constant 1 : index
    %c8_389 = arith.constant 8 : index
    %c0_390 = arith.constant 0 : index
    %c0_391 = arith.constant 0 : index
    %324 = vector.load %arg8[%c1_388, %c8_389, %c0_390, %c0_391] : memref<2x16x16x20xf32, #tpu.memory_space<vmem>>, vector<1x8x16x20xf32>
    %325 = vector.shape_cast %324 : vector<1x8x16x20xf32> to vector<8x16x20xf32>
    %326 = vector.shape_cast %323 : vector<8x16x20xf32> to vector<1x8x16x20xf32>
    tpu.vector_store %arg8[%c1_388, %c8_389, %c0_390, %c0_391], %326 {strides = array<i32>} : memref<2x16x16x20xf32, #tpu.memory_space<vmem>>, vector<1x8x16x20xf32>,
    return
  }
}

</mosaic_0001>

<bundles_post_ra>
// kernel: layer_forward.1
= control target key start
LH: loop header
LB: loop body
LE: loop exit
PB: predicated region body
PF: predicated region fallthrough
CT: control target
= control target key end

     0   :  { %s11245_s21 = smov 20   ;;  %s19713_s0 = inlined_call_operand.vmem [shape: f32[2,18,18,20], index: 0, kind: input, shape index: {}]   ;;  %s19714_s1 = inlined_call_operand.vmem [shape: f32[128,80], index: 1, kind: input, shape index: {}]   ;;  %s19715_s2 = inlined_call_operand.vmem [shape: f32[128,20], index: 2, kind: input, shape index: {}]   ;;  %s19716_s3 = inlined_call_operand.vmem [shape: f32[256,20], index: 3, kind: input, shape index: {}]   ;;  %s19717_s4 = inlined_call_operand.vmem [shape: f32[256,20], index: 4, kind: input, shape index: {}]   ;;  %s19718_s5 = inlined_call_operand.vmem [shape: f32[20,80], index: 5, kind: input, shape index: {}]   ;;  %s19719_s6 = inlined_call_operand.vmem [shape: f32[80,16], index: 6, kind: input, shape index: {}]   ;;  %s19720_s7 = inlined_call_operand.vmem [shape: f32[128,16], index: 7, kind: output, shape index: {0}]   ;;  %s19721_s8 = inlined_call_operand.hbm [shape: f32[2,16,16,20], index: 8, kind: output, shape index: {1}]   ;;  %s19722_s9 = inlined_call_operand.vmem [shape: f32[128,80], index: 9, kind: output, shape index: {2}]  }
   0x1   :  { %v11310_v0 = vld [vmem:[%s19713_s0 + $0x61] sm:$0xff]  ;;  %v11315_v1 = vld [vmem:[%s19713_s0 + $0x69] sm:$0xff]  ;;  %v11320_v2 = vld [vmem:[%s19713_s0 + $0x31] sm:$0xff] }
   0x2   :  { %v11324_v3 = vpack.i.bf16 %v11315_v1, %v11310_v0  ;;  %v11329_v4 = vld [vmem:[%s19713_s0 + $0x39] sm:$0xff]  ;;  %v612_v5 = vld [vmem:[%s19713_s0 + $0x1] sm:$0xff]  ;;  %v613_v6 = vld [vmem:[%s19713_s0 + $0x9] sm:$0xff] }
   0x3   :  { %v11339_v7 = vpack.i.bf16 %v11329_v4, %v11320_v2  ;;  %v9512_v8 = vpack.i.bf16 %v613_v6, %v612_v5  ;;  %v11346_v9 = vld [vmem:[%s19713_s0 + $0x79] sm:$0xff]  ;;  %v11354_v10 = vld [vmem:[%s19713_s0 + $0x81] sm:$0xff]  ;;  %v11359_v11 = vld [vmem:[%s19713_s0 + $0x49] sm:$0xff] }
   0x4   :  { %9533 = vrot.lane.b32.xlu2 %v11324_v3, %s11245_s21  ;;  %v11364_v12 = vld [vmem:[%s19713_s0 + $0x51] sm:$0xff]  ;;  %v614_v13 = vld [vmem:[%s19713_s0 + $0x19] sm:$0xff]  ;;  %v615_v14 = vld [vmem:[%s19713_s0 + $0x21] sm:$0xff]  ;;  %v11374_v15 = vpack.i.bf16 %v11354_v10, %v11346_v9 }
   0x5   :  { %9523 = vrot.lane.b32.xlu1 %v11339_v7, %s11245_s21  ;;  %9513 = vrot.lane.b32.xlu0 %v9512_v8, %s11245_s21  ;;  %v11378_v16 = vpack.i.bf16 %v11364_v12, %v11359_v11  ;;  %v11380_v17 = vpack.i.bf16 %v615_v14, %v614_v13  ;;  %v628_v18 = vld [vmem:[%s19713_s0 + $0x2] sm:$0xff]  ;;  %v629_v19 = vld [vmem:[%s19713_s0 + $0xa] sm:$0xff] }
   0x6   :  { %v11397_v20 = vld [vmem:[%s19713_s0 + $0xa9] sm:$0xff]  ;;  %v11402_v21 = vld [vmem:[%s19713_s0 + $0xb1] sm:$0xff]  ;;  %v11412_v23 = vld [vmem:[%s19713_s0 + $0x99] sm:$0xff] }
   0x7   :  { %v11407_v22 = vld [vmem:[%s19713_s0 + $0x91] sm:$0xff] }
   0xc   :  { %9538 = vrot.lane.b32.xlu2 %v11374_v15, %s11245_s21 }
   0xd   :  { %9528 = vrot.lane.b32.xlu1 %v11378_v16, %s11245_s21  ;;  %9518 = vrot.lane.b32.xlu0 %v11380_v17, %s11245_s21 }
   0xe   :  { %15 = vsyncpa [#allocation4], 0  ;;  %v9552_v24 = vpack.i.bf16 %v629_v19, %v628_v18  ;;  %v11416_v25 = vpack.i.bf16 %v11402_v21, %v11397_v20  ;;  %v11420_v26 = vpack.i.bf16 %v11412_v23, %v11407_v22  ;;  %s11246_s26 = smov 40   ;;  %v11426_v27 = vld [vmem:[%s19713_s0 + $0x4a] sm:$0xff]  ;;  %v11435_v28 = vld [vmem:[%s19713_s0 + $0x52] sm:$0xff]  ;;  %s11247_s24 = smov 60  }
   0xf   :  { %v11440_v29 = vld [vmem:[%s19713_s0 + $0x32] sm:$0xff]  ;;  %v11445_v30 = vld [vmem:[%s19713_s0 + $0x3a] sm:$0xff]  ;;  %v631_v32 = vld [vmem:[%s19713_s0 + $0x22] sm:$0xff]  ;;  %v11455_v33 = vpack.i.bf16 %v11435_v28, %v11426_v27  ;;  %s11248_s11 = smov 80   ;;  %s11249_s16 = smov 100   ;;  %vm279_vm0 = vcmask 654336  }
  0x10   :  { %v630_v31 = vld [vmem:[%s19713_s0 + $0x1a] sm:$0xff]  ;;  %v11459_v34 = vpack.i.bf16 %v11445_v30, %v11440_v29  ;;  %v11468_v36 = vld [vmem:[%s19713_s0 + $0x92] sm:$0xff]  ;;  %v11487_v39 = vld [vmem:[%s19713_s0 + $0x82] sm:$0xff]  ;;  %s11250_s22 = smov 120   ;;  %s11251_s20 = smov 12   ;;  %vm49_vm1 = vcmask 162816  }
  0x11   :  { %v11461_v35 = vpack.i.bf16 %v631_v32, %v630_v31  ;;  %v11477_v37 = vld [vmem:[%s19713_s0 + $0x9a] sm:$0xff]  ;;  %v11492_v40 = vld [vmem:[%s19713_s0 + $0x62] sm:$0xff]  ;;  %v11497_v41 = vld [vmem:[%s19713_s0 + $0x6a] sm:$0xff]  ;;  %s11252_s25 = smov 32   ;;  %vm1270_vm2 = vcmask 326656   ;;  %vm98_vm3 = vcmask 1043456  }
  0x12   :  { %v11482_v38 = vld [vmem:[%s19713_s0 + $0x7a] sm:$0xff]  ;;  %v9582_v42 = vpack.i.bf16 %v11477_v37, %v11468_v36  ;;  %v9572_v44 = vpack.i.bf16 %v11497_v41, %v11492_v40  ;;  %v11509_v45 = vld [vmem:[%s19713_s0 + $0x30] sm:$0xff]  ;;  %v11565_v57 = vld [vmem:[%s19713_s0 + $0x68] sm:$0xff]  ;;  %vm1287_vm4 = vcmask 490496   ;;  %vm1320_vm5 = vcmask 818176   ;;  %s11255_s27 = smov 128  }
  0x13   :  { %v9577_v43 = vpack.i.bf16 %v11487_v39, %v11482_v38  ;;  %v11516_v46 = vld [vmem:[%s19713_s0 + $0x38] sm:$0xff]  ;;  %v11526_v48 = vld [vmem:[%s19713_s0 + $0x20] sm:$0xff]  ;;  %v11531_v49 = vld [vmem:[%s19713_s0 + $0xaa] sm:$0xff]  ;;  %vm1337_vm6 = vcmask 982016   ;;  %vm435_vm7 = vcmask 130048   ;;  %vm1354_vm8 = vcmask 97280  }
  0x14   :  { %9553 = vrot.lane.b32.xlu2 %v9552_v24, %s11246_s26  ;;  %v11521_v47 = vld [vmem:[%s19713_s0 + $0x18] sm:$0xff]  ;;  %v9597_v51 = vpack.i.bf16 %v11516_v46, %v11509_v45  ;;  %v11555_v55 = vld [vmem:[%s19713_s0 + $0x80] sm:$0xff]  ;;  %v11570_v58 = vld [vmem:[%s19713_s0 + $0x48] sm:$0xff]  ;;  %vm1388_vm9 = vcmask 424960   ;;  %vm1371_vm10 = vcmask 261120  }
  0x15   :  { %9548 = vrot.lane.b32.xlu1 %v11416_v25, %s11245_s21  ;;  %9543 = vrot.lane.b32.xlu0 %v11420_v26, %s11245_s21  ;;  %v11536_v50 = vld [vmem:[%s19713_s0 + $0xb2] sm:$0xff]  ;;  %v9592_v52 = vpack.i.bf16 %v11526_v48, %v11521_v47  ;;  %v11560_v56 = vld [vmem:[%s19713_s0 + $0x60] sm:$0xff] }
  0x16   :  { %v9587_v53 = vpack.i.bf16 %v11536_v50, %v11531_v49  ;;  %v11548_v54 = vld [vmem:[%s19713_s0 + $0x78] sm:$0xff]  ;;  %v11575_v59 = vld [vmem:[%s19713_s0 + $0x50] sm:$0xff]  ;;  %v9607_v61 = vpack.i.bf16 %v11565_v57, %v11560_v56  ;;  %v11587_v63 = vld [vmem:[%s19713_s0 + $0xc0] sm:$0xff] }
  0x17   :  { %v9612_v60 = vpack.i.bf16 %v11555_v55, %v11548_v54  ;;  %v9602_v62 = vpack.i.bf16 %v11575_v59, %v11570_v58  ;;  %v11594_v5 = vld [vmem:[%s19713_s0 + $0xc8] sm:$0xff]  ;;  %v11604_v8 = vld [vmem:[%s19713_s0 + $0xb0] sm:$0xff]  ;;  %v11614_v14 = vld [vmem:[%s19713_s0 + $0x98] sm:$0xff] }
  0x18   :  { %v11599_v6 = vld [vmem:[%s19713_s0 + $0xa8] sm:$0xff]  ;;  %v11609_v13 = vld [vmem:[%s19713_s0 + $0x90] sm:$0xff]  ;;  %v9627_v18 = vpack.i.bf16 %v11594_v5, %v11587_v63 }
  0x19   :  { %v9622_v19 = vpack.i.bf16 %v11604_v8, %v11599_v6  ;;  %v9617_v24 = vpack.i.bf16 %v11614_v14, %v11609_v13  ;;  %v11640_v31 = vld [vmem:[%s19713_s0 + $0xc1] sm:$0xff] }
  0x1a   :  { %v321_v32 = vld [vmem:[%s19719_s6 + $0x48] sm:$0xff] }
  0x1b   :  { %9490 = vmatpush.msra.mxu2 %v321_v32  ;;  %376 = vmatpush.msra.mxu1 %v321_v32 }
  0x1c   :  { %9568 = vrot.lane.b32.xlu2 %v11455_v33, %s11246_s26 }
  0x1d   :  { %9563 = vrot.lane.b32.xlu1 %v11459_v34, %s11246_s26  ;;  %9558 = vrot.lane.b32.xlu0 %v11461_v35, %s11246_s26 }
  0x24   :  { %9583 = vrot.lane.b32.xlu2 %v9582_v42, %s11246_s26 }
  0x25   :  { %9578 = vrot.lane.b32.xlu1 %v9577_v43, %s11246_s26  ;;  %9573 = vrot.lane.b32.xlu0 %v9572_v44, %s11246_s26 }
  0x2c   :  { %9598 = vrot.lane.b32.xlu2 %v9597_v51, %s11247_s24 }
  0x2d   :  { %9593 = vrot.lane.b32.xlu1 %v9592_v52, %s11247_s24  ;;  %9588 = vrot.lane.b32.xlu0 %v9587_v53, %s11246_s26 }
  0x34   :  { %9613 = vrot.lane.b32.xlu2 %v9612_v60, %s11247_s24  ;;  %v315_v60 = vld [vmem:[%s19719_s6 + $0x18] sm:$0xff] }
  0x35   :  { %9608 = vrot.lane.b32.xlu1 %v9607_v61, %s11247_s24  ;;  %9603 = vrot.lane.b32.xlu0 %v9602_v62, %s11247_s24  ;;  %v314_v61 = vld [vmem:[%s19719_s6 + $0x10] sm:$0xff]  ;;  %v313_v62 = vld [vmem:[%s19719_s6 + $0x8] sm:$0xff] }
  0x3c   :  { %9628 = vrot.lane.b32.xlu2 %v9627_v18, %s11247_s24 }
  0x3d   :  { %9623 = vrot.lane.b32.xlu1 %v9622_v19, %s11247_s24  ;;  %9618 = vrot.lane.b32.xlu0 %v9617_v24, %s11247_s24 }
  0x44   :  { %9643 = vrot.lane.b32.xlu2 %v11378_v16, %s11248_s11 }
  0x45   :  { %9638 = vrot.lane.b32.xlu1 %v11339_v7, %s11248_s11  ;;  %9633 = vrot.lane.b32.xlu0 %v11380_v17, %s11248_s11  ;;  %v11645_v7 = vld [vmem:[%s19713_s0 + $0xc9] sm:$0xff] }
  0x46   :  { %v11649_v16 = vpack.i.bf16 %v11645_v7, %v11640_v31  ;;  %v11672_v17 = vld [vmem:[%s19713_s0 + $0xc2] sm:$0xff] }
  0x4c   :  { %9658 = vrot.lane.b32.xlu2 %v11420_v26, %s11248_s11 }
  0x4d   :  { %9653 = vrot.lane.b32.xlu1 %v11374_v15, %s11248_s11  ;;  %9648 = vrot.lane.b32.xlu0 %v11324_v3, %s11248_s11 }
  0x54   :  { %9673 = vrot.lane.b32.xlu2 %v11461_v35, %s11249_s16  ;;  %v319_v35 = vld [vmem:[%s19719_s6 + $0x38] sm:$0xff] }
  0x55   :  { %9668 = vrot.lane.b32.xlu1 %v11649_v16, %s11248_s11  ;;  %9663 = vrot.lane.b32.xlu0 %v11416_v25, %s11248_s11  ;;  %v11677_v25 = vld [vmem:[%s19713_s0 + $0xca] sm:$0xff] }
  0x56   :  { %v11681_v26 = vpack.i.bf16 %v11677_v25, %v11672_v17 }
  0x5c   :  { %9688 = vrot.lane.b32.xlu2 %v9572_v44, %s11249_s16 }
  0x5d   :  { %9683 = vrot.lane.b32.xlu1 %v11455_v33, %s11249_s16  ;;  %9678 = vrot.lane.b32.xlu0 %v11459_v34, %s11249_s16  ;;  %v320_v34 = vld [vmem:[%s19719_s6 + $0x40] sm:$0xff] }
  0x5e   :  { %v11662_v3 = vpop.permute.xlu2 %9533  ;;  %9491 = vmatpush.msra.mxu2 %v320_v34  ;;  %377 = vmatpush.msra.mxu1 %v320_v34 }
  0x60   :  { %9492 = vmatpush.msra.mxu2 %v319_v35  ;;  %378 = vmatpush.msra.mxu1 %v319_v35 }
  0x64   :  { %9703 = vrot.lane.b32.xlu2 %v9587_v53, %s11249_s16  ;;  %v316_v53 = vld [vmem:[%s19719_s6 + $0x20] sm:$0xff] }
  0x65   :  { %9698 = vrot.lane.b32.xlu1 %v9582_v42, %s11249_s16  ;;  %9693 = vrot.lane.b32.xlu0 %v9577_v43, %s11249_s16  ;;  %v318_v42 = vld [vmem:[%s19719_s6 + $0x30] sm:$0xff]  ;;  %v317_v43 = vld [vmem:[%s19719_s6 + $0x28] sm:$0xff] }
  0x66   :  { %v11667_v15 = vpop.permute.xlu2 %9538  ;;  %9493 = vmatpush.msra.mxu2 %v318_v42  ;;  %379 = vmatpush.msra.mxu1 %v318_v42  ;;  %v305_v42 = vld [vmem:[%s19714_s1 + $0x48] sm:$0xff] }
  0x68   :  { %9494 = vmatpush.msra.mxu2 %v317_v43  ;;  %380 = vmatpush.msra.mxu1 %v317_v43  ;;  %v306_v43 = vld [vmem:[%s19714_s1 + $0x50] sm:$0xff] }
  0x6a   :  { %9495 = vmatpush.msra.mxu2 %v316_v53  ;;  %381 = vmatpush.msra.mxu1 %v316_v53 }
  0x6c   :  { %1080 = vrot.lane.b32.xlu2 %v11516_v46, %s11250_s22  ;;  %9496 = vmatpush.msra.mxu2 %v315_v60 }
  0x6d   :  { %1078 = vrot.lane.b32.xlu1 %v11509_v45, %s11250_s22  ;;  %9708 = vrot.lane.b32.xlu0 %v11681_v26, %s11249_s16 }
  0x6e   :  { %v11692_v33 = vpop.permute.xlu2 %9553  ;;  %9497 = vmatpush.msra.mxu2 %v314_v61  ;;  %382 = vmatpush.msra.mxu1 %v315_v60 }
  0x70   :  { %9498 = vmatpush.msra.mxu2 %v313_v62  ;;  %383 = vmatpush.msra.mxu1 %v314_v61  ;;  %v307_v61 = vld [vmem:[%s19714_s1 + $0x58] sm:$0xff] }
  0x72   :  { %384 = vmatpush.msra.mxu1 %v313_v62 }
  0x74   :  { %1086 = vrot.lane.b32.xlu2 %v11560_v56, %s11250_s22 }
  0x75   :  { %1084 = vrot.lane.b32.xlu1 %v11575_v59, %s11250_s22  ;;  %1082 = vrot.lane.b32.xlu0 %v11570_v58, %s11250_s22 }
  0x76   :  { %v11712_v44 = vpop.permute.xlu2 %9568 }
  0x77   :  { %v11714_v51 = vpop.permute.xlu1 %9523  ;;  %v11716_v52 = vpop.permute.xlu0 %9513 }
  0x7c   :  { %1092 = vrot.lane.b32.xlu2 %v11555_v55, %s11250_s22  ;;  %v312_v55 = vld [vmem:[%s19719_s6] sm:$0xff] }
  0x7d   :  { %1090 = vrot.lane.b32.xlu1 %v11548_v54, %s11250_s22  ;;  %1088 = vrot.lane.b32.xlu0 %v11565_v57, %s11250_s22  ;;  %v304_v54 = vld [vmem:[%s19714_s1 + $0x40] sm:$0xff] }
  0x7e   :  { %v11736_v18 = vpop.permute.xlu2 %9583  ;;  %9499 = vmatpush.msra.mxu2 %v312_v55  ;;  %385 = vmatpush.msra.mxu1 %v312_v55 }
  0x7f   :  { %19891 = vst [vmem:[#allocation6_spill] sm:$0xff] %v11736_v18  ;;  %v11738_v19 = vpop.permute.xlu1 %9528  ;;  %v11740_v24 = vpop.permute.xlu0 %9518  ;;  %8759 = vmatmul.msk.f32.vlgmr.msra.gmra.mxu2 %vm279_vm0, %v304_v54  ;;  %v308_v54 = vld [vmem:[%s19714_s1 + $0x60] sm:$0xff] }
  0x84   :  { %1098 = vrot.lane.b32.xlu2 %v11599_v6, %s11250_s22 }
  0x85   :  { %1096 = vrot.lane.b32.xlu1 %v11614_v14, %s11250_s22  ;;  %1094 = vrot.lane.b32.xlu0 %v11609_v13, %s11250_s22 }
  0x86   :  { %v11755_v32 = vpop.permute.xlu2 %9598 }
  0x87   :  { %v11757_v34 = vpop.permute.xlu1 %9548  ;;  %v11759_v35 = vpop.permute.xlu0 %9543  ;;  %8760 = vmatmul.msk.f32.gmra.mxu2 %vm279_vm0, %v305_v42 }
  0x88   :  { %19892 = vst [vmem:[#allocation7_spill] sm:$0xff] %v11757_v34 }
  0x8c   :  { %1104 = vrot.lane.b32.xlu2 %v11594_v5, %s11250_s22  ;;  %v11783_v5 = vld [vmem:[%s19713_s0 + $0xe0] sm:$0xff] }
  0x8d   :  { %1102 = vrot.lane.b32.xlu1 %v11587_v63, %s11250_s22  ;;  %1100 = vrot.lane.b32.xlu0 %v11604_v8, %s11250_s22  ;;  %v11788_v63 = vld [vmem:[%s19713_s0 + $0xd8] sm:$0xff] }
  0x8e   :  { %v11771_v6 = vpop.permute.xlu2 %9613 }
  0x8f   :  { %v11773_v13 = vpop.permute.xlu1 %9563  ;;  %v11775_v14 = vpop.permute.xlu0 %9558  ;;  %8761 = vmatmul.msk.f32.gmra.mxu2 %vm279_vm0, %v306_v43 }
  0x94   :  { %1142 = vrot.lane.b32.xlu2 %v11320_v2, %s11251_s20 }
  0x95   :  { %1108 = vrot.lane.b32.xlu1 %v11783_v5, %s11250_s22  ;;  %1106 = vrot.lane.b32.xlu0 %v11788_v63, %s11250_s22 }
  0x96   :  { %v11797_v8 = vpop.permute.xlu2 %9628 }
  0x97   :  { %19893 = vst [vmem:[#allocation8_spill] sm:$0xff] %v11797_v8  ;;  %v11799_v53 = vpop.permute.xlu1 %9578  ;;  %v11801_v60 = vpop.permute.xlu0 %9573  ;;  %8762 = vmatmul.msk.f32.gmra.mxu2 %vm279_vm0, %v307_v61 }
  0x9c   :  { %1148 = vrot.lane.b32.xlu2 %v11364_v12, %s11251_s20  ;;  %v1420_v12 = vld [vmem:[%s19716_s3 + $0x78] sm:$0xff] }
  0x9d   :  { %1146 = vrot.lane.b32.xlu1 %v11359_v11, %s11251_s20  ;;  %1144 = vrot.lane.b32.xlu0 %v11329_v4, %s11251_s20  ;;  %v1419_v11 = vld [vmem:[%s19716_s3 + $0x70] sm:$0xff]  ;;  %v1418_v4 = vld [vmem:[%s19716_s3 + $0x68] sm:$0xff] }
  0x9e   :  { %v11813_v2 = vpop.permute.xlu2 %9643  ;;  %1437 = vmatpush.msrb.mxu2 %v1420_v12  ;;  %v1414_v12 = vld [vmem:[%s19716_s3 + $0x48] sm:$0xff] }
  0x9f   :  { %v11815_v62 = vpop.permute.xlu1 %9593  ;;  %v11817_v55 = vpop.permute.xlu0 %9588  ;;  %8763 = vmatmul.msk.f32.gmra.mxu2 %vm279_vm0, %v308_v54  ;;  %v1415_v54 = vld [vmem:[%s19716_s3 + $0x50] sm:$0xff] }
  0xa0   :  { %19894 = vst [vmem:[#allocation9_spill] sm:$0xff] %v11817_v55  ;;  %1438 = vmatpush.msrb.mxu2 %v1419_v11 }
  0xa2   :  { %1439 = vmatpush.msrb.mxu2 %v1418_v4 }
  0xa4   :  { %1154 = vrot.lane.b32.xlu2 %v11346_v9, %s11251_s20  ;;  %v1417_v9 = vld [vmem:[%s19716_s3 + $0x60] sm:$0xff] }
  0xa5   :  { %1152 = vrot.lane.b32.xlu1 %v11315_v1, %s11251_s20  ;;  %1150 = vrot.lane.b32.xlu0 %v11310_v0, %s11251_s20  ;;  %v309_v0 = vld [vmem:[%s19714_s1 + $0x68] sm:$0xff]  ;;  %v1416_v1 = vld [vmem:[%s19716_s3 + $0x58] sm:$0xff] }
  0xa6   :  { %v11838_v42 = vpop.permute.xlu2 %9658  ;;  %1440 = vmatpush.msrb.mxu2 %v1417_v9 }
  0xa7   :  { %v11840_v43 = vpop.permute.xlu1 %9608  ;;  %v11842_v61 = vpop.permute.xlu0 %9603  ;;  %8764 = vmatmul.msk.f32.gmra.mxu2 %vm279_vm0, %v309_v0  ;;  %v1411_v0 = vld [vmem:[%s19716_s3 + $0x30] sm:$0xff] }
  0xa8   :  { %1441 = vmatpush.msrb.mxu2 %v1416_v1  ;;  %v1410_v1 = vld [vmem:[%s19716_s3 + $0x28] sm:$0xff] }
  0xaa   :  { %1442 = vmatpush.msrb.mxu2 %v1415_v54 }
  0xac   :  { %1160 = vrot.lane.b32.xlu2 %v11412_v23, %s11251_s20  ;;  %v1413_v23 = vld [vmem:[%s19716_s3 + $0x40] sm:$0xff]  ;;  %1443 = vmatpush.msrb.mxu2 %v1414_v12 }
  0xad   :  { %1158 = vrot.lane.b32.xlu1 %v11407_v22, %s11251_s20  ;;  %1156 = vrot.lane.b32.xlu0 %v11354_v10, %s11251_s20  ;;  %v310_v10 = vld [vmem:[%s19714_s1 + $0x70] sm:$0xff]  ;;  %v1412_v22 = vld [vmem:[%s19716_s3 + $0x38] sm:$0xff] }
  0xae   :  { %v11866_v11 = vpop.permute.xlu2 %9673  ;;  %1444 = vmatpush.msrb.mxu2 %v1413_v23 }
  0xaf   :  { %v11868_v4 = vpop.permute.xlu1 %9623  ;;  %v11870_v9 = vpop.permute.xlu0 %9618  ;;  %8765 = vmatmul.msk.f32.gmra.mxu2 %vm279_vm0, %v310_v10  ;;  %v1408_v10 = vld [vmem:[%s19716_s3 + $0x18] sm:$0xff] }
  0xb0   :  { %19895 = vst [vmem:[#allocation10_spill] sm:$0xff] %v11868_v4  ;;  %1445 = vmatpush.msrb.mxu2 %v1412_v22  ;;  %v11917_v22 = vld [vmem:[%s19713_s0 + $0xd9] sm:$0xff]  ;;  %v597_v4 = vld [vmem:[%s19713_s0 + $0x8] sm:$0xff] }
  0xb2   :  { %1446 = vmatpush.msrb.mxu2 %v1411_v0  ;;  %v1407_v0 = vld [vmem:[%s19716_s3 + $0x10] sm:$0xff] }
  0xb4   :  { %1166 = vrot.lane.b32.xlu2 %v11640_v31, %s11251_s20  ;;  %v1409_v31 = vld [vmem:[%s19716_s3 + $0x20] sm:$0xff]  ;;  %1447 = vmatpush.msrb.mxu2 %v1410_v1  ;;  %v1406_v1 = vld [vmem:[%s19716_s3 + $0x8] sm:$0xff] }
  0xb5   :  { %1164 = vrot.lane.b32.xlu1 %v11402_v21, %s11251_s20  ;;  %1162 = vrot.lane.b32.xlu0 %v11397_v20, %s11251_s20  ;;  %v311_v20 = vld [vmem:[%s19714_s1 + $0x78] sm:$0xff]  ;;  %v11909_v21 = vld [vmem:[%s19713_s0 + $0xe1] sm:$0xff] }
  0xb6   :  { %v11894_v54 = vpop.permute.xlu2 %9688  ;;  %1448 = vmatpush.msrb.mxu2 %v1409_v31 }
  0xb7   :  { %v11896_v12 = vpop.permute.xlu1 %9638  ;;  %v11898_v23 = vpop.permute.xlu0 %9633  ;;  %8766 = vmatmul.msk.f32.gmra.mxu2 %vm279_vm0, %v311_v20 }
  0xb8   :  { %1449 = vmatpush.msrb.mxu2 %v1408_v10  ;;  %v1405_v10 = vld [vmem:[%s19716_s3] sm:$0xff] }
  0xba   :  { %1450 = vmatpush.msrb.mxu2 %v1407_v0 }
  0xbc   :  { %1172 = vrot.lane.b32.xlu2 %v11909_v21, %s11251_s20  ;;  %1451 = vmatpush.msrb.mxu2 %v1406_v1  ;;  %v9515_v1 = vunpack.i.l.bf16 %v11716_v52 }
  0xbd   :  { %1170 = vrot.lane.b32.xlu1 %v11917_v22, %s11251_s20  ;;  %1168 = vrot.lane.b32.xlu0 %v11645_v7, %s11251_s20 }
  0xbe   :  { %v11932_v31 = vpop.permute.xlu2 %9703  ;;  %1452 = vmatpush.msrb.mxu2 %v1405_v10  ;;  %v596_v10 = vld [vmem:[%s19713_s0] sm:$0xff] }
  0xbf   :  { %19896 = vst [vmem:[#allocation11_spill] sm:$0xff] %v11932_v31  ;;  %v11934_v20 = vpop.permute.xlu1 %9653  ;;  %v11936_v8 = vpop.permute.xlu0 %9648 }
  0xc4   :  { %1210 = vrot.lane.b32.xlu2 %v11426_v27, %s11252_s25 }
  0xc5   :  { %1208 = vrot.lane.b32.xlu1 %v11445_v30, %s11252_s25  ;;  %1206 = vrot.lane.b32.xlu0 %v11440_v29, %s11252_s25 }
  0xc6   :  { %v11947_v7 = vpop.permute.xlu2 %1080 }
  0xc7   :  { %19897 = vst [vmem:[#allocation12_spill] sm:$0xff] %v11947_v7  ;;  %v11949_v0 = vpop.permute.xlu1 %9668  ;;  %v11951_v55 = vpop.permute.xlu0 %9663 }
  0xc8   :  { %19898 = vst [vmem:[#allocation13_spill] sm:$0xff] %v11949_v0  ;;  %v9595_v0 = vunpack.i.l.bf16 %v11815_v62 }
  0xc9   :  { %19899 = vst [vmem:[#allocation14_spill] sm:$0xff] %v11951_v55  ;;  %v9675_v55 = vunpack.i.l.bf16 %v11866_v11 }
  0xcc   :  { %1216 = vrot.lane.b32.xlu2 %v11497_v41, %s11252_s25  ;;  %v1254_v41 = vsel %vm49_vm1, %v596_v10, %v9515_v1  ;;  %v9516_v1 = vunpack.i.h.bf16 %v11716_v52  ;;  %v47_v52 = vld [vmem:[%s19718_s5 + $0x8] sm:$0xff] }
  0xcd   :  { %1214 = vrot.lane.b32.xlu1 %v11492_v40, %s11252_s25  ;;  %1212 = vrot.lane.b32.xlu0 %v11435_v28, %s11252_s25  ;;  %v9555_v28 = vunpack.i.l.bf16 %v11692_v33 }
  0xce   :  { %v11959_v27 = vpop.permute.xlu2 %1086 }
  0xcf   :  { %v11961_v30 = vpop.permute.xlu1 %9683  ;;  %v11963_v29 = vpop.permute.xlu0 %9678 }
  0xd4   :  { %1222 = vrot.lane.b32.xlu2 %v11468_v36, %s11252_s25  ;;  %v9635_v36 = vunpack.i.l.bf16 %v11898_v23 }
  0xd5   :  { %1220 = vrot.lane.b32.xlu1 %v11487_v39, %s11252_s25  ;;  %1218 = vrot.lane.b32.xlu0 %v11482_v38, %s11252_s25  ;;  %v48_v39 = vld [vmem:[%s19718_s5 + $0x10] sm:$0xf]  ;;  %v1271_v38 = vsel %vm1270_vm2, %v1254_v41, %v9555_v28  ;;  %v9596_v41 = vunpack.i.h.bf16 %v11815_v62 }
  0xd6   :  { %v11976_v40 = vpop.permute.xlu2 %1092  ;;  %9487 = vmatpush.msk.msra.mxu3 %vm98_vm3, %v48_v39  ;;  %v1288_v10 = vsel %vm1287_vm4, %v1271_v38, %v9595_v0  ;;  %8734 = vmatpush.msk.msra.mxu0 %vm98_vm3, %v48_v39  ;;  %v9556_v0 = vunpack.i.h.bf16 %v11692_v33  ;;  %v46_v39 = vld [vmem:[%s19718_s5] sm:$0xff]  ;;  %v39_v33 = vld [vmem:[%s19715_s2 + $0x48] sm:$0xff]  ;;  %v9636_v38 = vunpack.i.h.bf16 %v11898_v23 }
  0xd7   :  { %19900 = vst [vmem:[#allocation15_spill] sm:$0xff] %v11976_v40  ;;  %v11980_v34 = vpop.permute.xlu1 %9698  ;;  %v11982_v31 = vpop.permute.xlu0 %9693  ;;  %v1304_v18 = vsel %vm279_vm0, %v1288_v10, %v9635_v36  ;;  %v9520_v10 = vunpack.i.l.bf16 %v11740_v24 }
  0xd8   :  { %9488 = vmatpush.msra.mxu3 %v47_v52  ;;  %116 = vmatpush.msra.mxu0 %v47_v52  ;;  %v9560_v52 = vunpack.i.l.bf16 %v11775_v14 }
  0xda   :  { %9489 = vmatpush.msra.mxu3 %v46_v39  ;;  %117 = vmatpush.msra.mxu0 %v46_v39  ;;  %v1256_v39 = vsel %vm49_vm1, %v11521_v47, %v9520_v10  ;;  %v8903_v47 = vld [vmem:[%s19713_s0 + $0x121] sm:$0xff]  ;;  %v9561_v10 = vunpack.i.h.bf16 %v11775_v14 }
  0xdb   :  { %8744 = vmatmul.msk.f32.vlgmr.msra.gmra.mxu3 %vm49_vm1, %v39_v33  ;;  %v9600_v33 = vunpack.i.l.bf16 %v11755_v32 }
  0xdc   :  { %1228 = vrot.lane.b32.xlu2 %v11536_v50, %s11252_s25  ;;  %v1255_v50 = vsel %vm49_vm1, %v597_v4, %v9516_v1  ;;  %v9676_v4 = vunpack.i.h.bf16 %v11866_v11 }
  0xdd   :  { %1226 = vrot.lane.b32.xlu1 %v11531_v49, %s11252_s25  ;;  %1224 = vrot.lane.b32.xlu0 %v11477_v37, %s11252_s25  ;;  %v1321_v37 = vsel %vm1320_vm5, %v1304_v18, %v9675_v55  ;;  %v12027_v18 = vld [vmem:[%s19713_s0 + $0xda] sm:$0xff]  ;;  %v1272_v55 = vsel %vm1270_vm2, %v1255_v50, %v9556_v0 }
  0xde   :  { %v12006_v28 = vpop.permute.xlu2 %1098  ;;  %v1289_v1 = vsel %vm1287_vm4, %v1272_v55, %v9596_v41  ;;  %v12067_v55 = vld [vmem:[%s19713_s0 + $0xe2] sm:$0xff] }
  0xdf   :  { %v12010_v36 = vpop.permute.xlu1 %1078  ;;  %v12012_v49 = vpop.permute.xlu0 %9708  ;;  %v1305_v23 = vsel %vm279_vm0, %v1289_v1, %v9636_v38  ;;  %v1273_v38 = vsel %vm1270_vm2, %v1256_v39, %v9560_v52  ;;  %v8904_v1 = vld [vmem:[%s19713_s0 + $0x129] sm:$0xff]  ;;  %v8902_v52 = vld [vmem:[%s19713_s0 + $0x111] sm:$0xff] }
  0xe0   :  { %19901 = vst [vmem:[#allocation16_spill] sm:$0xff] %v12010_v36  ;;  %v1338_v62 = vsel %vm1337_vm6, %v1321_v37, %v12010_v36  ;;  %v1322_v41 = vsel %vm1320_vm5, %v1305_v23, %v9676_v4  ;;  %v40_v37 = vld [vmem:[%s19715_s2 + $0x50] sm:$0xff]  ;;  %v1290_v4 = vsel %vm1287_vm4, %v1273_v38, %v9600_v33  ;;  %v12113_v38 = vpack.i.bf16 %v8904_v1, %v8903_v47 }
  0xe1   :  { %19902 = vst [vmem:[#allocation17_spill] sm:$0xff] %v12012_v49  ;;  %1453 = vmatmul.f32.vlgmr.msrb.gmra.mxu2 %v1338_v62  ;;  %v9640_v62 = vunpack.i.l.bf16 %v11896_v12  ;;  %v12087_v23 = vld [vmem:[%s19713_s0 + $0x109] sm:$0xff]  ;;  %v9601_v49 = vunpack.i.h.bf16 %v11755_v32  ;;  %v9641_v1 = vunpack.i.h.bf16 %v11896_v12  ;;  %v9565_v32 = vunpack.i.l.bf16 %v11773_v13 }
  0xe2   :  { %19905 = vst [vmem:[#allocation20_spill] sm:$0xff] %v12087_v23 }
  0xe3   :  { %8745 = vmatmul.msk.f32.gmra.mxu3 %vm49_vm1, %v40_v37  ;;  %v12104_v37 = vld [vmem:[%s19713_s0 + $0xf9] sm:$0xff] }
  0xe4   :  { %1234 = vrot.lane.b32.xlu2 %v12027_v18, %s11252_s25  ;;  %19907 = vst [vmem:[#allocation22_spill] sm:$0xff] %v12104_v37 }
  0xe5   :  { %1232 = vrot.lane.b32.xlu1 %v11677_v25, %s11252_s25  ;;  %1230 = vrot.lane.b32.xlu0 %v11672_v17, %s11252_s25  ;;  %v1339_v25 = vsel %vm1337_vm6, %v1322_v41, %v11947_v7  ;;  %v12056_v17 = vpack.i.bf16 %v11909_v21, %v11917_v22  ;;  %v9680_v21 = vunpack.i.l.bf16 %v11963_v29  ;;  %v9521_v22 = vunpack.i.h.bf16 %v11740_v24  ;;  %v12099_v41 = vld [vmem:[%s19713_s0 + $0xf1] sm:$0xff]  ;;  %v42_v7 = vld [vmem:[%s19715_s2 + $0x60] sm:$0xff] }
  0xe6   :  { %v12042_v0 = vpop.permute.xlu2 %1104  ;;  %19906 = vst [vmem:[#allocation21_spill] sm:$0xff] %v12099_v41 }
  0xe7   :  { %19903 = vst [vmem:[#allocation18_spill] sm:$0xff] %v12042_v0  ;;  %v12044_v11 = vpop.permute.xlu1 %1084  ;;  %v12046_v50 = vpop.permute.xlu0 %1082  ;;  %v12122_v0 = vpack.i.bf16 %v8902_v52, %v12087_v23  ;;  %v9605_v52 = vunpack.i.l.bf16 %v11842_v61  ;;  %v9645_v23 = vunpack.i.l.bf16 %v11813_v2 }
  0xe8   :  { %19904 = vst [vmem:[#allocation19_spill] sm:$0xff] %v12046_v50 }
  0xe9   :  { %1456 = vmatmul.f32.gmra.mxu2 %v1339_v25 }
  0xec   :  { %9718 = vrot.lane.b32.xlu2 %v12056_v17, %s11245_s21 }
  0xed   :  { %9713 = vrot.lane.b32.xlu1 %v11649_v16, %s11245_s21  ;;  %1236 = vrot.lane.b32.xlu0 %v12067_v55, %s11252_s25  ;;  %v1306_v16 = vsel %vm279_vm0, %v1290_v4, %v9640_v62  ;;  %v41_v62 = vld [vmem:[%s19715_s2 + $0x58] sm:$0xff]  ;;  %v1257_v4 = vsel %vm49_vm1, %v11526_v48, %v9521_v22  ;;  %v9681_v48 = vunpack.i.h.bf16 %v11963_v29  ;;  %v8909_v22 = vld [vmem:[%s19713_s0 + $0x169] sm:$0xff] }
  0xee   :  { %v12090_v24 = vpop.permute.xlu2 %1142  ;;  %v1323_v39 = vsel %vm1320_vm5, %v1306_v16, %v9680_v21  ;;  %v12126_v21 = vpack.i.bf16 %v12104_v37, %v12099_v41  ;;  %8746 = vmatmul.msk.f32.gmra.mxu3 %vm49_vm1, %v41_v62  ;;  %v1274_v47 = vsel %vm1270_vm2, %v1257_v4, %v9561_v10  ;;  %v9525_v16 = vunpack.i.l.bf16 %v11714_v51  ;;  %v8910_v29 = vld [vmem:[%s19713_s0 + $0x171] sm:$0xff]  ;;  %v8908_v62 = vld [vmem:[%s19713_s0 + $0x159] sm:$0xff]  ;;  %v8906_v4 = vld [vmem:[%s19713_s0 + $0x141] sm:$0xff] }
  0xef   :  { %v12106_v25 = vpop.permute.xlu1 %1090  ;;  %v12108_v14 = vpop.permute.xlu0 %1088  ;;  %v1340_v33 = vsel %vm1337_vm6, %v1323_v39, %v12046_v50  ;;  %v1291_v12 = vsel %vm1287_vm4, %v1274_v47, %v9601_v49  ;;  %v8907_v10 = vld [vmem:[%s19713_s0 + $0x151] sm:$0xff]  ;;  %v8905_v49 = vld [vmem:[%s19713_s0 + $0x139] sm:$0xff]  ;;  %v12174_v50 = vpack.i.bf16 %v8910_v29, %v8909_v22 }
  0xf0   :  { %19908 = vst [vmem:[#allocation23_spill] sm:$0xff] %v12106_v25  ;;  %v1258_v47 = vsel %vm49_vm1, %v11509_v45, %v9525_v16  ;;  %v9685_v45 = vunpack.i.l.bf16 %v11961_v30  ;;  %v12180_v16 = vpack.i.bf16 %v8908_v62, %v8907_v10  ;;  %v12182_v36 = vpack.i.bf16 %v8906_v4, %v8905_v49  ;;  %v1435_v22 = vld [vmem:[%s19716_s3 + $0xf0] sm:$0xff] }
  0xf1   :  { %1459 = vmatmul.f32.gmra.mxu2 %v1340_v33  ;;  %v1307_v33 = vsel %vm279_vm0, %v1291_v12, %v9641_v1  ;;  %v1275_v12 = vsel %vm1270_vm2, %v1258_v47, %v9565_v32  ;;  %v1436_v32 = vld [vmem:[%s19716_s3 + $0xf8] sm:$0xff] }
  0xf2   :  { %v1324_v1 = vsel %vm1320_vm5, %v1307_v33, %v9681_v48  ;;  %v1292_v48 = vsel %vm1287_vm4, %v1275_v12, %v9605_v52  ;;  %1502 = vmatpush.msrb.mxu3 %v1436_v32  ;;  %v8915_v52 = vld [vmem:[%s19713_s0 + $0xf2] sm:$0xff]  ;;  %v9566_v33 = vunpack.i.h.bf16 %v11773_v13  ;;  %v1433_v12 = vld [vmem:[%s19716_s3 + $0xe0] sm:$0xff]  ;;  %v43_v13 = vld [vmem:[%s19715_s2 + $0x68] sm:$0xff] }
  0xf3   :  { %v1308_v29 = vsel %vm279_vm0, %v1292_v48, %v9645_v23  ;;  %v1434_v23 = vld [vmem:[%s19716_s3 + $0xe8] sm:$0xff]  ;;  %v1432_v48 = vld [vmem:[%s19716_s3 + $0xd8] sm:$0xff] }
  0xf4   :  { %9733 = vrot.lane.b32.xlu2 %v12113_v38, %s11245_s21  ;;  %1503 = vmatpush.msrb.mxu3 %v1435_v22  ;;  %v1325_v10 = vsel %vm1320_vm5, %v1308_v29, %v9685_v45  ;;  %v12232_v45 = vpack.i.bf16 %v12067_v55, %v12027_v18  ;;  %v9646_v22 = vunpack.i.h.bf16 %v11813_v2  ;;  %v9530_v29 = vunpack.i.l.bf16 %v11738_v19  ;;  %v1431_v18 = vld [vmem:[%s19716_s3 + $0xd0] sm:$0xff]  ;;  %v8921_v2 = vld [vmem:[%s19713_s0 + $0x13a] sm:$0xff]  ;;  %v8922_v55 = vld [vmem:[%s19713_s0 + $0x142] sm:$0xff] }
  0xf5   :  { %9728 = vrot.lane.b32.xlu1 %v12122_v0, %s11245_s21  ;;  %9723 = vrot.lane.b32.xlu0 %v12126_v21, %s11245_s21  ;;  %v1342_v47 = vsel %vm1337_vm6, %v1325_v10, %v11959_v27  ;;  %v1430_v10 = vld [vmem:[%s19716_s3 + $0xc8] sm:$0xff] }
  0xf6   :  { %v12151_v39 = vpop.permute.xlu2 %1148  ;;  %8747 = vmatmul.msk.f32.gmra.mxu3 %vm49_vm1, %v42_v7  ;;  %v9526_v7 = vunpack.i.h.bf16 %v11714_v51  ;;  %v9606_v51 = vunpack.i.h.bf16 %v11842_v61 }
  0xf7   :  { %19909 = vst [vmem:[#allocation24_spill] sm:$0xff] %v12151_v39  ;;  %v12165_v41 = vpop.permute.xlu1 %1096  ;;  %v12167_v37 = vpop.permute.xlu0 %1094  ;;  %v1341_v39 = vsel %vm1337_vm6, %v1324_v1, %v12044_v11  ;;  %1504 = vmatpush.msrb.mxu3 %v1434_v23 }
  0xf8   :  { %19910 = vst [vmem:[#allocation25_spill] sm:$0xff] %v12167_v37  ;;  %v1259_v61 = vsel %vm49_vm1, %v11516_v46, %v9526_v7  ;;  %v9686_v46 = vunpack.i.h.bf16 %v11961_v30  ;;  %v8919_v30 = vld [vmem:[%s19713_s0 + $0x122] sm:$0xff] }
  0xf9   :  { %1462 = vmatmul.f32.gmra.mxu2 %v1341_v39  ;;  %v8916_v39 = vld [vmem:[%s19713_s0 + $0xfa] sm:$0xff]  ;;  %1505 = vmatpush.msrb.mxu3 %v1433_v12  ;;  %v1276_v32 = vsel %vm1270_vm2, %v1259_v61, %v9566_v33  ;;  %v1260_v12 = vsel %vm49_vm1, %v11570_v58, %v9530_v29  ;;  %v44_v29 = vld [vmem:[%s19715_s2 + $0x70] sm:$0xff] }
  0xfa   :  { %v12220_v1 = vpack.i.bf16 %v8916_v39, %v8915_v52  ;;  %v1293_v52 = vsel %vm1287_vm4, %v1276_v32, %v9606_v51  ;;  %v9570_v39 = vunpack.i.l.bf16 %v11712_v44  ;;  %v8920_v51 = vld [vmem:[%s19713_s0 + $0x12a] sm:$0xff]  ;;  %v1429_v58 = vld [vmem:[%s19716_s3 + $0xc0] sm:$0xff] }
  0xfb   :  { %1506 = vmatpush.msrb.mxu3 %v1432_v48  ;;  %v1309_v33 = vsel %vm279_vm0, %v1293_v52, %v9646_v22  ;;  %v9650_v22 = vunpack.i.l.bf16 %v11936_v8 }
  0xfc   :  { %9748 = vrot.lane.b32.xlu2 %v12174_v50, %s11245_s21  ;;  %v1326_v32 = vsel %vm1320_vm5, %v1309_v33, %v9686_v46 }
  0xfd   :  { %9743 = vrot.lane.b32.xlu1 %v12180_v16, %s11245_s21  ;;  %9738 = vrot.lane.b32.xlu0 %v12182_v36, %s11245_s21  ;;  %v1343_v52 = vsel %vm1337_vm6, %v1326_v32, %v12108_v14  ;;  %v8923_v32 = vld [vmem:[%s19713_s0 + $0x152] sm:$0xff] }
  0xfe   :  { %v12211_v62 = vpop.permute.xlu2 %1154  ;;  %8748 = vmatmul.msk.f32.gmra.mxu3 %vm49_vm1, %v43_v13  ;;  %v9610_v13 = vunpack.i.l.bf16 %v11840_v43 }
  0xff   :  { %19911 = vst [vmem:[#allocation26_spill] sm:$0xff] %v12211_v62  ;;  %v12214_v49 = vpop.permute.xlu1 %1102  ;;  %v12216_v4 = vpop.permute.xlu0 %1100  ;;  %1507 = vmatpush.msrb.mxu3 %v1431_v18  ;;  %v12300_v18 = vpack.i.bf16 %v8920_v51, %v8919_v30  ;;  %v1427_v30 = vld [vmem:[%s19716_s3 + $0xb0] sm:$0xff]  ;;  %v9616_v62 = vunpack.i.h.bf16 %v11771_v6 }
 0x101   :  { %1465 = vmatmul.f32.gmra.mxu2 %v1342_v47  ;;  %v8918_v47 = vld [vmem:[%s19713_s0 + $0x112] sm:$0xff]  ;;  %1508 = vmatpush.msrb.mxu3 %v1430_v10  ;;  %v9690_v10 = vunpack.i.l.bf16 %v11894_v54 }
 0x102   :  { %v411_v7 = vpop.f32.mrf.mxu2 }
 0x103   :  { %444 = vst.msk [vmem:[%s19720_s7 + $0x40] sm:$0xff] %vm435_vm7, %v411_v7  ;;  %v1428_v7 = vld [vmem:[%s19716_s3 + $0xb8] sm:$0xff]  ;;  %1509 = vmatpush.msrb.mxu3 %v1429_v58 }
 0x104   :  { %9763 = vrot.lane.b32.xlu2 %v12220_v1, %s11246_s26 }
 0x105   :  { %9758 = vrot.lane.b32.xlu1 %v12232_v45, %s11246_s26  ;;  %9753 = vrot.lane.b32.xlu0 %v11681_v26, %s11246_s26  ;;  %v8917_v26 = vld [vmem:[%s19713_s0 + $0x10a] sm:$0xff] }
 0x106   :  { %v12265_v23 = vpop.permute.xlu2 %1160  ;;  %v12302_v46 = vpack.i.bf16 %v8918_v47, %v8917_v26  ;;  %8749 = vmatmul.msk.f32.gmra.mxu3 %vm49_vm1, %v44_v29  ;;  %v1426_v26 = vld [vmem:[%s19716_s3 + $0xa8] sm:$0xff]  ;;  %v9571_v47 = vunpack.i.h.bf16 %v11712_v44 }
 0x107   :  { %19912 = vst [vmem:[#allocation27_spill] sm:$0xff] %v12265_v23  ;;  %v12284_v61 = vpop.permute.xlu1 %1108  ;;  %v12286_v48 = vpop.permute.xlu0 %1106  ;;  %v12292_v23 = vpack.i.bf16 %v8922_v55, %v8921_v2  ;;  %v1277_v2 = vsel %vm1270_vm2, %v1260_v12, %v9570_v39  ;;  %v9531_v55 = vunpack.i.h.bf16 %v11738_v19  ;;  %1510 = vmatpush.msrb.mxu3 %v1428_v7  ;;  %v8925_v19 = vld [vmem:[%s19713_s0 + $0x16a] sm:$0xff] }
 0x108   :  { %v1294_v33 = vsel %vm1287_vm4, %v1277_v2, %v9610_v13  ;;  %v8926_v13 = vld [vmem:[%s19713_s0 + $0x172] sm:$0xff]  ;;  %v9651_v2 = vunpack.i.h.bf16 %v11936_v8 }
 0x109   :  { %1468 = vmatmul.f32.gmra.mxu2 %v1343_v52  ;;  %v1310_v51 = vsel %vm279_vm0, %v1294_v33, %v9650_v22  ;;  %v8924_v22 = vld [vmem:[%s19713_s0 + $0x15a] sm:$0xff]  ;;  %1511 = vmatpush.msrb.mxu3 %v1427_v30  ;;  %v1261_v44 = vsel %vm49_vm1, %v11575_v59, %v9531_v55  ;;  %v9611_v52 = vunpack.i.h.bf16 %v11840_v43  ;;  %v12363_v55 = vpack.i.bf16 %v8926_v13, %v8925_v19  ;;  %v12397_v13 = vld [vmem:[%s19713_s0 + $0x108] sm:$0xff] }
 0x10a   :  { %v414_v39 = vpop.f32.mrf.mxu2  ;;  %v1327_v7 = vsel %vm1320_vm5, %v1310_v51, %v9690_v10  ;;  %v1425_v59 = vld [vmem:[%s19716_s3 + $0xa0] sm:$0xff]  ;;  %v45_v43 = vld [vmem:[%s19715_s2 + $0x78] sm:$0xff]  ;;  %v12365_v10 = vpack.i.bf16 %v8924_v22, %v8923_v32  ;;  %v1423_v51 = vld [vmem:[%s19716_s3 + $0x90] sm:$0xff] }
 0x10b   :  { %445 = vst.msk [vmem:[%s19720_s7 + $0x48] sm:$0xff] %vm435_vm7, %v414_v39  ;;  %v1344_v33 = vsel %vm1337_vm6, %v1327_v7, %v12106_v25  ;;  %v9792_v39 = vpack.i.bf16 %v11783_v5, %v11788_v63  ;;  %1512 = vmatpush.msrb.mxu3 %v1426_v26  ;;  %v1424_v8 = vld [vmem:[%s19716_s3 + $0x98] sm:$0xff]  ;;  %v1278_v5 = vsel %vm1270_vm2, %v1261_v44, %v9571_v47  ;;  %v9691_v63 = vunpack.i.h.bf16 %v11894_v54  ;;  %v12382_v26 = vld [vmem:[%s19713_s0 + $0x120] sm:$0xff]  ;;  %v12387_v54 = vld [vmem:[%s19713_s0 + $0x128] sm:$0xff] }
 0x10c   :  { %9778 = vrot.lane.b32.xlu2 %v12292_v23, %s11246_s26  ;;  %v1295_v30 = vsel %vm1287_vm4, %v1278_v5, %v9611_v52  ;;  %v9535_v47 = vunpack.i.l.bf16 %v11662_v3  ;;  %v1422_v22 = vld [vmem:[%s19716_s3 + $0x88] sm:$0xff]  ;;  %v9575_v44 = vunpack.i.l.bf16 %v11801_v60  ;;  %v12408_v7 = vld [vmem:[%s19713_s0 + $0x110] sm:$0xff]  ;;  %v9807_v5 = vpack.i.bf16 %v12387_v54, %v12382_v26 }
 0x10d   :  { %9773 = vrot.lane.b32.xlu1 %v12300_v18, %s11246_s26  ;;  %9768 = vrot.lane.b32.xlu0 %v12302_v46, %s11246_s26  ;;  %v1311_v19 = vsel %vm279_vm0, %v1295_v30, %v9651_v2  ;;  %v12413_v2 = vld [vmem:[%s19713_s0 + $0xf0] sm:$0xff]  ;;  %v1421_v30 = vld [vmem:[%s19716_s3 + $0x80] sm:$0xff] }
 0x10e   :  { %v12329_v12 = vpop.permute.xlu2 %1166  ;;  %1513 = vmatpush.msrb.mxu3 %v1425_v59 }
 0x10f   :  { %19913 = vst [vmem:[#allocation28_spill] sm:$0xff] %v12329_v12  ;;  %v12347_v58 = vpop.permute.xlu1 %1146  ;;  %v12349_v29 = vpop.permute.xlu0 %1144  ;;  %8750 = vmatmul.msk.f32.gmra.mxu3 %vm49_vm1, %v45_v43  ;;  %v1328_v43 = vsel %vm1320_vm5, %v1311_v19, %v9691_v63  ;;  %v9802_v63 = vpack.i.bf16 %v12408_v7, %v12397_v13 }
 0x110   :  { %1514 = vmatpush.msrb.mxu3 %v1424_v8  ;;  %v1345_v8 = vsel %vm1337_vm6, %v1328_v43, %v11976_v40 }
 0x111   :  { %1471 = vmatmul.f32.gmra.mxu2 %v1344_v33  ;;  %v12418_v33 = vld [vmem:[%s19713_s0 + $0xf8] sm:$0xff] }
 0x112   :  { %v417_v32 = vpop.f32.mrf.mxu2  ;;  %1515 = vmatpush.msrb.mxu3 %v1423_v51  ;;  %v1262_v51 = vsel %vm49_vm1, %v11560_v56, %v9535_v47  ;;  %v9797_v19 = vpack.i.bf16 %v12418_v33, %v12413_v2  ;;  %v12450_v56 = vld [vmem:[%s19713_s0 + $0x168] sm:$0xff]  ;;  %v9536_v47 = vunpack.i.h.bf16 %v11662_v3 }
 0x113   :  { %446 = vst.msk [vmem:[%s19720_s7 + $0x50] sm:$0xff] %vm435_vm7, %v417_v32  ;;  %v9615_v32 = vunpack.i.l.bf16 %v11771_v6  ;;  %v1279_v43 = vsel %vm1270_vm2, %v1262_v51, %v9575_v44  ;;  %v9576_v51 = vunpack.i.h.bf16 %v11801_v60 }
 0x114   :  { %9793 = vrot.lane.b32.xlu2 %v9792_v39, %s11247_s24  ;;  %1516 = vmatpush.msrb.mxu3 %v1422_v22  ;;  %v9655_v22 = vunpack.i.l.bf16 %v11934_v20  ;;  %v1263_v25 = vsel %vm49_vm1, %v11565_v57, %v9536_v47 }
 0x115   :  { %9788 = vrot.lane.b32.xlu1 %v12363_v55, %s11246_s26  ;;  %9783 = vrot.lane.b32.xlu0 %v12365_v10, %s11246_s26  ;;  %v1296_v44 = vsel %vm1287_vm4, %v1279_v43, %v9615_v32  ;;  %v12473_v32 = vld [vmem:[%s19713_s0 + $0x158] sm:$0xff]  ;;  %v12483_v43 = vld [vmem:[%s19713_s0 + $0x140] sm:$0xff] }
 0x116   :  { %v12403_v52 = vpop.permute.xlu2 %1172  ;;  %1517 = vmatpush.msrb.mxu3 %v1421_v30 }
 0x117   :  { %19914 = vst [vmem:[#allocation29_spill] sm:$0xff] %v12403_v52  ;;  %v12424_v39 = vpop.permute.xlu1 %1152  ;;  %v12426_v59 = vpop.permute.xlu0 %1150  ;;  %v9695_v52 = vunpack.i.l.bf16 %v11982_v31 }
 0x119   :  { %1474 = vmatmul.f32.gmra.mxu2 %v1345_v8  ;;  %v12459_v8 = vld [vmem:[%s19713_s0 + $0x170] sm:$0xff] }
 0x11a   :  { %v420_v30 = vpop.f32.mrf.mxu2  ;;  %v9822_v40 = vpack.i.bf16 %v12459_v8, %v12450_v56 }
 0x11b   :  { %447 = vst.msk [vmem:[%s19720_s7 + $0x58] sm:$0xff] %vm435_vm7, %v420_v30 }
 0x11c   :  { %9808 = vrot.lane.b32.xlu2 %v9807_v5, %s11247_s24  ;;  %v12464_v5 = vld [vmem:[%s19713_s0 + $0x150] sm:$0xff] }
 0x11d   :  { %9803 = vrot.lane.b32.xlu1 %v9802_v63, %s11247_s24  ;;  %9798 = vrot.lane.b32.xlu0 %v9797_v19, %s11247_s24  ;;  %v1312_v63 = vsel %vm279_vm0, %v1296_v44, %v9655_v22  ;;  %v12478_v19 = vld [vmem:[%s19713_s0 + $0x138] sm:$0xff]  ;;  %v9817_v30 = vpack.i.bf16 %v12473_v32, %v12464_v5 }
 0x11e   :  { %v12467_v3 = vpop.permute.xlu2 %1210  ;;  %v1329_v44 = vsel %vm1320_vm5, %v1312_v63, %v9695_v52  ;;  %v1280_v52 = vsel %vm1270_vm2, %v1263_v25, %v9576_v51  ;;  %v9656_v63 = vunpack.i.h.bf16 %v11934_v20  ;;  %v12525_v20 = vld [vmem:[%s19713_s0 + $0x188] sm:$0xff] }
 0x11f   :  { %v12489_v60 = vpop.permute.xlu1 %1158  ;;  %v12491_v22 = vpop.permute.xlu0 %1156  ;;  %v1346_v12 = vsel %vm1337_vm6, %v1329_v44, %v12167_v37  ;;  %v9696_v44 = vunpack.i.h.bf16 %v11982_v31  ;;  %v9540_v37 = vunpack.i.l.bf16 %v11667_v15  ;;  %v1297_v57 = vsel %vm1287_vm4, %v1280_v52, %v9616_v62  ;;  %v12520_v31 = vld [vmem:[%s19713_s0 + $0x180] sm:$0xff]  ;;  %v11144_v52 = vld [vmem:[%s19713_s0 + $0x78] sm:$0xff] }
 0x120   :  { %19915 = vst [vmem:[#allocation30_spill] sm:$0xff] %v12489_v60  ;;  %v9812_v60 = vpack.i.bf16 %v12483_v43, %v12478_v19  ;;  %v1313_v25 = vsel %vm279_vm0, %v1297_v57, %v9656_v63  ;;  %v9827_v57 = vpack.i.bf16 %v12525_v20, %v12520_v31 }
 0x121   :  { %1477 = vmatmul.f32.gmra.mxu2 %v1346_v12  ;;  %v9580_v12 = vunpack.i.l.bf16 %v11799_v53  ;;  %v1264_v63 = vsel %vm49_vm1, %v11144_v52, %v9540_v37 }
 0x122   :  { %v423_v6 = vpop.f32.mrf.mxu2 }
 0x123   :  { %448 = vst.msk [vmem:[%s19720_s7 + $0x60] sm:$0xff] %vm435_vm7, %v423_v6  ;;  %v1281_v6 = vsel %vm1270_vm2, %v1264_v63, %v9580_v12  ;;  %v9545_v63 = vunpack.i.l.bf16 %v11759_v35 }
 0x124   :  { %9823 = vrot.lane.b32.xlu2 %v9822_v40, %s11247_s24  ;;  %v9620_v40 = vunpack.i.l.bf16 %v11870_v9 }
 0x125   :  { %9818 = vrot.lane.b32.xlu1 %v9817_v30, %s11247_s24  ;;  %9813 = vrot.lane.b32.xlu0 %v9812_v60, %s11247_s24  ;;  %v1330_v60 = vsel %vm1320_vm5, %v1313_v25, %v9696_v44  ;;  %v9541_v25 = vunpack.i.h.bf16 %v11667_v15 }
 0x126   :  { %v12514_v47 = vpop.permute.xlu2 %1216  ;;  %v1347_v30 = vsel %vm1337_vm6, %v1330_v60, %v12165_v41  ;;  %v1298_v44 = vsel %vm1287_vm4, %v1281_v6, %v9620_v40  ;;  %v9581_v60 = vunpack.i.h.bf16 %v11799_v53  ;;  %v9701_v6 = vunpack.i.h.bf16 %v11980_v34 }
 0x127   :  { %v12532_v62 = vpop.permute.xlu1 %1164  ;;  %v12534_v51 = vpop.permute.xlu0 %1162 }
 0x128   :  { %19916 = vst [vmem:[#allocation31_spill] sm:$0xff] %v12532_v62  ;;  %v9660_v62 = vunpack.i.l.bf16 %v11838_v42 }
 0x129   :  { %19917 = vst [vmem:[#allocation32_spill] sm:$0xff] %v12534_v51  ;;  %1480 = vmatmul.f32.gmra.mxu2 %v1347_v30  ;;  %v9700_v51 = vunpack.i.l.bf16 %v11980_v34  ;;  %v12594_v34 = vld [vmem:[%s19713_s0 + $0x189] sm:$0xff] }
 0x12a   :  { %v426_v37 = vpop.f32.mrf.mxu2  ;;  %v1314_v30 = vsel %vm279_vm0, %v1298_v44, %v9660_v62  ;;  %v11145_v62 = vld [vmem:[%s19713_s0 + $0x80] sm:$0xff] }
 0x12b   :  { %449 = vst.msk [vmem:[%s19720_s7 + $0x68] sm:$0xff] %vm435_vm7, %v426_v37  ;;  %v1265_v52 = vsel %vm49_vm1, %v11145_v62, %v9541_v25  ;;  %v12589_v44 = vld [vmem:[%s19713_s0 + $0x181] sm:$0xff] }
 0x12c   :  { %9838 = vrot.lane.b32.xlu2 %v12126_v21, %s11248_s11  ;;  %v9621_v21 = vunpack.i.h.bf16 %v11870_v9  ;;  %v1282_v9 = vsel %vm1270_vm2, %v1265_v52, %v9581_v60 }
 0x12d   :  { %9833 = vrot.lane.b32.xlu1 %v12056_v17, %s11248_s11  ;;  %9828 = vrot.lane.b32.xlu0 %v9827_v57, %s11247_s24  ;;  %v1331_v17 = vsel %vm1320_vm5, %v1314_v30, %v9700_v51  ;;  %v9661_v57 = vunpack.i.h.bf16 %v11838_v42  ;;  %v19919_v42 = vld [vmem:[#allocation6_spill] sm:$0xff] }
 0x12e   :  { %v12556_v12 = vpop.permute.xlu2 %1222  ;;  %v1348_v53 = vsel %vm1337_vm6, %v1331_v17, %v12006_v28  ;;  %v1299_v51 = vsel %vm1287_vm4, %v1282_v9, %v9621_v21  ;;  %v9585_v25 = vunpack.i.l.bf16 %v19919_v42  ;;  %v19920_v30 = vld [vmem:[#allocation10_spill] sm:$0xff]  ;;  %v19921_v17 = vld [vmem:[#allocation16_spill] sm:$0xff] }
 0x12f   :  { %v12564_v15 = vpop.permute.xlu1 %1170  ;;  %v12566_v40 = vpop.permute.xlu0 %1168  ;;  %v9625_v21 = vunpack.i.l.bf16 %v19920_v30 }
 0x130   :  { %19918 = vst [vmem:[#allocation33_spill] sm:$0xff] %v12564_v15 }
 0x131   :  { %1483 = vmatmul.f32.gmra.mxu2 %v1348_v53  ;;  %v1355_v53 = vsel %vm1354_vm8, %v19921_v17, %v12090_v24  ;;  %v9867_v24 = vpack.i.bf16 %v12594_v34, %v12589_v44  ;;  %v19923_v17 = vld [vmem:[#allocation11_spill] sm:$0xff] }
 0x132   :  { %v429_v60 = vpop.f32.mrf.mxu2  ;;  %v9705_v15 = vunpack.i.l.bf16 %v19923_v17 }
 0x133   :  { %450 = vst.msk [vmem:[%s19720_s7 + $0x70] sm:$0xff] %vm435_vm7, %v429_v60 }
 0x134   :  { %9853 = vrot.lane.b32.xlu2 %v12182_v36, %s11248_s11  ;;  %v11146_v36 = vld [vmem:[%s19713_s0 + $0x90] sm:$0xff] }
 0x135   :  { %9848 = vrot.lane.b32.xlu1 %v12113_v38, %s11248_s11  ;;  %9843 = vrot.lane.b32.xlu0 %v12122_v0, %s11248_s11  ;;  %v1266_v38 = vsel %vm49_vm1, %v11146_v36, %v9545_v63  ;;  %v1315_v0 = vsel %vm279_vm0, %v1299_v51, %v9661_v57  ;;  %v19922_v63 = vld [vmem:[#allocation14_spill] sm:$0xff] }
 0x136   :  { %v12601_v37 = vpop.permute.xlu2 %1228  ;;  %v1332_v9 = vsel %vm1320_vm5, %v1315_v0, %v9701_v6  ;;  %v9665_v57 = vunpack.i.l.bf16 %v19922_v63  ;;  %v1283_v6 = vsel %vm1270_vm2, %v1266_v38, %v9585_v25  ;;  %v9546_v0 = vunpack.i.h.bf16 %v11759_v35  ;;  %v11147_v35 = vld [vmem:[%s19713_s0 + $0x98] sm:$0xff] }
 0x137   :  { %v1209_v62 = vpop.permute.xlu1 %1208  ;;  %v1207_v52 = vpop.permute.xlu0 %1206  ;;  %v1349_v36 = vsel %vm1337_vm6, %v1332_v9, %v12216_v4  ;;  %v1300_v60 = vsel %vm1287_vm4, %v1283_v6, %v9625_v21  ;;  %v9626_v21 = vunpack.i.h.bf16 %v19920_v30  ;;  %v9706_v6 = vunpack.i.h.bf16 %v19923_v17  ;;  %v19927_v17 = vld [vmem:[#allocation19_spill] sm:$0xff] }
 0x138   :  { %v1372_v51 = vsel %vm1371_vm10, %v1355_v53, %v1207_v52  ;;  %v1316_v53 = vsel %vm279_vm0, %v1300_v60, %v9665_v57  ;;  %v9586_v52 = vunpack.i.h.bf16 %v19919_v42  ;;  %v1267_v38 = vsel %vm49_vm1, %v11147_v35, %v9546_v0  ;;  %v19924_v57 = vld [vmem:[#allocation12_spill] sm:$0xff] }
 0x139   :  { %1486 = vmatmul.f32.gmra.mxu2 %v1349_v36  ;;  %8863 = vmatmul.msk.f32.vlgmr.msrb.gmra.mxu3 %vm1388_vm9, %v1372_v51  ;;  %v1333_v42 = vsel %vm1320_vm5, %v1316_v53, %v9705_v15  ;;  %v9666_v36 = vunpack.i.h.bf16 %v19922_v63  ;;  %v19925_v63 = vld [vmem:[#allocation7_spill] sm:$0xff] }
 0x13a   :  { %v432_v25 = vpop.f32.mrf.mxu2  ;;  %v9550_v60 = vunpack.i.l.bf16 %v19925_v63 }
 0x13b   :  { %451 = vst.msk [vmem:[%s19720_s7 + $0x78] sm:$0xff] %vm435_vm7, %v432_v25  ;;  %v1357_v25 = vsel %vm1354_vm8, %v19927_v17, %v12347_v58 }
 0x13c   :  { %9868 = vrot.lane.b32.xlu2 %v9867_v24, %s11248_s11  ;;  %v1350_v24 = vsel %vm1337_vm6, %v1333_v42, %v12214_v49  ;;  %v19929_v42 = vld [vmem:[#allocation8_spill] sm:$0xff] }
 0x13d   :  { %9863 = vrot.lane.b32.xlu1 %v12174_v50, %s11248_s11  ;;  %9858 = vrot.lane.b32.xlu0 %v12180_v16, %s11248_s11  ;;  %v1356_v50 = vsel %vm1354_vm8, %v19924_v57, %v12349_v29  ;;  %v1284_v29 = vsel %vm1270_vm2, %v1267_v38, %v9586_v52  ;;  %v11148_v57 = vld [vmem:[%s19713_s0 + $0xa8] sm:$0xff]  ;;  %v9630_v58 = vunpack.i.l.bf16 %v19929_v42 }
 0x13e   :  { %v12631_v9 = vpop.permute.xlu2 %1234  ;;  %v1373_v30 = vsel %vm1371_vm10, %v1356_v50, %v1209_v62  ;;  %v1301_v15 = vsel %vm1287_vm4, %v1284_v29, %v9626_v21  ;;  %v19926_v62 = vld [vmem:[#allocation9_spill] sm:$0xff]  ;;  %v19928_v21 = vld [vmem:[#allocation18_spill] sm:$0xff]  ;;  %v1268_v50 = vsel %vm49_vm1, %v11148_v57, %v9550_v60 }
 0x13f   :  { %v12641_v51 = vpop.permute.xlu1 %1214  ;;  %v1213_v16 = vpop.permute.xlu0 %1212  ;;  %v1317_v0 = vsel %vm279_vm0, %v1301_v15, %v9666_v36  ;;  %v9590_v53 = vunpack.i.l.bf16 %v19926_v62  ;;  %v19931_v29 = vld [vmem:[#allocation17_spill] sm:$0xff] }
 0x140   :  { %v1334_v38 = vsel %vm1320_vm5, %v1317_v0, %v9706_v6  ;;  %v9710_v6 = vunpack.i.l.bf16 %v19931_v29  ;;  %v9591_v0 = vunpack.i.h.bf16 %v19926_v62 }
 0x141   :  { %1489 = vmatmul.f32.gmra.mxu2 %v1350_v24  ;;  %8864 = vmatmul.msk.f32.gmra.mxu3 %vm1388_vm9, %v1373_v30  ;;  %v1285_v36 = vsel %vm1270_vm2, %v1268_v50, %v9590_v53  ;;  %v19930_v24 = vld [vmem:[#allocation13_spill] sm:$0xff]  ;;  %v9631_v50 = vunpack.i.h.bf16 %v19929_v42 }
 0x142   :  { %v9670_v30 = vunpack.i.l.bf16 %v19930_v24  ;;  %v1302_v15 = vsel %vm1287_vm4, %v1285_v36, %v9630_v58  ;;  %v9671_v36 = vunpack.i.h.bf16 %v19930_v24 }
 0x144   :  { %9883 = vrot.lane.b32.xlu2 %v12302_v46, %s11249_s16  ;;  %v1318_v53 = vsel %vm279_vm0, %v1302_v15, %v9670_v30  ;;  %v9711_v30 = vunpack.i.h.bf16 %v19931_v29  ;;  %v1359_v29 = vsel %vm1354_vm8, %v11959_v27, %v12426_v59  ;;  %v1360_v59 = vsel %vm1354_vm8, %v12108_v14, %v12424_v39 }
 0x145   :  { %9878 = vrot.lane.b32.xlu1 %v12220_v1, %s11249_s16  ;;  %9873 = vrot.lane.b32.xlu0 %v12232_v45, %s11249_s16  ;;  %v1351_v1 = vsel %vm1337_vm6, %v1334_v38, %v19928_v21  ;;  %v1374_v45 = vsel %vm1371_vm10, %v1357_v25, %v12467_v3  ;;  %v9551_v3 = vunpack.i.h.bf16 %v19925_v63  ;;  %v8974_v63 = vld [vmem:[%s19713_s0 + $0x18a] sm:$0xff]  ;;  %v1335_v62 = vsel %vm1320_vm5, %v1318_v53, %v9710_v6 }
 0x146   :  { %v12665_v52 = vpop.permute.xlu2 %9718  ;;  %v1352_v38 = vsel %vm1337_vm6, %v1335_v62, %v12286_v48  ;;  %v31_v53 = vld [vmem:[%s19715_s2 + $0x8] sm:$0xff] }
 0x147   :  { %v12670_v35 = vpop.permute.xlu1 %1220  ;;  %v12672_v46 = vpop.permute.xlu0 %1218 }
 0x149   :  { %1492 = vmatmul.f32.gmra.mxu2 %v1351_v1  ;;  %8865 = vmatmul.msk.f32.gmra.mxu3 %vm1388_vm9, %v1374_v45  ;;  %v11149_v45 = vld [vmem:[%s19713_s0 + $0xb0] sm:$0xff] }
 0x14a   :  { %v1269_v57 = vsel %vm49_vm1, %v11149_v45, %v9551_v3 }
 0x14b   :  { %v1286_v58 = vsel %vm1270_vm2, %v1269_v57, %v9591_v0  ;;  %v19936_v57 = vld [vmem:[#allocation15_spill] sm:$0xff] }
 0x14c   :  { %9898 = vrot.lane.b32.xlu2 %v12365_v10, %s11249_s16  ;;  %v8973_v10 = vld [vmem:[%s19713_s0 + $0x182] sm:$0xff]  ;;  %v1303_v42 = vsel %vm1287_vm4, %v1286_v58, %v9631_v50  ;;  %v1362_v50 = vsel %vm1354_vm8, %v19936_v57, %v12491_v22 }
 0x14d   :  { %9893 = vrot.lane.b32.xlu1 %v12292_v23, %s11249_s16  ;;  %9888 = vrot.lane.b32.xlu0 %v12300_v18, %s11249_s16  ;;  %v19932_v23 = vld [vmem:[#allocation24_spill] sm:$0xff]  ;;  %v1319_v24 = vsel %vm279_vm0, %v1303_v42, %v9671_v36  ;;  %v256_v36 = vld [vmem:[%s19714_s1 + $0x48] sm:$0xff] }
 0x14e   :  { %v12697_v60 = vpop.permute.xlu2 %9733  ;;  %v1358_v18 = vsel %vm1354_vm8, %v12044_v11, %v19932_v23  ;;  %v9907_v11 = vpack.i.bf16 %v8974_v63, %v8973_v10  ;;  %v1336_v15 = vsel %vm1320_vm5, %v1319_v24, %v9711_v30  ;;  %v1377_v10 = vsel %vm1371_vm10, %v1360_v59, %v12514_v47  ;;  %v19934_v47 = vld [vmem:[#allocation26_spill] sm:$0xff]  ;;  %v19935_v63 = vld [vmem:[#allocation23_spill] sm:$0xff] }
 0x14f   :  { %v12709_v17 = vpop.permute.xlu1 %1226  ;;  %v12711_v25 = vpop.permute.xlu0 %1224  ;;  %v1375_v1 = vsel %vm1371_vm10, %v1358_v18, %v1213_v16  ;;  %v30_v16 = vld [vmem:[%s19715_s2] sm:$0xff]  ;;  %v1353_v0 = vsel %vm1337_vm6, %v1336_v15, %v12284_v61  ;;  %v1361_v23 = vsel %vm1354_vm8, %v19935_v63, %v19934_v47 }
 0x150   :  { %8735 = vmatmul.msk.f32.vlgmr.msra.gmra.mxu0 %vm49_vm1, %v30_v16  ;;  %v19938_v15 = vld [vmem:[#allocation30_spill] sm:$0xff] }
 0x151   :  { %1495 = vmatmul.f32.gmra.mxu2 %v1352_v38  ;;  %8866 = vmatmul.msk.f32.gmra.mxu3 %vm1388_vm9, %v1375_v1 }
 0x154   :  { %2083 = vrot.lane.b32.xlu2 %v12413_v2, %s11250_s22 }
 0x155   :  { %9908 = vrot.lane.b32.xlu1 %v9907_v11, %s11249_s16  ;;  %9903 = vrot.lane.b32.xlu0 %v12363_v55, %s11249_s16  ;;  %v1376_v55 = vsel %vm1371_vm10, %v1359_v29, %v12641_v51 }
 0x156   :  { %v12736_v6 = vpop.permute.xlu2 %9748 }
 0x157   :  { %19933 = vst [vmem:[#allocation6_spill] sm:$0xff] %v12736_v6  ;;  %v12742_v3 = vpop.permute.xlu0 %1230  ;;  %v12745_v2 = vpop.permute.xlu1 %1232  ;;  %v9057_v6 = vld [vmem:[%s19713_s0 + $0x1c9] sm:$0xff] }
 0x158   :  { %8736 = vmatmul.msk.f32.gmra.mxu0 %vm49_vm1, %v31_v53 }
 0x159   :  { %1498 = vmatmul.f32.gmra.mxu2 %v1353_v0  ;;  %8867 = vmatmul.msk.f32.gmra.mxu3 %vm1388_vm9, %v1376_v55  ;;  %v19939_v0 = vld [vmem:[#allocation25_spill] sm:$0xff] }
 0x15a   :  { %v1363_v55 = vsel %vm1354_vm8, %v19939_v0, %v19938_v15 }
 0x15c   :  { %2089 = vrot.lane.b32.xlu2 %v12408_v7, %s11250_s22 }
 0x15d   :  { %2087 = vrot.lane.b32.xlu1 %v12397_v13, %s11250_s22  ;;  %2085 = vrot.lane.b32.xlu0 %v12418_v33, %s11250_s22  ;;  %v32_v13 = vld [vmem:[%s19715_s2 + $0x10] sm:$0xff] }
 0x15e   :  { %v12762_v27 = vpop.permute.xlu2 %9763  ;;  %v146_v33 = vpop.f32.mrf.mxu3 }
 0x15f   :  { %v12767_v51 = vpop.permute.xlu0 %1236  ;;  %v12772_v7 = vpop.permute.xlu1 %9713  ;;  %v176_v14 = vsub.f32 0.0, %v146_v33 }
 0x160   :  { %8737 = vmatmul.msk.f32.gmra.mxu0 %vm49_vm1, %v32_v13  ;;  %v8989_v13 = vld [vmem:[%s19713_s0 + $0x198] sm:$0xff] }
 0x161   :  { %8868 = vmatmul.msk.f32.gmra.mxu3 %vm1388_vm9, %v1377_v10  ;;  %v201_v62 = vmul.f32 1.442695, %v176_v14  ;;  %v35_v10 = vld [vmem:[%s19715_s2 + $0x28] sm:$0xff] }
 0x163   :  { %11112 = vpow2.f32 %v201_v62 }
 0x164   :  { %2095 = vrot.lane.b32.xlu2 %v12478_v19, %s11250_s22  ;;  %v1378_v19 = vsel %vm1371_vm10, %v1361_v23, %v12672_v46  ;;  %v2418_v23 = vld [vmem:[%s19716_s3 + $0x78] sm:$0xff] }
 0x165   :  { %2093 = vrot.lane.b32.xlu1 %v12387_v54, %s11250_s22  ;;  %2091 = vrot.lane.b32.xlu0 %v12382_v26, %s11250_s22  ;;  %v33_v26 = vld [vmem:[%s19715_s2 + $0x18] sm:$0xff] }
 0x166   :  { %v12784_v39 = vpop.permute.xlu2 %9778  ;;  %v149_v38 = vpop.f32.mrf.mxu3  ;;  %2435 = vmatpush.msrb.mxu0 %v2418_v23  ;;  %v8994_v23 = vld [vmem:[%s19713_s0 + $0x111] sm:$0xff] }
 0x167   :  { %v12789_v18 = vpop.permute.xlu0 %9723  ;;  %v12798_v54 = vpop.permute.xlu1 %9728  ;;  %v177_v46 = vsub.f32 0.0, %v149_v38 }
 0x168   :  { %8738 = vmatmul.msk.f32.gmra.mxu0 %vm49_vm1, %v33_v26  ;;  %v19941_v26 = vld [vmem:[#allocation27_spill] sm:$0xff] }
 0x169   :  { %8869 = vmatmul.msk.f32.gmra.mxu3 %vm1388_vm9, %v1378_v19  ;;  %v11113_v45 = vpop.eup %11112  ;;  %v203_v58 = vmul.f32 1.442695, %v177_v46  ;;  %v1364_v38 = vsel %vm1354_vm8, %v12165_v41, %v19941_v26 }
 0x16b   :  { %11114 = vpow2.f32 %v203_v58  ;;  %v2416_v58 = vld [vmem:[%s19716_s3 + $0x68] sm:$0xff] }
 0x16c   :  { %2101 = vrot.lane.b32.xlu2 %v12473_v32, %s11250_s22  ;;  %v1379_v32 = vsel %vm1371_vm10, %v1362_v50, %v12670_v35  ;;  %v1381_v50 = vsel %vm1371_vm10, %v1364_v38, %v12711_v25  ;;  %v36_v25 = vld [vmem:[%s19715_s2 + $0x30] sm:$0xff] }
 0x16d   :  { %2099 = vrot.lane.b32.xlu1 %v12464_v5, %s11250_s22  ;;  %2097 = vrot.lane.b32.xlu0 %v12483_v43, %s11250_s22  ;;  %v224_v5 = vadd.f32 1.0, %v11113_v45  ;;  %v34_v43 = vld [vmem:[%s19715_s2 + $0x20] sm:$0xff]  ;;  %v2417_v45 = vld [vmem:[%s19716_s3 + $0x70] sm:$0xff] }
 0x16e   :  { %v12806_v1 = vpop.permute.xlu2 %9793  ;;  %2436 = vmatpush.msrb.mxu0 %v2417_v45 }
 0x16f   :  { %v12811_v11 = vpop.permute.xlu0 %9738  ;;  %v240_v16 = vmul.f32 0.5, %v224_v5  ;;  %v12829_v42 = vpop.permute.xlu1 %9743  ;;  %v2415_v5 = vld [vmem:[%s19716_s3 + $0x60] sm:$0xff] }
 0x170   :  { %8739 = vmatmul.msk.f32.gmra.mxu0 %vm49_vm1, %v34_v43  ;;  %19937 = vst [vmem:[#allocation10_spill] sm:$0xff] %v12829_v42 }
 0x171   :  { %8870 = vmatmul.msk.f32.gmra.mxu3 %vm1388_vm9, %v1379_v32  ;;  %v152_v22 = vpop.f32.mrf.mxu3  ;;  %v272_v35 = vmul.f32 %v256_v36, %v240_v16  ;;  %v11115_v29 = vpop.eup %11114  ;;  %v258_v32 = vld [vmem:[%s19714_s1 + $0x58] sm:$0xff]  ;;  %2437 = vmatpush.msrb.mxu0 %v2416_v58  ;;  %v19942_v36 = vld [vmem:[#allocation20_spill] sm:$0xff]  ;;  %v19943_v16 = vld [vmem:[#allocation22_spill] sm:$0xff] }
 0x172   :  { %v178_v30 = vsub.f32 0.0, %v152_v22  ;;  %v225_v59 = vadd.f32 1.0, %v11115_v29  ;;  %v19944_v22 = vld [vmem:[#allocation21_spill] sm:$0xff] }
 0x173   :  { %289 = vst.msk [vmem:[%s19722_s9 + $0x48] sm:$0xff] %vm279_vm0, %v272_v35  ;;  %2438 = vmatpush.msrb.mxu0 %v2415_v5  ;;  %v2414_v29 = vld [vmem:[%s19716_s3 + $0x58] sm:$0xff]  ;;  %v2409_v5 = vld [vmem:[%s19716_s3 + $0x30] sm:$0xff] }
 0x174   :  { %2107 = vrot.lane.b32.xlu2 %v12520_v31, %s11250_s22  ;;  %v8990_v31 = vld [vmem:[%s19713_s0 + $0x1a0] sm:$0xff]  ;;  %v241_v33 = vmul.f32 0.5, %v225_v59 }
 0x175   :  { %2105 = vrot.lane.b32.xlu1 %v12459_v8, %s11250_s22  ;;  %2103 = vrot.lane.b32.xlu0 %v12450_v56, %s11250_s22  ;;  %v205_v8 = vmul.f32 1.442695, %v178_v30  ;;  %v1380_v56 = vsel %vm1371_vm10, %v1363_v55, %v12556_v12  ;;  %v257_v12 = vld [vmem:[%s19714_s1 + $0x50] sm:$0xff] }
 0x176   :  { %v12831_v24 = vpop.permute.xlu2 %9808  ;;  %v273_v47 = vmul.f32 %v257_v12, %v241_v33  ;;  %2439 = vmatpush.msrb.mxu0 %v2414_v29  ;;  %v19945_v55 = vld [vmem:[#allocation32_spill] sm:$0xff]  ;;  %v2412_v33 = vld [vmem:[%s19716_s3 + $0x48] sm:$0xff]  ;;  %v8997_v29 = vld [vmem:[%s19713_s0 + $0x139] sm:$0xff] }
 0x177   :  { %v12836_v53 = vpop.permute.xlu0 %9753  ;;  %11116 = vpow2.f32 %v205_v8  ;;  %v12879_v57 = vpop.permute.xlu1 %9758  ;;  %v1365_v8 = vsel %vm1354_vm8, %v12006_v28, %v19945_v55  ;;  %v8996_v28 = vld [vmem:[%s19713_s0 + $0x129] sm:$0xff] }
 0x178   :  { %8740 = vmatmul.msk.f32.gmra.mxu0 %vm49_vm1, %v35_v10  ;;  %290 = vst.msk [vmem:[%s19722_s9 + $0x50] sm:$0xff] %vm279_vm0, %v273_v47  ;;  %v1382_v10 = vsel %vm1371_vm10, %v1365_v8, %v12709_v17  ;;  %v37_v17 = vld [vmem:[%s19715_s2 + $0x38] sm:$0xff] }
 0x179   :  { %8871 = vmatmul.msk.f32.gmra.mxu3 %vm1388_vm9, %v1380_v56  ;;  %v155_v14 = vpop.f32.mrf.mxu3 }
 0x17a   :  { %v179_v63 = vsub.f32 0.0, %v155_v14  ;;  %v2411_v14 = vld [vmem:[%s19716_s3 + $0x40] sm:$0xff] }
 0x17c   :  { %2113 = vrot.lane.b32.xlu2 %v8990_v31, %s11250_s22  ;;  %v2413_v31 = vld [vmem:[%s19716_s3 + $0x50] sm:$0xff] }
 0x17d   :  { %2111 = vrot.lane.b32.xlu1 %v8989_v13, %s11250_s22  ;;  %2109 = vrot.lane.b32.xlu0 %v12525_v20, %s11250_s22  ;;  %v11117_v19 = vpop.eup %11116  ;;  %v207_v20 = vmul.f32 1.442695, %v179_v63  ;;  %v8995_v63 = vld [vmem:[%s19713_s0 + $0x121] sm:$0xff] }
 0x17e   :  { %v12865_v62 = vpop.permute.xlu2 %9823  ;;  %v226_v41 = vadd.f32 1.0, %v11117_v19  ;;  %2440 = vmatpush.msrb.mxu0 %v2413_v31  ;;  %v259_v19 = vld [vmem:[%s19714_s1 + $0x60] sm:$0xff]  ;;  %v2406_v31 = vld [vmem:[%s19716_s3 + $0x18] sm:$0xff] }
 0x17f   :  { %19940 = vst [vmem:[#allocation16_spill] sm:$0xff] %v12865_v62  ;;  %v12870_v46 = vpop.permute.xlu0 %9768  ;;  %11118 = vpow2.f32 %v207_v20  ;;  %v12935_v47 = vpop.permute.xlu1 %9773  ;;  %v2410_v20 = vld [vmem:[%s19716_s3 + $0x38] sm:$0xff] }
 0x180   :  { %v242_v43 = vmul.f32 0.5, %v226_v41  ;;  %8741 = vmatmul.msk.f32.gmra.mxu0 %vm49_vm1, %v36_v25 }
 0x181   :  { %8872 = vmatmul.msk.f32.gmra.mxu3 %vm1388_vm9, %v1381_v50  ;;  %v158_v30 = vpop.f32.mrf.mxu3  ;;  %2441 = vmatpush.msrb.mxu0 %v2412_v33  ;;  %v19947_v50 = vld [vmem:[#allocation31_spill] sm:$0xff] }
 0x182   :  { %v274_v35 = vmul.f32 %v258_v32, %v242_v43  ;;  %v180_v15 = vsub.f32 0.0, %v158_v30  ;;  %v1366_v41 = vsel %vm1354_vm8, %v12216_v4, %v19947_v50  ;;  %v8999_v43 = vld [vmem:[%s19713_s0 + $0x151] sm:$0xff]  ;;  %v8998_v30 = vld [vmem:[%s19713_s0 + $0x141] sm:$0xff] }
 0x183   :  { %2442 = vmatpush.msrb.mxu0 %v2411_v14  ;;  %v1383_v25 = vsel %vm1371_vm10, %v1366_v41, %v12601_v37  ;;  %v38_v37 = vld [vmem:[%s19715_s2 + $0x40] sm:$0xff]  ;;  %v261_v50 = vld [vmem:[%s19714_s1 + $0x70] sm:$0xff] }
 0x184   :  { %2151 = vrot.lane.b32.xlu2 %v19942_v36, %s11251_s20  ;;  %291 = vst.msk [vmem:[%s19722_s9 + $0x58] sm:$0xff] %vm279_vm0, %v274_v35  ;;  %v209_v12 = vmul.f32 1.442695, %v180_v15 }
 0x185   :  { %2149 = vrot.lane.b32.xlu1 %v19943_v16, %s11251_s20  ;;  %2147 = vrot.lane.b32.xlu0 %v19944_v22, %s11251_s20  ;;  %v11119_v0 = vpop.eup %11118  ;;  %v2408_v16 = vld [vmem:[%s19716_s3 + $0x28] sm:$0xff]  ;;  %v2407_v22 = vld [vmem:[%s19716_s3 + $0x20] sm:$0xff] }
 0x186   :  { %v12918_v59 = vpop.permute.xlu2 %9838  ;;  %v227_v13 = vadd.f32 1.0, %v11119_v0  ;;  %11120 = vpow2.f32 %v209_v12  ;;  %2443 = vmatpush.msrb.mxu0 %v2410_v20  ;;  %v260_v0 = vld [vmem:[%s19714_s1 + $0x68] sm:$0xff]  ;;  %v9000_v20 = vld [vmem:[%s19713_s0 + $0x159] sm:$0xff] }
 0x187   :  { %v12909_v56 = vpop.permute.xlu0 %9783  ;;  %v12992_v55 = vpop.permute.xlu1 %9788 }
 0x188   :  { %19946 = vst [vmem:[#allocation14_spill] sm:$0xff] %v12909_v56  ;;  %v243_v26 = vmul.f32 0.5, %v227_v13  ;;  %8742 = vmatmul.msk.f32.gmra.mxu0 %vm49_vm1, %v37_v17  ;;  %v19949_v13 = vld [vmem:[#allocation28_spill] sm:$0xff]  ;;  %v9726_v56 = vunpack.i.h.bf16 %v12789_v18 }
 0x189   :  { %8873 = vmatmul.msk.f32.gmra.mxu3 %vm1388_vm9, %v1382_v10  ;;  %v161_v45 = vpop.f32.mrf.mxu3  ;;  %2444 = vmatpush.msrb.mxu0 %v2409_v5  ;;  %19948 = vst [vmem:[#allocation11_spill] sm:$0xff] %v12992_v55  ;;  %v1367_v12 = vsel %vm1354_vm8, %v12214_v49, %v19949_v13  ;;  %v2405_v17 = vld [vmem:[%s19716_s3 + $0x10] sm:$0xff]  ;;  %v2404_v49 = vld [vmem:[%s19716_s3 + $0x8] sm:$0xff]  ;;  %v19750_v5 = vmov 0.0  }
 0x18a   :  { %v275_v38 = vmul.f32 %v259_v19, %v243_v26  ;;  %v181_v32 = vsub.f32 0.0, %v161_v45  ;;  %v9002_v19 = vld [vmem:[%s19713_s0 + $0x171] sm:$0xff]  ;;  %457 = vst.msk [vmem:[#allocation2 + $0x28] sm:$0xff] %vm49_vm1, %v19750_v5 }
 0x18b   :  { %2445 = vmatpush.msrb.mxu0 %v2408_v16  ;;  %452 = vst.msk [vmem:[#allocation2] sm:$0xff] %vm49_vm1, %v19750_v5 }
 0x18c   :  { %2157 = vrot.lane.b32.xlu2 %v8996_v28, %s11251_s20  ;;  %292 = vst.msk [vmem:[%s19722_s9 + $0x60] sm:$0xff] %vm279_vm0, %v275_v38  ;;  %v11121_v4 = vpop.eup %11120  ;;  %v211_v36 = vmul.f32 1.442695, %v181_v32  ;;  %v9001_v38 = vld [vmem:[%s19713_s0 + $0x169] sm:$0xff] }
 0x18d   :  { %2155 = vrot.lane.b32.xlu1 %v8995_v63, %s11251_s20  ;;  %2153 = vrot.lane.b32.xlu0 %v8994_v23, %s11251_s20  ;;  %v228_v15 = vadd.f32 1.0, %v11121_v4  ;;  %v1384_v63 = vsel %vm1371_vm10, %v1367_v12, %v12742_v3  ;;  %v2403_v3 = vld [vmem:[%s19716_s3] sm:$0xff]  ;;  %v1368_v4 = vsel %vm1354_vm8, %v19928_v21, %v12566_v40  ;;  %453 = vst.msk [vmem:[#allocation2 + $0x8] sm:$0xff] %vm49_vm1, %v19750_v5  ;;  %v9715_v12 = vunpack.i.l.bf16 %v12772_v7 }
 0x18e   :  { %v12980_v35 = vpop.permute.xlu2 %9853  ;;  %11122 = vpow2.f32 %v211_v36  ;;  %2446 = vmatpush.msrb.mxu0 %v2407_v22  ;;  %v1385_v16 = vsel %vm1371_vm10, %v1368_v4, %v12745_v2  ;;  %v9005_v40 = vld [vmem:[%s19713_s0 + $0x199] sm:$0xff]  ;;  %454 = vst.msk [vmem:[#allocation2 + $0x10] sm:$0xff] %vm49_vm1, %v19750_v5  ;;  %v9014_v4 = vld [vmem:[%s19713_s0 + $0x142] sm:$0xff] }
 0x18f   :  { %v12956_v58 = vpop.permute.xlu0 %9798  ;;  %v244_v8 = vmul.f32 0.5, %v228_v15  ;;  %455 = vst.msk [vmem:[#allocation2 + $0x18] sm:$0xff] %vm49_vm1, %v19750_v5  ;;  %v262_v2 = vld [vmem:[%s19714_s1 + $0x78] sm:$0xff] }
 0x190   :  { %8743 = vmatmul.msk.f32.gmra.mxu0 %vm49_vm1, %v38_v37  ;;  %456 = vst.msk [vmem:[#allocation2 + $0x20] sm:$0xff] %vm49_vm1, %v19750_v5  ;;  %v19952_v15 = vld [vmem:[#allocation33_spill] sm:$0xff] }
 0x191   :  { %8874 = vmatmul.msk.f32.gmra.mxu3 %vm1388_vm9, %v1383_v25  ;;  %v276_v10 = vmul.f32 %v260_v0, %v244_v8  ;;  %2447 = vmatpush.msrb.mxu0 %v2406_v31  ;;  %v13040_v25 = vpop.permute.xlu1 %9803  ;;  %458 = vst.msk [vmem:[#allocation2 + $0x30] sm:$0xff] %vm49_vm1, %v19750_v5  ;;  %v1369_v0 = vsel %vm1354_vm8, %v12286_v48, %v19952_v15  ;;  %v9008_v48 = vld [vmem:[%s19713_s0 + $0xfa] sm:$0xff]  ;;  %v9007_v31 = vld [vmem:[%s19713_s0 + $0xf2] sm:$0xff] }
 0x192   :  { %v164_v28 = vpop.f32.mrf.mxu3  ;;  %459 = vst.msk [vmem:[#allocation2 + $0x38] sm:$0xff] %vm49_vm1, %v19750_v5 }
 0x193   :  { %v182_v14 = vsub.f32 0.0, %v164_v28  ;;  %293 = vst.msk [vmem:[%s19722_s9 + $0x68] sm:$0xff] %vm279_vm0, %v276_v10  ;;  %2448 = vmatpush.msrb.mxu0 %v2405_v17  ;;  %v19953_v10 = vld [vmem:[#allocation29_spill] sm:$0xff] }
 0x194   :  { %2163 = vrot.lane.b32.xlu2 %v8999_v43, %s11251_s20  ;;  %v11123_v23 = vpop.eup %11122  ;;  %460 = vst.msk [vmem:[#allocation2 + $0x40] sm:$0xff] %vm49_vm1, %v19750_v5  ;;  %v1370_v28 = vsel %vm1354_vm8, %v12284_v61, %v19953_v10  ;;  %v9755_v61 = vunpack.i.l.bf16 %v12836_v53 }
 0x195   :  { %2161 = vrot.lane.b32.xlu1 %v8998_v30, %s11251_s20  ;;  %2159 = vrot.lane.b32.xlu0 %v8997_v29, %s11251_s20  ;;  %v213_v26 = vmul.f32 1.442695, %v182_v14  ;;  %v229_v45 = vadd.f32 1.0, %v11123_v23  ;;  %461 = vst.msk [vmem:[#allocation2 + $0x48] sm:$0xff] %vm49_vm1, %v19750_v5  ;;  %v1387_v17 = vsel %vm1371_vm10, %v1370_v28, %v12767_v51  ;;  %v9010_v51 = vld [vmem:[%s19713_s0 + $0x112] sm:$0xff] }
 0x196   :  { %2449 = vmatpush.msrb.mxu0 %v2404_v49  ;;  %v13033_v41 = vpop.permute.xlu2 %9868  ;;  %462 = vst.msk [vmem:[#allocation2 + $0x50] sm:$0xff] %vm49_vm1, %v19750_v5  ;;  %v9011_v49 = vld [vmem:[%s19713_s0 + $0x122] sm:$0xff] }
 0x197   :  { %v13003_v33 = vpop.permute.xlu0 %9813  ;;  %11124 = vpow2.f32 %v213_v26  ;;  %19950 = vst [vmem:[#allocation12_spill] sm:$0xff] %v13033_v41  ;;  %v245_v32 = vmul.f32 0.5, %v229_v45  ;;  %v9721_v41 = vunpack.i.h.bf16 %v12665_v52 }
 0x198   :  { %2450 = vmatpush.msrb.mxu0 %v2403_v3  ;;  %463 = vst.msk [vmem:[#allocation2 + $0x58] sm:$0xff] %vm49_vm1, %v19750_v5  ;;  %v9795_v3 = vunpack.i.l.bf16 %v12806_v1 }
 0x199   :  { %8875 = vmatmul.msk.f32.gmra.mxu3 %vm1388_vm9, %v1384_v63  ;;  %v277_v43 = vmul.f32 %v261_v50, %v245_v32  ;;  %464 = vst.msk [vmem:[#allocation2 + $0x60] sm:$0xff] %vm49_vm1, %v19750_v5  ;;  %v8879_v63 = vld [vmem:[%s19713_s0 + $0xc0] sm:$0xff] }
 0x19a   :  { %465 = vst.msk [vmem:[#allocation2 + $0x68] sm:$0xff] %vm49_vm1, %v19750_v5  ;;  %v2259_v26 = vsel %vm49_vm1, %v8879_v63, %v9715_v12 }
 0x19b   :  { %294 = vst.msk [vmem:[%s19722_s9 + $0x70] sm:$0xff] %vm279_vm0, %v277_v43 }
 0x19c   :  { %2169 = vrot.lane.b32.xlu2 %v9002_v19, %s11251_s20  ;;  %466 = vst.msk [vmem:[#allocation2 + $0x70] sm:$0xff] %vm49_vm1, %v19750_v5  ;;  %v9009_v19 = vld [vmem:[%s19713_s0 + $0x10a] sm:$0xff] }
 0x19d   :  { %2167 = vrot.lane.b32.xlu1 %v9001_v38, %s11251_s20  ;;  %2165 = vrot.lane.b32.xlu0 %v9000_v20, %s11251_s20  ;;  %v11125_v22 = vpop.eup %11124  ;;  %467 = vst.msk [vmem:[#allocation2 + $0x78] sm:$0xff] %vm49_vm1, %v19750_v5  ;;  %v2275_v38 = vsel %vm1270_vm2, %v2259_v26, %v9755_v61  ;;  %v9016_v26 = vld [vmem:[%s19713_s0 + $0x15a] sm:$0xff] }
 0x19e   :  { %v230_v21 = vadd.f32 1.0, %v11125_v22  ;;  %v13079_v30 = vpop.permute.xlu2 %9883  ;;  %468 = vst.msk [vmem:[#allocation2 + $0x80] sm:$0xff] %vm49_vm1, %v19750_v5  ;;  %v2291_v32 = vsel %vm1287_vm4, %v2275_v38, %v9795_v3  ;;  %v9015_v3 = vld [vmem:[%s19713_s0 + $0x152] sm:$0xff]  ;;  %v9716_v38 = vunpack.i.h.bf16 %v12772_v7 }
 0x19f   :  { %v13047_v36 = vpop.permute.xlu0 %9828  ;;  %469 = vst.msk [vmem:[#allocation2 + $0x88] sm:$0xff] %vm49_vm1, %v19750_v5 }
 0x1a0   :  { %19951 = vst [vmem:[#allocation7_spill] sm:$0xff] %v13047_v36  ;;  %v246_v37 = vmul.f32 0.5, %v230_v21  ;;  %v9012_v21 = vld [vmem:[%s19713_s0 + $0x12a] sm:$0xff] }
 0x1a1   :  { %8876 = vmatmul.msk.f32.gmra.mxu3 %vm1388_vm9, %v1385_v16  ;;  %470 = vst.msk [vmem:[#allocation2 + $0x90] sm:$0xff] %vm49_vm1, %v19750_v5 }
 0x1a2   :  { %v278_v29 = vmul.f32 %v262_v2, %v246_v37  ;;  %471 = vst.msk [vmem:[#allocation2 + $0x98] sm:$0xff] %vm49_vm1, %v19750_v5  ;;  %v1454_v37 = vpop.f32.mrf.mxu2 }
 0x1a3   :  { %472 = vst.msk [vmem:[#allocation2 + $0xa0] sm:$0xff] %vm49_vm1, %v19750_v5 }
 0x1a4   :  { %2175 = vrot.lane.b32.xlu2 %v9005_v40, %s11251_s20  ;;  %295 = vst.msk [vmem:[%s19722_s9 + $0x78] sm:$0xff] %vm279_vm0, %v278_v29  ;;  %v9013_v40 = vld [vmem:[%s19713_s0 + $0x13a] sm:$0xff] }
 0x1a5   :  { %2173 = vrot.lane.b32.xlu1 %v12594_v34, %s11251_s20  ;;  %2171 = vrot.lane.b32.xlu0 %v12589_v44, %s11251_s20  ;;  %v13090_v34 = vpop.permute.xlu1 %9818  ;;  %v1386_v44 = vsel %vm1371_vm10, %v1369_v0, %v12631_v9  ;;  %v9006_v9 = vld [vmem:[%s19713_s0 + $0x1a1] sm:$0xff]  ;;  %473 = vst.msk [vmem:[#allocation2 + $0xa8] sm:$0xff] %vm49_vm1, %v19750_v5 }
 0x1a6   :  { %v13131_v14 = vpop.permute.xlu2 %9898  ;;  %474 = vst.msk [vmem:[#allocation2 + $0xb0] sm:$0xff] %vm49_vm1, %v19750_v5 }
 0x1a7   :  { %v13086_v8 = vpop.permute.xlu0 %9843  ;;  %475 = vst.msk [vmem:[#allocation2 + $0xb8] sm:$0xff] %vm49_vm1, %v19750_v5 }
 0x1a8   :  { %476 = vst.msk [vmem:[#allocation2 + $0xc0] sm:$0xff] %vm49_vm1, %v19750_v5 }
 0x1a9   :  { %8877 = vmatmul.msk.f32.gmra.mxu3 %vm1388_vm9, %v1386_v44  ;;  %477 = vst.msk [vmem:[#allocation2 + $0xc8] sm:$0xff] %vm49_vm1, %v19750_v5 }
 0x1aa   :  { %478 = vst.msk [vmem:[#allocation2 + $0xd0] sm:$0xff] %vm49_vm1, %v19750_v5 }
 0x1ab   :  { %479 = vst.msk [vmem:[#allocation2 + $0xd8] sm:$0xff] %vm49_vm1, %v19750_v5 }
 0x1ac   :  { %2213 = vrot.lane.b32.xlu2 %v9008_v48, %s11252_s25  ;;  %480 = vst.msk [vmem:[#allocation2 + $0xe0] sm:$0xff] %vm49_vm1, %v19750_v5  ;;  %v13299_v48 = vpop.f32.mrf.mxu2 }
 0x1ad   :  { %2211 = vrot.lane.b32.xlu1 %v9007_v31, %s11252_s25  ;;  %2177 = vrot.lane.b32.xlu0 %v9006_v9, %s11251_s20  ;;  %v13147_v23 = vpop.permute.xlu1 %9833  ;;  %481 = vst.msk [vmem:[#allocation2 + $0xe8] sm:$0xff] %vm49_vm1, %v19750_v5 }
 0x1ae   :  { %v9835_v20 = vunpack.i.l.bf16 %v13147_v23  ;;  %v13186_v16 = vpop.permute.xlu2 %2083  ;;  %482 = vst.msk [vmem:[#allocation2 + $0xf0] sm:$0xff] %vm49_vm1, %v19750_v5 }
 0x1af   :  { %v13126_v13 = vpop.permute.xlu0 %9858  ;;  %19954 = vst [vmem:[#allocation9_spill] sm:$0xff] %v13186_v16 }
 0x1b0   :  { %v2307_v43 = vsel %vm279_vm0, %v2291_v32, %v9835_v20  ;;  %483 = vst.msk [vmem:[#allocation2 + $0xf8] sm:$0xff] %vm49_vm1, %v19750_v5  ;;  %v8880_v20 = vld [vmem:[%s19713_s0 + $0xc8] sm:$0xff] }
 0x1b1   :  { %8878 = vmatmul.msk.f32.gmra.mxu3 %vm1388_vm9, %v1387_v17  ;;  %484 = vst.msk [vmem:[#allocation2 + $0x100] sm:$0xff] %vm49_vm1, %v19750_v5 }
 0x1b2   :  { %485 = vst.msk [vmem:[#allocation2 + $0x108] sm:$0xff] %vm49_vm1, %v19750_v5 }
 0x1b3   :  { %486 = vst.msk [vmem:[#allocation2 + $0x110] sm:$0xff] %vm49_vm1, %v19750_v5 }
 0x1b4   :  { %2219 = vrot.lane.b32.xlu2 %v9011_v49, %s11252_s25  ;;  %487 = vst.msk [vmem:[#allocation2 + $0x118] sm:$0xff] %vm49_vm1, %v19750_v5  ;;  %v13323_v9 = vpop.f32.mrf.mxu2 }
 0x1b5   :  { %2217 = vrot.lane.b32.xlu1 %v9010_v51, %s11252_s25  ;;  %2215 = vrot.lane.b32.xlu0 %v9009_v19, %s11252_s25  ;;  %488 = vst.msk [vmem:[#allocation2 + $0x120] sm:$0xff] %vm49_vm1, %v19750_v5  ;;  %v13287_v44 = vpop.permute.xlu1 %9848  ;;  %v9017_v19 = vld [vmem:[%s19713_s0 + $0x16a] sm:$0xff] }
 0x1b6   :  { %489 = vst.msk [vmem:[#allocation2 + $0x128] sm:$0xff] %vm49_vm1, %v19750_v5  ;;  %v13335_v10 = vpop.permute.xlu2 %2089 }
 0x1b7   :  { %v13172_v45 = vpop.permute.xlu0 %9873  ;;  %490 = vst.msk [vmem:[#allocation2 + $0x130] sm:$0xff] %vm49_vm1, %v19750_v5 }
 0x1b8   :  { %v9875_v50 = vunpack.i.l.bf16 %v13172_v45  ;;  %491 = vst.msk [vmem:[#allocation2 + $0x138] sm:$0xff] %vm49_vm1, %v19750_v5 }
 0x1b9   :  { %492 = vst.msk [vmem:[#allocation2 + $0x140] sm:$0xff] %vm49_vm1, %v19750_v5 }
 0x1ba   :  { %v2323_v22 = vsel %vm1320_vm5, %v2307_v43, %v9875_v50  ;;  %493 = vst.msk [vmem:[#allocation2 + $0x148] sm:$0xff] %vm49_vm1, %v19750_v5  ;;  %v9756_v50 = vunpack.i.h.bf16 %v12836_v53  ;;  %v9796_v53 = vunpack.i.h.bf16 %v12806_v1  ;;  %v9018_v1 = vld [vmem:[%s19713_s0 + $0x172] sm:$0xff] }
 0x1bb   :  { %v2339_v2 = vsel %vm1337_vm6, %v2323_v22, %v13186_v16  ;;  %494 = vst.msk [vmem:[#allocation2 + $0x150] sm:$0xff] %vm49_vm1, %v19750_v5  ;;  %v2260_v22 = vsel %vm49_vm1, %v8880_v20, %v9716_v38  ;;  %v9760_v38 = vunpack.i.l.bf16 %v12879_v57 }
 0x1bc   :  { %v1519_v29 = vpop.f32.mrf.mxu3  ;;  %2451 = vmatmul.f32.vlgmr.msrb.gmra.mxu0 %v2339_v2  ;;  %2225 = vrot.lane.b32.xlu2 %v9014_v4, %s11252_s25  ;;  %495 = vst.msk [vmem:[#allocation2 + $0x158] sm:$0xff] %vm49_vm1, %v19750_v5  ;;  %v13349_v12 = vpop.f32.mrf.mxu2  ;;  %v2276_v2 = vsel %vm1270_vm2, %v2260_v22, %v9756_v50 }
 0x1bd   :  { %v1520_v15 = vadd.f32 %v1519_v29, %v1454_v37  ;;  %2223 = vrot.lane.b32.xlu1 %v9013_v40, %s11252_s25  ;;  %2221 = vrot.lane.b32.xlu0 %v9012_v21, %s11252_s25  ;;  %496 = vst.msk [vmem:[#allocation2 + $0x160] sm:$0xff] %vm49_vm1, %v19750_v5  ;;  %v13311_v31 = vpop.permute.xlu1 %9863  ;;  %v9020_v40 = vld [vmem:[%s19713_s0 + $0x18a] sm:$0xff]  ;;  %v9019_v21 = vld [vmem:[%s19713_s0 + $0x182] sm:$0xff]  ;;  %v9836_v37 = vunpack.i.h.bf16 %v13147_v23  ;;  %v9720_v23 = vunpack.i.l.bf16 %v12665_v52 }
 0x1be   :  { %497 = vst.msk [vmem:[#allocation2 + $0x168] sm:$0xff] %vm49_vm1, %v19750_v5  ;;  %v13363_v17 = vpop.permute.xlu2 %2095 }
 0x1bf   :  { %v1567_v0 = vmax.f32 %v1520_v15, 0.0  ;;  %498 = vst.msk [vmem:[#allocation2 + $0x170] sm:$0xff] %vm49_vm1, %v19750_v5  ;;  %v13369_v61 = vpop.permute.xlu0 %9888  ;;  %v9876_v15 = vunpack.i.h.bf16 %v13172_v45  ;;  %v9055_v45 = vld [vmem:[%s19713_s0 + $0x1b1] sm:$0xff] }
 0x1c0   :  { %499 = vst.msk [vmem:[#allocation2 + $0x178] sm:$0xff] %vm49_vm1, %v19750_v5 }
 0x1c1   :  { %1584 = vst.msk [vmem:[#allocation2 + $0x28] sm:$0xff] %vm49_vm1, %v1567_v0  ;;  %v2292_v0 = vsel %vm1287_vm4, %v2276_v2, %v9796_v53  ;;  %v9800_v53 = vunpack.i.l.bf16 %v12956_v58 }
 0x1c2   :  { %500 = vst.msk [vmem:[#allocation2 + $0x180] sm:$0xff] %vm49_vm1, %v19750_v5  ;;  %v2308_v22 = vsel %vm279_vm0, %v2292_v0, %v9836_v37 }
 0x1c3   :  { %501 = vst.msk [vmem:[#allocation2 + $0x188] sm:$0xff] %vm49_vm1, %v19750_v5 }
 0x1c4   :  { %502 = vst.msk [vmem:[#allocation2 + $0x190] sm:$0xff] %vm49_vm1, %v19750_v5  ;;  %v13373_v49 = vpop.f32.mrf.mxu3  ;;  %v13379_v51 = vpop.f32.mrf.mxu2  ;;  %2231 = vrot.lane.b32.xlu2 %v9017_v19, %s11252_s25  ;;  %v9056_v19 = vld [vmem:[%s19713_s0 + $0x1b9] sm:$0xff] }
 0x1c5   :  { %503 = vst.msk [vmem:[#allocation2 + $0x198] sm:$0xff] %vm49_vm1, %v19750_v5  ;;  %v13337_v28 = vpop.permute.xlu1 %9878  ;;  %2229 = vrot.lane.b32.xlu1 %v9016_v26, %s11252_s25  ;;  %2227 = vrot.lane.b32.xlu0 %v9015_v3, %s11252_s25  ;;  %v13462_v26 = vld [vmem:[%s19714_s1] sm:$0xff]  ;;  %v8881_v3 = vld [vmem:[%s19713_s0 + $0xd8] sm:$0xff]  ;;  %v9912_v0 = vpack.i.bf16 %v9056_v19, %v9055_v45  ;;  %v9761_v19 = vunpack.i.h.bf16 %v12879_v57 }
 0x1c6   :  { %504 = vst.msk [vmem:[#allocation2 + $0x1a0] sm:$0xff] %vm49_vm1, %v19750_v5  ;;  %v13410_v32 = vpop.permute.xlu2 %2101  ;;  %8751 = vmatmul.msk.f32.vlgmr.msra.gmra.mxu1 %vm279_vm0, %v13462_v26  ;;  %v8882_v45 = vld [vmem:[%s19713_s0 + $0xe0] sm:$0xff] }
 0x1c7   :  { %505 = vst.msk [vmem:[#allocation2 + $0x1a8] sm:$0xff] %vm49_vm1, %v19750_v5  ;;  %v13416_v7 = vpop.permute.xlu0 %9903  ;;  %v9061_v57 = vld [vmem:[%s19713_s0 + $0x1f9] sm:$0xff] }
 0x1c8   :  { %506 = vst.msk [vmem:[#allocation2 + $0x1b0] sm:$0xff] %vm49_vm1, %v19750_v5 }
 0x1c9   :  { %507 = vst.msk [vmem:[#allocation2 + $0x1b8] sm:$0xff] %vm49_vm1, %v19750_v5 }
 0x1ca   :  { %508 = vst.msk [vmem:[#allocation2 + $0x1c0] sm:$0xff] %vm49_vm1, %v19750_v5 }
 0x1cb   :  { %509 = vst.msk [vmem:[#allocation2 + $0x1c8] sm:$0xff] %vm49_vm1, %v19750_v5 }
 0x1cc   :  { %510 = vst.msk [vmem:[#allocation2 + $0x1d0] sm:$0xff] %vm49_vm1, %v19750_v5  ;;  %v13420_v4 = vpop.f32.mrf.mxu3  ;;  %v13439_v29 = vpop.f32.mrf.mxu2  ;;  %2237 = vrot.lane.b32.xlu2 %v9020_v40, %s11252_s25 }
 0x1cd   :  { %511 = vst.msk [vmem:[#allocation2 + $0x1d8] sm:$0xff] %vm49_vm1, %v19750_v5  ;;  %v13365_v63 = vpop.permute.xlu1 %9893  ;;  %2235 = vrot.lane.b32.xlu1 %v9019_v21, %s11252_s25  ;;  %2233 = vrot.lane.b32.xlu0 %v9018_v1, %s11252_s25  ;;  %v2324_v21 = vsel %vm1320_vm5, %v2308_v22, %v9876_v15  ;;  %v119_v2 = vpop.f32.mrf.mxu0  ;;  %v9022_v15 = vld [vmem:[%s19713_s0 + $0x1a2] sm:$0xff] }
 0x1ce   :  { %512 = vst.msk [vmem:[#allocation2 + $0x1e0] sm:$0xff] %vm49_vm1, %v19750_v5  ;;  %v13470_v20 = vpop.permute.xlu2 %2107  ;;  %v167_v22 = vsub.f32 0.0, %v119_v2 }
 0x1cf   :  { %513 = vst.msk [vmem:[#allocation2 + $0x1e8] sm:$0xff] %vm49_vm1, %v19750_v5  ;;  %v13480_v40 = vpop.permute.xlu0 %2085 }
 0x1d0   :  { %514 = vst.msk [vmem:[#allocation2 + $0x1f0] sm:$0xff] %vm49_vm1, %v19750_v5  ;;  %v2340_v1 = vsel %vm1337_vm6, %v2324_v21, %v13480_v40  ;;  %v9840_v21 = vunpack.i.l.bf16 %v12918_v59 }
 0x1d1   :  { %515 = vst.msk [vmem:[#allocation2 + $0x1f8] sm:$0xff] %vm49_vm1, %v19750_v5  ;;  %2454 = vmatmul.f32.gmra.mxu0 %v2340_v1  ;;  %v9060_v1 = vld [vmem:[%s19713_s0 + $0x1e9] sm:$0xff] }
 0x1d2   :  { %516 = vst.msk [vmem:[#allocation2 + $0x200] sm:$0xff] %vm49_vm1, %v19750_v5 }
 0x1d3   :  { %517 = vst.msk [vmem:[#allocation2 + $0x208] sm:$0xff] %vm49_vm1, %v19750_v5 }
 0x1d4   :  { %518 = vst.msk [vmem:[#allocation2 + $0x210] sm:$0xff] %vm49_vm1, %v19750_v5  ;;  %v13487_v37 = vpop.f32.mrf.mxu3  ;;  %9913 = vrot.lane.b32.xlu2 %v9912_v0, %s11245_s21  ;;  %v13524_v2 = vpop.f32.mrf.mxu2  ;;  %v2262_v0 = vsel %vm49_vm1, %v8882_v45, %v9721_v41  ;;  %v9841_v45 = vunpack.i.h.bf16 %v12918_v59 }
 0x1d5   :  { %519 = vst.msk [vmem:[#allocation2 + $0x218] sm:$0xff] %vm49_vm1, %v19750_v5  ;;  %v13412_v43 = vpop.permute.xlu1 %9908  ;;  %2241 = vrot.lane.b32.xlu1 %v9022_v15, %s11252_s25  ;;  %v2278_v41 = vsel %vm1270_vm2, %v2262_v0, %v9761_v19  ;;  %v9881_v0 = vunpack.i.h.bf16 %v13337_v28 }
 0x1d6   :  { %520 = vst.msk [vmem:[#allocation2 + $0x220] sm:$0xff] %vm49_vm1, %v19750_v5  ;;  %v13541_v15 = vpop.permute.xlu2 %2113 }
 0x1d7   :  { %521 = vst.msk [vmem:[#allocation2 + $0x228] sm:$0xff] %vm49_vm1, %v19750_v5 }
 0x1d8   :  { %522 = vst.msk [vmem:[#allocation2 + $0x230] sm:$0xff] %vm49_vm1, %v19750_v5 }
 0x1d9   :  { %523 = vst.msk [vmem:[#allocation2 + $0x238] sm:$0xff] %vm49_vm1, %v19750_v5 }
 0x1da   :  { %524 = vst.msk [vmem:[#allocation2 + $0x240] sm:$0xff] %vm49_vm1, %v19750_v5 }
 0x1db   :  { %525 = vst.msk [vmem:[#allocation2 + $0x248] sm:$0xff] %vm49_vm1, %v19750_v5 }
 0x1dc   :  { %526 = vst.msk [vmem:[#allocation2 + $0x250] sm:$0xff] %vm49_vm1, %v19750_v5 }
 0x1dd   :  { %527 = vst.msk [vmem:[#allocation2 + $0x258] sm:$0xff] %vm49_vm1, %v19750_v5  ;;  %v13472_v50 = vpop.permute.xlu1 %2087 }
 0x1de   :  { %528 = vst.msk [vmem:[#allocation2 + $0x260] sm:$0xff] %vm49_vm1, %v19750_v5 }
 0x1df   :  { %529 = vst.msk [vmem:[#allocation2 + $0x268] sm:$0xff] %vm49_vm1, %v19750_v5 }
 0x1e0   :  { %530 = vst.msk [vmem:[#allocation2 + $0x270] sm:$0xff] %vm49_vm1, %v19750_v5 }
 0x1e1   :  { %531 = vst.msk [vmem:[#allocation2 + $0x278] sm:$0xff] %vm49_vm1, %v19750_v5 }
 0x1e2   :  { %19955 = vst [vmem:[#allocation19_spill] sm:$0xff] %v13311_v31 }
 0x1e3   :  { %532 = vst.msk [vmem:[#allocation2 + $0x280] sm:$0xff] %vm49_vm1, %v19750_v5 }
 0x1e4   :  { %533 = vst.msk [vmem:[#allocation2 + $0x288] sm:$0xff] %vm49_vm1, %v19750_v5 }
 0x1e5   :  { %534 = vst.msk [vmem:[#allocation2 + $0x290] sm:$0xff] %vm49_vm1, %v19750_v5 }
 0x1e6   :  { %535 = vst.msk [vmem:[#allocation2 + $0x298] sm:$0xff] %vm49_vm1, %v19750_v5 }
 0x1e7   :  { %536 = vst.msk [vmem:[#allocation2 + $0x2a0] sm:$0xff] %vm49_vm1, %v19750_v5 }
 0x1e8   :  { %537 = vst.msk [vmem:[#allocation2 + $0x2a8] sm:$0xff] %vm49_vm1, %v19750_v5 }
 0x1e9   :  { %538 = vst.msk [vmem:[#allocation2 + $0x2b0] sm:$0xff] %vm49_vm1, %v19750_v5 }
 0x1ea   :  { %539 = vst.msk [vmem:[#allocation2 + $0x2b8] sm:$0xff] %vm49_vm1, %v19750_v5 }
 0x1eb   :  { %540 = vst.msk [vmem:[#allocation2 + $0x2c0] sm:$0xff] %vm49_vm1, %v19750_v5 }
 0x1ec   :  { %541 = vst.msk [vmem:[#allocation2 + $0x2c8] sm:$0xff] %vm49_vm1, %v19750_v5 }
 0x1ed   :  { %542 = vst.msk [vmem:[#allocation2 + $0x2d0] sm:$0xff] %vm49_vm1, %v19750_v5 }
 0x1ee   :  { %543 = vst.msk [vmem:[#allocation2 + $0x2d8] sm:$0xff] %vm49_vm1, %v19750_v5 }
 0x1ef   :  { %544 = vst.msk [vmem:[#allocation2 + $0x2e0] sm:$0xff] %vm49_vm1, %v19750_v5 }
 0x1f0   :  { %545 = vst.msk [vmem:[#allocation2 + $0x2e8] sm:$0xff] %vm49_vm1, %v19750_v5 }
 0x1f1   :  { %546 = vst.msk [vmem:[#allocation2 + $0x2f0] sm:$0xff] %vm49_vm1, %v19750_v5 }
 0x1f2   :  { %547 = vst.msk [vmem:[#allocation2 + $0x2f8] sm:$0xff] %vm49_vm1, %v19750_v5 }
 0x1f3   :  { %548 = vst.msk [vmem:[#allocation2 + $0x300] sm:$0xff] %vm49_vm1, %v19750_v5 }
 0x1f4   :  { %549 = vst.msk [vmem:[#allocation2 + $0x308] sm:$0xff] %vm49_vm1, %v19750_v5 }
 0x1f5   :  { %550 = vst.msk [vmem:[#allocation2 + $0x310] sm:$0xff] %vm49_vm1, %v19750_v5 }
 0x1f6   :  { %551 = vst.msk [vmem:[#allocation2 + $0x318] sm:$0xff] %vm49_vm1, %v19750_v5 }
 0x1f7   :  { %552 = vst.msk [vmem:[#allocation2 + $0x320] sm:$0xff] %vm49_vm1, %v19750_v5 }
 0x1f8   :  { %19956 = vst [vmem:[#allocation18_spill] sm:$0xff] %v13363_v17 }
 0x1f9   :  { %553 = vst.msk [vmem:[#allocation2 + $0x328] sm:$0xff] %vm49_vm1, %v19750_v5 }
 0x1fa   :  { %554 = vst.msk [vmem:[#allocation2 + $0x330] sm:$0xff] %vm49_vm1, %v19750_v5 }
 0x1fb   :  { %555 = vst.msk [vmem:[#allocation2 + $0x338] sm:$0xff] %vm49_vm1, %v19750_v5 }
 0x1fc   :  { %556 = vst.msk [vmem:[#allocation2 + $0x340] sm:$0xff] %vm49_vm1, %v19750_v5 }
 0x1fd   :  { %557 = vst.msk [vmem:[#allocation2 + $0x348] sm:$0xff] %vm49_vm1, %v19750_v5 }
 0x1fe   :  { %558 = vst.msk [vmem:[#allocation2 + $0x350] sm:$0xff] %vm49_vm1, %v19750_v5 }
 0x1ff   :  { %559 = vst.msk [vmem:[#allocation2 + $0x358] sm:$0xff] %vm49_vm1, %v19750_v5 }
 0x200   :  { %560 = vst.msk [vmem:[#allocation2 + $0x360] sm:$0xff] %vm49_vm1, %v19750_v5 }
 0x201   :  { %561 = vst.msk [vmem:[#allocation2 + $0x368] sm:$0xff] %vm49_vm1, %v19750_v5 }
 0x202   :  { %562 = vst.msk [vmem:[#allocation2 + $0x370] sm:$0xff] %vm49_vm1, %v19750_v5 }
 0x203   :  { %19957 = vst [vmem:[#allocation8_spill] sm:$0xff] %v13410_v32 }
 0x204   :  { %19958 = vst [vmem:[#allocation13_spill] sm:$0xff] %v13412_v43  ;;  %v2261_v43 = vsel %vm49_vm1, %v8881_v3, %v9720_v23  ;;  %v9021_v23 = vld [vmem:[%s19713_s0 + $0x19a] sm:$0xff]  ;;  %v9880_v3 = vunpack.i.l.bf16 %v13337_v28  ;;  %v13585_v28 = vld [vmem:[%s19714_s1 + $0x10] sm:$0xff] }
 0x205   :  { %563 = vst.msk [vmem:[#allocation2 + $0x378] sm:$0xff] %vm49_vm1, %v19750_v5  ;;  %v2277_v36 = vsel %vm1270_vm2, %v2261_v43, %v9760_v38  ;;  %v13514_v43 = vld [vmem:[%s19714_s1 + $0x8] sm:$0xff]  ;;  %v9801_v38 = vunpack.i.h.bf16 %v12956_v58  ;;  %2239 = vrot.lane.b32.xlu0 %v9021_v23, %s11252_s25  ;;  %v183_v58 = vmul.f32 1.442695, %v167_v22  ;;  %v13543_v23 = vpop.permute.xlu1 %2093  ;;  %v13557_v22 = vpop.permute.xlu0 %2091 }
 0x206   :  { %19959 = vst [vmem:[#allocation17_spill] sm:$0xff] %v13416_v7  ;;  %v2293_v52 = vsel %vm1287_vm4, %v2277_v36, %v9800_v53  ;;  %v9062_v36 = vld [vmem:[%s19713_s0 + $0x201] sm:$0xff]  ;;  %8752 = vmatmul.msk.f32.gmra.mxu1 %vm279_vm0, %v13514_v43  ;;  %v19968_v7 = vmov 0.0  }
 0x207   :  { %564 = vst.msk [vmem:[#allocation2 + $0x380] sm:$0xff] %vm49_vm1, %v19750_v5  ;;  %v9059_v53 = vld [vmem:[%s19713_s0 + $0x1e1] sm:$0xff]  ;;  %v2309_v55 = vsel %vm279_vm0, %v2293_v52, %v9840_v21  ;;  %v2294_v59 = vsel %vm1287_vm4, %v2278_v41, %v9801_v38  ;;  %11126 = vpow2.f32 %v183_v58  ;;  %v9066_v58 = vld [vmem:[%s19713_s0 + $0x231] sm:$0xff]  ;;  %v9765_v41 = vunpack.i.l.bf16 %v12762_v27 }
 0x208   :  { %565 = vst.msk [vmem:[#allocation2 + $0x388] sm:$0xff] %vm49_vm1, %v19750_v5  ;;  %v2325_v21 = vsel %vm1320_vm5, %v2309_v55, %v9880_v3  ;;  %v13569_v19 = vpack.i.bf16 %v9060_v1, %v9059_v53  ;;  %v122_v3 = vpop.f32.mrf.mxu0  ;;  %v9068_v53 = vld [vmem:[%s19713_s0 + $0x249] sm:$0xff] }
 0x209   :  { %566 = vst.msk [vmem:[#allocation2 + $0x390] sm:$0xff] %vm49_vm1, %v19750_v5  ;;  %v2341_v52 = vsel %vm1337_vm6, %v2325_v21, %v13472_v50  ;;  %v168_v21 = vsub.f32 0.0, %v122_v3  ;;  %v9065_v1 = vld [vmem:[%s19713_s0 + $0x229] sm:$0xff] }
 0x20a   :  { %567 = vst.msk [vmem:[#allocation2 + $0x398] sm:$0xff] %vm49_vm1, %v19750_v5  ;;  %2457 = vmatmul.f32.gmra.mxu0 %v2341_v52  ;;  %9923 = vrot.lane.b32.xlu1 %v13569_v19, %s11245_s21  ;;  %v13646_v16 = vpack.i.bf16 %v9066_v58, %v9065_v1 }
 0x20b   :  { %568 = vst.msk [vmem:[#allocation2 + $0x3a0] sm:$0xff] %vm49_vm1, %v19750_v5  ;;  %v185_v38 = vmul.f32 1.442695, %v168_v21  ;;  %v11150_v21 = vld [vmem:[%s19713_s0 + $0xf0] sm:$0xff] }
 0x20c   :  { %569 = vst.msk [vmem:[#allocation2 + $0x3a8] sm:$0xff] %vm49_vm1, %v19750_v5 }
 0x20d   :  { %570 = vst.msk [vmem:[#allocation2 + $0x3b0] sm:$0xff] %vm49_vm1, %v19750_v5  ;;  %v13616_v52 = vpop.permute.xlu1 %2099  ;;  %11128 = vpow2.f32 %v185_v38  ;;  %v11127_v3 = vpop.eup %11126  ;;  %v1523_v38 = vadd.f32 %v13373_v49, %v13299_v48  ;;  %v2434_v49 = vld [vmem:[%s19716_s3 + $0xf8] sm:$0xff] }
 0x20e   :  { %19960 = vst [vmem:[#allocation24_spill] sm:$0xff] %v13470_v20  ;;  %v9058_v20 = vld [vmem:[%s19713_s0 + $0x1d1] sm:$0xff]  ;;  %8753 = vmatmul.msk.f32.gmra.mxu1 %vm279_vm0, %v13585_v28  ;;  %v13636_v31 = vpop.permute.xlu0 %2097 }
 0x20f   :  { %19961 = vst [vmem:[#allocation26_spill] sm:$0xff] %v13472_v50  ;;  %v13574_v55 = vpack.i.bf16 %v9058_v20, %v9057_v6  ;;  %v2310_v6 = vsel %vm279_vm0, %v2294_v59, %v9841_v45  ;;  %v9067_v20 = vld [vmem:[%s19713_s0 + $0x241] sm:$0xff]  ;;  %v13614_v45 = vpop.permute.xlu2 %2151  ;;  %v9064_v59 = vld [vmem:[%s19713_s0 + $0x219] sm:$0xff]  ;;  %v13631_v50 = vpop.f32.mrf.mxu2  ;;  %2500 = vmatpush.msrb.mxu1 %v2434_v49  ;;  %v1568_v58 = vmax.f32 %v1523_v38, 0.0 }
 0x210   :  { %571 = vst.msk [vmem:[#allocation2 + $0x3b8] sm:$0xff] %vm49_vm1, %v19750_v5  ;;  %v13644_v62 = vpack.i.bf16 %v9068_v53, %v9067_v20  ;;  %v125_v48 = vpop.f32.mrf.mxu0  ;;  %v9069_v49 = vld [vmem:[%s19713_s0 + $0x259] sm:$0xff] }
 0x211   :  { %19962 = vst [vmem:[#allocation23_spill] sm:$0xff] %v13480_v40  ;;  %v13567_v40 = vpack.i.bf16 %v9062_v36, %v9061_v57  ;;  %v9725_v57 = vunpack.i.l.bf16 %v12789_v18  ;;  %9918 = vrot.lane.b32.xlu0 %v13574_v55, %s11245_s21  ;;  %v2326_v36 = vsel %vm1320_vm5, %v2310_v6, %v9881_v0  ;;  %v9063_v0 = vld [vmem:[%s19713_s0 + $0x211] sm:$0xff]  ;;  %v13664_v18 = vadd.f32 %v13487_v37, %v13349_v12 }
 0x212   :  { %572 = vst.msk [vmem:[#allocation2 + $0x3c0] sm:$0xff] %vm49_vm1, %v19750_v5  ;;  %v13655_v42 = vpack.i.bf16 %v9064_v59, %v9063_v0  ;;  %v13678_v12 = vld [vmem:[%s19714_s1 + $0x18] sm:$0xff]  ;;  %9938 = vrot.lane.b32.xlu1 %v13646_v16, %s11245_s21 }
 0x213   :  { %573 = vst.msk [vmem:[#allocation2 + $0x3c8] sm:$0xff] %vm49_vm1, %v19750_v5  ;;  %9928 = vrot.lane.b32.xlu2 %v13567_v40, %s11245_s21  ;;  %v2263_v6 = vsel %vm49_vm1, %v11150_v21, %v9725_v57  ;;  %v2342_v57 = vsel %vm1337_vm6, %v2326_v36, %v13335_v10  ;;  %v215_v36 = vadd.f32 1.0, %v11127_v3  ;;  %v11129_v37 = vpop.eup %11128  ;;  %v11151_v59 = vld [vmem:[%s19713_s0 + $0xf8] sm:$0xff] }
 0x214   :  { %574 = vst.msk [vmem:[#allocation2 + $0x3d0] sm:$0xff] %vm49_vm1, %v19750_v5  ;;  %2460 = vmatmul.f32.gmra.mxu0 %v2342_v57  ;;  %v2279_v20 = vsel %vm1270_vm2, %v2263_v6, %v9765_v41  ;;  %v2264_v3 = vsel %vm49_vm1, %v11151_v59, %v9726_v56  ;;  %v9071_v6 = vld [vmem:[%s19713_s0 + $0x1b2] sm:$0xff]  ;;  %v216_v38 = vadd.f32 1.0, %v11129_v37  ;;  %v9806_v57 = vunpack.i.h.bf16 %v13040_v25 }
 0x215   :  { %575 = vst.msk [vmem:[#allocation2 + $0x3d8] sm:$0xff] %vm49_vm1, %v19750_v5  ;;  %v2433_v56 = vld [vmem:[%s19716_s3 + $0xf0] sm:$0xff] }
 0x216   :  { %576 = vst.msk [vmem:[#allocation2 + $0x3e0] sm:$0xff] %vm49_vm1, %v19750_v5  ;;  %8754 = vmatmul.msk.f32.gmra.mxu1 %vm279_vm0, %v13678_v12  ;;  %v232_v59 = vmul.f32 0.5, %v216_v38 }
 0x217   :  { %577 = vst.msk [vmem:[#allocation2 + $0x3e8] sm:$0xff] %vm49_vm1, %v19750_v5  ;;  %2501 = vmatpush.msrb.mxu1 %v2433_v56  ;;  %v13751_v38 = vpop.f32.mrf.mxu2 }
 0x218   :  { %578 = vst.msk [vmem:[#allocation2 + $0x3f0] sm:$0xff] %vm49_vm1, %v19750_v5  ;;  %v128_v56 = vpop.f32.mrf.mxu0 }
 0x219   :  { %19963 = vst [vmem:[#allocation15_spill] sm:$0xff] %v13541_v15  ;;  %v13565_v15 = vpop.f32.mrf.mxu3  ;;  %9933 = vrot.lane.b32.xlu0 %v13655_v42, %s11245_s21 }
 0x21a   :  { %19964 = vst [vmem:[#allocation30_spill] sm:$0xff] %v13543_v23  ;;  %v13672_v53 = vadd.f32 %v13565_v15, %v13379_v51  ;;  %v9073_v51 = vld [vmem:[%s19713_s0 + $0x1ca] sm:$0xff]  ;;  %v9074_v15 = vld [vmem:[%s19713_s0 + $0x1d2] sm:$0xff] }
 0x21b   :  { %579 = vst.msk [vmem:[#allocation2 + $0x3f8] sm:$0xff] %vm49_vm1, %v19750_v5  ;;  %9943 = vrot.lane.b32.xlu2 %v13644_v62, %s11245_s21 }
 0x21c   :  { %580 = vst.msk [vmem:[#allocation2 + $0x400] sm:$0xff] %vm49_vm1, %v19750_v5 }
 0x21d   :  { %19965 = vst [vmem:[#allocation25_spill] sm:$0xff] %v13569_v19  ;;  %v13653_v19 = vadd.f32 %v13420_v4, %v13323_v9  ;;  %v169_v9 = vsub.f32 0.0, %v125_v48  ;;  %v9885_v4 = vunpack.i.l.bf16 %v13079_v30  ;;  %v13721_v48 = vpop.permute.xlu1 %2105 }
 0x21e   :  { %581 = vst.msk [vmem:[#allocation2 + $0x408] sm:$0xff] %vm49_vm1, %v19750_v5 }
 0x21f   :  { %582 = vst.msk [vmem:[#allocation2 + $0x410] sm:$0xff] %vm49_vm1, %v19750_v5  ;;  %v187_v0 = vmul.f32 1.442695, %v169_v9  ;;  %v231_v9 = vmul.f32 0.5, %v215_v36  ;;  %v2432_v36 = vld [vmem:[%s19716_s3 + $0xe8] sm:$0xff] }
 0x220   :  { %583 = vst.msk [vmem:[#allocation2 + $0x418] sm:$0xff] %vm49_vm1, %v19750_v5  ;;  %2502 = vmatpush.msrb.mxu1 %v2432_v36 }
 0x221   :  { %584 = vst.msk [vmem:[#allocation2 + $0x420] sm:$0xff] %vm49_vm1, %v19750_v5  ;;  %v1534_v21 = vpop.f32.mrf.mxu3  ;;  %11130 = vpow2.f32 %v187_v0 }
 0x222   :  { %585 = vst.msk [vmem:[#allocation2 + $0x428] sm:$0xff] %vm49_vm1, %v19750_v5  ;;  %v13683_v41 = vadd.f32 %v1534_v21, %v13439_v29  ;;  %v9766_v29 = vunpack.i.h.bf16 %v12762_v27  ;;  %v9072_v27 = vld [vmem:[%s19713_s0 + $0x1ba] sm:$0xff]  ;;  %v13719_v21 = vpop.permute.xlu2 %2157 }
 0x223   :  { %586 = vst.msk [vmem:[#allocation2 + $0x430] sm:$0xff] %vm49_vm1, %v19750_v5  ;;  %v9805_v5 = vunpack.i.l.bf16 %v13040_v25  ;;  %v9846_v25 = vunpack.i.h.bf16 %v13086_v8 }
 0x224   :  { %19966 = vst [vmem:[#allocation27_spill] sm:$0xff] %v13614_v45  ;;  %v9845_v45 = vunpack.i.l.bf16 %v13086_v8  ;;  %v1572_v0 = vmax.f32 %v13683_v41, 0.0 }
 0x225   :  { %19967 = vst [vmem:[#allocation20_spill] sm:$0xff] %v13616_v52  ;;  %v2295_v1 = vsel %vm1287_vm4, %v2279_v20, %v9805_v5  ;;  %v9070_v20 = vld [vmem:[%s19713_s0 + $0x261] sm:$0xff] }
 0x226   :  { %587 = vst.msk [vmem:[#allocation2 + $0x438] sm:$0xff] %vm49_vm1, %v19968_v7  ;;  %v2311_v5 = vsel %vm279_vm0, %v2295_v1, %v9845_v45  ;;  %v1569_v45 = vmax.f32 %v13653_v19, 0.0  ;;  %v1570_v19 = vmax.f32 %v13664_v18, 0.0  ;;  %v1571_v18 = vmax.f32 %v13672_v53, 0.0  ;;  %v13735_v1 = vpop.permute.xlu0 %2103 }
 0x227   :  { %19969 = vst [vmem:[#allocation22_spill] sm:$0xff] %v13636_v31  ;;  %v2327_v37 = vsel %vm1320_vm5, %v2311_v5, %v9885_v4  ;;  %v9952_v53 = vpack.i.bf16 %v9072_v27, %v9071_v6  ;;  %v2431_v4 = vld [vmem:[%s19716_s3 + $0xe0] sm:$0xff]  ;;  %v9730_v5 = vunpack.i.l.bf16 %v12798_v54  ;;  %v13755_v41 = vpack.i.bf16 %v9070_v20, %v9069_v49 }
 0x228   :  { %588 = vst.msk [vmem:[#allocation2 + $0x440] sm:$0xff] %vm49_vm1, %v19968_v7  ;;  %v2343_v8 = vsel %vm1337_vm6, %v2327_v37, %v13557_v22  ;;  %v2280_v6 = vsel %vm1270_vm2, %v2264_v3, %v9766_v29  ;;  %v170_v27 = vsub.f32 0.0, %v128_v56  ;;  %v9886_v37 = vunpack.i.h.bf16 %v13079_v30  ;;  %2503 = vmatpush.msrb.mxu1 %v2431_v4  ;;  %v11131_v29 = vpop.eup %11130  ;;  %v9080_v3 = vld [vmem:[%s19713_s0 + $0x21a] sm:$0xff] }
 0x229   :  { %589 = vst.msk [vmem:[#allocation2 + $0x448] sm:$0xff] %vm49_vm1, %v19968_v7  ;;  %2463 = vmatmul.f32.gmra.mxu0 %v2343_v8  ;;  %v2296_v49 = vsel %vm1287_vm4, %v2280_v6, %v9806_v57  ;;  %v264_v20 = vmul.f32 %v13514_v43, %v232_v59  ;;  %9953 = vrot.lane.b32.xlu1 %v9952_v53, %s11246_s26  ;;  %v9079_v43 = vld [vmem:[%s19713_s0 + $0x212] sm:$0xff]  ;;  %v11152_v59 = vld [vmem:[%s19713_s0 + $0x108] sm:$0xff]  ;;  %v13802_v8 = vpop.permute.xlu1 %2111  ;;  %v9810_v4 = vunpack.i.l.bf16 %v12831_v24 }
 0x22a   :  { %590 = vst.msk [vmem:[#allocation2 + $0x450] sm:$0xff] %vm49_vm1, %v19968_v7  ;;  %v2312_v30 = vsel %vm279_vm0, %v2296_v49, %v9846_v25  ;;  %v189_v57 = vmul.f32 1.442695, %v170_v27  ;;  %9948 = vrot.lane.b32.xlu0 %v13755_v41, %s11245_s21  ;;  %v217_v25 = vadd.f32 1.0, %v11131_v29  ;;  %v2265_v36 = vsel %vm49_vm1, %v11152_v59, %v9730_v5  ;;  %v9076_v53 = vld [vmem:[%s19713_s0 + $0x1ea] sm:$0xff]  ;;  %v2427_v49 = vld [vmem:[%s19716_s3 + $0xc0] sm:$0xff] }
 0x22b   :  { %591 = vst.msk [vmem:[#allocation2 + $0x458] sm:$0xff] %vm49_vm1, %v19968_v7  ;;  %v2328_v56 = vsel %vm1320_vm5, %v2312_v30, %v9886_v37  ;;  %v2428_v6 = vld [vmem:[%s19716_s3 + $0xc8] sm:$0xff]  ;;  %v9850_v27 = vunpack.i.l.bf16 %v13287_v44  ;;  %v9731_v59 = vunpack.i.h.bf16 %v12798_v54 }
 0x22c   :  { %592 = vst.msk [vmem:[#allocation2 + $0x460] sm:$0xff] %vm49_vm1, %v19968_v7  ;;  %11132 = vpow2.f32 %v189_v57 }
 0x22d   :  { %593 = vst.msk [vmem:[#allocation2 + $0x468] sm:$0xff] %vm49_vm1, %v19968_v7 }
 0x22e   :  { %594 = vst.msk [vmem:[#allocation2 + $0x470] sm:$0xff] %vm49_vm1, %v19968_v7 }
 0x22f   :  { %19970 = vst [vmem:[#allocation21_spill] sm:$0xff] %v13719_v21  ;;  %v13745_v21 = vpack.i.bf16 %v9074_v15, %v9073_v51  ;;  %v9770_v51 = vunpack.i.l.bf16 %v12870_v46  ;;  %v263_v15 = vmul.f32 %v13462_v26, %v231_v9  ;;  %v13771_v26 = vld [vmem:[%s19714_s1 + $0x20] sm:$0xff] }
 0x230   :  { %595 = vst.msk [vmem:[#allocation2 + $0x478] sm:$0xff] %vm49_vm1, %v19968_v7  ;;  %v1537_v7 = vpop.f32.mrf.mxu3  ;;  %v9078_v9 = vld [vmem:[%s19713_s0 + $0x202] sm:$0xff]  ;;  %8755 = vmatmul.msk.f32.gmra.mxu1 %vm279_vm0, %v13771_v26 }
 0x231   :  { %1585 = vst.msk [vmem:[#allocation2 + $0x30] sm:$0xff] %vm49_vm1, %v1568_v58  ;;  %v1538_v58 = vadd.f32 %v1537_v7, %v13524_v2  ;;  %9958 = vrot.lane.b32.xlu2 %v13745_v21, %s11246_s26  ;;  %v9075_v7 = vld [vmem:[%s19713_s0 + $0x1e2] sm:$0xff]  ;;  %v2281_v5 = vsel %vm1270_vm2, %v2265_v36, %v9770_v51  ;;  %v2344_v51 = vsel %vm1337_vm6, %v2328_v56, %v13543_v23  ;;  %v9084_v56 = vld [vmem:[%s19713_s0 + $0x24a] sm:$0xff] }
 0x232   :  { %1586 = vst.msk [vmem:[#allocation2 + $0x48] sm:$0xff] %vm49_vm1, %v1569_v45  ;;  %v2430_v45 = vld [vmem:[%s19716_s3 + $0xd8] sm:$0xff]  ;;  %2466 = vmatmul.f32.gmra.mxu0 %v2344_v51  ;;  %v13840_v30 = vpack.i.bf16 %v9076_v53, %v9075_v7  ;;  %v9086_v53 = vld [vmem:[%s19713_s0 + $0x262] sm:$0xff] }
 0x233   :  { %1587 = vst.msk [vmem:[#allocation2 + $0x50] sm:$0xff] %vm49_vm1, %v1570_v19  ;;  %v1573_v2 = vmax.f32 %v1538_v58, 0.0  ;;  %v9077_v19 = vld [vmem:[%s19713_s0 + $0x1fa] sm:$0xff]  ;;  %2504 = vmatpush.msrb.mxu1 %v2430_v45  ;;  %v13818_v58 = vpop.permute.xlu0 %2109 }
 0x234   :  { %1588 = vst.msk [vmem:[#allocation2 + $0x68] sm:$0xff] %vm49_vm1, %v1571_v18  ;;  %v2429_v18 = vld [vmem:[%s19716_s3 + $0xd0] sm:$0xff]  ;;  %v13833_v37 = vpack.i.bf16 %v9078_v9, %v9077_v19  ;;  %v2297_v9 = vsel %vm1287_vm4, %v2281_v5, %v9810_v4  ;;  %v9085_v7 = vld [vmem:[%s19713_s0 + $0x25a] sm:$0xff]  ;;  %9963 = vrot.lane.b32.xlu0 %v13840_v30, %s11246_s26  ;;  %v9083_v5 = vld [vmem:[%s19713_s0 + $0x242] sm:$0xff] }
 0x235   :  { %1589 = vst.msk [vmem:[#allocation2 + $0x70] sm:$0xff] %vm49_vm1, %v1572_v0  ;;  %v13800_v0 = vpop.permute.xlu2 %2163  ;;  %2505 = vmatpush.msrb.mxu1 %v2429_v18  ;;  %v2313_v36 = vsel %vm279_vm0, %v2297_v9, %v9850_v27  ;;  %v9771_v27 = vunpack.i.h.bf16 %v12870_v46  ;;  %v2424_v46 = vld [vmem:[%s19716_s3 + $0xa8] sm:$0xff]  ;;  %v13907_v9 = vpack.i.bf16 %v9086_v53, %v9085_v7  ;;  %v9851_v53 = vunpack.i.h.bf16 %v13287_v44 }
 0x236   :  { %1590 = vst.msk [vmem:[#allocation2 + $0x88] sm:$0xff] %vm49_vm1, %v1573_v2  ;;  %v13831_v2 = vpack.i.bf16 %v9080_v3, %v9079_v43  ;;  %v2426_v43 = vld [vmem:[%s19716_s3 + $0xb8] sm:$0xff]  ;;  %v13846_v3 = vpop.f32.mrf.mxu2  ;;  %9968 = vrot.lane.b32.xlu1 %v13833_v37, %s11246_s26 }
 0x237   :  { %19971 = vst [vmem:[#allocation32_spill] sm:$0xff] %v13800_v0  ;;  %2506 = vmatpush.msrb.mxu1 %v2428_v6  ;;  %v2425_v6 = vld [vmem:[%s19716_s3 + $0xb0] sm:$0xff] }
 0x238   :  { %280 = vst.msk [vmem:[%s19722_s9] sm:$0xff] %vm279_vm0, %v263_v15  ;;  %v233_v15 = vmul.f32 0.5, %v217_v25  ;;  %v1540_v45 = vpop.f32.mrf.mxu3  ;;  %v131_v25 = vpop.f32.mrf.mxu0 }
 0x239   :  { %281 = vst.msk [vmem:[%s19722_s9 + $0x8] sm:$0xff] %vm279_vm0, %v264_v20  ;;  %v9890_v20 = vunpack.i.l.bf16 %v13369_v61  ;;  %v1541_v29 = vadd.f32 %v1540_v45, %v13631_v50  ;;  %v171_v18 = vsub.f32 0.0, %v131_v25  ;;  %v13856_v50 = vld [vmem:[%s19714_s1 + $0x28] sm:$0xff]  ;;  %2507 = vmatpush.msrb.mxu1 %v2427_v49  ;;  %9973 = vrot.lane.b32.xlu2 %v13831_v2, %s11246_s26  ;;  %v13886_v45 = vpop.permute.xlu1 %2149  ;;  %v11153_v25 = vld [vmem:[%s19713_s0 + $0x110] sm:$0xff] }
 0x23a   :  { %v265_v57 = vmul.f32 %v13585_v28, %v233_v15  ;;  %v11133_v28 = vpop.eup %11132  ;;  %v9081_v49 = vld [vmem:[%s19713_s0 + $0x22a] sm:$0xff]  ;;  %8756 = vmatmul.msk.f32.gmra.mxu1 %vm279_vm0, %v13856_v50 }
 0x23b   :  { %v1574_v19 = vmax.f32 %v1541_v29, 0.0  ;;  %v191_v4 = vmul.f32 1.442695, %v171_v18  ;;  %v2329_v54 = vsel %vm1320_vm5, %v2313_v36, %v9890_v20  ;;  %v218_v15 = vadd.f32 1.0, %v11133_v28  ;;  %2508 = vmatpush.msrb.mxu1 %v2426_v43  ;;  %v9082_v20 = vld [vmem:[%s19713_s0 + $0x232] sm:$0xff]  ;;  %v13899_v29 = vpop.permute.xlu0 %2147  ;;  %v2423_v36 = vld [vmem:[%s19716_s3 + $0xa0] sm:$0xff] }
 0x23c   :  { %282 = vst.msk [vmem:[%s19722_s9 + $0x10] sm:$0xff] %vm279_vm0, %v265_v57  ;;  %v2266_v18 = vsel %vm49_vm1, %v11153_v25, %v9731_v59  ;;  %v2345_v43 = vsel %vm1337_vm6, %v2329_v54, %v13363_v17  ;;  %v13909_v28 = vpack.i.bf16 %v9084_v56, %v9083_v5  ;;  %v2422_v56 = vld [vmem:[%s19716_s3 + $0x98] sm:$0xff] }
 0x23d   :  { %1591 = vst.msk [vmem:[#allocation2 + $0x90] sm:$0xff] %vm49_vm1, %v1574_v19  ;;  %v13884_v51 = vpop.permute.xlu2 %2169  ;;  %11134 = vpow2.f32 %v191_v4  ;;  %v234_v57 = vmul.f32 0.5, %v218_v15  ;;  %2509 = vmatpush.msrb.mxu1 %v2425_v6  ;;  %v9811_v4 = vunpack.i.h.bf16 %v12831_v24  ;;  %2469 = vmatmul.f32.gmra.mxu0 %v2345_v43  ;;  %v13916_v6 = vpack.i.bf16 %v9082_v20, %v9081_v49 }
 0x23e   :  { %19972 = vst [vmem:[#allocation31_spill] sm:$0xff] %v13884_v51  ;;  %v2282_v7 = vsel %vm1270_vm2, %v2266_v18, %v9771_v27  ;;  %v9891_v24 = vunpack.i.h.bf16 %v13369_v61  ;;  %9983 = vrot.lane.b32.xlu1 %v13909_v28, %s11246_s26  ;;  %v13942_v61 = vld [vmem:[%s19713_s0 + $0x1f8] sm:$0xff]  ;;  %v13947_v27 = vld [vmem:[%s19713_s0 + $0x200] sm:$0xff]  ;;  %v13949_v20 = vpop.f32.mrf.mxu2  ;;  %v13963_v18 = vld [vmem:[%s19713_s0 + $0x1e8] sm:$0xff] }
 0x23f   :  { %v266_v59 = vmul.f32 %v13678_v12, %v234_v57  ;;  %2510 = vmatpush.msrb.mxu1 %v2424_v46  ;;  %v13932_v12 = vld [vmem:[%s19714_s1 + $0x30] sm:$0xff]  ;;  %19973 = vst [vmem:[#allocation28_spill] sm:$0xff] %v13947_v27  ;;  %9978 = vrot.lane.b32.xlu0 %v13916_v6, %s11246_s26  ;;  %v2298_v46 = vsel %vm1287_vm4, %v2282_v7, %v9811_v4  ;;  %v13958_v57 = vld [vmem:[%s19713_s0 + $0x1e0] sm:$0xff] }
 0x240   :  { %v1543_v19 = vpop.f32.mrf.mxu3  ;;  %v134_v54 = vpop.f32.mrf.mxu0  ;;  %19974 = vst [vmem:[#allocation33_spill] sm:$0xff] %v13958_v57  ;;  %v9088_v7 = vld [vmem:[%s19713_s0 + $0x1d0] sm:$0xff]  ;;  %v10002_v0 = vpack.i.bf16 %v13947_v27, %v13942_v61  ;;  %v9997_v17 = vpack.i.bf16 %v13963_v18, %v13958_v57  ;;  %v9895_v27 = vunpack.i.l.bf16 %v13365_v63 }
 0x241   :  { %v1544_v15 = vadd.f32 %v1543_v19, %v13751_v38  ;;  %v172_v5 = vsub.f32 0.0, %v134_v54  ;;  %283 = vst.msk [vmem:[%s19722_s9 + $0x18] sm:$0xff] %vm279_vm0, %v266_v59  ;;  %2511 = vmatpush.msrb.mxu1 %v2423_v36  ;;  %v9735_v38 = vunpack.i.l.bf16 %v12697_v60  ;;  %9988 = vrot.lane.b32.xlu2 %v13907_v9, %s11246_s26  ;;  %v2421_v19 = vld [vmem:[%s19716_s3 + $0x90] sm:$0xff]  ;;  %v9775_v36 = vunpack.i.l.bf16 %v12935_v47  ;;  %v13971_v4 = vpop.permute.xlu1 %2155  ;;  %v9087_v54 = vld [vmem:[%s19713_s0 + $0x1c8] sm:$0xff] }
 0x242   :  { %v2314_v59 = vsel %vm279_vm0, %v2298_v46, %v9851_v53  ;;  %8757 = vmatmul.msk.f32.gmra.mxu1 %vm279_vm0, %v13932_v12  ;;  %v11154_v46 = vld [vmem:[%s19713_s0 + $0x120] sm:$0xff] }
 0x243   :  { %v1575_v25 = vmax.f32 %v1544_v15, 0.0  ;;  %v11135_v44 = vpop.eup %11134  ;;  %v193_v49 = vmul.f32 1.442695, %v172_v5  ;;  %2512 = vmatpush.msrb.mxu1 %v2422_v56  ;;  %v2420_v5 = vld [vmem:[%s19716_s3 + $0x88] sm:$0xff]  ;;  %v9815_v56 = vunpack.i.l.bf16 %v13003_v33  ;;  %v2330_v53 = vsel %vm1320_vm5, %v2314_v59, %v9891_v24  ;;  %v2419_v24 = vld [vmem:[%s19716_s3 + $0x80] sm:$0xff] }
 0x244   :  { %v219_v43 = vadd.f32 1.0, %v11135_v44 }
 0x245   :  { %1592 = vst.msk [vmem:[#allocation2 + $0xa8] sm:$0xff] %vm49_vm1, %v1575_v25  ;;  %v13969_v15 = vpop.permute.xlu2 %2175  ;;  %11136 = vpow2.f32 %v193_v49  ;;  %v13986_v25 = vpop.permute.xlu0 %2153  ;;  %2513 = vmatpush.msrb.mxu1 %v2421_v19  ;;  %v2346_v49 = vsel %vm1337_vm6, %v2330_v53, %v13636_v31  ;;  %v9992_v19 = vpack.i.bf16 %v9088_v7, %v9087_v54  ;;  %v14030_v54 = vld [vmem:[%s19713_s0 + $0x248] sm:$0xff] }
 0x246   :  { %19975 = vst [vmem:[#allocation29_spill] sm:$0xff] %v13969_v15  ;;  %v235_v44 = vmul.f32 0.5, %v219_v43  ;;  %v2267_v15 = vsel %vm49_vm1, %v11154_v46, %v9735_v38  ;;  %2472 = vmatmul.f32.gmra.mxu0 %v2346_v49  ;;  %v9855_v46 = vunpack.i.l.bf16 %v12980_v35  ;;  %9998 = vrot.lane.b32.xlu1 %v9997_v17, %s11247_s24  ;;  %v14035_v17 = vld [vmem:[%s19713_s0 + $0x228] sm:$0xff]  ;;  %v1487_v49 = vpop.f32.mrf.mxu2 }
 0x247   :  { %2514 = vmatpush.msrb.mxu1 %v2420_v5  ;;  %v2283_v53 = vsel %vm1270_vm2, %v2267_v15, %v9775_v36  ;;  %v9736_v15 = vunpack.i.h.bf16 %v12697_v60  ;;  %9993 = vrot.lane.b32.xlu0 %v9992_v19, %s11247_s24  ;;  %19976 = vst [vmem:[#allocation34_spill] sm:$0xff] %v14030_v54 }
 0x248   :  { %v1546_v51 = vpop.f32.mrf.mxu3  ;;  %v267_v38 = vmul.f32 %v13771_v26, %v235_v44  ;;  %v137_v59 = vpop.f32.mrf.mxu0  ;;  %v2299_v57 = vsel %vm1287_vm4, %v2283_v53, %v9815_v56  ;;  %v14015_v26 = vld [vmem:[%s19714_s1 + $0x38] sm:$0xff]  ;;  %19977 = vst [vmem:[#allocation35_spill] sm:$0xff] %v14035_v17  ;;  %v14051_v56 = vld [vmem:[%s19713_s0 + $0x210] sm:$0xff] }
 0x249   :  { %v1547_v43 = vadd.f32 %v1546_v51, %v13846_v3  ;;  %v173_v31 = vsub.f32 0.0, %v137_v59  ;;  %2515 = vmatpush.msrb.mxu1 %v2419_v24  ;;  %10003 = vrot.lane.b32.xlu2 %v10002_v0, %s11247_s24  ;;  %v14022_v51 = vld [vmem:[%s19713_s0 + $0x240] sm:$0xff]  ;;  %v14045_v7 = vpop.permute.xlu1 %2161  ;;  %v2315_v5 = vsel %vm279_vm0, %v2299_v57, %v9855_v46  ;;  %v14056_v44 = vld [vmem:[%s19713_s0 + $0x218] sm:$0xff] }
 0x24a   :  { %284 = vst.msk [vmem:[%s19722_s9 + $0x20] sm:$0xff] %vm279_vm0, %v267_v38  ;;  %8758 = vmatmul.msk.f32.gmra.mxu1 %vm279_vm0, %v14015_v26  ;;  %v2331_v57 = vsel %vm1320_vm5, %v2315_v5, %v9895_v27  ;;  %v10017_v59 = vpack.i.bf16 %v14030_v54, %v14022_v51  ;;  %v9740_v54 = vunpack.i.l.bf16 %v12811_v11 }
 0x24b   :  { %v1576_v23 = vmax.f32 %v1547_v43, 0.0  ;;  %v11137_v3 = vpop.eup %11136  ;;  %v195_v36 = vmul.f32 1.442695, %v173_v31  ;;  %v14040_v31 = vld [vmem:[%s19713_s0 + $0x230] sm:$0xff]  ;;  %19978 = vst [vmem:[#allocation36_spill] sm:$0xff] %v14045_v7  ;;  %v2347_v19 = vsel %vm1337_vm6, %v2331_v57, %v13616_v52  ;;  %v9856_v57 = vunpack.i.h.bf16 %v12980_v35 }
 0x24c   :  { %v220_v60 = vadd.f32 1.0, %v11137_v3  ;;  %v10012_v53 = vpack.i.bf16 %v14040_v31, %v14035_v17  ;;  %v10007_v3 = vpack.i.bf16 %v14056_v44, %v14051_v56  ;;  %v9896_v7 = vunpack.i.h.bf16 %v13365_v63  ;;  %v14094_v35 = vld [vmem:[%s19713_s0 + $0x270] sm:$0xff]  ;;  %v14099_v63 = vld [vmem:[%s19713_s0 + $0x278] sm:$0xff] }
 0x24d   :  { %1593 = vst.msk [vmem:[#allocation2 + $0xb0] sm:$0xff] %vm49_vm1, %v1576_v23  ;;  %v9776_v23 = vunpack.i.h.bf16 %v12935_v47  ;;  %v14043_v0 = vpop.permute.xlu2 %2213  ;;  %11138 = vpow2.f32 %v195_v36  ;;  %v9816_v47 = vunpack.i.h.bf16 %v13003_v33  ;;  %v14061_v24 = vpop.permute.xlu0 %2159  ;;  %v11155_v33 = vld [vmem:[%s19713_s0 + $0x128] sm:$0xff] }
 0x24e   :  { %v236_v43 = vmul.f32 0.5, %v220_v60  ;;  %v2268_v46 = vsel %vm49_vm1, %v11155_v33, %v9736_v15  ;;  %2475 = vmatmul.f32.gmra.mxu0 %v2347_v19  ;;  %10013 = vrot.lane.b32.xlu1 %v10012_v53, %s11247_s24  ;;  %v14110_v19 = vld [vmem:[%s19713_s0 + $0x258] sm:$0xff]  ;;  %v9820_v33 = vunpack.i.l.bf16 %v13090_v34 }
 0x24f   :  { %v2284_v5 = vsel %vm1270_vm2, %v2268_v46, %v9776_v23  ;;  %10008 = vrot.lane.b32.xlu0 %v10007_v3, %s11247_s24 }
 0x250   :  { %v1549_v38 = vpop.f32.mrf.mxu3  ;;  %v268_v36 = vmul.f32 %v13856_v50, %v236_v43  ;;  %v140_v60 = vpop.f32.mrf.mxu0  ;;  %v2300_v15 = vsel %vm1287_vm4, %v2284_v5, %v9816_v47  ;;  %v9780_v47 = vunpack.i.l.bf16 %v12784_v39 }
 0x251   :  { %v1550_v27 = vadd.f32 %v1549_v38, %v13949_v20  ;;  %v174_v52 = vsub.f32 0.0, %v140_v60  ;;  %10018 = vrot.lane.b32.xlu2 %v10017_v59, %s11247_s24  ;;  %v14115_v38 = vld [vmem:[%s19713_s0 + $0x260] sm:$0xff]  ;;  %v11156_v59 = vld [vmem:[%s19713_s0 + $0x138] sm:$0xff] }
 0x252   :  { %285 = vst.msk [vmem:[%s19722_s9 + $0x28] sm:$0xff] %vm279_vm0, %v268_v36  ;;  %v2269_v53 = vsel %vm49_vm1, %v11156_v59, %v9740_v54  ;;  %v9860_v36 = vunpack.i.l.bf16 %v13126_v13  ;;  %v10022_v54 = vpack.i.bf16 %v14115_v38, %v14110_v19 }
 0x253   :  { %v1577_v17 = vmax.f32 %v1550_v27, 0.0  ;;  %v11139_v20 = vpop.eup %11138  ;;  %v197_v50 = vmul.f32 1.442695, %v174_v52  ;;  %v14104_v52 = vpop.permute.xlu1 %2167 }
 0x254   :  { %v221_v23 = vadd.f32 1.0, %v11139_v20  ;;  %19979 = vst [vmem:[#allocation37_spill] sm:$0xff] %v14104_v52 }
 0x255   :  { %1594 = vst.msk [vmem:[#allocation2 + $0xc8] sm:$0xff] %vm49_vm1, %v1577_v17  ;;  %v14102_v43 = vpop.permute.xlu2 %2219  ;;  %v2316_v17 = vsel %vm279_vm0, %v2300_v15, %v9856_v57  ;;  %11140 = vpow2.f32 %v197_v50  ;;  %v14122_v46 = vpop.permute.xlu0 %2165  ;;  %v10027_v57 = vpack.i.bf16 %v14099_v63, %v14094_v35 }
 0x256   :  { %v2332_v27 = vsel %vm1320_vm5, %v2316_v17, %v9896_v7  ;;  %v237_v3 = vmul.f32 0.5, %v221_v23  ;;  %v1490_v15 = vpop.f32.mrf.mxu2  ;;  %v2285_v7 = vsel %vm1270_vm2, %v2269_v53, %v9780_v47  ;;  %v9741_v17 = vunpack.i.h.bf16 %v12811_v11 }
 0x257   :  { %v2348_v60 = vsel %vm1337_vm6, %v2332_v27, %v13410_v32  ;;  %v9900_v27 = vunpack.i.l.bf16 %v13131_v14  ;;  %v2301_v32 = vsel %vm1287_vm4, %v2285_v7, %v9820_v33  ;;  %10028 = vrot.lane.b32.xlu1 %v10027_v57, %s11247_s24  ;;  %10023 = vrot.lane.b32.xlu0 %v10022_v54, %s11247_s24  ;;  %v9781_v53 = vunpack.i.h.bf16 %v12784_v39 }
 0x258   :  { %v1552_v5 = vpop.f32.mrf.mxu3  ;;  %2478 = vmatmul.f32.gmra.mxu0 %v2348_v60  ;;  %v269_v50 = vmul.f32 %v13932_v12, %v237_v3  ;;  %v143_v59 = vpop.f32.mrf.mxu0  ;;  %v2317_v12 = vsel %vm279_vm0, %v2301_v32, %v9860_v36  ;;  %v9821_v32 = vunpack.i.h.bf16 %v13090_v34  ;;  %v9861_v39 = vunpack.i.h.bf16 %v13126_v13 }
 0x259   :  { %v1553_v20 = vadd.f32 %v1552_v5, %v1487_v49  ;;  %v175_v23 = vsub.f32 0.0, %v143_v59  ;;  %10033 = vrot.lane.b32.xlu2 %v13574_v55, %s11248_s11  ;;  %v11157_v55 = vld [vmem:[%s19713_s0 + $0x140] sm:$0xff]  ;;  %v9901_v7 = vunpack.i.h.bf16 %v13131_v14 }
 0x25a   :  { %286 = vst.msk [vmem:[%s19722_s9 + $0x30] sm:$0xff] %vm279_vm0, %v269_v50  ;;  %v2270_v60 = vsel %vm49_vm1, %v11157_v55, %v9741_v17 }
 0x25b   :  { %v1578_v52 = vmax.f32 %v1553_v20, 0.0  ;;  %v11141_v49 = vpop.eup %11140  ;;  %v199_v47 = vmul.f32 1.442695, %v175_v23  ;;  %v14150_v3 = vpop.permute.xlu1 %2173  ;;  %v2286_v59 = vsel %vm1270_vm2, %v2270_v60, %v9781_v53 }
 0x25c   :  { %v222_v11 = vadd.f32 1.0, %v11141_v49  ;;  %v2302_v17 = vsel %vm1287_vm4, %v2286_v59, %v9821_v32 }
 0x25d   :  { %1595 = vst.msk [vmem:[#allocation2 + $0xd0] sm:$0xff] %vm49_vm1, %v1578_v52  ;;  %v14148_v33 = vpop.permute.xlu2 %2225  ;;  %11142 = vpow2.f32 %v199_v47  ;;  %v14157_v36 = vpop.permute.xlu0 %2171  ;;  %v2333_v52 = vsel %vm1320_vm5, %v2317_v12, %v9900_v27  ;;  %v19981_v27 = vld [vmem:[#allocation25_spill] sm:$0xff]  ;;  %v19982_v12 = vld [vmem:[#allocation14_spill] sm:$0xff] }
 0x25e   :  { %v238_v5 = vmul.f32 0.5, %v222_v11  ;;  %v2349_v57 = vsel %vm1337_vm6, %v2333_v52, %v13735_v1  ;;  %v1493_v34 = vpop.f32.mrf.mxu2  ;;  %v9785_v47 = vunpack.i.l.bf16 %v19982_v12  ;;  %v19983_v11 = vld [vmem:[#allocation9_spill] sm:$0xff] }
 0x25f   :  { %10043 = vrot.lane.b32.xlu1 %v13567_v40, %s11248_s11  ;;  %10038 = vrot.lane.b32.xlu0 %v19981_v27, %s11248_s11  ;;  %v2355_v53 = vsel %vm1354_vm8, %v19983_v11, %v13899_v29  ;;  %v255_v40 = vld [vmem:[%s19714_s1 + $0x40] sm:$0xff]  ;;  %v9786_v11 = vunpack.i.h.bf16 %v19982_v12 }
 0x260   :  { %v1555_v20 = vpop.f32.mrf.mxu3  ;;  %2481 = vmatmul.f32.gmra.mxu0 %v2349_v57  ;;  %v270_v50 = vmul.f32 %v14015_v26, %v238_v5  ;;  %v2318_v26 = vsel %vm279_vm0, %v2302_v17, %v9861_v39  ;;  %v11158_v57 = vld [vmem:[%s19713_s0 + $0x150] sm:$0xff]  ;;  %v19985_v17 = vld [vmem:[#allocation19_spill] sm:$0xff] }
 0x261   :  { %v1556_v54 = vadd.f32 %v1555_v20, %v1490_v15  ;;  %10048 = vrot.lane.b32.xlu2 %v13655_v42, %s11248_s11  ;;  %v19980_v15 = vld [vmem:[#allocation10_spill] sm:$0xff]  ;;  %v2334_v52 = vsel %vm1320_vm5, %v2318_v26, %v9901_v7  ;;  %v19986_v26 = vld [vmem:[#allocation17_spill] sm:$0xff] }
 0x262   :  { %287 = vst.msk [vmem:[%s19722_s9 + $0x38] sm:$0xff] %vm279_vm0, %v270_v50  ;;  %v9745_v14 = vunpack.i.l.bf16 %v19980_v15  ;;  %v2350_v39 = vsel %vm1337_vm6, %v2334_v52, %v13721_v48  ;;  %v9905_v27 = vunpack.i.l.bf16 %v19986_v26  ;;  %v19988_v52 = vld [vmem:[#allocation24_spill] sm:$0xff] }
 0x263   :  { %v1579_v23 = vmax.f32 %v1556_v54, 0.0  ;;  %v11143_v13 = vpop.eup %11142  ;;  %v2212_v55 = vpop.permute.xlu1 %2211  ;;  %v19984_v54 = vld [vmem:[#allocation16_spill] sm:$0xff] }
 0x264   :  { %v223_v49 = vadd.f32 1.0, %v11143_v13  ;;  %v2371_v60 = vsel %vm1371_vm10, %v2355_v53, %v2212_v55  ;;  %v2271_v20 = vsel %vm49_vm1, %v11158_v57, %v9745_v14  ;;  %v9825_v50 = vunpack.i.l.bf16 %v19984_v54  ;;  %v19987_v53 = vld [vmem:[#allocation23_spill] sm:$0xff] }
 0x265   :  { %1596 = vst.msk [vmem:[#allocation2 + $0xe8] sm:$0xff] %vm49_vm1, %v1579_v23  ;;  %v14184_v42 = vpop.permute.xlu2 %2231  ;;  %v14190_v32 = vpop.permute.xlu0 %2177  ;;  %9023 = vmatmul.msk.f32.vlgmr.msrb.gmra.mxu1 %vm1388_vm9, %v2371_v60  ;;  %v2287_v7 = vsel %vm1270_vm2, %v2271_v20, %v9785_v47  ;;  %v9865_v13 = vunpack.i.l.bf16 %v19985_v17  ;;  %v2356_v55 = vsel %vm1354_vm8, %v19987_v53, %v13886_v45  ;;  %v9826_v20 = vunpack.i.h.bf16 %v19984_v54  ;;  %v19989_v54 = vld [vmem:[#allocation6_spill] sm:$0xff]  ;;  %v19993_v53 = vld [vmem:[#allocation7_spill] sm:$0xff] }
 0x266   :  { %v239_v5 = vmul.f32 0.5, %v223_v49  ;;  %v1496_v14 = vpop.f32.mrf.mxu2  ;;  %v2303_v47 = vsel %vm1287_vm4, %v2287_v7, %v9825_v50  ;;  %v2372_v45 = vsel %vm1371_vm10, %v2356_v55, %v14043_v0  ;;  %v9906_v7 = vunpack.i.h.bf16 %v19986_v26  ;;  %v19992_v26 = vld [vmem:[#allocation26_spill] sm:$0xff] }
 0x267   :  { %10058 = vrot.lane.b32.xlu1 %v13644_v62, %s11248_s11  ;;  %10053 = vrot.lane.b32.xlu0 %v13646_v16, %s11248_s11  ;;  %v2319_v62 = vsel %vm279_vm0, %v2303_v47, %v9865_v13  ;;  %v14234_v16 = vld [vmem:[%s19713_s0 + $0x279] sm:$0xff]  ;;  %v9830_v55 = vunpack.i.l.bf16 %v19993_v53 }
 0x268   :  { %v1558_v29 = vpop.f32.mrf.mxu3  ;;  %2484 = vmatmul.f32.gmra.mxu0 %v2350_v39  ;;  %v271_v23 = vmul.f32 %v255_v40, %v239_v5  ;;  %v2335_v60 = vsel %vm1320_vm5, %v2319_v62, %v9905_v27  ;;  %v9750_v27 = vunpack.i.l.bf16 %v19989_v54 }
 0x269   :  { %v1559_v59 = vadd.f32 %v1558_v29, %v1493_v34  ;;  %10063 = vrot.lane.b32.xlu2 %v13755_v41, %s11248_s11  ;;  %v9746_v34 = vunpack.i.h.bf16 %v19980_v15  ;;  %v14229_v15 = vld [vmem:[%s19713_s0 + $0x271] sm:$0xff]  ;;  %v2351_v5 = vsel %vm1337_vm6, %v2335_v60, %v19988_v52 }
 0x26a   :  { %288 = vst.msk [vmem:[%s19722_s9 + $0x40] sm:$0xff] %vm279_vm0, %v271_v23  ;;  %v11159_v29 = vld [vmem:[%s19713_s0 + $0x158] sm:$0xff]  ;;  %v9866_v23 = vunpack.i.h.bf16 %v19985_v17 }
 0x26b   :  { %v1580_v49 = vmax.f32 %v1559_v59, 0.0  ;;  %v14223_v40 = vpop.permute.xlu1 %2217  ;;  %v2272_v57 = vsel %vm49_vm1, %v11159_v29, %v9746_v34  ;;  %v14249_v59 = vpack.i.bf16 %v14234_v16, %v14229_v15  ;;  %v19990_v34 = vld [vmem:[#allocation11_spill] sm:$0xff] }
 0x26c   :  { %v2288_v0 = vsel %vm1270_vm2, %v2272_v57, %v9786_v11  ;;  %v9790_v17 = vunpack.i.l.bf16 %v19990_v34  ;;  %v11160_v57 = vld [vmem:[%s19713_s0 + $0x168] sm:$0xff] }
 0x26d   :  { %1597 = vst.msk [vmem:[#allocation2 + $0xf0] sm:$0xff] %vm49_vm1, %v1580_v49  ;;  %v14221_v41 = vpop.permute.xlu2 %2237  ;;  %v2216_v12 = vpop.permute.xlu0 %2215  ;;  %9024 = vmatmul.msk.f32.gmra.mxu1 %vm1388_vm9, %v2372_v45  ;;  %v2304_v49 = vsel %vm1287_vm4, %v2288_v0, %v9826_v20  ;;  %v2273_v20 = vsel %vm49_vm1, %v11160_v57, %v9750_v27  ;;  %v14299_v27 = vld [vmem:[%s19713_s0 + $0x272] sm:$0xff]  ;;  %v2359_v57 = vsel %vm1354_vm8, %v13557_v22, %v13971_v4 }
 0x26e   :  { %v2289_v0 = vsel %vm1270_vm2, %v2273_v20, %v9790_v17  ;;  %v14304_v17 = vld [vmem:[%s19713_s0 + $0x27a] sm:$0xff] }
 0x26f   :  { %10073 = vrot.lane.b32.xlu1 %v13745_v21, %s11249_s16  ;;  %10068 = vrot.lane.b32.xlu0 %v14249_v59, %s11248_s11  ;;  %v2320_v21 = vsel %vm279_vm0, %v2304_v49, %v9866_v23  ;;  %v19994_v23 = vld [vmem:[#allocation12_spill] sm:$0xff]  ;;  %v19997_v22 = vld [vmem:[#allocation33_spill] sm:$0xff] }
 0x270   :  { %v1561_v39 = vpop.f32.mrf.mxu3  ;;  %2487 = vmatmul.f32.gmra.mxu0 %v2351_v5  ;;  %v2336_v60 = vsel %vm1320_vm5, %v2320_v21, %v9906_v7  ;;  %v1499_v5 = vpop.f32.mrf.mxu2  ;;  %v9870_v7 = vunpack.i.l.bf16 %v19994_v23  ;;  %v9831_v21 = vunpack.i.h.bf16 %v19993_v53  ;;  %v19998_v4 = vld [vmem:[#allocation21_spill] sm:$0xff] }
 0x271   :  { %v1562_v50 = vadd.f32 %v1561_v39, %v1496_v14  ;;  %10078 = vrot.lane.b32.xlu2 %v13840_v30, %s11249_s16  ;;  %v19991_v14 = vld [vmem:[#allocation27_spill] sm:$0xff]  ;;  %v2352_v39 = vsel %vm1337_vm6, %v2336_v60, %v13818_v58 }
 0x272   :  { %v2357_v47 = vsel %vm1354_vm8, %v19992_v26, %v19991_v14  ;;  %v2305_v14 = vsel %vm1287_vm4, %v2289_v0, %v9830_v55  ;;  %v9751_v26 = vunpack.i.h.bf16 %v19989_v54 }
 0x273   :  { %v1581_v13 = vmax.f32 %v1562_v50, 0.0  ;;  %v14269_v30 = vpop.permute.xlu1 %2223  ;;  %v2373_v45 = vsel %vm1371_vm10, %v2357_v47, %v2216_v12  ;;  %v19995_v12 = vld [vmem:[#allocation13_spill] sm:$0xff] }
 0x275   :  { %1598 = vst.msk [vmem:[#allocation2 + $0x108] sm:$0xff] %vm49_vm1, %v1581_v13  ;;  %v14267_v11 = vpop.permute.xlu2 %9913  ;;  %v14273_v62 = vpop.permute.xlu0 %2221  ;;  %9025 = vmatmul.msk.f32.gmra.mxu1 %vm1388_vm9, %v2373_v45  ;;  %v9910_v13 = vunpack.i.l.bf16 %v19995_v12 }
 0x277   :  { %10088 = vrot.lane.b32.xlu1 %v13831_v2, %s11249_s16  ;;  %10083 = vrot.lane.b32.xlu0 %v13833_v37, %s11249_s16  ;;  %v2358_v2 = vsel %vm1354_vm8, %v13335_v10, %v13986_v25  ;;  %v2321_v37 = vsel %vm279_vm0, %v2305_v14, %v9870_v7  ;;  %v14326_v10 = vpack.i.bf16 %v14304_v17, %v14299_v27  ;;  %v11161_v25 = vld [vmem:[%s19713_s0 + $0x170] sm:$0xff] }
 0x278   :  { %v1564_v29 = vpop.f32.mrf.mxu3  ;;  %2490 = vmatmul.f32.gmra.mxu0 %v2352_v39  ;;  %v2337_v60 = vsel %vm1320_vm5, %v2321_v37, %v9910_v13  ;;  %v2374_v45 = vsel %vm1371_vm10, %v2358_v2, %v14223_v40  ;;  %v2274_v53 = vsel %vm49_vm1, %v11161_v25, %v9751_v26  ;;  %v9871_v40 = vunpack.i.h.bf16 %v19994_v23  ;;  %v19999_v13 = vld [vmem:[#allocation30_spill] sm:$0xff] }
 0x279   :  { %v1565_v50 = vadd.f32 %v1564_v29, %v1499_v5  ;;  %10093 = vrot.lane.b32.xlu2 %v13916_v6, %s11249_s16  ;;  %v9791_v6 = vunpack.i.h.bf16 %v19990_v34  ;;  %v2353_v34 = vsel %vm1337_vm6, %v2337_v60, %v13802_v8  ;;  %v9911_v29 = vunpack.i.h.bf16 %v19995_v12  ;;  %v19996_v12 = vld [vmem:[#allocation15_spill] sm:$0xff]  ;;  %v20001_v2 = vld [vmem:[#allocation18_spill] sm:$0xff] }
 0x27b   :  { %v1582_v49 = vmax.f32 %v1565_v50, 0.0  ;;  %v14312_v47 = vpop.permute.xlu1 %2229  ;;  %v2290_v5 = vsel %vm1270_vm2, %v2274_v53, %v9791_v6 }
 0x27c   :  { %v2306_v39 = vsel %vm1287_vm4, %v2290_v5, %v9831_v21 }
 0x27d   :  { %1599 = vst.msk [vmem:[#allocation2 + $0x110] sm:$0xff] %vm49_vm1, %v1582_v49  ;;  %v14310_v54 = vpop.permute.xlu2 %9928  ;;  %v14316_v55 = vpop.permute.xlu0 %2227  ;;  %9026 = vmatmul.msk.f32.gmra.mxu1 %vm1388_vm9, %v2374_v45  ;;  %v2322_v0 = vsel %vm279_vm0, %v2306_v39, %v9871_v40  ;;  %v2360_v49 = vsel %vm1354_vm8, %v19999_v13, %v19998_v4  ;;  %v20003_v45 = vld [vmem:[#allocation36_spill] sm:$0xff]  ;;  %v20006_v40 = vld [vmem:[#allocation34_spill] sm:$0xff] }
 0x27e   :  { %v2338_v7 = vsel %vm1320_vm5, %v2322_v0, %v9911_v29  ;;  %v2376_v6 = vsel %vm1371_vm10, %v2360_v49, %v14273_v62  ;;  %v2361_v62 = vsel %vm1354_vm8, %v20001_v2, %v14061_v24  ;;  %v20002_v24 = vld [vmem:[#allocation35_spill] sm:$0xff]  ;;  %v20007_v39 = vld [vmem:[#allocation32_spill] sm:$0xff] }
 0x27f   :  { %10103 = vrot.lane.b32.xlu1 %v13907_v9, %s11249_s16  ;;  %10098 = vrot.lane.b32.xlu0 %v13909_v28, %s11249_s16  ;;  %v2375_v9 = vsel %vm1371_vm10, %v2359_v57, %v14102_v43  ;;  %v2354_v28 = vsel %vm1337_vm6, %v2338_v7, %v19996_v12  ;;  %v20008_v29 = vld [vmem:[#allocation20_spill] sm:$0xff]  ;;  %v14445_v7 = vld [vmem:[%s19713_s0 + $0x288] sm:$0xff] }
 0x280   :  { %2493 = vmatmul.f32.gmra.mxu0 %v2353_v34  ;;  %v20004_v34 = vld [vmem:[#allocation22_spill] sm:$0xff]  ;;  %v9152_v49 = vld [vmem:[%s19713_s0 + $0x1e9] sm:$0xff] }
 0x281   :  { %10108 = vrot.lane.b32.xlu2 %v14326_v10, %s11249_s16 }
 0x283   :  { %v14347_v50 = vpop.permute.xlu1 %2235 }
 0x285   :  { %v14345_v20 = vpop.permute.xlu2 %9943  ;;  %v14350_v23 = vpop.permute.xlu0 %2233  ;;  %9027 = vmatmul.msk.f32.gmra.mxu1 %vm1388_vm9, %v2375_v9 }
 0x287   :  { %3083 = vrot.lane.b32.xlu1 %v13963_v18, %s11250_s22  ;;  %3081 = vrot.lane.b32.xlu0 %v19997_v22, %s11250_s22  ;;  %v20000_v18 = vld [vmem:[#allocation28_spill] sm:$0xff] }
 0x288   :  { %2496 = vmatmul.f32.gmra.mxu0 %v2354_v28 }
 0x289   :  { %3085 = vrot.lane.b32.xlu2 %v13942_v61, %s11250_s22  ;;  %v387_v61 = vpop.f32.mrf.mxu1 }
 0x28a   :  { %436 = vst.msk [vmem:[%s19720_s7] sm:$0xff] %vm435_vm7, %v387_v61 }
 0x28b   :  { %v14369_v14 = vpop.permute.xlu1 %2241 }
 0x28d   :  { %v14367_v43 = vpop.permute.xlu2 %9958  ;;  %v14371_v26 = vpop.permute.xlu0 %2239  ;;  %9028 = vmatmul.msk.f32.gmra.mxu1 %vm1388_vm9, %v2376_v6 }
 0x28f   :  { %3089 = vrot.lane.b32.xlu1 %v14051_v56, %s11250_s22  ;;  %3087 = vrot.lane.b32.xlu0 %v20000_v18, %s11250_s22  ;;  %v2377_v56 = vsel %vm1371_vm10, %v2361_v62, %v14269_v30  ;;  %v2362_v30 = vsel %vm1354_vm8, %v20004_v34, %v20003_v45 }
 0x291   :  { %3091 = vrot.lane.b32.xlu2 %v14056_v44, %s11250_s22  ;;  %v390_v60 = vpop.f32.mrf.mxu1 }
 0x292   :  { %437 = vst.msk [vmem:[%s19720_s7 + $0x8] sm:$0xff] %vm435_vm7, %v390_v60  ;;  %v9155_v60 = vld [vmem:[%s19713_s0 + $0x211] sm:$0xff] }
 0x293   :  { %v14391_v21 = vpop.permute.xlu1 %9923 }
 0x295   :  { %v14389_v37 = vpop.permute.xlu2 %9973  ;;  %v14393_v44 = vpop.permute.xlu0 %9918  ;;  %9029 = vmatmul.msk.f32.gmra.mxu1 %vm1388_vm9, %v2377_v56 }
 0x297   :  { %3095 = vrot.lane.b32.xlu1 %v14040_v31, %s11250_s22  ;;  %3093 = vrot.lane.b32.xlu0 %v20002_v24, %s11250_s22  ;;  %v2378_v31 = vsel %vm1371_vm10, %v2362_v30, %v14148_v33  ;;  %v2363_v33 = vsel %vm1354_vm8, %v20008_v29, %v20007_v39  ;;  %v9154_v24 = vld [vmem:[%s19713_s0 + $0x201] sm:$0xff]  ;;  %v3416_v39 = vld [vmem:[%s19716_s3 + $0x78] sm:$0xff] }
 0x298   :  { %v3415_v29 = vld [vmem:[%s19716_s3 + $0x70] sm:$0xff]  ;;  %3433 = vmatpush.msra.mxu2 %v3416_v39  ;;  %v3409_v39 = vld [vmem:[%s19716_s3 + $0x40] sm:$0xff] }
 0x299   :  { %3097 = vrot.lane.b32.xlu2 %v14022_v51, %s11250_s22  ;;  %v393_v5 = vpop.f32.mrf.mxu1 }
 0x29a   :  { %438 = vst.msk [vmem:[%s19720_s7 + $0x10] sm:$0xff] %vm435_vm7, %v393_v5  ;;  %3434 = vmatpush.msra.mxu2 %v3415_v29  ;;  %v20015_v29 = vld [vmem:[#allocation29_spill] sm:$0xff] }
 0x29b   :  { %v14413_v53 = vpop.permute.xlu1 %9938 }
 0x29d   :  { %v14411_v25 = vpop.permute.xlu2 %9988  ;;  %v14415_v51 = vpop.permute.xlu0 %9933  ;;  %9030 = vmatmul.msk.f32.gmra.mxu1 %vm1388_vm9, %v2378_v31 }
 0x29e   :  { %20005 = vst [vmem:[#allocation10_spill] sm:$0xff] %v14411_v25 }
 0x29f   :  { %3101 = vrot.lane.b32.xlu1 %v14110_v19, %s11250_s22  ;;  %3099 = vrot.lane.b32.xlu0 %v20006_v40, %s11250_s22  ;;  %v2379_v19 = vsel %vm1371_vm10, %v2363_v33, %v14316_v55  ;;  %v20010_v55 = vld [vmem:[#allocation8_spill] sm:$0xff] }
 0x2a0   :  { %v2364_v28 = vsel %vm1354_vm8, %v20010_v55, %v14122_v46  ;;  %v14478_v46 = vld [vmem:[%s19713_s0 + $0x290] sm:$0xff] }
 0x2a1   :  { %3103 = vrot.lane.b32.xlu2 %v14115_v38, %s11250_s22  ;;  %v396_v9 = vpop.f32.mrf.mxu1  ;;  %v9157_v33 = vld [vmem:[%s19713_s0 + $0x229] sm:$0xff] }
 0x2a2   :  { %439 = vst.msk [vmem:[%s19720_s7 + $0x18] sm:$0xff] %vm435_vm7, %v396_v9  ;;  %v2367_v9 = vsel %vm1354_vm8, %v19988_v52, %v14157_v36  ;;  %v9160_v36 = vld [vmem:[%s19713_s0 + $0x249] sm:$0xff]  ;;  %v9159_v52 = vld [vmem:[%s19713_s0 + $0x241] sm:$0xff] }
 0x2a3   :  { %v14435_v0 = vpop.permute.xlu1 %9953 }
 0x2a5   :  { %v14433_v57 = vpop.permute.xlu2 %10003  ;;  %v14437_v38 = vpop.permute.xlu0 %9948  ;;  %9031 = vmatmul.msk.f32.gmra.mxu1 %vm1388_vm9, %v2379_v19 }
 0x2a6   :  { %20009 = vst [vmem:[#allocation25_spill] sm:$0xff] %v14437_v38 }
 0x2a7   :  { %3107 = vrot.lane.b32.xlu1 %v14099_v63, %s11250_s22  ;;  %3105 = vrot.lane.b32.xlu0 %v14094_v35, %s11250_s22  ;;  %v2380_v63 = vsel %vm1371_vm10, %v2364_v28, %v14312_v47  ;;  %v9151_v35 = vld [vmem:[%s19713_s0 + $0x1e1] sm:$0xff]  ;;  %v20011_v47 = vld [vmem:[#allocation37_spill] sm:$0xff] }
 0x2a8   :  { %v2365_v61 = vsel %vm1354_vm8, %v13735_v1, %v20011_v47  ;;  %v9153_v1 = vld [vmem:[%s19713_s0 + $0x1f9] sm:$0xff] }
 0x2a9   :  { %3109 = vrot.lane.b32.xlu2 %v14445_v7, %s11250_s22  ;;  %v2381_v56 = vsel %vm1371_vm10, %v2365_v61, %v14184_v42  ;;  %v20012_v42 = vld [vmem:[#allocation31_spill] sm:$0xff]  ;;  %v3413_v47 = vld [vmem:[%s19716_s3 + $0x60] sm:$0xff] }
 0x2aa   :  { %v2366_v34 = vsel %vm1354_vm8, %v13721_v48, %v20012_v42  ;;  %v9158_v48 = vld [vmem:[%s19713_s0 + $0x231] sm:$0xff] }
 0x2ab   :  { %v14462_v4 = vpop.permute.xlu1 %9968  ;;  %v2382_v40 = vsel %vm1371_vm10, %v2366_v34, %v14350_v23  ;;  %v9156_v23 = vld [vmem:[%s19713_s0 + $0x219] sm:$0xff] }
 0x2ad   :  { %v14460_v22 = vpop.permute.xlu2 %10018  ;;  %v14464_v13 = vpop.permute.xlu0 %9963  ;;  %9032 = vmatmul.msk.f32.gmra.mxu1 %vm1388_vm9, %v2380_v63 }
 0x2ae   :  { %v399_v6 = vpop.f32.mrf.mxu1 }
 0x2af   :  { %3145 = vrot.lane.b32.xlu1 %v9151_v35, %s11251_s20  ;;  %440 = vst.msk [vmem:[%s19720_s7 + $0x20] sm:$0xff] %vm435_vm7, %v399_v6  ;;  %3111 = vrot.lane.b32.xlu0 %v14478_v46, %s11250_s22  ;;  %v14561_v35 = vpop.f32.mrf.mxu0  ;;  %v9161_v6 = vld [vmem:[%s19713_s0 + $0x259] sm:$0xff] }
 0x2b1   :  { %3147 = vrot.lane.b32.xlu2 %v9152_v49, %s11251_s20  ;;  %v2383_v49 = vsel %vm1371_vm10, %v2367_v9, %v14347_v50  ;;  %v3414_v50 = vld [vmem:[%s19716_s3 + $0x68] sm:$0xff]  ;;  %v14644_v9 = vld [vmem:[%s19713_s0 + $0x291] sm:$0xff] }
 0x2b2   :  { %3435 = vmatpush.msra.mxu2 %v3414_v50  ;;  %v2370_v50 = vsel %vm1354_vm8, %v19996_v12, %v14190_v32  ;;  %v9170_v32 = vld [vmem:[%s19713_s0 + $0x202] sm:$0xff]  ;;  %v9169_v12 = vld [vmem:[%s19713_s0 + $0x1fa] sm:$0xff] }
 0x2b3   :  { %v14493_v2 = vpop.permute.xlu1 %9983 }
 0x2b4   :  { %3436 = vmatpush.msra.mxu2 %v3413_v47 }
 0x2b5   :  { %v14491_v18 = vpop.permute.xlu2 %10033  ;;  %v14495_v62 = vpop.permute.xlu0 %9978  ;;  %9033 = vmatmul.msk.f32.gmra.mxu1 %vm1388_vm9, %v2381_v56  ;;  %v3412_v56 = vld [vmem:[%s19716_s3 + $0x58] sm:$0xff] }
 0x2b6   :  { %3437 = vmatpush.msra.mxu2 %v3412_v56 }
 0x2b7   :  { %v402_v45 = vpop.f32.mrf.mxu1  ;;  %3151 = vrot.lane.b32.xlu1 %v9154_v24, %s11251_s20  ;;  %3149 = vrot.lane.b32.xlu0 %v9153_v1, %s11251_s20  ;;  %v3411_v1 = vld [vmem:[%s19716_s3 + $0x50] sm:$0xff] }
 0x2b8   :  { %441 = vst.msk [vmem:[%s19720_s7 + $0x28] sm:$0xff] %vm435_vm7, %v402_v45  ;;  %3438 = vmatpush.msra.mxu2 %v3411_v1  ;;  %v2386_v1 = vsel %vm1371_vm10, %v2370_v50, %v14369_v14  ;;  %v3402_v14 = vld [vmem:[%s19716_s3 + $0x8] sm:$0xff] }
 0x2b9   :  { %3153 = vrot.lane.b32.xlu2 %v9155_v60, %s11251_s20  ;;  %v2368_v60 = vsel %vm1354_vm8, %v13818_v58, %v14150_v3  ;;  %v9162_v58 = vld [vmem:[%s19713_s0 + $0x261] sm:$0xff] }
 0x2ba   :  { %v2384_v34 = vsel %vm1371_vm10, %v2368_v60, %v14221_v41  ;;  %v3410_v3 = vld [vmem:[%s19716_s3 + $0x48] sm:$0xff]  ;;  %v3408_v41 = vld [vmem:[%s19716_s3 + $0x38] sm:$0xff] }
 0x2bb   :  { %v14521_v31 = vpop.permute.xlu1 %9998  ;;  %3439 = vmatpush.msra.mxu2 %v3410_v3 }
 0x2bd   :  { %v14519_v30 = vpop.permute.xlu2 %10048  ;;  %v14523_v5 = vpop.permute.xlu0 %9993  ;;  %9034 = vmatmul.msk.f32.gmra.mxu1 %vm1388_vm9, %v2382_v40  ;;  %3440 = vmatpush.msra.mxu2 %v3409_v39 }
 0x2be   :  { %v14603_v40 = vpop.f32.mrf.mxu0 }
 0x2bf   :  { %v405_v19 = vpop.f32.mrf.mxu1  ;;  %3157 = vrot.lane.b32.xlu1 %v9157_v33, %s11251_s20  ;;  %3155 = vrot.lane.b32.xlu0 %v9156_v23, %s11251_s20 }
 0x2c0   :  { %442 = vst.msk [vmem:[%s19720_s7 + $0x30] sm:$0xff] %vm435_vm7, %v405_v19  ;;  %3441 = vmatpush.msra.mxu2 %v3408_v41 }
 0x2c1   :  { %3159 = vrot.lane.b32.xlu2 %v9158_v48, %s11251_s20  ;;  %v2369_v48 = vsel %vm1354_vm8, %v13802_v8, %v20015_v29  ;;  %v9167_v8 = vld [vmem:[%s19713_s0 + $0x1e2] sm:$0xff] }
 0x2c2   :  { %v2385_v19 = vsel %vm1371_vm10, %v2369_v48, %v14371_v26  ;;  %v3406_v26 = vld [vmem:[%s19716_s3 + $0x28] sm:$0xff] }
 0x2c3   :  { %v14555_v28 = vpop.permute.xlu1 %10013 }
 0x2c5   :  { %v14553_v55 = vpop.permute.xlu2 %10063  ;;  %v14557_v63 = vpop.permute.xlu0 %10008  ;;  %9035 = vmatmul.msk.f32.gmra.mxu1 %vm1388_vm9, %v2383_v49 }
 0x2c6   :  { %20013 = vst [vmem:[#allocation14_spill] sm:$0xff] %v14553_v55  ;;  %v2458_v49 = vpop.f32.mrf.mxu0 }
 0x2c7   :  { %v408_v61 = vpop.f32.mrf.mxu1  ;;  %3163 = vrot.lane.b32.xlu1 %v9160_v36, %s11251_s20  ;;  %3161 = vrot.lane.b32.xlu0 %v9159_v52, %s11251_s20  ;;  %v3405_v36 = vld [vmem:[%s19716_s3 + $0x20] sm:$0xff]  ;;  %v3404_v52 = vld [vmem:[%s19716_s3 + $0x18] sm:$0xff] }
 0x2c8   :  { %443 = vst.msk [vmem:[%s19720_s7 + $0x38] sm:$0xff] %vm435_vm7, %v408_v61  ;;  %v3403_v61 = vld [vmem:[%s19716_s3 + $0x10] sm:$0xff] }
 0x2c9   :  { %3165 = vrot.lane.b32.xlu2 %v9161_v6, %s11251_s20  ;;  %v14649_v6 = vld [vmem:[%s19713_s0 + $0x289] sm:$0xff] }
 0x2cb   :  { %v14597_v45 = vpop.permute.xlu1 %10028 }
 0x2cc   :  { %20014 = vst [vmem:[#allocation9_spill] sm:$0xff] %v14597_v45 }
 0x2cd   :  { %v14592_v24 = vpop.permute.xlu2 %10078  ;;  %v14599_v42 = vpop.permute.xlu0 %10023  ;;  %9036 = vmatmul.msk.f32.gmra.mxu1 %vm1388_vm9, %v2384_v34  ;;  %v9168_v34 = vld [vmem:[%s19713_s0 + $0x1ea] sm:$0xff] }
 0x2ce   :  { %v2461_v3 = vpop.f32.mrf.mxu0 }
 0x2cf   :  { %3169 = vrot.lane.b32.xlu1 %v14229_v15, %s11251_s20  ;;  %3167 = vrot.lane.b32.xlu0 %v9162_v58, %s11251_s20  ;;  %v3401_v58 = vld [vmem:[%s19716_s3] sm:$0xff] }
 0x2d1   :  { %3171 = vrot.lane.b32.xlu2 %v14234_v16, %s11251_s20  ;;  %v3407_v16 = vld [vmem:[%s19716_s3 + $0x30] sm:$0xff] }
 0x2d2   :  { %3442 = vmatpush.msra.mxu2 %v3407_v16 }
 0x2d3   :  { %v14631_v23 = vpop.permute.xlu1 %10043 }
 0x2d4   :  { %3443 = vmatpush.msra.mxu2 %v3406_v26  ;;  %v9172_v26 = vld [vmem:[%s19713_s0 + $0x21a] sm:$0xff] }
 0x2d5   :  { %v14626_v33 = vpop.permute.xlu2 %10093  ;;  %v14633_v15 = vpop.permute.xlu0 %10038  ;;  %9037 = vmatmul.msk.f32.gmra.mxu1 %vm1388_vm9, %v2385_v19 }
 0x2d6   :  { %3444 = vmatpush.msra.mxu2 %v3405_v36 }
 0x2d7   :  { %3175 = vrot.lane.b32.xlu1 %v14644_v9, %s11251_s20  ;;  %3173 = vrot.lane.b32.xlu0 %v14649_v6, %s11251_s20 }
 0x2d8   :  { %3445 = vmatpush.msra.mxu2 %v3404_v52  ;;  %v14718_v52 = vpop.f32.mrf.mxu0 }
 0x2d9   :  { %3209 = vrot.lane.b32.xlu2 %v9167_v8, %s11252_s25  ;;  %v9173_v8 = vld [vmem:[%s19713_s0 + $0x22a] sm:$0xff] }
 0x2da   :  { %3446 = vmatpush.msra.mxu2 %v3403_v61 }
 0x2db   :  { %v14673_v56 = vpop.permute.xlu1 %10058 }
 0x2dc   :  { %3447 = vmatpush.msra.mxu2 %v3402_v14  ;;  %v9175_v14 = vld [vmem:[%s19713_s0 + $0x242] sm:$0xff] }
 0x2dd   :  { %v14668_v47 = vpop.permute.xlu2 %10108  ;;  %v14675_v60 = vpop.permute.xlu0 %10053  ;;  %9038 = vmatmul.msk.f32.gmra.mxu1 %vm1388_vm9, %v2386_v1 }
 0x2de   :  { %20016 = vst [vmem:[#allocation16_spill] sm:$0xff] %v14668_v47  ;;  %3448 = vmatpush.msra.mxu2 %v3401_v58  ;;  %v9915_v58 = vunpack.i.l.bf16 %v14267_v11 }
 0x2df   :  { %3213 = vrot.lane.b32.xlu1 %v9169_v12, %s11252_s25  ;;  %3211 = vrot.lane.b32.xlu0 %v9168_v34, %s11252_s25  ;;  %v9176_v34 = vld [vmem:[%s19713_s0 + $0x24a] sm:$0xff] }
 0x2e1   :  { %3215 = vrot.lane.b32.xlu2 %v9170_v32, %s11252_s25 }
 0x2e2   :  { %v2517_v39 = vpop.f32.mrf.mxu1 }
 0x2e3   :  { %v2518_v41 = vadd.f32 %v2517_v39, %v14561_v35  ;;  %v14701_v48 = vpop.permute.xlu1 %10073  ;;  %v9171_v35 = vld [vmem:[%s19713_s0 + $0x212] sm:$0xff] }
 0x2e5   :  { %v14699_v29 = vpop.permute.xlu2 %3085  ;;  %v14703_v16 = vpop.permute.xlu0 %10068  ;;  %v2565_v19 = vmax.f32 %v2518_v41, 0.0  ;;  %v9039_v41 = vld [vmem:[%s19713_s0 + $0x1b0] sm:$0xff] }
 0x2e6   :  { %20017 = vst [vmem:[#allocation19_spill] sm:$0xff] %v14699_v29 }
 0x2e7   :  { %20018 = vst [vmem:[#allocation17_spill] sm:$0xff] %v14703_v16  ;;  %3219 = vrot.lane.b32.xlu1 %v9172_v26, %s11252_s25  ;;  %3217 = vrot.lane.b32.xlu0 %v9171_v35, %s11252_s25  ;;  %v9995_v35 = vunpack.i.l.bf16 %v14523_v5  ;;  %v9040_v16 = vld [vmem:[%s19713_s0 + $0x1b8] sm:$0xff] }
 0x2e8   :  { %2582 = vst.msk [vmem:[#allocation2 + $0x128] sm:$0xff] %vm49_vm1, %v2565_v19  ;;  %v9955_v19 = vunpack.i.l.bf16 %v14435_v0 }
 0x2e9   :  { %3221 = vrot.lane.b32.xlu2 %v9173_v8, %s11252_s25 }
 0x2ea   :  { %v2520_v36 = vpop.f32.mrf.mxu1 }
 0x2eb   :  { %v2521_v50 = vadd.f32 %v2520_v36, %v14603_v40  ;;  %v14723_v1 = vpop.permute.xlu1 %10088  ;;  %v9174_v40 = vld [vmem:[%s19713_s0 + $0x232] sm:$0xff] }
 0x2ed   :  { %v14721_v61 = vpop.permute.xlu2 %3091  ;;  %v14725_v32 = vpop.permute.xlu0 %10083  ;;  %v2566_v12 = vmax.f32 %v2521_v50, 0.0 }
 0x2ef   :  { %2583 = vst.msk [vmem:[#allocation2 + $0x130] sm:$0xff] %vm49_vm1, %v2566_v12  ;;  %3225 = vrot.lane.b32.xlu1 %v9175_v14, %s11252_s25  ;;  %3223 = vrot.lane.b32.xlu0 %v9174_v40, %s11252_s25  ;;  %v14752_v12 = vpop.f32.mrf.mxu0  ;;  %v3257_v14 = vsel %vm49_vm1, %v9039_v41, %v9915_v58  ;;  %v9178_v40 = vld [vmem:[%s19713_s0 + $0x262] sm:$0xff]  ;;  %v3431_v58 = vld [vmem:[%s19716_s3 + $0xf0] sm:$0xff] }
 0x2f0   :  { %v3273_v47 = vsel %vm1270_vm2, %v3257_v14, %v9955_v19  ;;  %v10075_v19 = vunpack.i.l.bf16 %v14701_v48 }
 0x2f1   :  { %3227 = vrot.lane.b32.xlu2 %v9176_v34, %s11252_s25  ;;  %v3289_v41 = vsel %vm1287_vm4, %v3273_v47, %v9995_v35  ;;  %v9956_v47 = vunpack.i.h.bf16 %v14435_v0  ;;  %v14796_v0 = vld [vmem:[%s19713_s0 + $0x292] sm:$0xff] }
 0x2f2   :  { %v2523_v39 = vpop.f32.mrf.mxu1 }
 0x2f3   :  { %v2524_v8 = vadd.f32 %v2523_v39, %v2458_v49  ;;  %v14748_v36 = vpop.permute.xlu1 %10103  ;;  %v10035_v49 = vunpack.i.l.bf16 %v14491_v18  ;;  %v9177_v39 = vld [vmem:[%s19713_s0 + $0x25a] sm:$0xff] }
 0x2f4   :  { %20019 = vst [vmem:[#allocation23_spill] sm:$0xff] %v14748_v36 }
 0x2f5   :  { %v14745_v26 = vpop.permute.xlu2 %3097  ;;  %v14750_v50 = vpop.permute.xlu0 %10098  ;;  %v2567_v34 = vmax.f32 %v2524_v8, 0.0  ;;  %v3432_v8 = vld [vmem:[%s19716_s3 + $0xf8] sm:$0xff] }
 0x2f6   :  { %3498 = vmatpush.msra.mxu3 %v3432_v8  ;;  %v3305_v8 = vsel %vm279_vm0, %v3289_v41, %v10035_v49  ;;  %v10036_v49 = vunpack.i.h.bf16 %v14491_v18  ;;  %v3428_v18 = vld [vmem:[%s19716_s3 + $0xd8] sm:$0xff] }
 0x2f7   :  { %2584 = vst.msk [vmem:[#allocation2 + $0x148] sm:$0xff] %vm49_vm1, %v2567_v34  ;;  %3231 = vrot.lane.b32.xlu1 %v9178_v40, %s11252_s25  ;;  %v9916_v34 = vunpack.i.h.bf16 %v14267_v11  ;;  %3229 = vrot.lane.b32.xlu0 %v9177_v39, %s11252_s25  ;;  %v3321_v39 = vsel %vm1320_vm5, %v3305_v8, %v10075_v19  ;;  %v14805_v41 = vpop.f32.mrf.mxu0  ;;  %v9920_v19 = vunpack.i.l.bf16 %v14393_v44 }
 0x2f8   :  { %3499 = vmatpush.msra.mxu3 %v3431_v58 }
 0x2f9   :  { %3233 = vrot.lane.b32.xlu2 %v14299_v27, %s11252_s25  ;;  %v9996_v27 = vunpack.i.h.bf16 %v14523_v5  ;;  %v3258_v38 = vsel %vm49_vm1, %v9040_v16, %v9916_v34  ;;  %v14801_v5 = vld [vmem:[%s19713_s0 + $0x28a] sm:$0xff]  ;;  %v3429_v16 = vld [vmem:[%s19716_s3 + $0xe0] sm:$0xff] }
 0x2fa   :  { %v2526_v14 = vpop.f32.mrf.mxu1 }
 0x2fb   :  { %v2527_v35 = vadd.f32 %v2526_v14, %v2461_v3  ;;  %v14785_v40 = vpop.permute.xlu1 %3083  ;;  %v3274_v3 = vsel %vm1270_vm2, %v3258_v38, %v9956_v47  ;;  %v10076_v38 = vunpack.i.h.bf16 %v14701_v48  ;;  %v14829_v47 = vld [vmem:[%s19713_s0 + $0x2a1] sm:$0xff]  ;;  %v9220_v48 = vld [vmem:[%s19713_s0 + $0x2a9] sm:$0xff] }
 0x2fc   :  { %20021 = vst [vmem:[#allocation6_spill] sm:$0xff] %v14785_v40  ;;  %v3290_v34 = vsel %vm1287_vm4, %v3274_v3, %v9996_v27 }
 0x2fd   :  { %v14781_v45 = vpop.permute.xlu2 %3103  ;;  %v14787_v11 = vpop.permute.xlu0 %3081  ;;  %v2568_v58 = vmax.f32 %v2527_v35, 0.0  ;;  %20022 = vst [vmem:[#allocation11_spill] sm:$0xff] %v14829_v47  ;;  %v9960_v35 = vunpack.i.l.bf16 %v14367_v43 }
 0x2fe   :  { %20020 = vst [vmem:[#allocation24_spill] sm:$0xff] %v14781_v45  ;;  %v3337_v25 = vsel %vm1337_vm6, %v3321_v39, %v14787_v11  ;;  %v3306_v39 = vsel %vm279_vm0, %v3290_v34, %v10036_v49 }
 0x2ff   :  { %3449 = vmatmul.f32.vlgmr.msra.gmra.mxu2 %v3337_v25  ;;  %2585 = vst.msk [vmem:[#allocation2 + $0x150] sm:$0xff] %vm49_vm1, %v2568_v58  ;;  %v3430_v25 = vld [vmem:[%s19716_s3 + $0xe8] sm:$0xff]  ;;  %3237 = vrot.lane.b32.xlu1 %v14801_v5, %s11252_s25  ;;  %v3322_v49 = vsel %vm1320_vm5, %v3306_v39, %v10076_v38 }
 0x300   :  { %3500 = vmatpush.msra.mxu3 %v3430_v25  ;;  %3235 = vrot.lane.b32.xlu0 %v14304_v17, %s11252_s25  ;;  %v3427_v17 = vld [vmem:[%s19716_s3 + $0xd0] sm:$0xff]  ;;  %v11162_v58 = vld [vmem:[%s19713_s0 + $0x1c8] sm:$0xff]  ;;  %v10000_v25 = vunpack.i.l.bf16 %v14521_v31 }
 0x301   :  { %3239 = vrot.lane.b32.xlu2 %v14796_v0, %s11252_s25  ;;  %v3259_v3 = vsel %vm49_vm1, %v11162_v58, %v9920_v19  ;;  %v14860_v19 = vpack.i.bf16 %v14644_v9, %v14649_v6  ;;  %v3426_v38 = vld [vmem:[%s19716_s3 + $0xc8] sm:$0xff]  ;;  %v10080_v9 = vunpack.i.l.bf16 %v14592_v24  ;;  %v14873_v6 = vpop.f32.mrf.mxu0 }
 0x302   :  { %v2529_v14 = vpop.f32.mrf.mxu1  ;;  %3501 = vmatpush.msra.mxu3 %v3429_v16  ;;  %v10040_v16 = vunpack.i.l.bf16 %v14633_v15  ;;  %v3275_v58 = vsel %vm1270_vm2, %v3259_v3, %v9960_v35  ;;  %v14883_v39 = vld [vmem:[%s19713_s0 + $0x2e9] sm:$0xff]  ;;  %v9226_v3 = vld [vmem:[%s19713_s0 + $0x2f1] sm:$0xff] }
 0x303   :  { %v2530_v8 = vadd.f32 %v2529_v14, %v14718_v52  ;;  %v14848_v36 = vpop.permute.xlu1 %3089  ;;  %v3338_v14 = vsel %vm1337_vm6, %v3322_v49, %v14785_v40  ;;  %20025 = vst [vmem:[#allocation7_spill] sm:$0xff] %v14883_v39  ;;  %v9961_v49 = vunpack.i.h.bf16 %v14367_v43  ;;  %v11163_v43 = vld [vmem:[%s19713_s0 + $0x1d0] sm:$0xff] }
 0x304   :  { %3502 = vmatpush.msra.mxu3 %v3428_v18  ;;  %v3425_v18 = vld [vmem:[%s19716_s3 + $0xc0] sm:$0xff] }
 0x305   :  { %v14836_v27 = vpop.permute.xlu2 %3109  ;;  %v14850_v52 = vpop.permute.xlu0 %3087  ;;  %v2569_v34 = vmax.f32 %v2530_v8, 0.0  ;;  %v3291_v8 = vsel %vm1287_vm4, %v3275_v58, %v10000_v25  ;;  %v14896_v25 = vld [vmem:[%s19713_s0 + $0x2d1] sm:$0xff]  ;;  %v14915_v58 = vld [vmem:[%s19713_s0 + $0x2c1] sm:$0xff] }
 0x306   :  { %20023 = vst [vmem:[#allocation27_spill] sm:$0xff] %v14836_v27  ;;  %v14856_v27 = vpack.i.bf16 %v9220_v48, %v14829_v47  ;;  %3503 = vmatpush.msra.mxu3 %v3427_v17  ;;  %v9921_v48 = vunpack.i.h.bf16 %v14393_v44  ;;  %v3307_v35 = vsel %vm279_vm0, %v3291_v8, %v10040_v16  ;;  %v3424_v44 = vld [vmem:[%s19716_s3 + $0xb8] sm:$0xff]  ;;  %v10041_v8 = vunpack.i.h.bf16 %v14633_v15 }
 0x307   :  { %20024 = vst [vmem:[#allocation26_spill] sm:$0xff] %v14850_v52  ;;  %3452 = vmatmul.f32.gmra.mxu2 %v3338_v14  ;;  %10118 = vrot.lane.b32.xlu1 %v14860_v19, %s11245_s21  ;;  %v14901_v16 = vld [vmem:[%s19713_s0 + $0x2d9] sm:$0xff]  ;;  %v3323_v55 = vsel %vm1320_vm5, %v3307_v35, %v10080_v9 }
 0x308   :  { %2586 = vst.msk [vmem:[#allocation2 + $0x168] sm:$0xff] %vm49_vm1, %v2569_v34  ;;  %3504 = vmatpush.msra.mxu3 %v3426_v38  ;;  %10113 = vrot.lane.b32.xlu0 %v14249_v59, %s11245_s21  ;;  %v14910_v14 = vld [vmem:[%s19713_s0 + $0x2b9] sm:$0xff]  ;;  %v3423_v38 = vld [vmem:[%s19716_s3 + $0xb0] sm:$0xff]  ;;  %v3339_v40 = vsel %vm1337_vm6, %v3323_v55, %v14699_v29  ;;  %v3422_v55 = vld [vmem:[%s19716_s3 + $0xa8] sm:$0xff] }
 0x309   :  { %10123 = vrot.lane.b32.xlu2 %v14856_v27, %s11245_s21  ;;  %20026 = vst [vmem:[#allocation12_spill] sm:$0xff] %v14896_v25  ;;  %v3421_v9 = vld [vmem:[%s19716_s3 + $0xa0] sm:$0xff] }
 0x30a   :  { %v2532_v17 = vpop.f32.mrf.mxu1  ;;  %20027 = vst [vmem:[#allocation13_spill] sm:$0xff] %v14901_v16  ;;  %3505 = vmatpush.msra.mxu3 %v3425_v18  ;;  %v10001_v18 = vunpack.i.h.bf16 %v14521_v31  ;;  %v14942_v31 = vpack.i.bf16 %v14915_v58, %v14910_v14 }
 0x30b   :  { %v2533_v59 = vadd.f32 %v2532_v17, %v14752_v12  ;;  %20029 = vst [vmem:[#allocation33_spill] sm:$0xff] %v14910_v14  ;;  %v3260_v12 = vsel %vm49_vm1, %v11163_v43, %v9921_v48  ;;  %v14926_v17 = vpop.permute.xlu1 %3095  ;;  %v14938_v48 = vpack.i.bf16 %v14901_v16, %v14896_v25  ;;  %v14972_v43 = vpop.f32.mrf.mxu0 }
 0x30c   :  { %20030 = vst [vmem:[#allocation21_spill] sm:$0xff] %v14915_v58  ;;  %3506 = vmatpush.msra.mxu3 %v3424_v44  ;;  %v3276_v15 = vsel %vm1270_vm2, %v3260_v12, %v9961_v49  ;;  %v3420_v44 = vld [vmem:[%s19716_s3 + $0x98] sm:$0xff]  ;;  %v10005_v58 = vunpack.i.l.bf16 %v14433_v57 }
 0x30d   :  { %v14905_v34 = vpop.permute.xlu2 %3147  ;;  %20031 = vst [vmem:[#allocation30_spill] sm:$0xff] %v14926_v17  ;;  %v14928_v47 = vpop.permute.xlu0 %3093  ;;  %v2570_v45 = vmax.f32 %v2533_v59, 0.0  ;;  %v3292_v35 = vsel %vm1287_vm4, %v3276_v15, %v10001_v18  ;;  %v9230_v59 = vld [vmem:[%s19713_s0 + $0x321] sm:$0xff]  ;;  %v14985_v15 = vld [vmem:[%s19713_s0 + $0x309] sm:$0xff] }
 0x30e   :  { %20028 = vst [vmem:[#allocation15_spill] sm:$0xff] %v14905_v34  ;;  %v14934_v34 = vpack.i.bf16 %v9226_v3, %v14883_v39  ;;  %3507 = vmatpush.msra.mxu3 %v3423_v38  ;;  %v9925_v3 = vunpack.i.l.bf16 %v14391_v21  ;;  %v9965_v38 = vunpack.i.l.bf16 %v14464_v13  ;;  %v11164_v39 = vld [vmem:[%s19713_s0 + $0x1e0] sm:$0xff] }
 0x30f   :  { %20032 = vst [vmem:[#allocation28_spill] sm:$0xff] %v14928_v47  ;;  %3455 = vmatmul.f32.gmra.mxu2 %v3339_v40  ;;  %v10081_v40 = vunpack.i.h.bf16 %v14592_v24  ;;  %10133 = vrot.lane.b32.xlu1 %v14938_v48, %s11245_s21  ;;  %v9229_v24 = vld [vmem:[%s19713_s0 + $0x319] sm:$0xff] }
 0x310   :  { %2587 = vst.msk [vmem:[#allocation2 + $0x170] sm:$0xff] %vm49_vm1, %v2570_v45  ;;  %3508 = vmatpush.msra.mxu3 %v3422_v55  ;;  %v3308_v45 = vsel %vm279_vm0, %v3292_v35, %v10041_v8  ;;  %10128 = vrot.lane.b32.xlu0 %v14942_v31, %s11245_s21  ;;  %v14980_v8 = vld [vmem:[%s19713_s0 + $0x301] sm:$0xff]  ;;  %v3419_v55 = vld [vmem:[%s19716_s3 + $0x90] sm:$0xff]  ;;  %v14997_v16 = vpack.i.bf16 %v9230_v59, %v9229_v24  ;;  %v10085_v24 = vunpack.i.l.bf16 %v14725_v32 }
 0x311   :  { %10138 = vrot.lane.b32.xlu2 %v14934_v34, %s11245_s21  ;;  %20034 = vst [vmem:[#allocation35_spill] sm:$0xff] %v14980_v8  ;;  %v3261_v14 = vsel %vm49_vm1, %v11164_v39, %v9925_v3  ;;  %v3418_v39 = vld [vmem:[%s19716_s3 + $0x88] sm:$0xff]  ;;  %v9966_v3 = vunpack.i.h.bf16 %v14464_v13 }
 0x312   :  { %v2535_v49 = vpop.f32.mrf.mxu1  ;;  %3509 = vmatpush.msra.mxu3 %v3421_v9  ;;  %20035 = vst [vmem:[#allocation36_spill] sm:$0xff] %v14985_v15  ;;  %v9238_v13 = vld [vmem:[%s19713_s0 + $0x2c2] sm:$0xff] }
 0x313   :  { %v2536_v12 = vadd.f32 %v2535_v49, %v14805_v41  ;;  %v14990_v9 = vpop.permute.xlu1 %3101  ;;  %v3324_v41 = vsel %vm1320_vm5, %v3308_v45, %v10081_v40  ;;  %v9926_v40 = vunpack.i.h.bf16 %v14391_v21  ;;  %v3277_v45 = vsel %vm1270_vm2, %v3261_v14, %v9965_v38  ;;  %v9237_v21 = vld [vmem:[%s19713_s0 + $0x2ba] sm:$0xff]  ;;  %v9236_v38 = vld [vmem:[%s19713_s0 + $0x2aa] sm:$0xff]  ;;  %v2479_v29 = vpop.f32.mrf.mxu0 }
 0x314   :  { %3510 = vmatpush.msra.mxu3 %v3420_v44  ;;  %v3340_v25 = vsel %vm1337_vm6, %v3324_v41, %v14850_v52  ;;  %v10045_v44 = vunpack.i.l.bf16 %v14631_v23  ;;  %v3293_v59 = vsel %vm1287_vm4, %v3277_v45, %v10005_v58  ;;  %v10006_v45 = vunpack.i.h.bf16 %v14433_v57 }
 0x315   :  { %v14975_v18 = vpop.permute.xlu2 %3153  ;;  %v14992_v35 = vpop.permute.xlu0 %3099  ;;  %v2571_v49 = vmax.f32 %v2536_v12, 0.0  ;;  %v11165_v12 = vld [vmem:[%s19713_s0 + $0x1e8] sm:$0xff]  ;;  %v10086_v57 = vunpack.i.h.bf16 %v14725_v32 }
 0x316   :  { %20033 = vst [vmem:[#allocation18_spill] sm:$0xff] %v14975_v18  ;;  %v15006_v18 = vpack.i.bf16 %v14985_v15, %v14980_v8  ;;  %3511 = vmatpush.msra.mxu3 %v3419_v55  ;;  %v3262_v55 = vsel %vm49_vm1, %v11165_v12, %v9926_v40  ;;  %v10046_v8 = vunpack.i.h.bf16 %v14631_v23  ;;  %v15064_v23 = vpack.i.bf16 %v14796_v0, %v14801_v5  ;;  %v9243_v32 = vld [vmem:[%s19713_s0 + $0x302] sm:$0xff]  ;;  %v9239_v12 = vld [vmem:[%s19713_s0 + $0x2d2] sm:$0xff] }
 0x317   :  { %3458 = vmatmul.f32.gmra.mxu2 %v3340_v25  ;;  %2588 = vst.msk [vmem:[#allocation2 + $0x188] sm:$0xff] %vm49_vm1, %v2571_v49  ;;  %v3417_v25 = vld [vmem:[%s19716_s3 + $0x80] sm:$0xff]  ;;  %10148 = vrot.lane.b32.xlu1 %v14997_v16, %s11245_s21  ;;  %v3309_v49 = vsel %vm279_vm0, %v3293_v59, %v10045_v44  ;;  %v9242_v59 = vld [vmem:[%s19713_s0 + $0x2f2] sm:$0xff] }
 0x318   :  { %3512 = vmatpush.msra.mxu3 %v3418_v39  ;;  %10143 = vrot.lane.b32.xlu0 %v15006_v18, %s11245_s21  ;;  %v3278_v39 = vsel %vm1270_vm2, %v3262_v55, %v9966_v3  ;;  %v3325_v52 = vsel %vm1320_vm5, %v3309_v49, %v10085_v24  ;;  %v9930_v24 = vunpack.i.l.bf16 %v14310_v54  ;;  %v9240_v55 = vld [vmem:[%s19713_s0 + $0x2da] sm:$0xff] }
 0x319   :  { %10153 = vrot.lane.b32.xlu2 %v14326_v10, %s11246_s26  ;;  %v9235_v10 = vld [vmem:[%s19713_s0 + $0x2a2] sm:$0xff]  ;;  %v3294_v3 = vsel %vm1287_vm4, %v3278_v39, %v10006_v45 }
 0x31a   :  { %v2538_v14 = vpop.f32.mrf.mxu1  ;;  %3513 = vmatpush.msra.mxu3 %v3417_v25  ;;  %v15059_v44 = vpack.i.bf16 %v9236_v38, %v9235_v10 }
 0x31b   :  { %v2539_v58 = vadd.f32 %v2538_v14, %v14873_v6  ;;  %v15050_v15 = vpop.permute.xlu1 %3107  ;;  %v3341_v6 = vsel %vm1337_vm6, %v3325_v52, %v14848_v36  ;;  %v15057_v14 = vpack.i.bf16 %v9238_v13, %v9237_v21  ;;  %v3310_v52 = vsel %vm279_vm0, %v3294_v3, %v10046_v8  ;;  %v9244_v21 = vld [vmem:[%s19713_s0 + $0x30a] sm:$0xff] }
 0x31c   :  { %v3326_v5 = vsel %vm1320_vm5, %v3310_v52, %v10086_v57  ;;  %v9241_v8 = vld [vmem:[%s19713_s0 + $0x2ea] sm:$0xff]  ;;  %v9970_v13 = vunpack.i.l.bf16 %v14462_v4  ;;  %v11166_v57 = vld [vmem:[%s19713_s0 + $0x1f8] sm:$0xff]  ;;  %v15112_v52 = vpack.i.bf16 %v9240_v55, %v9239_v12 }
 0x31d   :  { %v15044_v41 = vpop.permute.xlu2 %3159  ;;  %v15052_v25 = vpop.permute.xlu0 %3105  ;;  %v2572_v40 = vmax.f32 %v2539_v58, 0.0  ;;  %v10010_v58 = vunpack.i.l.bf16 %v14557_v63  ;;  %v3263_v3 = vsel %vm49_vm1, %v11166_v57, %v9930_v24  ;;  %v9931_v24 = vunpack.i.h.bf16 %v14310_v54 }
 0x31e   :  { %20036 = vst [vmem:[#allocation22_spill] sm:$0xff] %v15044_v41  ;;  %v10015_v41 = vunpack.i.l.bf16 %v14555_v28 }
 0x31f   :  { %3461 = vmatmul.f32.gmra.mxu2 %v3341_v6  ;;  %2589 = vst.msk [vmem:[#allocation2 + $0x190] sm:$0xff] %vm49_vm1, %v2572_v40  ;;  %10163 = vrot.lane.b32.xlu1 %v15059_v44, %s11246_s26  ;;  %v3342_v40 = vsel %vm1337_vm6, %v3326_v5, %v14721_v61  ;;  %v15106_v6 = vpack.i.bf16 %v9242_v59, %v9241_v8  ;;  %v10090_v5 = vunpack.i.l.bf16 %v14723_v1  ;;  %v15129_v8 = vld [vmem:[%s19713_s0 + $0x2a0] sm:$0xff]  ;;  %v15134_v59 = vld [vmem:[%s19713_s0 + $0x2a8] sm:$0xff] }
 0x320   :  { %10158 = vrot.lane.b32.xlu0 %v15064_v23, %s11246_s26 }
 0x321   :  { %10168 = vrot.lane.b32.xlu2 %v15057_v14, %s11246_s26 }
 0x322   :  { %v2541_v0 = vpop.f32.mrf.mxu1 }
 0x323   :  { %v2542_v10 = vadd.f32 %v2541_v0, %v14972_v43  ;;  %v3146_v49 = vpop.permute.xlu1 %3145  ;;  %v15104_v43 = vpack.i.bf16 %v9244_v21, %v9243_v32  ;;  %v3279_v0 = vsel %vm1270_vm2, %v3263_v3, %v9970_v13  ;;  %v9971_v13 = vunpack.i.h.bf16 %v14462_v4 }
 0x324   :  { %v3295_v32 = vsel %vm1287_vm4, %v3279_v0, %v10010_v58  ;;  %v9245_v58 = vld [vmem:[%s19713_s0 + $0x31a] sm:$0xff] }
 0x325   :  { %v15091_v38 = vpop.permute.xlu2 %3165  ;;  %v15100_v45 = vpop.permute.xlu0 %3111  ;;  %v2573_v39 = vmax.f32 %v2542_v10, 0.0  ;;  %v10050_v10 = vunpack.i.l.bf16 %v14519_v30 }
 0x326   :  { %20037 = vst [vmem:[#allocation34_spill] sm:$0xff] %v15091_v38  ;;  %v2482_v38 = vpop.f32.mrf.mxu0 }
 0x327   :  { %3464 = vmatmul.f32.gmra.mxu2 %v3342_v40  ;;  %2590 = vst.msk [vmem:[#allocation2 + $0x1a8] sm:$0xff] %vm49_vm1, %v2573_v39  ;;  %10178 = vrot.lane.b32.xlu1 %v15106_v6, %s11246_s26  ;;  %v3311_v54 = vsel %vm279_vm0, %v3295_v32, %v10050_v10  ;;  %v9246_v39 = vld [vmem:[%s19713_s0 + $0x322] sm:$0xff]  ;;  %v10011_v40 = vunpack.i.h.bf16 %v14557_v63  ;;  %v10197_v10 = vpack.i.bf16 %v15134_v59, %v15129_v8 }
 0x328   :  { %10173 = vrot.lane.b32.xlu0 %v15112_v52, %s11246_s26  ;;  %v3327_v4 = vsel %vm1320_vm5, %v3311_v54, %v10090_v5  ;;  %v10192_v32 = vpack.i.bf16 %v14478_v46, %v14445_v7  ;;  %v11167_v63 = vld [vmem:[%s19713_s0 + $0x200] sm:$0xff]  ;;  %v9935_v5 = vunpack.i.l.bf16 %v14415_v51  ;;  %v10051_v54 = vunpack.i.h.bf16 %v14519_v30 }
 0x329   :  { %10183 = vrot.lane.b32.xlu2 %v15104_v43, %s11246_s26  ;;  %v3343_v0 = vsel %vm1337_vm6, %v3327_v4, %v14928_v47  ;;  %v10091_v7 = vunpack.i.h.bf16 %v14723_v1  ;;  %v15183_v1 = vld [vmem:[%s19713_s0 + $0x2f0] sm:$0xff] }
 0x32a   :  { %v2544_v21 = vpop.f32.mrf.mxu1  ;;  %20040 = vst [vmem:[#allocation8_spill] sm:$0xff] %v15183_v1 }
 0x32b   :  { %v2545_v12 = vadd.f32 %v2544_v21, %v2479_v29  ;;  %v15147_v57 = vpop.permute.xlu1 %3151  ;;  %v3264_v21 = vsel %vm49_vm1, %v11167_v63, %v9931_v24  ;;  %v15175_v24 = vld [vmem:[%s19713_s0 + $0x2e8] sm:$0xff] }
 0x32c   :  { %20039 = vst [vmem:[#allocation20_spill] sm:$0xff] %v15175_v24 }
 0x32d   :  { %v15137_v55 = vpop.permute.xlu2 %3171  ;;  %v15149_v3 = vpop.permute.xlu0 %3149  ;;  %v2574_v29 = vmax.f32 %v2545_v12, 0.0  ;;  %v3280_v12 = vsel %vm1270_vm2, %v3264_v21, %v9971_v13  ;;  %v9975_v13 = vunpack.i.l.bf16 %v14389_v37  ;;  %v15205_v21 = vld [vmem:[%s19713_s0 + $0x2b8] sm:$0xff] }
 0x32e   :  { %20038 = vst [vmem:[#allocation32_spill] sm:$0xff] %v15137_v55  ;;  %v15162_v55 = vpack.i.bf16 %v9246_v39, %v9245_v58  ;;  %v3296_v4 = vsel %vm1287_vm4, %v3280_v12, %v10011_v40  ;;  %v2485_v46 = vpop.f32.mrf.mxu0  ;;  %v15188_v58 = vld [vmem:[%s19713_s0 + $0x2d0] sm:$0xff]  ;;  %v15193_v39 = vld [vmem:[%s19713_s0 + $0x2d8] sm:$0xff]  ;;  %v15210_v12 = vld [vmem:[%s19713_s0 + $0x2c0] sm:$0xff] }
 0x32f   :  { %3467 = vmatmul.f32.gmra.mxu2 %v3343_v0  ;;  %2591 = vst.msk [vmem:[#allocation2 + $0x1b0] sm:$0xff] %vm49_vm1, %v2574_v29  ;;  %10193 = vrot.lane.b32.xlu1 %v10192_v32, %s11247_s24  ;;  %v11168_v40 = vld [vmem:[%s19713_s0 + $0x210] sm:$0xff]  ;;  %v3353_v0 = vsel %vm1354_vm8, %v14787_v11, %v3146_v49  ;;  %v3312_v63 = vsel %vm279_vm0, %v3296_v4, %v10051_v54 }
 0x330   :  { %10188 = vrot.lane.b32.xlu0 %v15162_v55, %s11246_s26  ;;  %20041 = vst [vmem:[#allocation37_spill] sm:$0xff] %v15193_v39  ;;  %v3265_v29 = vsel %vm49_vm1, %v11168_v40, %v9935_v5  ;;  %v10055_v5 = vunpack.i.l.bf16 %v14675_v60  ;;  %v3328_v54 = vsel %vm1320_vm5, %v3312_v63, %v10091_v7  ;;  %v10212_v40 = vpack.i.bf16 %v15183_v1, %v15175_v24 }
 0x331   :  { %10198 = vrot.lane.b32.xlu2 %v10197_v10, %s11247_s24  ;;  %v10207_v47 = vpack.i.bf16 %v15193_v39, %v15188_v58  ;;  %v9936_v7 = vunpack.i.h.bf16 %v14415_v51  ;;  %v10095_v63 = vunpack.i.l.bf16 %v14626_v33  ;;  %v15246_v51 = vld [vmem:[%s19713_s0 + $0x338] sm:$0xff] }
 0x332   :  { %v2547_v30 = vpop.f32.mrf.mxu1 }
 0x333   :  { %v2548_v10 = vadd.f32 %v2547_v30, %v2482_v38  ;;  %v15215_v38 = vpop.permute.xlu1 %3157  ;;  %v3344_v30 = vsel %vm1337_vm6, %v3328_v54, %v14926_v17  ;;  %v15240_v54 = vld [vmem:[%s19713_s0 + $0x330] sm:$0xff] }
 0x334   :  { %20042 = vst [vmem:[#allocation31_spill] sm:$0xff] %v15215_v38  ;;  %v10227_v38 = vpack.i.bf16 %v15246_v51, %v15240_v54 }
 0x335   :  { %v3210_v32 = vpop.permute.xlu2 %3209  ;;  %v15217_v49 = vpop.permute.xlu0 %3155  ;;  %v2575_v4 = vmax.f32 %v2548_v10, 0.0 }
 0x336   :  { %v3369_v11 = vsel %vm1371_vm10, %v3353_v0, %v3210_v32  ;;  %v10202_v0 = vpack.i.bf16 %v15210_v12, %v15205_v21  ;;  %v3281_v32 = vsel %vm1270_vm2, %v3265_v29, %v9975_v13  ;;  %v9976_v29 = vunpack.i.h.bf16 %v14389_v37 }
 0x337   :  { %9183 = vmatmul.msk.f32.vlgmr.msra.gmra.mxu3 %vm1388_vm9, %v3369_v11  ;;  %3470 = vmatmul.f32.gmra.mxu2 %v3344_v30  ;;  %2592 = vst.msk [vmem:[#allocation2 + $0x1c8] sm:$0xff] %vm49_vm1, %v2575_v4  ;;  %v3297_v10 = vsel %vm1287_vm4, %v3281_v32, %v10015_v41  ;;  %v15251_v41 = vld [vmem:[%s19713_s0 + $0x318] sm:$0xff] }
 0x338   :  { %10208 = vrot.lane.b32.xlu1 %v10207_v47, %s11247_s24  ;;  %v3313_v11 = vsel %vm279_vm0, %v3297_v10, %v10055_v5  ;;  %10203 = vrot.lane.b32.xlu0 %v10202_v0, %s11247_s24  ;;  %v15256_v47 = vld [vmem:[%s19713_s0 + $0x320] sm:$0xff]  ;;  %v2488_v5 = vpop.f32.mrf.mxu0  ;;  %v15269_v0 = vld [vmem:[%s19713_s0 + $0x308] sm:$0xff]  ;;  %v10056_v10 = vunpack.i.h.bf16 %v14675_v60 }
 0x339   :  { %10213 = vrot.lane.b32.xlu2 %v10212_v40, %s11247_s24  ;;  %v15264_v40 = vld [vmem:[%s19713_s0 + $0x300] sm:$0xff]  ;;  %v11169_v32 = vld [vmem:[%s19713_s0 + $0x218] sm:$0xff]  ;;  %v3329_v39 = vsel %vm1320_vm5, %v3313_v11, %v10095_v63  ;;  %v10096_v11 = vunpack.i.h.bf16 %v14626_v33 }
 0x33a   :  { %v2550_v13 = vpop.f32.mrf.mxu1  ;;  %v3266_v37 = vsel %vm49_vm1, %v11169_v32, %v9936_v7  ;;  %v3345_v1 = vsel %vm1337_vm6, %v3329_v39, %v14745_v26  ;;  %v10222_v7 = vpack.i.bf16 %v15256_v47, %v15251_v41  ;;  %v9980_v32 = vunpack.i.l.bf16 %v14495_v62 }
 0x33b   :  { %v2551_v4 = vadd.f32 %v2550_v13, %v2485_v46  ;;  %v10016_v46 = vunpack.i.h.bf16 %v14555_v28  ;;  %v15277_v13 = vpop.permute.xlu1 %3163  ;;  %v10217_v28 = vpack.i.bf16 %v15269_v0, %v15264_v40  ;;  %v3282_v60 = vsel %vm1270_vm2, %v3266_v37, %v9976_v29 }
 0x33d   :  { %v15259_v30 = vpop.permute.xlu2 %3215  ;;  %v15279_v17 = vpop.permute.xlu0 %3161  ;;  %v2576_v24 = vmax.f32 %v2551_v4, 0.0  ;;  %v3298_v63 = vsel %vm1287_vm4, %v3282_v60, %v10016_v46  ;;  %v9940_v4 = vunpack.i.l.bf16 %v14413_v53 }
 0x33e   :  { %v3314_v39 = vsel %vm279_vm0, %v3298_v63, %v10056_v10 }
 0x33f   :  { %3473 = vmatmul.f32.gmra.mxu2 %v3345_v1  ;;  %2593 = vst.msk [vmem:[#allocation2 + $0x1d0] sm:$0xff] %vm49_vm1, %v2576_v24  ;;  %v3330_v33 = vsel %vm1320_vm5, %v3314_v39, %v10096_v11  ;;  %v10100_v11 = vunpack.i.l.bf16 %v14750_v50  ;;  %v9941_v39 = vunpack.i.h.bf16 %v14413_v53 }
 0x340   :  { %10223 = vrot.lane.b32.xlu1 %v10222_v7, %s11247_s24  ;;  %10218 = vrot.lane.b32.xlu0 %v10217_v28, %s11247_s24  ;;  %v3346_v10 = vsel %vm1337_vm6, %v3330_v33, %v14992_v35  ;;  %v11170_v7 = vld [vmem:[%s19713_s0 + $0x228] sm:$0xff]  ;;  %v2491_v60 = vpop.f32.mrf.mxu0 }
 0x341   :  { %10228 = vrot.lane.b32.xlu2 %v10227_v38, %s11247_s24  ;;  %v3267_v28 = vsel %vm49_vm1, %v11170_v7, %v9940_v4 }
 0x342   :  { %v2553_v1 = vpop.f32.mrf.mxu1  ;;  %v3283_v63 = vsel %vm1270_vm2, %v3267_v28, %v9980_v32  ;;  %v11171_v28 = vld [vmem:[%s19713_s0 + $0x230] sm:$0xff] }
 0x343   :  { %v2554_v29 = vadd.f32 %v2553_v1, %v2488_v5  ;;  %v15302_v24 = vpop.permute.xlu1 %3169  ;;  %v10020_v5 = vunpack.i.l.bf16 %v14460_v22  ;;  %v10060_v1 = vunpack.i.l.bf16 %v14673_v56 }
 0x345   :  { %v15300_v37 = vpop.permute.xlu2 %3221  ;;  %v15304_v46 = vpop.permute.xlu0 %3167  ;;  %v2577_v38 = vmax.f32 %v2554_v29, 0.0  ;;  %v3299_v32 = vsel %vm1287_vm4, %v3283_v63, %v10020_v5  ;;  %v9981_v29 = vunpack.i.h.bf16 %v14495_v62  ;;  %v3268_v62 = vsel %vm49_vm1, %v11171_v28, %v9941_v39 }
 0x346   :  { %v10021_v5 = vunpack.i.h.bf16 %v14460_v22  ;;  %v10061_v63 = vunpack.i.h.bf16 %v14673_v56  ;;  %v9945_v39 = vunpack.i.l.bf16 %v14345_v20  ;;  %v15357_v56 = vld [vmem:[%s19713_s0 + $0x331] sm:$0xff] }
 0x347   :  { %3476 = vmatmul.f32.gmra.mxu2 %v3346_v10  ;;  %2594 = vst.msk [vmem:[#allocation2 + $0x1e8] sm:$0xff] %vm49_vm1, %v2577_v38  ;;  %v3315_v10 = vsel %vm279_vm0, %v3299_v32, %v10060_v1  ;;  %v10101_v1 = vunpack.i.h.bf16 %v14750_v50  ;;  %v15362_v50 = vld [vmem:[%s19713_s0 + $0x339] sm:$0xff] }
 0x348   :  { %10238 = vrot.lane.b32.xlu1 %v14856_v27, %s11248_s11  ;;  %10233 = vrot.lane.b32.xlu0 %v14860_v19, %s11248_s11  ;;  %v3331_v27 = vsel %vm1320_vm5, %v3315_v10, %v10100_v11  ;;  %v2494_v11 = vpop.f32.mrf.mxu0  ;;  %v20044_v10 = vld [vmem:[#allocation6_spill] sm:$0xff] }
 0x349   :  { %10243 = vrot.lane.b32.xlu2 %v14942_v31, %s11248_s11  ;;  %v3347_v19 = vsel %vm1337_vm6, %v3331_v27, %v14990_v9 }
 0x34a   :  { %v2556_v4 = vpop.f32.mrf.mxu1 }
 0x34b   :  { %v2557_v33 = vadd.f32 %v2556_v4, %v2491_v60  ;;  %v15330_v7 = vpop.permute.xlu1 %3175  ;;  %v3284_v60 = vsel %vm1270_vm2, %v3268_v62, %v9981_v29  ;;  %v10025_v29 = vunpack.i.l.bf16 %v14599_v42 }
 0x34c   :  { %v3300_v4 = vsel %vm1287_vm4, %v3284_v60, %v10021_v5  ;;  %v20045_v60 = vld [vmem:[#allocation24_spill] sm:$0xff] }
 0x34d   :  { %v15327_v38 = vpop.permute.xlu2 %3227  ;;  %v15332_v31 = vpop.permute.xlu0 %3173  ;;  %v2578_v53 = vmax.f32 %v2557_v33, 0.0  ;;  %v20043_v33 = vld [vmem:[#allocation15_spill] sm:$0xff] }
 0x34e   :  { %v3354_v27 = vsel %vm1354_vm8, %v20044_v10, %v20043_v33  ;;  %v20047_v10 = vld [vmem:[#allocation23_spill] sm:$0xff] }
 0x34f   :  { %3479 = vmatmul.f32.gmra.mxu2 %v3347_v19  ;;  %2595 = vst.msk [vmem:[#allocation2 + $0x1f0] sm:$0xff] %vm49_vm1, %v2578_v53 }
 0x350   :  { %10253 = vrot.lane.b32.xlu1 %v14934_v34, %s11248_s11  ;;  %10248 = vrot.lane.b32.xlu0 %v14938_v48, %s11248_s11  ;;  %v9985_v34 = vunpack.i.l.bf16 %v14493_v2  ;;  %v3316_v48 = vsel %vm279_vm0, %v3300_v4, %v10061_v63  ;;  %v11172_v63 = vld [vmem:[%s19713_s0 + $0x240] sm:$0xff] }
 0x351   :  { %10258 = vrot.lane.b32.xlu2 %v15006_v18, %s11248_s11  ;;  %v3332_v28 = vsel %vm1320_vm5, %v3316_v48, %v10101_v1  ;;  %v3269_v4 = vsel %vm49_vm1, %v11172_v63, %v9945_v39  ;;  %v9946_v39 = vunpack.i.h.bf16 %v14345_v20 }
 0x352   :  { %v2559_v22 = vpop.f32.mrf.mxu1  ;;  %v3285_v1 = vsel %vm1270_vm2, %v3269_v4, %v9985_v34 }
 0x353   :  { %v2560_v18 = vadd.f32 %v2559_v22, %v2494_v11  ;;  %v3214_v53 = vpop.permute.xlu1 %3213  ;;  %v3348_v11 = vsel %vm1337_vm6, %v3332_v28, %v20045_v60  ;;  %v10267_v22 = vpack.i.bf16 %v15362_v50, %v15357_v56  ;;  %v3301_v33 = vsel %vm1287_vm4, %v3285_v1, %v10025_v29 }
 0x354   :  { %v9986_v28 = vunpack.i.h.bf16 %v14493_v2 }
 0x355   :  { %v15365_v32 = vpop.permute.xlu2 %3233  ;;  %v3212_v19 = vpop.permute.xlu0 %3211  ;;  %v2579_v62 = vmax.f32 %v2560_v18, 0.0  ;;  %v20046_v18 = vld [vmem:[#allocation14_spill] sm:$0xff] }
 0x356   :  { %v3370_v5 = vsel %vm1371_vm10, %v3354_v27, %v3212_v19  ;;  %v10065_v48 = vunpack.i.l.bf16 %v20046_v18  ;;  %v10105_v27 = vunpack.i.l.bf16 %v20047_v10  ;;  %v2497_v19 = vpop.f32.mrf.mxu0 }
 0x357   :  { %3482 = vmatmul.f32.gmra.mxu2 %v3348_v11  ;;  %9184 = vmatmul.msk.f32.gmra.mxu3 %vm1388_vm9, %v3370_v5  ;;  %2596 = vst.msk [vmem:[#allocation2 + $0x208] sm:$0xff] %vm49_vm1, %v2579_v62  ;;  %v10026_v11 = vunpack.i.h.bf16 %v14599_v42 }
 0x358   :  { %10268 = vrot.lane.b32.xlu1 %v10267_v22, %s11248_s11  ;;  %10263 = vrot.lane.b32.xlu0 %v14997_v16, %s11248_s11  ;;  %v3317_v29 = vsel %vm279_vm0, %v3301_v33, %v10065_v48  ;;  %v11173_v48 = vld [vmem:[%s19713_s0 + $0x248] sm:$0xff]  ;;  %v10066_v33 = vunpack.i.h.bf16 %v20046_v18 }
 0x359   :  { %10273 = vrot.lane.b32.xlu2 %v15064_v23, %s11249_s16  ;;  %v20048_v23 = vld [vmem:[#allocation19_spill] sm:$0xff]  ;;  %v3333_v4 = vsel %vm1320_vm5, %v3317_v29, %v10105_v27  ;;  %v3270_v42 = vsel %vm49_vm1, %v11173_v48, %v9946_v39  ;;  %v20050_v39 = vld [vmem:[#allocation10_spill] sm:$0xff]  ;;  %v11174_v29 = vld [vmem:[%s19713_s0 + $0x258] sm:$0xff] }
 0x35a   :  { %v2562_v34 = vpop.f32.mrf.mxu1  ;;  %v3355_v22 = vsel %vm1354_vm8, %v20048_v23, %v15149_v3  ;;  %v3349_v2 = vsel %vm1337_vm6, %v3333_v4, %v15052_v25  ;;  %v3286_v3 = vsel %vm1270_vm2, %v3270_v42, %v9986_v28  ;;  %v9990_v28 = vunpack.i.l.bf16 %v20050_v39  ;;  %v20052_v23 = vld [vmem:[#allocation26_spill] sm:$0xff] }
 0x35b   :  { %v2563_v5 = vadd.f32 %v2562_v34, %v2497_v19  ;;  %v15402_v63 = vpop.permute.xlu1 %3219  ;;  %v3371_v16 = vsel %vm1371_vm10, %v3355_v22, %v3214_v53  ;;  %v20049_v53 = vld [vmem:[#allocation25_spill] sm:$0xff]  ;;  %v3302_v19 = vsel %vm1287_vm4, %v3286_v3, %v10026_v11  ;;  %v10106_v34 = vunpack.i.h.bf16 %v20047_v10 }
 0x35c   :  { %v9950_v27 = vunpack.i.l.bf16 %v20049_v53  ;;  %v20051_v11 = vld [vmem:[#allocation9_spill] sm:$0xff] }
 0x35d   :  { %v15395_v62 = vpop.permute.xlu2 %3239  ;;  %v3218_v20 = vpop.permute.xlu0 %3217  ;;  %v2580_v1 = vmax.f32 %v2563_v5, 0.0  ;;  %v3318_v5 = vsel %vm279_vm0, %v3302_v19, %v10066_v33  ;;  %v20054_v33 = vld [vmem:[#allocation16_spill] sm:$0xff]  ;;  %v9991_v19 = vunpack.i.h.bf16 %v20050_v39  ;;  %v10031_v39 = vunpack.i.h.bf16 %v20051_v11 }
 0x35e   :  { %v3271_v10 = vsel %vm49_vm1, %v11174_v29, %v9950_v27  ;;  %v3334_v4 = vsel %vm1320_vm5, %v3318_v5, %v10106_v34  ;;  %v10110_v27 = vunpack.i.l.bf16 %v20054_v33 }
 0x35f   :  { %3485 = vmatmul.f32.gmra.mxu2 %v3349_v2  ;;  %9185 = vmatmul.msk.f32.gmra.mxu3 %vm1388_vm9, %v3371_v16  ;;  %2597 = vst.msk [vmem:[#allocation2 + $0x210] sm:$0xff] %vm49_vm1, %v2580_v1  ;;  %v20053_v16 = vld [vmem:[#allocation17_spill] sm:$0xff]  ;;  %v3350_v48 = vsel %vm1337_vm6, %v3334_v4, %v15050_v15  ;;  %v3287_v42 = vsel %vm1270_vm2, %v3271_v10, %v9990_v28  ;;  %v20055_v28 = vld [vmem:[#allocation18_spill] sm:$0xff]  ;;  %v20056_v4 = vld [vmem:[#allocation27_spill] sm:$0xff] }
 0x360   :  { %10283 = vrot.lane.b32.xlu1 %v15057_v14, %s11249_s16  ;;  %10278 = vrot.lane.b32.xlu0 %v15059_v44, %s11249_s16  ;;  %v3356_v14 = vsel %vm1354_vm8, %v20052_v23, %v15147_v57  ;;  %v10070_v1 = vunpack.i.l.bf16 %v20053_v16  ;;  %v9951_v57 = vunpack.i.h.bf16 %v20049_v53  ;;  %v15465_v53 = vld [vmem:[%s19713_s0 + $0x332] sm:$0xff]  ;;  %v3357_v5 = vsel %vm1354_vm8, %v14848_v36, %v20055_v28  ;;  %v20063_v28 = vld [vmem:[#allocation30_spill] sm:$0xff] }
 0x361   :  { %10288 = vrot.lane.b32.xlu2 %v15112_v52, %s11249_s16  ;;  %v10030_v52 = vunpack.i.l.bf16 %v20051_v11  ;;  %v3372_v2 = vsel %vm1371_vm10, %v3356_v14, %v15259_v30  ;;  %v10071_v23 = vunpack.i.h.bf16 %v20053_v16  ;;  %v3373_v14 = vsel %vm1371_vm10, %v3357_v5, %v3218_v20 }
 0x363   :  { %v15437_v22 = vpop.permute.xlu1 %3225  ;;  %v3303_v3 = vsel %vm1287_vm4, %v3287_v42, %v10030_v52  ;;  %v3358_v42 = vsel %vm1354_vm8, %v14721_v61, %v15217_v49  ;;  %v20057_v49 = vld [vmem:[#allocation31_spill] sm:$0xff] }
 0x364   :  { %v3319_v30 = vsel %vm279_vm0, %v3303_v3, %v10070_v1 }
 0x365   :  { %v15426_v18 = vpop.permute.xlu2 %10123  ;;  %v15439_v44 = vpop.permute.xlu0 %3223  ;;  %v3335_v52 = vsel %vm1320_vm5, %v3319_v30, %v10110_v27  ;;  %v20058_v27 = vld [vmem:[#allocation28_spill] sm:$0xff] }
 0x366   :  { %v3351_v1 = vsel %vm1337_vm6, %v3335_v52, %v20056_v4 }
 0x367   :  { %3488 = vmatmul.f32.gmra.mxu2 %v3350_v48  ;;  %9186 = vmatmul.msk.f32.gmra.mxu3 %vm1388_vm9, %v3372_v2  ;;  %v10111_v48 = vunpack.i.h.bf16 %v20054_v33 }
 0x368   :  { %10298 = vrot.lane.b32.xlu1 %v15104_v43, %s11249_s16  ;;  %10293 = vrot.lane.b32.xlu0 %v15106_v6, %s11249_s16  ;;  %v11175_v43 = vld [vmem:[%s19713_s0 + $0x260] sm:$0xff] }
 0x369   :  { %10303 = vrot.lane.b32.xlu2 %v15162_v55, %s11249_s16  ;;  %v15470_v55 = vld [vmem:[%s19713_s0 + $0x33a] sm:$0xff]  ;;  %v3272_v6 = vsel %vm49_vm1, %v11175_v43, %v9951_v57 }
 0x36a   :  { %v10307_v11 = vpack.i.bf16 %v15470_v55, %v15465_v53  ;;  %v3288_v36 = vsel %vm1270_vm2, %v3272_v6, %v9991_v19 }
 0x36b   :  { %v15480_v29 = vpop.permute.xlu1 %3231  ;;  %v3304_v2 = vsel %vm1287_vm4, %v3288_v36, %v10031_v39  ;;  %v20062_v39 = vld [vmem:[#allocation22_spill] sm:$0xff] }
 0x36c   :  { %v3320_v20 = vsel %vm279_vm0, %v3304_v2, %v10071_v23  ;;  %v3360_v5 = vsel %vm1354_vm8, %v20063_v28, %v20062_v39 }
 0x36d   :  { %v15460_v34 = vpop.permute.xlu2 %10138  ;;  %v15482_v10 = vpop.permute.xlu0 %3229  ;;  %v3336_v33 = vsel %vm1320_vm5, %v3320_v20, %v10111_v48  ;;  %v3376_v23 = vsel %vm1371_vm10, %v3360_v5, %v15439_v44  ;;  %v9312_v20 = vld [vmem:[%s19713_s0 + $0x2a9] sm:$0xff]  ;;  %v4411_v5 = vld [vmem:[%s19716_s3 + $0x60] sm:$0xff] }
 0x36f   :  { %3491 = vmatmul.f32.gmra.mxu2 %v3351_v1  ;;  %9187 = vmatmul.msk.f32.gmra.mxu3 %vm1388_vm9, %v3373_v14  ;;  %v3361_v1 = vsel %vm1354_vm8, %v14745_v26, %v15279_v17  ;;  %v3362_v26 = vsel %vm1354_vm8, %v14992_v35, %v15277_v13  ;;  %v20066_v13 = vld [vmem:[#allocation34_spill] sm:$0xff] }
 0x370   :  { %4079 = vrot.lane.b32.xlu1 %v15129_v8, %s11250_s22  ;;  %10308 = vrot.lane.b32.xlu0 %v10307_v11, %s11249_s16  ;;  %v3352_v8 = vsel %vm1337_vm6, %v3336_v33, %v15100_v45  ;;  %v3377_v36 = vsel %vm1371_vm10, %v3361_v1, %v15437_v22  ;;  %v20068_v33 = vld [vmem:[#allocation33_spill] sm:$0xff]  ;;  %v4409_v1 = vld [vmem:[%s19716_s3 + $0x50] sm:$0xff] }
 0x371   :  { %4081 = vrot.lane.b32.xlu2 %v15134_v59, %s11250_s22  ;;  %v3374_v59 = vsel %vm1371_vm10, %v3358_v42, %v15402_v63  ;;  %v3359_v63 = vsel %vm1354_vm8, %v20058_v27, %v20057_v49  ;;  %v20067_v42 = vld [vmem:[#allocation21_spill] sm:$0xff] }
 0x372   :  { %v3375_v43 = vsel %vm1371_vm10, %v3359_v63, %v15300_v37  ;;  %v4414_v27 = vld [vmem:[%s19716_s3 + $0x78] sm:$0xff]  ;;  %v20069_v63 = vld [vmem:[#allocation7_spill] sm:$0xff] }
 0x373   :  { %v15506_v57 = vpop.permute.xlu1 %3237  ;;  %4431 = vmatpush.msra.mxu0 %v4414_v27  ;;  %v3367_v27 = vsel %vm1354_vm8, %v20056_v4, %v15332_v31  ;;  %v9325_v31 = vld [vmem:[%s19713_s0 + $0x349] sm:$0xff] }
 0x374   :  { %v4405_v4 = vld [vmem:[%s19716_s3 + $0x30] sm:$0xff] }
 0x375   :  { %v15501_v16 = vpop.permute.xlu2 %10153  ;;  %v15508_v3 = vpop.permute.xlu0 %3235 }
 0x377   :  { %3494 = vmatmul.f32.gmra.mxu2 %v3352_v8  ;;  %9188 = vmatmul.msk.f32.gmra.mxu3 %vm1388_vm9, %v3374_v59 }
 0x378   :  { %4085 = vrot.lane.b32.xlu1 %v15210_v12, %s11250_s22  ;;  %4083 = vrot.lane.b32.xlu0 %v15205_v21, %s11250_s22  ;;  %v20060_v21 = vld [vmem:[#allocation20_spill] sm:$0xff]  ;;  %v20061_v12 = vld [vmem:[#allocation37_spill] sm:$0xff] }
 0x379   :  { %4087 = vrot.lane.b32.xlu2 %v15188_v58, %s11250_s22  ;;  %v20059_v58 = vld [vmem:[#allocation8_spill] sm:$0xff] }
 0x37b   :  { %v15527_v30 = vpop.permute.xlu1 %10118 }
 0x37d   :  { %v15522_v61 = vpop.permute.xlu2 %10168  ;;  %v15529_v19 = vpop.permute.xlu0 %10113 }
 0x37f   :  { %9189 = vmatmul.msk.f32.gmra.mxu3 %vm1388_vm9, %v3375_v43  ;;  %v20070_v43 = vld [vmem:[#allocation13_spill] sm:$0xff] }
 0x380   :  { %4091 = vrot.lane.b32.xlu1 %v20060_v21, %s11250_s22  ;;  %4089 = vrot.lane.b32.xlu0 %v20061_v12, %s11250_s22  ;;  %v3365_v21 = vsel %vm1354_vm8, %v15052_v25, %v15302_v24  ;;  %v9318_v25 = vld [vmem:[%s19713_s0 + $0x2f1] sm:$0xff] }
 0x381   :  { %4093 = vrot.lane.b32.xlu2 %v20059_v58, %s11250_s22  ;;  %v3381_v28 = vsel %vm1371_vm10, %v3365_v21, %v15365_v32  ;;  %v20072_v24 = vld [vmem:[#allocation36_spill] sm:$0xff]  ;;  %v20073_v32 = vld [vmem:[#allocation35_spill] sm:$0xff] }
 0x383   :  { %v15545_v52 = vpop.permute.xlu1 %10133 }
 0x385   :  { %v15540_v6 = vpop.permute.xlu2 %10183  ;;  %v15547_v37 = vpop.permute.xlu0 %10128 }
 0x387   :  { %9190 = vmatmul.msk.f32.gmra.mxu3 %vm1388_vm9, %v3376_v23  ;;  %v4410_v23 = vld [vmem:[%s19716_s3 + $0x58] sm:$0xff] }
 0x388   :  { %4097 = vrot.lane.b32.xlu1 %v15269_v0, %s11250_s22  ;;  %4095 = vrot.lane.b32.xlu0 %v15264_v40, %s11250_s22  ;;  %v3378_v0 = vsel %vm1371_vm10, %v3362_v26, %v15327_v38  ;;  %v3363_v38 = vsel %vm1354_vm8, %v14990_v9, %v20066_v13  ;;  %v3450_v26 = vpop.f32.mrf.mxu2 }
 0x389   :  { %4099 = vrot.lane.b32.xlu2 %v15251_v41, %s11250_s22  ;;  %v3379_v48 = vsel %vm1371_vm10, %v3363_v38, %v15482_v10  ;;  %v3364_v10 = vsel %vm1354_vm8, %v20045_v60, %v15304_v46  ;;  %v4413_v46 = vld [vmem:[%s19716_s3 + $0x70] sm:$0xff] }
 0x38a   :  { %v3380_v49 = vsel %vm1371_vm10, %v3364_v10, %v15480_v29  ;;  %v20071_v60 = vld [vmem:[#allocation12_spill] sm:$0xff]  ;;  %4432 = vmatpush.msra.mxu0 %v4413_v46  ;;  %v4412_v29 = vld [vmem:[%s19716_s3 + $0x68] sm:$0xff]  ;;  %v3383_v46 = vsel %vm1371_vm10, %v3367_v27, %v15506_v57 }
 0x38b   :  { %v15563_v11 = vpop.permute.xlu1 %10148  ;;  %v4404_v57 = vld [vmem:[%s19716_s3 + $0x28] sm:$0xff]  ;;  %v9334_v27 = vld [vmem:[%s19713_s0 + $0x2f2] sm:$0xff] }
 0x38c   :  { %4433 = vmatpush.msra.mxu0 %v4412_v29  ;;  %v4403_v29 = vld [vmem:[%s19716_s3 + $0x20] sm:$0xff] }
 0x38d   :  { %v15558_v14 = vpop.permute.xlu2 %10198  ;;  %v15565_v44 = vpop.permute.xlu0 %10143 }
 0x38e   :  { %4434 = vmatpush.msra.mxu0 %v4411_v5  ;;  %v3368_v5 = vsel %vm1354_vm8, %v15100_v45, %v15330_v7  ;;  %v4401_v45 = vld [vmem:[%s19716_s3 + $0x10] sm:$0xff] }
 0x38f   :  { %9191 = vmatmul.msk.f32.gmra.mxu3 %vm1388_vm9, %v3377_v36  ;;  %v4408_v36 = vld [vmem:[%s19716_s3 + $0x48] sm:$0xff] }
 0x390   :  { %4103 = vrot.lane.b32.xlu1 %v15240_v54, %s11250_s22  ;;  %4101 = vrot.lane.b32.xlu0 %v15256_v47, %s11250_s22  ;;  %v9310_v54 = vld [vmem:[%s19713_s0 + $0x350] sm:$0xff]  ;;  %v20064_v47 = vld [vmem:[#allocation11_spill] sm:$0xff] }
 0x391   :  { %4105 = vrot.lane.b32.xlu2 %v15246_v51, %s11250_s22  ;;  %v9309_v51 = vld [vmem:[%s19713_s0 + $0x348] sm:$0xff]  ;;  %4435 = vmatpush.msra.mxu0 %v4410_v23 }
 0x393   :  { %v15581_v17 = vpop.permute.xlu1 %10163  ;;  %4436 = vmatpush.msra.mxu0 %v4409_v1  ;;  %v4400_v1 = vld [vmem:[%s19716_s3 + $0x8] sm:$0xff] }
 0x395   :  { %v15576_v41 = vpop.permute.xlu2 %10213  ;;  %v15583_v40 = vpop.permute.xlu0 %10158  ;;  %4437 = vmatpush.msra.mxu0 %v4408_v36  ;;  %v4399_v36 = vld [vmem:[%s19716_s3] sm:$0xff] }
 0x397   :  { %9192 = vmatmul.msk.f32.gmra.mxu3 %vm1388_vm9, %v3378_v0 }
 0x398   :  { %4109 = vrot.lane.b32.xlu1 %v9310_v54, %s11250_s22  ;;  %4107 = vrot.lane.b32.xlu0 %v9309_v51, %s11250_s22  ;;  %v20074_v54 = vld [vmem:[#allocation32_spill] sm:$0xff] }
 0x399   :  { %4143 = vrot.lane.b32.xlu2 %v20064_v47, %s11251_s20  ;;  %v3366_v51 = vsel %vm1354_vm8, %v15050_v15, %v20074_v54  ;;  %v9322_v15 = vld [vmem:[%s19713_s0 + $0x321] sm:$0xff] }
 0x39a   :  { %v3382_v38 = vsel %vm1371_vm10, %v3366_v51, %v15508_v3 }
 0x39b   :  { %v15603_v22 = vpop.permute.xlu1 %10178 }
 0x39d   :  { %v15598_v35 = vpop.permute.xlu2 %10228  ;;  %v15605_v2 = vpop.permute.xlu0 %10173 }
 0x39e   :  { %20065 = vst [vmem:[#allocation29_spill] sm:$0xff] %v15598_v35  ;;  %v4631_v35 = vld [vmem:[#allocation2 + $0x51] sm:$0xff] }
 0x39f   :  { %9193 = vmatmul.msk.f32.gmra.mxu3 %vm1388_vm9, %v3379_v48  ;;  %v4407_v48 = vld [vmem:[%s19716_s3 + $0x40] sm:$0xff] }
 0x3a0   :  { %4147 = vrot.lane.b32.xlu1 %v20068_v33, %s11251_s20  ;;  %4145 = vrot.lane.b32.xlu0 %v9312_v20, %s11251_s20  ;;  %v4406_v20 = vld [vmem:[%s19716_s3 + $0x38] sm:$0xff] }
 0x3a1   :  { %4149 = vrot.lane.b32.xlu2 %v20067_v42, %s11251_s20  ;;  %4438 = vmatpush.msra.mxu0 %v4407_v48  ;;  %v9321_v42 = vld [vmem:[%s19713_s0 + $0x319] sm:$0xff] }
 0x3a2   :  { %v9331_v48 = vld [vmem:[%s19713_s0 + $0x2d2] sm:$0xff] }
 0x3a3   :  { %v15623_v59 = vpop.permute.xlu1 %10193  ;;  %4439 = vmatpush.msra.mxu0 %v4406_v20  ;;  %v9330_v20 = vld [vmem:[%s19713_s0 + $0x2c2] sm:$0xff] }
 0x3a5   :  { %v15618_v9 = vpop.permute.xlu2 %10243  ;;  %v15625_v8 = vpop.permute.xlu0 %10188  ;;  %4440 = vmatpush.msra.mxu0 %v4405_v4 }
 0x3a7   :  { %9194 = vmatmul.msk.f32.gmra.mxu3 %vm1388_vm9, %v3380_v49  ;;  %4441 = vmatpush.msra.mxu0 %v4404_v57 }
 0x3a8   :  { %4153 = vrot.lane.b32.xlu1 %v20070_v43, %s11251_s20  ;;  %4151 = vrot.lane.b32.xlu0 %v20071_v60, %s11251_s20  ;;  %v3453_v60 = vpop.f32.mrf.mxu2 }
 0x3a9   :  { %4155 = vrot.lane.b32.xlu2 %v20069_v63, %s11251_s20  ;;  %4442 = vmatpush.msra.mxu0 %v4403_v29  ;;  %v10155_v29 = vunpack.i.l.bf16 %v15501_v16 }
 0x3ab   :  { %v15650_v12 = vpop.permute.xlu1 %10208 }
 0x3ad   :  { %v15645_v58 = vpop.permute.xlu2 %10258  ;;  %v15652_v39 = vpop.permute.xlu0 %10203 }
 0x3af   :  { %9195 = vmatmul.msk.f32.gmra.mxu3 %vm1388_vm9, %v3381_v28  ;;  %v4402_v28 = vld [vmem:[%s19716_s3 + $0x18] sm:$0xff] }
 0x3b0   :  { %4159 = vrot.lane.b32.xlu1 %v20073_v32, %s11251_s20  ;;  %4157 = vrot.lane.b32.xlu0 %v9318_v25, %s11251_s20  ;;  %v9328_v32 = vld [vmem:[%s19713_s0 + $0x2aa] sm:$0xff]  ;;  %v3456_v7 = vpop.f32.mrf.mxu2 }
 0x3b1   :  { %4161 = vrot.lane.b32.xlu2 %v20072_v24, %s11251_s20  ;;  %v3384_v24 = vsel %vm1371_vm10, %v3368_v5, %v15395_v62  ;;  %4443 = vmatpush.msra.mxu0 %v4402_v28  ;;  %v9327_v62 = vld [vmem:[%s19713_s0 + $0x2a2] sm:$0xff] }
 0x3b3   :  { %v15682_v47 = vpop.permute.xlu1 %10223  ;;  %4444 = vmatpush.msra.mxu0 %v4401_v45 }
 0x3b5   :  { %v15677_v0 = vpop.permute.xlu2 %10273  ;;  %v15684_v13 = vpop.permute.xlu0 %10218  ;;  %4445 = vmatpush.msra.mxu0 %v4400_v1 }
 0x3b7   :  { %9196 = vmatmul.msk.f32.gmra.mxu3 %vm1388_vm9, %v3382_v38  ;;  %4446 = vmatpush.msra.mxu0 %v4399_v36  ;;  %v9332_v38 = vld [vmem:[%s19713_s0 + $0x2da] sm:$0xff] }
 0x3b8   :  { %4165 = vrot.lane.b32.xlu1 %v9322_v15, %s11251_s20  ;;  %4163 = vrot.lane.b32.xlu0 %v9321_v42, %s11251_s20  ;;  %v15788_v15 = vpop.f32.mrf.mxu2  ;;  %v9337_v36 = vld [vmem:[%s19713_s0 + $0x31a] sm:$0xff] }
 0x3b9   :  { %4167 = vrot.lane.b32.xlu2 %v15357_v56, %s11251_s20  ;;  %v9326_v56 = vld [vmem:[%s19713_s0 + $0x351] sm:$0xff] }
 0x3ba   :  { %v3515_v3 = vpop.f32.mrf.mxu3 }
 0x3bb   :  { %v3516_v33 = vadd.f32 %v3515_v3, %v3450_v26  ;;  %v15710_v63 = vpop.permute.xlu1 %10238 }
 0x3bd   :  { %v3563_v10 = vmax.f32 %v3516_v33, 0.0  ;;  %v15705_v49 = vpop.permute.xlu2 %10288  ;;  %v15712_v43 = vpop.permute.xlu0 %10233 }
 0x3be   :  { %v10235_v1 = vunpack.i.l.bf16 %v15712_v43 }
 0x3bf   :  { %3580 = vst.msk [vmem:[#allocation2 + $0x268] sm:$0xff] %vm49_vm1, %v3563_v10  ;;  %9197 = vmatmul.msk.f32.gmra.mxu3 %vm1388_vm9, %v3383_v46  ;;  %v9335_v10 = vld [vmem:[%s19713_s0 + $0x302] sm:$0xff]  ;;  %v9333_v46 = vld [vmem:[%s19713_s0 + $0x2ea] sm:$0xff] }
 0x3c0   :  { %4171 = vrot.lane.b32.xlu1 %v9325_v31, %s11251_s20  ;;  %4169 = vrot.lane.b32.xlu0 %v15362_v50, %s11251_s20  ;;  %v9329_v50 = vld [vmem:[%s19713_s0 + $0x2ba] sm:$0xff]  ;;  %v9199_v31 = vld [vmem:[%s19713_s0 + $0x270] sm:$0xff]  ;;  %v15816_v28 = vpop.f32.mrf.mxu2 }
 0x3c1   :  { %4173 = vrot.lane.b32.xlu2 %v9326_v56, %s11251_s20  ;;  %v10115_v56 = vunpack.i.l.bf16 %v15529_v19 }
 0x3c3   :  { %v15745_v23 = vpop.permute.xlu1 %10253 }
 0x3c5   :  { %v15737_v21 = vpop.permute.xlu2 %10303  ;;  %v15747_v25 = vpop.permute.xlu0 %10248 }
 0x3c7   :  { %9198 = vmatmul.msk.f32.gmra.mxu3 %vm1388_vm9, %v3384_v24  ;;  %v4255_v24 = vsel %vm49_vm1, %v9199_v31, %v10115_v56 }
 0x3c8   :  { %4209 = vrot.lane.b32.xlu1 %v9328_v32, %s11252_s25  ;;  %4207 = vrot.lane.b32.xlu0 %v9327_v62, %s11252_s25 }
 0x3c9   :  { %4211 = vrot.lane.b32.xlu2 %v9329_v50, %s11252_s25  ;;  %v10195_v50 = vunpack.i.l.bf16 %v15623_v59 }
 0x3cb   :  { %v15775_v54 = vpop.permute.xlu1 %10268 }
 0x3cc   :  { %20075 = vst [vmem:[#allocation15_spill] sm:$0xff] %v15775_v54  ;;  %v4625_v54 = vld [vmem:[#allocation2 + $0xf0] sm:$0xff] }
 0x3cd   :  { %v15773_v26 = vpop.permute.xlu2 %4081  ;;  %v15777_v51 = vpop.permute.xlu0 %10263 }
 0x3d0   :  { %4215 = vrot.lane.b32.xlu1 %v9331_v48, %s11252_s25  ;;  %4213 = vrot.lane.b32.xlu0 %v9330_v20, %s11252_s25  ;;  %v9336_v48 = vld [vmem:[%s19713_s0 + $0x30a] sm:$0xff]  ;;  %v10116_v20 = vunpack.i.h.bf16 %v15529_v19  ;;  %v10156_v19 = vunpack.i.h.bf16 %v15501_v16 }
 0x3d1   :  { %4217 = vrot.lane.b32.xlu2 %v9332_v38, %s11252_s25  ;;  %v4271_v38 = vsel %vm1270_vm2, %v4255_v24, %v10155_v29  ;;  %v10196_v24 = vunpack.i.h.bf16 %v15623_v59  ;;  %v9341_v59 = vld [vmem:[%s19713_s0 + $0x34a] sm:$0xff] }
 0x3d3   :  { %v15795_v3 = vpop.permute.xlu1 %10283 }
 0x3d5   :  { %v15793_v42 = vpop.permute.xlu2 %4087  ;;  %v15797_v33 = vpop.permute.xlu0 %10278 }
 0x3d6   :  { %20076 = vst [vmem:[#allocation6_spill] sm:$0xff] %v15793_v42 }
 0x3d8   :  { %4221 = vrot.lane.b32.xlu1 %v9334_v27, %s11252_s25  ;;  %4219 = vrot.lane.b32.xlu0 %v9333_v46, %s11252_s25  ;;  %v10275_v27 = vunpack.i.l.bf16 %v15677_v0  ;;  %v9200_v46 = vld [vmem:[%s19713_s0 + $0x278] sm:$0xff] }
 0x3d9   :  { %4223 = vrot.lane.b32.xlu2 %v9335_v10, %s11252_s25  ;;  %v4287_v10 = vsel %vm1287_vm4, %v4271_v38, %v10195_v50  ;;  %v4256_v29 = vsel %vm49_vm1, %v9200_v46, %v10116_v20  ;;  %v10276_v20 = vunpack.i.h.bf16 %v15677_v0  ;;  %v9201_v0 = vld [vmem:[%s19713_s0 + $0x288] sm:$0xff] }
 0x3da   :  { %v3518_v4 = vpop.f32.mrf.mxu3  ;;  %v4303_v31 = vsel %vm279_vm0, %v4287_v10, %v10235_v1  ;;  %v4272_v1 = vsel %vm1270_vm2, %v4256_v29, %v10156_v19 }
 0x3db   :  { %v3519_v57 = vadd.f32 %v3518_v4, %v3453_v60  ;;  %v15822_v45 = vpop.permute.xlu1 %10298  ;;  %v9338_v60 = vld [vmem:[%s19713_s0 + $0x322] sm:$0xff] }
 0x3dd   :  { %v15818_v5 = vpop.permute.xlu2 %4093  ;;  %v3564_v32 = vmax.f32 %v3519_v57, 0.0  ;;  %v15824_v62 = vpop.permute.xlu0 %10293 }
 0x3de   :  { %20077 = vst [vmem:[#allocation24_spill] sm:$0xff] %v15818_v5 }
 0x3df   :  { %3581 = vst.msk [vmem:[#allocation2 + $0x270] sm:$0xff] %vm49_vm1, %v3564_v32 }
 0x3e0   :  { %4227 = vrot.lane.b32.xlu1 %v9337_v36, %s11252_s25  ;;  %4225 = vrot.lane.b32.xlu0 %v9336_v48, %s11252_s25  ;;  %v15858_v36 = vpop.f32.mrf.mxu2  ;;  %v4288_v48 = vsel %vm1287_vm4, %v4272_v1, %v10196_v24 }
 0x3e1   :  { %4229 = vrot.lane.b32.xlu2 %v9338_v60, %s11252_s25  ;;  %v4319_v60 = vsel %vm1320_vm5, %v4303_v31, %v10275_v27  ;;  %v10120_v27 = vunpack.i.l.bf16 %v15527_v30  ;;  %v4611_v31 = vld [vmem:[#allocation2 + $0x10] sm:$0xff] }
 0x3e2   :  { %v3521_v56 = vpop.f32.mrf.mxu3 }
 0x3e3   :  { %v3522_v4 = vadd.f32 %v3521_v56, %v3456_v7  ;;  %v15853_v32 = vpop.permute.xlu1 %4079  ;;  %v10236_v7 = vunpack.i.h.bf16 %v15712_v43  ;;  %v4610_v56 = vld [vmem:[#allocation2 + $0x8] sm:$0xff] }
 0x3e4   :  { %v4335_v16 = vsel %vm1337_vm6, %v4319_v60, %v15853_v32  ;;  %v10312_v60 = vpack.i.bf16 %v4611_v31, %v4610_v56  ;;  %v10121_v56 = vunpack.i.h.bf16 %v15527_v30 }
 0x3e5   :  { %v15849_v57 = vpop.permute.xlu2 %4099  ;;  %v3565_v50 = vmax.f32 %v3522_v4, 0.0  ;;  %v15856_v38 = vpop.permute.xlu0 %10308  ;;  %4447 = vmatmul.f32.vlgmr.msra.gmra.mxu0 %v4335_v16  ;;  %v4304_v43 = vsel %vm279_vm0, %v4288_v48, %v10236_v7  ;;  %v10160_v4 = vunpack.i.l.bf16 %v15583_v40  ;;  %v4257_v7 = vsel %vm49_vm1, %v9201_v0, %v10120_v27 }
 0x3e6   :  { %20078 = vst [vmem:[#allocation14_spill] sm:$0xff] %v15856_v38  ;;  %v10200_v16 = vunpack.i.l.bf16 %v15558_v14  ;;  %v10280_v27 = vunpack.i.l.bf16 %v15797_v33 }
 0x3e7   :  { %3582 = vst.msk [vmem:[#allocation2 + $0x288] sm:$0xff] %vm49_vm1, %v3565_v50  ;;  %v4613_v50 = vld [vmem:[#allocation2 + $0x30] sm:$0xff]  ;;  %v4273_v1 = vsel %vm1270_vm2, %v4257_v7, %v10160_v4 }
 0x3e8   :  { %4233 = vrot.lane.b32.xlu1 %v15470_v55, %s11252_s25  ;;  %4231 = vrot.lane.b32.xlu0 %v15465_v53, %s11252_s25  ;;  %v15895_v48 = vpop.f32.mrf.mxu2  ;;  %v4289_v0 = vsel %vm1287_vm4, %v4273_v1, %v10200_v16  ;;  %v9202_v4 = vld [vmem:[%s19713_s0 + $0x290] sm:$0xff] }
 0x3e9   :  { %4235 = vrot.lane.b32.xlu2 %v9341_v59, %s11252_s25  ;;  %v4612_v59 = vld [vmem:[#allocation2 + $0x28] sm:$0xff]  ;;  %v15923_v7 = vld [vmem:[#allocation2 + $0x70] sm:$0xff] }
 0x3ea   :  { %v3524_v10 = vpop.f32.mrf.mxu3  ;;  %20084 = vst [vmem:[#allocation26_spill] sm:$0xff] %v15923_v7  ;;  %v15925_v16 = vld [vmem:[#allocation2 + $0x90] sm:$0xff] }
 0x3eb   :  { %v3525_v46 = vadd.f32 %v3524_v10, %v15788_v15  ;;  %v15884_v29 = vpop.permute.xlu1 %4085  ;;  %v4320_v15 = vsel %vm1320_vm5, %v4304_v43, %v10276_v20  ;;  %v10240_v10 = vunpack.i.l.bf16 %v15710_v63  ;;  %v9342_v20 = vld [vmem:[%s19713_s0 + $0x352] sm:$0xff]  ;;  %v15901_v43 = vpack.i.bf16 %v4613_v50, %v4612_v59  ;;  %20085 = vst [vmem:[#allocation17_spill] sm:$0xff] %v15925_v16 }
 0x3ec   :  { %20080 = vst [vmem:[#allocation19_spill] sm:$0xff] %v15884_v29  ;;  %v4336_v53 = vsel %vm1337_vm6, %v4320_v15, %v15773_v26  ;;  %v15929_v1 = vld [vmem:[#allocation2 + $0x50] sm:$0xff] }
 0x3ed   :  { %v15882_v19 = vpop.permute.xlu2 %4105  ;;  %v3566_v55 = vmax.f32 %v3525_v46, 0.0  ;;  %v15886_v24 = vpop.permute.xlu0 %4083  ;;  %4450 = vmatmul.f32.gmra.mxu0 %v4336_v53  ;;  %v4305_v50 = vsel %vm279_vm0, %v4289_v0, %v10240_v10  ;;  %20086 = vst [vmem:[#allocation16_spill] sm:$0xff] %v15929_v1  ;;  %v10201_v10 = vunpack.i.h.bf16 %v15558_v14 }
 0x3ee   :  { %20079 = vst [vmem:[#allocation23_spill] sm:$0xff] %v15882_v19  ;;  %v10246_v19 = vunpack.i.h.bf16 %v15618_v9 }
 0x3ef   :  { %20081 = vst [vmem:[#allocation25_spill] sm:$0xff] %v15886_v24 }
 0x3f0   :  { %3583 = vst.msk [vmem:[#allocation2 + $0x290] sm:$0xff] %vm49_vm1, %v3566_v55  ;;  %10313 = vrot.lane.b32.xlu1 %v10312_v60, %s11245_s21  ;;  %4237 = vrot.lane.b32.xlu0 %v9342_v20, %s11252_s25  ;;  %v10161_v55 = vunpack.i.h.bf16 %v15583_v40  ;;  %v4258_v40 = vsel %vm49_vm1, %v9202_v4, %v10121_v56  ;;  %v15934_v20 = vld [vmem:[#allocation2 + $0x68] sm:$0xff]  ;;  %v10125_v56 = vunpack.i.l.bf16 %v15426_v18  ;;  %v10281_v4 = vunpack.i.h.bf16 %v15797_v33 }
 0x3f1   :  { %10318 = vrot.lane.b32.xlu2 %v15901_v43, %s11245_s21  ;;  %20087 = vst [vmem:[#allocation18_spill] sm:$0xff] %v15934_v20  ;;  %v15942_v0 = vpack.i.bf16 %v15923_v7, %v15934_v20 }
 0x3f2   :  { %v3527_v46 = vpop.f32.mrf.mxu3 }
 0x3f3   :  { %v3528_v31 = vadd.f32 %v3527_v46, %v15816_v28  ;;  %v15918_v60 = vpop.permute.xlu1 %4091  ;;  %v4321_v28 = vsel %vm1320_vm5, %v4305_v50, %v10280_v27  ;;  %v15936_v46 = vld [vmem:[#allocation2 + $0x88] sm:$0xff]  ;;  %v4274_v27 = vsel %vm1270_vm2, %v4258_v40, %v10161_v55  ;;  %v15957_v55 = vpop.f32.mrf.mxu2 }
 0x3f4   :  { %20082 = vst [vmem:[#allocation10_spill] sm:$0xff] %v15918_v60  ;;  %v4337_v59 = vsel %vm1337_vm6, %v4321_v28, %v15886_v24  ;;  %v15944_v50 = vld [vmem:[#allocation2 + $0x48] sm:$0xff]  ;;  %v15948_v14 = vpack.i.bf16 %v15925_v16, %v15936_v46  ;;  %v4290_v33 = vsel %vm1287_vm4, %v4274_v27, %v10201_v10  ;;  %v10245_v27 = vunpack.i.l.bf16 %v15618_v9 }
 0x3f5   :  { %v15915_v15 = vpop.permute.xlu2 %4143  ;;  %v3567_v53 = vmax.f32 %v3528_v31, 0.0  ;;  %v15920_v30 = vpop.permute.xlu0 %4089  ;;  %4453 = vmatmul.f32.gmra.mxu0 %v4337_v59  ;;  %20088 = vst [vmem:[#allocation27_spill] sm:$0xff] %v15936_v46  ;;  %v10241_v31 = vunpack.i.h.bf16 %v15710_v63  ;;  %v10165_v63 = vunpack.i.l.bf16 %v15581_v17  ;;  %v10205_v59 = vunpack.i.l.bf16 %v15652_v39  ;;  %v11176_v46 = vld [vmem:[%s19713_s0 + $0x2a0] sm:$0xff] }
 0x3f6   :  { %20083 = vst [vmem:[#allocation9_spill] sm:$0xff] %v15920_v30 }
 0x3f7   :  { %3584 = vst.msk [vmem:[#allocation2 + $0x2a8] sm:$0xff] %vm49_vm1, %v3567_v53  ;;  %v15954_v53 = vpack.i.bf16 %v15929_v1, %v15944_v50  ;;  %v4306_v16 = vsel %vm279_vm0, %v4290_v33, %v10241_v31  ;;  %v15984_v33 = vld [vmem:[#allocation2 + $0xb0] sm:$0xff] }
 0x3f8   :  { %20089 = vst [vmem:[#allocation31_spill] sm:$0xff] %v15944_v50  ;;  %10328 = vrot.lane.b32.xlu1 %v15942_v0, %s11245_s21  ;;  %v4259_v50 = vsel %vm49_vm1, %v11176_v46, %v10125_v56  ;;  %v10285_v56 = vunpack.i.l.bf16 %v15795_v3 }
 0x3f9   :  { %10333 = vrot.lane.b32.xlu2 %v15948_v14, %s11245_s21  ;;  %10323 = vrot.lane.b32.xlu0 %v15954_v53, %s11245_s21  ;;  %v4275_v10 = vsel %vm1270_vm2, %v4259_v50, %v10165_v63  ;;  %20092 = vst [vmem:[#allocation20_spill] sm:$0xff] %v15984_v33  ;;  %v4430_v50 = vld [vmem:[%s19716_s3 + $0xf8] sm:$0xff]  ;;  %v15997_v63 = vld [vmem:[#allocation2 + $0xa8] sm:$0xff] }
 0x3fa   :  { %v3530_v28 = vpop.f32.mrf.mxu3  ;;  %v4291_v46 = vsel %vm1287_vm4, %v4275_v10, %v10205_v59  ;;  %20094 = vst [vmem:[#allocation22_spill] sm:$0xff] %v15997_v63  ;;  %4496 = vmatpush.msra.mxu1 %v4430_v50  ;;  %v16003_v59 = vpack.i.bf16 %v15984_v33, %v15997_v63  ;;  %v4627_v33 = vld [vmem:[#allocation2 + $0x11] sm:$0xff] }
 0x3fb   :  { %v3531_v40 = vadd.f32 %v3530_v28, %v15858_v36  ;;  %v15975_v1 = vpop.permute.xlu1 %4097  ;;  %v4322_v36 = vsel %vm1320_vm5, %v4306_v16, %v10281_v4  ;;  %v4623_v28 = vld [vmem:[#allocation2 + $0xd0] sm:$0xff]  ;;  %v4624_v16 = vld [vmem:[#allocation2 + $0xe8] sm:$0xff]  ;;  %v4307_v10 = vsel %vm279_vm0, %v4291_v46, %v10245_v27  ;;  %v16016_v50 = vpop.f32.mrf.mxu2  ;;  %v10206_v27 = vunpack.i.h.bf16 %v15652_v39 }
 0x3fc   :  { %v4338_v31 = vsel %vm1337_vm6, %v4322_v36, %v15884_v29  ;;  %v15999_v36 = vpack.i.bf16 %v4625_v54, %v4624_v16  ;;  %v4323_v54 = vsel %vm1320_vm5, %v4307_v10, %v10285_v56  ;;  %v10166_v16 = vunpack.i.h.bf16 %v15581_v17  ;;  %v4628_v29 = vld [vmem:[#allocation2 + $0x29] sm:$0xff] }
 0x3fd   :  { %v15968_v7 = vpop.permute.xlu2 %4149  ;;  %v3568_v20 = vmax.f32 %v3531_v40, 0.0  ;;  %v15977_v38 = vpop.permute.xlu0 %4095  ;;  %4456 = vmatmul.f32.gmra.mxu0 %v4338_v31  ;;  %v15989_v40 = vld [vmem:[#allocation2 + $0xc8] sm:$0xff]  ;;  %v4339_v17 = vsel %vm1337_vm6, %v4323_v54, %v15793_v42  ;;  %v4633_v42 = vld [vmem:[#allocation2 + $0x71] sm:$0xff] }
 0x3fe   :  { %20090 = vst [vmem:[#allocation28_spill] sm:$0xff] %v15968_v7  ;;  %v15995_v4 = vpack.i.bf16 %v4623_v28, %v15989_v40  ;;  %v10126_v28 = vunpack.i.h.bf16 %v15426_v18  ;;  %v4630_v7 = vld [vmem:[#allocation2 + $0x49] sm:$0xff] }
 0x3ff   :  { %20091 = vst [vmem:[#allocation8_spill] sm:$0xff] %v15977_v38  ;;  %v11177_v56 = vld [vmem:[%s19713_s0 + $0x2a8] sm:$0xff]  ;;  %v16039_v54 = vpack.i.bf16 %v4631_v35, %v4630_v7  ;;  %v4427_v35 = vld [vmem:[%s19716_s3 + $0xe0] sm:$0xff] }
 0x400   :  { %3585 = vst.msk [vmem:[#allocation2 + $0x2b0] sm:$0xff] %vm49_vm1, %v3568_v20  ;;  %10343 = vrot.lane.b32.xlu1 %v15995_v4, %s11245_s21  ;;  %v4260_v10 = vsel %vm49_vm1, %v11177_v56, %v10126_v28  ;;  %v4428_v28 = vld [vmem:[%s19716_s3 + $0xe8] sm:$0xff] }
 0x401   :  { %20093 = vst [vmem:[#allocation37_spill] sm:$0xff] %v15989_v40  ;;  %10348 = vrot.lane.b32.xlu2 %v15999_v36, %s11245_s21  ;;  %10338 = vrot.lane.b32.xlu0 %v16003_v59, %s11245_s21  ;;  %v4626_v40 = vld [vmem:[#allocation2 + $0x9] sm:$0xff] }
 0x402   :  { %v3533_v20 = vpop.f32.mrf.mxu3  ;;  %v10352_v39 = vpack.i.bf16 %v4627_v33, %v4626_v40  ;;  %v10286_v40 = vunpack.i.h.bf16 %v15795_v3 }
 0x403   :  { %v3534_v31 = vadd.f32 %v3533_v20, %v15895_v48  ;;  %v16021_v18 = vpop.permute.xlu1 %4103  ;;  %v4629_v20 = vld [vmem:[#allocation2 + $0x31] sm:$0xff] }
 0x404   :  { %v16037_v24 = vpack.i.bf16 %v4629_v20, %v4628_v29  ;;  %v10170_v29 = vunpack.i.l.bf16 %v15522_v61  ;;  %v10210_v20 = vunpack.i.l.bf16 %v15650_v12 }
 0x405   :  { %v16018_v63 = vpop.permute.xlu2 %4155  ;;  %v3569_v46 = vmax.f32 %v3534_v31, 0.0  ;;  %v16023_v48 = vpop.permute.xlu0 %4101  ;;  %4459 = vmatmul.f32.gmra.mxu0 %v4339_v17  ;;  %v4429_v31 = vld [vmem:[%s19716_s3 + $0xf0] sm:$0xff] }
 0x406   :  { %20095 = vst [vmem:[#allocation30_spill] sm:$0xff] %v16018_v63  ;;  %v4276_v63 = vsel %vm1270_vm2, %v4260_v10, %v10166_v16  ;;  %4497 = vmatpush.msra.mxu1 %v4429_v31  ;;  %v4426_v16 = vld [vmem:[%s19716_s3 + $0xd8] sm:$0xff] }
 0x407   :  { %3586 = vst.msk [vmem:[#allocation2 + $0x2c8] sm:$0xff] %vm49_vm1, %v3569_v46  ;;  %v10130_v46 = vunpack.i.l.bf16 %v15547_v37  ;;  %v4292_v33 = vsel %vm1287_vm4, %v4276_v63, %v10206_v27  ;;  %v4634_v63 = vld [vmem:[#allocation2 + $0x89] sm:$0xff]  ;;  %v11178_v27 = vld [vmem:[%s19713_s0 + $0x2b8] sm:$0xff] }
 0x408   :  { %10358 = vrot.lane.b32.xlu1 %v16037_v24, %s11246_s26  ;;  %4498 = vmatpush.msra.mxu1 %v4428_v28  ;;  %v4308_v3 = vsel %vm279_vm0, %v4292_v33, %v10246_v19  ;;  %v4635_v31 = vld [vmem:[#allocation2 + $0x91] sm:$0xff]  ;;  %v4636_v28 = vld [vmem:[#allocation2 + $0xa9] sm:$0xff] }
 0x409   :  { %10363 = vrot.lane.b32.xlu2 %v16039_v54, %s11246_s26  ;;  %10353 = vrot.lane.b32.xlu0 %v10352_v39, %s11246_s26  ;;  %v4324_v19 = vsel %vm1320_vm5, %v4308_v3, %v10286_v40  ;;  %v4637_v33 = vld [vmem:[#allocation2 + $0xb1] sm:$0xff] }
 0x40a   :  { %v3536_v17 = vpop.f32.mrf.mxu3  ;;  %4499 = vmatpush.msra.mxu1 %v4427_v35  ;;  %v4425_v40 = vld [vmem:[%s19716_s3 + $0xd0] sm:$0xff]  ;;  %v16083_v35 = vpack.i.bf16 %v4635_v31, %v4634_v63  ;;  %v16085_v3 = vpack.i.bf16 %v4637_v33, %v4636_v28  ;;  %v11179_v31 = vld [vmem:[%s19713_s0 + $0x2c0] sm:$0xff] }
 0x40b   :  { %v3537_v9 = vadd.f32 %v3536_v17, %v15957_v55  ;;  %v4261_v55 = vsel %vm49_vm1, %v11178_v27, %v10130_v46  ;;  %v16068_v10 = vpop.permute.xlu1 %4109  ;;  %v10250_v17 = vunpack.i.l.bf16 %v15747_v25  ;;  %v4340_v46 = vsel %vm1337_vm6, %v4324_v19, %v15920_v30  ;;  %v4632_v27 = vld [vmem:[#allocation2 + $0x69] sm:$0xff] }
 0x40c   :  { %20097 = vst [vmem:[#allocation34_spill] sm:$0xff] %v16068_v10  ;;  %4500 = vmatpush.msra.mxu1 %v4426_v16  ;;  %v4424_v19 = vld [vmem:[%s19716_s3 + $0xc8] sm:$0xff]  ;;  %v10131_v30 = vunpack.i.h.bf16 %v15547_v37  ;;  %v10290_v16 = vunpack.i.l.bf16 %v15705_v49  ;;  %v4423_v37 = vld [vmem:[%s19716_s3 + $0xc0] sm:$0xff] }
 0x40d   :  { %v16057_v7 = vpop.permute.xlu2 %4161  ;;  %v3570_v56 = vmax.f32 %v3537_v9, 0.0  ;;  %v16070_v39 = vpop.permute.xlu0 %4107  ;;  %4462 = vmatmul.f32.gmra.mxu0 %v4340_v46  ;;  %v4277_v9 = vsel %vm1270_vm2, %v4261_v55, %v10170_v29  ;;  %v16093_v46 = vpack.i.bf16 %v4633_v42, %v4632_v27  ;;  %v10171_v42 = vunpack.i.h.bf16 %v15522_v61  ;;  %v4640_v27 = vld [vmem:[#allocation2 + $0xe9] sm:$0xff] }
 0x40e   :  { %20096 = vst [vmem:[#allocation11_spill] sm:$0xff] %v16057_v7  ;;  %v16074_v7 = vpop.f32.mrf.mxu2  ;;  %4501 = vmatpush.msra.mxu1 %v4425_v40  ;;  %v4262_v28 = vsel %vm49_vm1, %v11179_v31, %v10131_v30  ;;  %v4641_v40 = vld [vmem:[#allocation2 + $0xf1] sm:$0xff]  ;;  %v4638_v30 = vld [vmem:[#allocation2 + $0xc9] sm:$0xff] }
 0x40f   :  { %3587 = vst.msk [vmem:[#allocation2 + $0x2d0] sm:$0xff] %vm49_vm1, %v3570_v56  ;;  %v4293_v56 = vsel %vm1287_vm4, %v4277_v9, %v10210_v20  ;;  %v4422_v20 = vld [vmem:[%s19716_s3 + $0xb8] sm:$0xff]  ;;  %v16122_v9 = vld [vmem:[#allocation2 + $0x2f] sm:$0xff] }
 0x410   :  { %10373 = vrot.lane.b32.xlu1 %v16083_v35, %s11246_s26  ;;  %v4309_v29 = vsel %vm279_vm0, %v4293_v56, %v10250_v17  ;;  %4502 = vmatpush.msra.mxu1 %v4424_v19  ;;  %20099 = vst [vmem:[#allocation33_spill] sm:$0xff] %v16122_v9  ;;  %v10251_v19 = vunpack.i.h.bf16 %v15747_v25  ;;  %v4639_v31 = vld [vmem:[#allocation2 + $0xd1] sm:$0xff] }
 0x411   :  { %10378 = vrot.lane.b32.xlu2 %v16085_v3, %s11246_s26  ;;  %10368 = vrot.lane.b32.xlu0 %v16093_v46, %s11246_s26  ;;  %v4325_v61 = vsel %vm1320_vm5, %v4309_v29, %v10290_v16  ;;  %v4421_v16 = vld [vmem:[%s19716_s3 + $0xb0] sm:$0xff]  ;;  %v4278_v29 = vsel %vm1270_vm2, %v4262_v28, %v10171_v42  ;;  %v4419_v28 = vld [vmem:[%s19716_s3 + $0xa0] sm:$0xff] }
 0x412   :  { %v3539_v10 = vpop.f32.mrf.mxu3  ;;  %4503 = vmatpush.msra.mxu1 %v4423_v37  ;;  %v4341_v56 = vsel %vm1337_vm6, %v4325_v61, %v15918_v60  ;;  %v10136_v60 = vunpack.i.h.bf16 %v15545_v52 }
 0x413   :  { %v3540_v63 = vadd.f32 %v3539_v10, %v16016_v50  ;;  %v10211_v50 = vunpack.i.h.bf16 %v15650_v12  ;;  %v16117_v33 = vpop.permute.xlu1 %4147  ;;  %v16128_v12 = vld [vmem:[#allocation2 + $0x27] sm:$0xff] }
 0x414   :  { %20100 = vst [vmem:[#allocation7_spill] sm:$0xff] %v16128_v12  ;;  %4504 = vmatpush.msra.mxu1 %v4422_v20  ;;  %v10392_v25 = vpack.i.bf16 %v16122_v9, %v16128_v12  ;;  %v10291_v20 = vunpack.i.h.bf16 %v15705_v49  ;;  %v10175_v49 = vunpack.i.l.bf16 %v15605_v2  ;;  %v10215_v9 = vunpack.i.l.bf16 %v15576_v41 }
 0x415   :  { %v16107_v55 = vpop.permute.xlu2 %4167  ;;  %v3571_v10 = vmax.f32 %v3540_v63, 0.0  ;;  %v16119_v17 = vpop.permute.xlu0 %4145  ;;  %4465 = vmatmul.f32.gmra.mxu0 %v4341_v56  ;;  %v16134_v63 = vpack.i.bf16 %v4641_v40, %v4640_v27  ;;  %v4294_v61 = vsel %vm1287_vm4, %v4278_v29, %v10211_v50  ;;  %v16143_v56 = vpack.i.bf16 %v4639_v31, %v4638_v30 }
 0x416   :  { %20098 = vst [vmem:[#allocation21_spill] sm:$0xff] %v16107_v55  ;;  %v3480_v37 = vpop.f32.mrf.mxu2  ;;  %4505 = vmatpush.msra.mxu1 %v4421_v16  ;;  %v4310_v42 = vsel %vm279_vm0, %v4294_v61, %v10251_v19  ;;  %v10135_v27 = vunpack.i.l.bf16 %v15545_v52  ;;  %v4418_v19 = vld [vmem:[%s19716_s3 + $0x98] sm:$0xff]  ;;  %v11180_v61 = vld [vmem:[%s19713_s0 + $0x2d0] sm:$0xff]  ;;  %v10255_v12 = vunpack.i.l.bf16 %v15745_v23 }
 0x417   :  { %3588 = vst.msk [vmem:[#allocation2 + $0x2e8] sm:$0xff] %vm49_vm1, %v3571_v10  ;;  %v4420_v10 = vld [vmem:[%s19716_s3 + $0xa8] sm:$0xff]  ;;  %v4326_v29 = vsel %vm1320_vm5, %v4310_v42, %v10291_v20 }
 0x418   :  { %10388 = vrot.lane.b32.xlu1 %v16134_v63, %s11246_s26  ;;  %4506 = vmatpush.msra.mxu1 %v4420_v10  ;;  %v16173_v10 = vld [vmem:[#allocation2 + $0x4f] sm:$0xff]  ;;  %v16181_v20 = vld [vmem:[#allocation2 + $0x67] sm:$0xff] }
 0x419   :  { %10393 = vrot.lane.b32.xlu2 %v10392_v25, %s11247_s24  ;;  %10383 = vrot.lane.b32.xlu0 %v16143_v56, %s11246_s26  ;;  %v4342_v25 = vsel %vm1337_vm6, %v4326_v29, %v15818_v5  ;;  %20105 = vst [vmem:[#allocation32_spill] sm:$0xff] %v16173_v10  ;;  %v16183_v42 = vld [vmem:[#allocation2 + $0x87] sm:$0xff]  ;;  %v16219_v52 = vld [vmem:[#allocation2 + $0xcf] sm:$0xff] }
 0x41a   :  { %v3542_v55 = vpop.f32.mrf.mxu3  ;;  %4507 = vmatpush.msra.mxu1 %v4419_v28  ;;  %20106 = vst [vmem:[#allocation38_spill] sm:$0xff] %v16181_v20  ;;  %v4417_v28 = vld [vmem:[%s19716_s3 + $0x90] sm:$0xff]  ;;  %v4415_v5 = vld [vmem:[%s19716_s3 + $0x80] sm:$0xff] }
 0x41b   :  { %v3543_v50 = vadd.f32 %v3542_v55, %v16074_v7  ;;  %v16162_v31 = vpop.permute.xlu1 %4153  ;;  %v16167_v7 = vld [vmem:[#allocation2 + $0x6f] sm:$0xff]  ;;  %20107 = vst [vmem:[#allocation39_spill] sm:$0xff] %v16183_v42 }
 0x41c   :  { %20102 = vst [vmem:[#allocation12_spill] sm:$0xff] %v16162_v31  ;;  %v16169_v55 = vld [vmem:[#allocation2 + $0x8f] sm:$0xff]  ;;  %4508 = vmatpush.msra.mxu1 %v4418_v19 }
 0x41d   :  { %v16157_v40 = vpop.permute.xlu2 %4173  ;;  %v3572_v30 = vmax.f32 %v3543_v50, 0.0  ;;  %v16164_v16 = vpop.permute.xlu0 %4151  ;;  %20103 = vst [vmem:[#allocation36_spill] sm:$0xff] %v16167_v7  ;;  %v4263_v50 = vsel %vm49_vm1, %v11180_v61, %v10135_v27  ;;  %4468 = vmatmul.f32.gmra.mxu0 %v4342_v25  ;;  %v10402_v27 = vpack.i.bf16 %v16167_v7, %v16181_v20  ;;  %v4416_v19 = vld [vmem:[%s19716_s3 + $0x88] sm:$0xff]  ;;  %v10295_v25 = vunpack.i.l.bf16 %v15824_v62  ;;  %s11256_s3 = smov 8  }
 0x41e   :  { %20101 = vst [vmem:[#allocation13_spill] sm:$0xff] %v16157_v40  ;;  %v4279_v29 = vsel %vm1270_vm2, %v4263_v50, %v10175_v49  ;;  %v16190_v40 = vld [vmem:[#allocation2 + $0x47] sm:$0xff]  ;;  %4509 = vmatpush.msra.mxu1 %v4417_v28  ;;  %v3483_v49 = vpop.f32.mrf.mxu2  ;;  %v10176_v28 = vunpack.i.h.bf16 %v15605_v2  ;;  %v16225_v2 = vld [vmem:[#allocation2 + $0xaf] sm:$0xff] }
 0x41f   :  { %20104 = vst [vmem:[#allocation35_spill] sm:$0xff] %v16169_v55  ;;  %v10397_v61 = vpack.i.bf16 %v16173_v10, %v16190_v40 }
 0x420   :  { %3589 = vst.msk [vmem:[#allocation2 + $0x2f0] sm:$0xff] %vm49_vm1, %v3572_v30  ;;  %v10407_v30 = vpack.i.bf16 %v16169_v55, %v16183_v42  ;;  %10403 = vrot.lane.b32.xlu1 %v10402_v27, %s11247_s24  ;;  %v4295_v55 = vsel %vm1287_vm4, %v4279_v29, %v10215_v9  ;;  %4510 = vmatpush.msra.mxu1 %v4416_v19  ;;  %v16233_v29 = vld [vmem:[#allocation2 + $0xc7] sm:$0xff] }
 0x421   :  { %10398 = vrot.lane.b32.xlu0 %v10397_v61, %s11247_s24  ;;  %v4311_v27 = vsel %vm279_vm0, %v4295_v55, %v10255_v12  ;;  %v11181_v12 = vld [vmem:[%s19713_s0 + $0x2d8] sm:$0xff]  ;;  %v16235_v19 = vld [vmem:[#allocation2 + $0xe7] sm:$0xff]  ;;  %v10417_v61 = vpack.i.bf16 %v16219_v52, %v16233_v29 }
 0x422   :  { %v3545_v50 = vpop.f32.mrf.mxu3  ;;  %10408 = vrot.lane.b32.xlu2 %v10407_v30, %s11247_s24  ;;  %v4327_v20 = vsel %vm1320_vm5, %v4311_v27, %v10295_v25  ;;  %4511 = vmatpush.msra.mxu1 %v4415_v5  ;;  %v4264_v55 = vsel %vm49_vm1, %v11181_v12, %v10136_v60  ;;  %v16239_v25 = vld [vmem:[#allocation2 + $0xa7] sm:$0xff] }
 0x423   :  { %v3546_v42 = vadd.f32 %v3545_v50, %v3480_v37  ;;  %v16214_v30 = vpop.permute.xlu1 %4159  ;;  %v16221_v37 = vld [vmem:[#allocation2 + $0xef] sm:$0xff]  ;;  %v4343_v9 = vsel %vm1337_vm6, %v4327_v20, %v15977_v38  ;;  %v4280_v5 = vsel %vm1270_vm2, %v4264_v55, %v10176_v28  ;;  %v10256_v20 = vunpack.i.h.bf16 %v15745_v23 }
 0x424   :  { %20108 = vst [vmem:[#allocation40_spill] sm:$0xff] %v16214_v30  ;;  %v10422_v60 = vpack.i.bf16 %v16221_v37, %v16235_v19  ;;  %v10140_v23 = vunpack.i.l.bf16 %v15460_v34  ;;  %v10220_v38 = vunpack.i.l.bf16 %v15684_v13 }
 0x425   :  { %v16211_v31 = vpop.permute.xlu2 %4211  ;;  %v3573_v10 = vmax.f32 %v3546_v42, 0.0  ;;  %v16216_v7 = vpop.permute.xlu0 %4157  ;;  %v10216_v42 = vunpack.i.h.bf16 %v15576_v41  ;;  %4471 = vmatmul.f32.gmra.mxu0 %v4343_v9  ;;  %v10296_v41 = vunpack.i.h.bf16 %v15824_v62  ;;  %v10180_v9 = vunpack.i.l.bf16 %v15603_v22 }
 0x426   :  { %v3486_v12 = vpop.f32.mrf.mxu2 }
 0x427   :  { %3590 = vst.msk [vmem:[#allocation2 + $0x308] sm:$0xff] %vm49_vm1, %v3573_v10  ;;  %v10412_v10 = vpack.i.bf16 %v16225_v2, %v16239_v25  ;;  %v4296_v27 = vsel %vm1287_vm4, %v4280_v5, %v10216_v42  ;;  %v16265_v42 = vld [vmem:[#allocation2 + $0x10f] sm:$0xff] }
 0x428   :  { %10418 = vrot.lane.b32.xlu1 %v10417_v61, %s11247_s24  ;;  %v4312_v62 = vsel %vm279_vm0, %v4296_v27, %v10256_v20  ;;  %v11182_v5 = vld [vmem:[%s19713_s0 + $0x2e8] sm:$0xff] }
 0x429   :  { %10413 = vrot.lane.b32.xlu0 %v10412_v10, %s11247_s24  ;;  %v4265_v20 = vsel %vm49_vm1, %v11182_v5, %v10140_v23  ;;  %v16274_v27 = vld [vmem:[#allocation2 + $0x107] sm:$0xff]  ;;  %v10221_v5 = vunpack.i.h.bf16 %v15684_v13  ;;  %v10145_v13 = vunpack.i.l.bf16 %v15565_v44 }
 0x42a   :  { %v3548_v50 = vpop.f32.mrf.mxu3  ;;  %10423 = vrot.lane.b32.xlu2 %v10422_v60, %s11247_s24 }
 0x42b   :  { %v3549_v28 = vadd.f32 %v3548_v50, %v3483_v49  ;;  %v16258_v61 = vpop.permute.xlu1 %4165  ;;  %v4328_v49 = vsel %vm1320_vm5, %v4312_v62, %v10296_v41  ;;  %v4281_v50 = vsel %vm1270_vm2, %v4265_v20, %v10180_v9  ;;  %v10300_v62 = vunpack.i.l.bf16 %v15822_v45 }
 0x42c   :  { %20109 = vst [vmem:[#allocation41_spill] sm:$0xff] %v16258_v61  ;;  %v4344_v10 = vsel %vm1337_vm6, %v4328_v49, %v15975_v1  ;;  %v4297_v41 = vsel %vm1287_vm4, %v4281_v50, %v10220_v38  ;;  %v10427_v49 = vpack.i.bf16 %v16265_v42, %v16274_v27  ;;  %v10181_v9 = vunpack.i.h.bf16 %v15603_v22  ;;  %v11183_v22 = vld [vmem:[%s19713_s0 + $0x2f0] sm:$0xff] }
 0x42d   :  { %v16254_v55 = vpop.permute.xlu2 %4217  ;;  %v3574_v30 = vmax.f32 %v3549_v28, 0.0  ;;  %v16260_v60 = vpop.permute.xlu0 %4163  ;;  %4474 = vmatmul.f32.gmra.mxu0 %v4344_v10  ;;  %v10260_v28 = vunpack.i.l.bf16 %v15645_v58 }
 0x42e   :  { %20110 = vst [vmem:[#allocation42_spill] sm:$0xff] %v16260_v60  ;;  %v3489_v60 = vpop.f32.mrf.mxu2 }
 0x42f   :  { %3591 = vst.msk [vmem:[#allocation2 + $0x310] sm:$0xff] %vm49_vm1, %v3574_v30  ;;  %v10141_v30 = vunpack.i.h.bf16 %v15460_v34  ;;  %v4313_v10 = vsel %vm279_vm0, %v4297_v41, %v10260_v28  ;;  %v10261_v28 = vunpack.i.h.bf16 %v15645_v58  ;;  %v11184_v58 = vld [vmem:[%s19713_s0 + $0x300] sm:$0xff] }
 0x430   :  { %10433 = vrot.lane.b32.xlu1 %v15901_v43, %s11248_s11 }
 0x431   :  { %10428 = vrot.lane.b32.xlu0 %v10427_v49, %s11247_s24 }
 0x432   :  { %v3551_v61 = vpop.f32.mrf.mxu3  ;;  %10438 = vrot.lane.b32.xlu2 %v15954_v53, %s11248_s11  ;;  %v4329_v53 = vsel %vm1320_vm5, %v4313_v10, %v10300_v62  ;;  %v10301_v62 = vunpack.i.h.bf16 %v15822_v45 }
 0x433   :  { %v3552_v23 = vadd.f32 %v3551_v61, %v3486_v12  ;;  %v16291_v50 = vpop.permute.xlu1 %4171  ;;  %v4345_v34 = vsel %vm1337_vm6, %v4329_v53, %v15849_v57  ;;  %v4266_v12 = vsel %vm49_vm1, %v11183_v22, %v10141_v30  ;;  %v16327_v53 = vld [vmem:[#allocation2 + $0x110] sm:$0xff] }
 0x434   :  { %v4282_v61 = vsel %vm1270_vm2, %v4266_v12, %v10181_v9  ;;  %v4267_v9 = vsel %vm49_vm1, %v11184_v58, %v10145_v13  ;;  %v11185_v58 = vld [vmem:[%s19713_s0 + $0x308] sm:$0xff] }
 0x435   :  { %v16287_v38 = vpop.permute.xlu2 %4223  ;;  %v3575_v20 = vmax.f32 %v3552_v23, 0.0  ;;  %v16293_v43 = vpop.permute.xlu0 %4169  ;;  %4477 = vmatmul.f32.gmra.mxu0 %v4345_v34  ;;  %v4298_v41 = vsel %vm1287_vm4, %v4282_v61, %v10221_v5  ;;  %v10185_v23 = vunpack.i.l.bf16 %v15540_v6  ;;  %v10265_v34 = vunpack.i.l.bf16 %v15777_v51 }
 0x436   :  { %v4314_v10 = vsel %vm279_vm0, %v4298_v41, %v10261_v28  ;;  %v3492_v61 = vpop.f32.mrf.mxu2 }
 0x437   :  { %3592 = vst.msk [vmem:[#allocation2 + $0x328] sm:$0xff] %vm49_vm1, %v3575_v20  ;;  %v4330_v20 = vsel %vm1320_vm5, %v4314_v10, %v10301_v62  ;;  %v4283_v13 = vsel %vm1270_vm2, %v4267_v9, %v10185_v23  ;;  %v10305_v62 = vunpack.i.l.bf16 %v15737_v21  ;;  %v10186_v23 = vunpack.i.h.bf16 %v15540_v6 }
 0x438   :  { %10448 = vrot.lane.b32.xlu1 %v15948_v14, %s11248_s11  ;;  %v10225_v14 = vunpack.i.l.bf16 %v15682_v47  ;;  %v4346_v12 = vsel %vm1337_vm6, %v4330_v20, %v16023_v48 }
 0x439   :  { %10443 = vrot.lane.b32.xlu0 %v15942_v0, %s11248_s11 }
 0x43a   :  { %v3554_v49 = vpop.f32.mrf.mxu3  ;;  %10453 = vrot.lane.b32.xlu2 %v16003_v59, %s11248_s11  ;;  %v4351_v59 = vsel %vm1354_vm8, %v15853_v32, %v15915_v15  ;;  %v16335_v32 = vld [vmem:[#allocation2 + $0x108] sm:$0xff]  ;;  %v10146_v15 = vunpack.i.h.bf16 %v15565_v44  ;;  %v4299_v41 = vsel %vm1287_vm4, %v4283_v13, %v10225_v14  ;;  %v4352_v14 = vsel %vm1354_vm8, %v15773_v26, %v16119_v17 }
 0x43b   :  { %v3555_v30 = vadd.f32 %v3554_v49, %v3489_v60  ;;  %v4210_v0 = vpop.permute.xlu1 %4209  ;;  %v16341_v28 = vpack.i.bf16 %v16327_v53, %v16335_v32  ;;  %v4315_v44 = vsel %vm279_vm0, %v4299_v41, %v10265_v34  ;;  %v10306_v17 = vunpack.i.h.bf16 %v15737_v21  ;;  %v20111_v21 = vld [vmem:[#allocation25_spill] sm:$0xff] }
 0x43c   :  { %v4268_v9 = vsel %vm49_vm1, %v11185_v58, %v10146_v15  ;;  %v4331_v6 = vsel %vm1320_vm5, %v4315_v44, %v10305_v62  ;;  %v4368_v20 = vsel %vm1371_vm10, %v4352_v14, %v4210_v0  ;;  %v10150_v0 = vunpack.i.l.bf16 %v15563_v11  ;;  %v20114_v14 = vld [vmem:[#allocation15_spill] sm:$0xff] }
 0x43d   :  { %v16319_v45 = vpop.permute.xlu2 %4229  ;;  %v3576_v60 = vmax.f32 %v3555_v30, 0.0  ;;  %v4208_v5 = vpop.permute.xlu0 %4207  ;;  %4480 = vmatmul.f32.gmra.mxu0 %v4346_v12  ;;  %v4347_v34 = vsel %vm1337_vm6, %v4331_v6, %v16021_v18  ;;  %v10190_v13 = vunpack.i.l.bf16 %v15625_v8  ;;  %v4353_v41 = vsel %vm1354_vm8, %v20111_v21, %v16117_v33  ;;  %v20113_v33 = vld [vmem:[#allocation29_spill] sm:$0xff] }
 0x43e   :  { %v4367_v22 = vsel %vm1371_vm10, %v4351_v59, %v4208_v5  ;;  %v10266_v5 = vunpack.i.h.bf16 %v15777_v51  ;;  %v4369_v44 = vsel %vm1371_vm10, %v4353_v41, %v16211_v31  ;;  %v10270_v31 = vunpack.i.l.bf16 %v20114_v14 }
 0x43f   :  { %3593 = vst.msk [vmem:[#allocation2 + $0x330] sm:$0xff] %vm49_vm1, %v3576_v60  ;;  %9343 = vmatmul.msk.f32.vlgmr.msra.gmra.mxu1 %vm1388_vm9, %v4367_v22  ;;  %v3495_v22 = vpop.f32.mrf.mxu2  ;;  %v10231_v21 = vunpack.i.h.bf16 %v20113_v33 }
 0x440   :  { %10463 = vrot.lane.b32.xlu1 %v15999_v36, %s11248_s11  ;;  %v10226_v36 = vunpack.i.h.bf16 %v15682_v47  ;;  %v4284_v47 = vsel %vm1270_vm2, %v4268_v9, %v10186_v23  ;;  %v11186_v23 = vld [vmem:[%s19713_s0 + $0x318] sm:$0xff]  ;;  %v10230_v9 = vunpack.i.l.bf16 %v20113_v33 }
 0x441   :  { %10458 = vrot.lane.b32.xlu0 %v15995_v4, %s11248_s11  ;;  %v4269_v58 = vsel %vm49_vm1, %v11186_v23, %v10150_v0 }
 0x442   :  { %v3557_v49 = vpop.f32.mrf.mxu3  ;;  %10468 = vrot.lane.b32.xlu2 %v16341_v28, %s11248_s11  ;;  %v4300_v26 = vsel %vm1287_vm4, %v4284_v47, %v10226_v36  ;;  %v4285_v36 = vsel %vm1270_vm2, %v4269_v58, %v10190_v13  ;;  %v20118_v58 = vld [vmem:[#allocation6_spill] sm:$0xff] }
 0x443   :  { %v3558_v30 = vadd.f32 %v3557_v49, %v3492_v61  ;;  %v16363_v60 = vpop.permute.xlu1 %4215  ;;  %v4316_v51 = vsel %vm279_vm0, %v4300_v26, %v10266_v5  ;;  %v10151_v5 = vunpack.i.h.bf16 %v15563_v11  ;;  %v4355_v33 = vsel %vm1354_vm8, %v20118_v58, %v16164_v16  ;;  %v20121_v16 = vld [vmem:[#allocation36_spill] sm:$0xff] }
 0x444   :  { %v4332_v49 = vsel %vm1320_vm5, %v4316_v51, %v10306_v17  ;;  %v20116_v17 = vld [vmem:[#allocation28_spill] sm:$0xff] }
 0x445   :  { %v16357_v10 = vpop.permute.xlu2 %4235  ;;  %v3577_v59 = vmax.f32 %v3558_v30, 0.0  ;;  %v4214_v4 = vpop.permute.xlu0 %4213  ;;  %4483 = vmatmul.f32.gmra.mxu0 %v4347_v34  ;;  %v20112_v30 = vld [vmem:[#allocation23_spill] sm:$0xff]  ;;  %v10191_v34 = vunpack.i.h.bf16 %v15625_v8 }
 0x446   :  { %v16428_v51 = vld [vmem:[#allocation2 + $0x109] sm:$0xff] }
 0x447   :  { %3594 = vst.msk [vmem:[#allocation2 + $0x348] sm:$0xff] %vm49_vm1, %v3577_v59  ;;  %9344 = vmatmul.msk.f32.gmra.mxu1 %vm1388_vm9, %v4368_v20  ;;  %v20115_v59 = vld [vmem:[#allocation14_spill] sm:$0xff]  ;;  %v4301_v20 = vsel %vm1287_vm4, %v4285_v36, %v10230_v9 }
 0x448   :  { %10478 = vrot.lane.b32.xlu1 %v16039_v54, %s11249_s16  ;;  %v10310_v6 = vunpack.i.l.bf16 %v20115_v59  ;;  %v4317_v26 = vsel %vm279_vm0, %v4301_v20, %v10270_v31  ;;  %v4371_v31 = vsel %vm1371_vm10, %v4355_v33, %v16363_v60 }
 0x449   :  { %10473 = vrot.lane.b32.xlu0 %v16037_v24, %s11249_s16  ;;  %v4348_v24 = vsel %vm1337_vm6, %v4332_v49, %v20112_v30  ;;  %v10311_v49 = vunpack.i.h.bf16 %v20115_v59 }
 0x44a   :  { %v3560_v12 = vpop.f32.mrf.mxu3  ;;  %10483 = vrot.lane.b32.xlu2 %v16093_v46, %s11249_s16  ;;  %v4333_v11 = vsel %vm1320_vm5, %v4317_v26, %v10310_v6  ;;  %v20120_v6 = vld [vmem:[#allocation38_spill] sm:$0xff]  ;;  %v20124_v26 = vld [vmem:[#allocation9_spill] sm:$0xff] }
 0x44b   :  { %v3561_v15 = vadd.f32 %v3560_v12, %v3495_v22  ;;  %v16389_v62 = vpop.permute.xlu1 %4221  ;;  %v20117_v22 = vld [vmem:[#allocation19_spill] sm:$0xff]  ;;  %v4349_v0 = vsel %vm1337_vm6, %v4333_v11, %v16070_v39 }
 0x44c   :  { %v20125_v11 = vld [vmem:[#allocation35_spill] sm:$0xff] }
 0x44d   :  { %v16384_v61 = vpop.permute.xlu2 %10318  ;;  %v3578_v54 = vmax.f32 %v3561_v15, 0.0  ;;  %v16391_v46 = vpop.permute.xlu0 %4219  ;;  %4486 = vmatmul.f32.gmra.mxu0 %v4348_v24  ;;  %v11187_v15 = vld [vmem:[%s19713_s0 + $0x320] sm:$0xff] }
 0x44e   :  { %v4270_v13 = vsel %vm49_vm1, %v11187_v15, %v10151_v5  ;;  %v20122_v5 = vld [vmem:[#allocation32_spill] sm:$0xff]  ;;  %v20127_v15 = vld [vmem:[#allocation30_spill] sm:$0xff] }
 0x44f   :  { %3595 = vst.msk [vmem:[#allocation2 + $0x350] sm:$0xff] %vm49_vm1, %v3578_v54  ;;  %9345 = vmatmul.msk.f32.gmra.mxu1 %vm1388_vm9, %v4369_v44  ;;  %v4286_v41 = vsel %vm1270_vm2, %v4270_v13, %v10191_v34  ;;  %v10271_v54 = vunpack.i.h.bf16 %v20114_v14  ;;  %v20123_v34 = vld [vmem:[#allocation12_spill] sm:$0xff]  ;;  %v20128_v13 = vld [vmem:[#allocation10_spill] sm:$0xff] }
 0x450   :  { %10493 = vrot.lane.b32.xlu1 %v16085_v3, %s11249_s16  ;;  %v4354_v3 = vsel %vm1354_vm8, %v20117_v22, %v20116_v17  ;;  %v4302_v44 = vsel %vm1287_vm4, %v4286_v41, %v10231_v21  ;;  %v4356_v60 = vsel %vm1354_vm8, %v20124_v26, %v20123_v34  ;;  %v4357_v21 = vsel %vm1354_vm8, %v20128_v13, %v20127_v15  ;;  %v5407_v26 = vld [vmem:[%s19717_s4 + $0x60] sm:$0xff] }
 0x451   :  { %10488 = vrot.lane.b32.xlu0 %v16083_v35, %s11249_s16  ;;  %v16430_v35 = vld [vmem:[#allocation2 + $0x111] sm:$0xff]  ;;  %v4370_v8 = vsel %vm1371_vm10, %v4354_v3, %v4214_v4  ;;  %v4318_v23 = vsel %vm279_vm0, %v4302_v44, %v10271_v54  ;;  %v4372_v3 = vsel %vm1371_vm10, %v4356_v60, %v16254_v55  ;;  %v4373_v54 = vsel %vm1371_vm10, %v4357_v21, %v16391_v46  ;;  %v20134_v60 = vld [vmem:[#allocation18_spill] sm:$0xff] }
 0x452   :  { %10498 = vrot.lane.b32.xlu2 %v16143_v56, %s11249_s16  ;;  %v16445_v4 = vpack.i.bf16 %v16430_v35, %v16428_v51  ;;  %v4334_v14 = vsel %vm1320_vm5, %v4318_v23, %v10311_v49  ;;  %v20129_v49 = vld [vmem:[#allocation24_spill] sm:$0xff]  ;;  %v20136_v15 = vld [vmem:[#allocation42_spill] sm:$0xff] }
 0x453   :  { %v16423_v12 = vpop.permute.xlu1 %4227  ;;  %v4358_v44 = vsel %vm1354_vm8, %v20129_v49, %v16216_v7  ;;  %v20130_v7 = vld [vmem:[#allocation40_spill] sm:$0xff]  ;;  %v4361_v13 = vsel %vm1354_vm8, %v15849_v57, %v20136_v15  ;;  %v20138_v57 = vld [vmem:[#allocation27_spill] sm:$0xff] }
 0x454   :  { %v4374_v58 = vsel %vm1371_vm10, %v4358_v44, %v16389_v62  ;;  %v4377_v49 = vsel %vm1371_vm10, %v4361_v13, %v16423_v12  ;;  %v5404_v44 = vld [vmem:[%s19717_s4 + $0x48] sm:$0xff]  ;;  %v5402_v12 = vld [vmem:[%s19717_s4 + $0x38] sm:$0xff] }
 0x455   :  { %v16417_v47 = vpop.permute.xlu2 %10333  ;;  %v16425_v56 = vpop.permute.xlu0 %4225  ;;  %4489 = vmatmul.f32.gmra.mxu0 %v4349_v0 }
 0x457   :  { %9346 = vmatmul.msk.f32.gmra.mxu1 %vm1388_vm9, %v4370_v8  ;;  %v20126_v8 = vld [vmem:[#allocation39_spill] sm:$0xff] }
 0x458   :  { %10508 = vrot.lane.b32.xlu1 %v16445_v4, %s11249_s16 }
 0x459   :  { %10503 = vrot.lane.b32.xlu0 %v16134_v63, %s11249_s16  ;;  %v20119_v63 = vld [vmem:[#allocation34_spill] sm:$0xff] }
 0x45a   :  { %5075 = vrot.lane.b32.xlu2 %v16190_v40, %s11250_s22  ;;  %v4350_v59 = vsel %vm1337_vm6, %v4334_v14, %v20119_v63 }
 0x45b   :  { %v16461_v9 = vpop.permute.xlu1 %4233 }
 0x45d   :  { %v16455_v24 = vpop.permute.xlu2 %10348  ;;  %v16463_v36 = vpop.permute.xlu0 %4231  ;;  %4492 = vmatmul.f32.gmra.mxu0 %v4350_v59  ;;  %v20132_v59 = vld [vmem:[#allocation11_spill] sm:$0xff] }
 0x45f   :  { %9347 = vmatmul.msk.f32.gmra.mxu1 %vm1388_vm9, %v4371_v31  ;;  %v5409_v31 = vld [vmem:[%s19717_s4 + $0x70] sm:$0xff] }
 0x460   :  { %5079 = vrot.lane.b32.xlu1 %v20120_v6, %s11250_s22  ;;  %v4360_v6 = vsel %vm1354_vm8, %v15975_v1, %v20132_v59  ;;  %v20133_v1 = vld [vmem:[#allocation16_spill] sm:$0xff] }
 0x461   :  { %5077 = vrot.lane.b32.xlu0 %v20122_v5, %s11250_s22  ;;  %v4376_v34 = vsel %vm1371_vm10, %v4360_v6, %v16425_v56  ;;  %v5406_v56 = vld [vmem:[%s19717_s4 + $0x58] sm:$0xff] }
 0x462   :  { %5081 = vrot.lane.b32.xlu2 %v20121_v16, %s11250_s22 }
 0x463   :  { %v16484_v22 = vpop.permute.xlu1 %10313 }
 0x465   :  { %v16477_v20 = vpop.permute.xlu2 %10363  ;;  %v16482_v17 = vpop.permute.xlu0 %4237 }
 0x467   :  { %9348 = vmatmul.msk.f32.gmra.mxu1 %vm1388_vm9, %v4372_v3  ;;  %v20135_v3 = vld [vmem:[#allocation31_spill] sm:$0xff] }
 0x468   :  { %5085 = vrot.lane.b32.xlu1 %v20125_v11, %s11250_s22 }
 0x469   :  { %5083 = vrot.lane.b32.xlu0 %v20126_v8, %s11250_s22  ;;  %v5405_v8 = vld [vmem:[%s19717_s4 + $0x50] sm:$0xff] }
 0x46a   :  { %5087 = vrot.lane.b32.xlu2 %v16239_v25, %s11250_s22 }
 0x46b   :  { %v16500_v41 = vpop.permute.xlu1 %10328 }
 0x46d   :  { %v16495_v0 = vpop.permute.xlu2 %10378  ;;  %v16502_v55 = vpop.permute.xlu0 %10323 }
 0x46f   :  { %9349 = vmatmul.msk.f32.gmra.mxu1 %vm1388_vm9, %v4373_v54 }
 0x470   :  { %5091 = vrot.lane.b32.xlu1 %v16233_v29, %s11250_s22 }
 0x471   :  { %5089 = vrot.lane.b32.xlu0 %v16225_v2, %s11250_s22  ;;  %v20131_v2 = vld [vmem:[#allocation8_spill] sm:$0xff] }
 0x472   :  { %5093 = vrot.lane.b32.xlu2 %v16219_v52, %s11250_s22  ;;  %v4359_v29 = vsel %vm1354_vm8, %v20131_v2, %v20130_v7  ;;  %v20139_v7 = vld [vmem:[#allocation17_spill] sm:$0xff]  ;;  %v20140_v2 = vld [vmem:[#allocation26_spill] sm:$0xff] }
 0x473   :  { %v16518_v23 = vpop.permute.xlu1 %10343  ;;  %v4375_v14 = vsel %vm1371_vm10, %v4359_v29, %v16287_v38 }
 0x475   :  { %v16513_v25 = vpop.permute.xlu2 %10393  ;;  %v16520_v46 = vpop.permute.xlu0 %10338 }
 0x477   :  { %9350 = vmatmul.msk.f32.gmra.mxu1 %vm1388_vm9, %v4374_v58  ;;  %v5403_v58 = vld [vmem:[%s19717_s4 + $0x40] sm:$0xff] }
 0x478   :  { %5097 = vrot.lane.b32.xlu1 %v16221_v37, %s11250_s22  ;;  %v5410_v37 = vld [vmem:[%s19717_s4 + $0x78] sm:$0xff] }
 0x479   :  { %5095 = vrot.lane.b32.xlu0 %v16235_v19, %s11250_s22  ;;  %v16546_v19 = vld [vmem:[#allocation2 + $0x127] sm:$0xff]  ;;  %5427 = vmatpush.msrb.mxu2 %v5410_v37  ;;  %v20141_v37 = vld [vmem:[#allocation41_spill] sm:$0xff] }
 0x47a   :  { %5099 = vrot.lane.b32.xlu2 %v16274_v27, %s11250_s22  ;;  %v16548_v27 = vld [vmem:[#allocation2 + $0x12f] sm:$0xff] }
 0x47b   :  { %v16538_v62 = vpop.permute.xlu1 %10358  ;;  %5428 = vmatpush.msrb.mxu2 %v5409_v31  ;;  %v4362_v31 = vsel %vm1354_vm8, %v16023_v48, %v20141_v37  ;;  %v20142_v48 = vld [vmem:[#allocation20_spill] sm:$0xff] }
 0x47d   :  { %v16531_v52 = vpop.permute.xlu2 %10408  ;;  %v16536_v33 = vpop.permute.xlu0 %10353 }
 0x47f   :  { %9351 = vmatmul.msk.f32.gmra.mxu1 %vm1388_vm9, %v4375_v14  ;;  %v5401_v14 = vld [vmem:[%s19717_s4 + $0x30] sm:$0xff] }
 0x480   :  { %5103 = vrot.lane.b32.xlu1 %v16546_v19, %s11250_s22 }
 0x481   :  { %5101 = vrot.lane.b32.xlu0 %v16265_v42, %s11250_s22  ;;  %v5408_v42 = vld [vmem:[%s19717_s4 + $0x68] sm:$0xff] }
 0x482   :  { %5105 = vrot.lane.b32.xlu2 %v16548_v27, %s11250_s22  ;;  %5429 = vmatpush.msrb.mxu2 %v5408_v42  ;;  %v5400_v42 = vld [vmem:[%s19717_s4 + $0x28] sm:$0xff] }
 0x483   :  { %v16566_v5 = vpop.permute.xlu1 %10373 }
 0x484   :  { %5430 = vmatpush.msrb.mxu2 %v5407_v26  ;;  %v5399_v26 = vld [vmem:[%s19717_s4 + $0x20] sm:$0xff] }
 0x485   :  { %v16556_v38 = vpop.permute.xlu2 %10423  ;;  %v16564_v16 = vpop.permute.xlu0 %10368 }
 0x486   :  { %5431 = vmatpush.msrb.mxu2 %v5406_v56 }
 0x487   :  { %9352 = vmatmul.msk.f32.gmra.mxu1 %vm1388_vm9, %v4376_v34  ;;  %v4378_v34 = vsel %vm1371_vm10, %v4362_v31, %v16319_v45  ;;  %v5398_v45 = vld [vmem:[%s19717_s4 + $0x18] sm:$0xff] }
 0x488   :  { %5141 = vrot.lane.b32.xlu1 %v20133_v1, %s11251_s20  ;;  %5432 = vmatpush.msrb.mxu2 %v5405_v8  ;;  %v20143_v1 = vld [vmem:[#allocation37_spill] sm:$0xff] }
 0x489   :  { %5139 = vrot.lane.b32.xlu0 %v20135_v3, %s11251_s20  ;;  %v20146_v3 = vld [vmem:[#allocation21_spill] sm:$0xff] }
 0x48a   :  { %5143 = vrot.lane.b32.xlu2 %v20134_v60, %s11251_s20  ;;  %5433 = vmatpush.msrb.mxu2 %v5404_v44  ;;  %v20144_v60 = vld [vmem:[#allocation22_spill] sm:$0xff]  ;;  %v4363_v8 = vsel %vm1354_vm8, %v16021_v18, %v20146_v3  ;;  %v4448_v44 = vpop.f32.mrf.mxu0  ;;  %v5396_v18 = vld [vmem:[%s19717_s4 + $0x8] sm:$0xff] }
 0x48b   :  { %v16596_v54 = vpop.permute.xlu1 %10388 }
 0x48c   :  { %20137 = vst [vmem:[#allocation25_spill] sm:$0xff] %v16596_v54  ;;  %5434 = vmatpush.msrb.mxu2 %v5403_v58  ;;  %v4717_v58 = vld [vmem:[#allocation2 + $0xe8] sm:$0xff] }
 0x48d   :  { %v16586_v11 = vpop.permute.xlu2 %10438  ;;  %v16594_v21 = vpop.permute.xlu0 %10383 }
 0x48e   :  { %5435 = vmatpush.msrb.mxu2 %v5402_v12  ;;  %v4716_v12 = vld [vmem:[#allocation2 + $0xd0] sm:$0xff] }
 0x48f   :  { %9353 = vmatmul.msk.f32.gmra.mxu1 %vm1388_vm9, %v4377_v49  ;;  %v4379_v49 = vsel %vm1371_vm10, %v4363_v8, %v16463_v36 }
 0x490   :  { %5147 = vrot.lane.b32.xlu1 %v20138_v57, %s11251_s20  ;;  %5436 = vmatpush.msrb.mxu2 %v5401_v14  ;;  %v4718_v57 = vld [vmem:[#allocation2 + $0xf0] sm:$0xff]  ;;  %v4364_v14 = vsel %vm1354_vm8, %v20112_v30, %v16293_v43  ;;  %v4365_v30 = vsel %vm1354_vm8, %v16070_v39, %v16291_v50  ;;  %v20148_v50 = vld [vmem:[#allocation13_spill] sm:$0xff] }
 0x491   :  { %5145 = vrot.lane.b32.xlu0 %v20140_v2, %s11251_s20  ;;  %v5395_v2 = vld [vmem:[%s19717_s4] sm:$0xff] }
 0x492   :  { %5149 = vrot.lane.b32.xlu2 %v20139_v7, %s11251_s20  ;;  %5437 = vmatpush.msrb.mxu2 %v5400_v42  ;;  %v5397_v7 = vld [vmem:[%s19717_s4 + $0x10] sm:$0xff]  ;;  %v4451_v42 = vpop.f32.mrf.mxu0 }
 0x493   :  { %v16626_v6 = vpop.permute.xlu1 %10403 }
 0x494   :  { %5438 = vmatpush.msrb.mxu2 %v5399_v26  ;;  %v16682_v26 = vld [vmem:[#allocation2 + $0x128] sm:$0xff] }
 0x495   :  { %v16616_v29 = vpop.permute.xlu2 %10453  ;;  %v16624_v59 = vpop.permute.xlu0 %10398 }
 0x496   :  { %5439 = vmatpush.msrb.mxu2 %v5398_v45  ;;  %v4724_v45 = vld [vmem:[#allocation2 + $0x51] sm:$0xff] }
 0x497   :  { %9354 = vmatmul.msk.f32.gmra.mxu1 %vm1388_vm9, %v4378_v34  ;;  %v4380_v34 = vsel %vm1371_vm10, %v4364_v14, %v16461_v9 }
 0x498   :  { %5153 = vrot.lane.b32.xlu1 %v20142_v48, %s11251_s20  ;;  %5440 = vmatpush.msrb.mxu2 %v5397_v7  ;;  %v10355_v7 = vunpack.i.l.bf16 %v16536_v33 }
 0x499   :  { %5151 = vrot.lane.b32.xlu0 %v20144_v60, %s11251_s20 }
 0x49a   :  { %5155 = vrot.lane.b32.xlu2 %v20143_v1, %s11251_s20  ;;  %5441 = vmatpush.msrb.mxu2 %v5396_v18  ;;  %v4381_v1 = vsel %vm1371_vm10, %v4365_v30, %v16357_v10  ;;  %v4454_v60 = vpop.f32.mrf.mxu0  ;;  %v4366_v10 = vsel %vm1354_vm8, %v20119_v63, %v20148_v50  ;;  %v4727_v18 = vld [vmem:[#allocation2 + $0x89] sm:$0xff] }
 0x49b   :  { %v16653_v13 = vpop.permute.xlu1 %10418  ;;  %v4725_v63 = vld [vmem:[#allocation2 + $0x69] sm:$0xff] }
 0x49c   :  { %5442 = vmatpush.msrb.mxu2 %v5395_v2 }
 0x49d   :  { %v16646_v56 = vpop.permute.xlu2 %10468  ;;  %v16651_v15 = vpop.permute.xlu0 %10413 }
 0x49e   :  { %20145 = vst [vmem:[#allocation23_spill] sm:$0xff] %v16646_v56 }
 0x49f   :  { %9355 = vmatmul.msk.f32.gmra.mxu1 %vm1388_vm9, %v4379_v49  ;;  %v4382_v49 = vsel %vm1371_vm10, %v4366_v10, %v16482_v17 }
 0x4a0   :  { %5159 = vrot.lane.b32.xlu1 %v4717_v58, %s11251_s20  ;;  %v10315_v58 = vunpack.i.l.bf16 %v16484_v22 }
 0x4a1   :  { %5157 = vrot.lane.b32.xlu0 %v4716_v12, %s11251_s20  ;;  %v4726_v12 = vld [vmem:[#allocation2 + $0x71] sm:$0xff] }
 0x4a2   :  { %5161 = vrot.lane.b32.xlu2 %v4718_v57, %s11251_s20  ;;  %v4594_v57 = vld [vmem:[#allocation2 + $0x7] sm:$0xff]  ;;  %v4457_v30 = vpop.f32.mrf.mxu0 }
 0x4a3   :  { %v16677_v31 = vpop.permute.xlu1 %10433  ;;  %v5251_v2 = vsel %vm49_vm1, %v4594_v57, %v10315_v58 }
 0x4a4   :  { %v5267_v14 = vsel %vm1270_vm2, %v5251_v2, %v10355_v7  ;;  %v10435_v17 = vunpack.i.l.bf16 %v16677_v31  ;;  %v4729_v2 = vld [vmem:[#allocation2 + $0xa9] sm:$0xff] }
 0x4a5   :  { %v16667_v36 = vpop.permute.xlu2 %10483  ;;  %v16675_v37 = vpop.permute.xlu0 %10428 }
 0x4a6   :  { %20147 = vst [vmem:[#allocation29_spill] sm:$0xff] %v16675_v37 }
 0x4a7   :  { %9356 = vmatmul.msk.f32.gmra.mxu1 %vm1388_vm9, %v4380_v34  ;;  %v10395_v34 = vunpack.i.l.bf16 %v16513_v25 }
 0x4a8   :  { %5165 = vrot.lane.b32.xlu1 %v16327_v53, %s11251_s20  ;;  %v4723_v53 = vld [vmem:[#allocation2 + $0x49] sm:$0xff] }
 0x4a9   :  { %5163 = vrot.lane.b32.xlu0 %v16335_v32, %s11251_s20  ;;  %v16703_v32 = vld [vmem:[#allocation2 + $0x130] sm:$0xff]  ;;  %v5283_v10 = vsel %vm1287_vm4, %v5267_v14, %v10395_v34 }
 0x4aa   :  { %5167 = vrot.lane.b32.xlu2 %v16682_v26, %s11251_s20  ;;  %v5299_v57 = vsel %vm279_vm0, %v5283_v10, %v10435_v17 }
 0x4ab   :  { %v16697_v48 = vpop.permute.xlu1 %10448 }
 0x4ad   :  { %v16690_v43 = vpop.permute.xlu2 %10498  ;;  %v16695_v9 = vpop.permute.xlu0 %10443 }
 0x4af   :  { %9357 = vmatmul.msk.f32.gmra.mxu1 %vm1388_vm9, %v4381_v1 }
 0x4b0   :  { %5203 = vrot.lane.b32.xlu1 %v4723_v53, %s11252_s25 }
 0x4b1   :  { %5169 = vrot.lane.b32.xlu0 %v16703_v32, %s11251_s20 }
 0x4b2   :  { %5205 = vrot.lane.b32.xlu2 %v4724_v45, %s11252_s25 }
 0x4b3   :  { %v16715_v8 = vpop.permute.xlu1 %10463 }
 0x4b5   :  { %v16708_v39 = vpop.permute.xlu2 %5075  ;;  %v16713_v3 = vpop.permute.xlu0 %10458 }
 0x4b7   :  { %9358 = vmatmul.msk.f32.gmra.mxu1 %vm1388_vm9, %v4382_v49 }
 0x4b8   :  { %5209 = vrot.lane.b32.xlu1 %v4726_v12, %s11252_s25 }
 0x4b9   :  { %5207 = vrot.lane.b32.xlu0 %v4725_v63, %s11252_s25  ;;  %v4730_v63 = vld [vmem:[#allocation2 + $0xb1] sm:$0xff] }
 0x4ba   :  { %5211 = vrot.lane.b32.xlu2 %v4727_v18, %s11252_s25 }
 0x4bb   :  { %v16729_v50 = vpop.permute.xlu1 %10478 }
 0x4bc   :  { %v4513_v1 = vpop.f32.mrf.mxu1 }
 0x4bd   :  { %v4514_v53 = vadd.f32 %v4513_v1, %v4448_v44  ;;  %v10474_v45 = vpop.permute.xlu0 %10473  ;;  %v16732_v58 = vpop.permute.xlu2 %5081  ;;  %v4728_v44 = vld [vmem:[#allocation2 + $0x91] sm:$0xff] }
 0x4be   :  { %v10475_v49 = vunpack.i.l.bf16 %v10474_v45  ;;  %20149 = vst [vmem:[#allocation15_spill] sm:$0xff] %v16732_v58 }
 0x4bf   :  { %v4561_v7 = vmax.f32 %v4514_v53, 0.0  ;;  %v16746_v53 = vpop.f32.mrf.mxu0 }
 0x4c0   :  { %v5315_v12 = vsel %vm1320_vm5, %v5299_v57, %v10475_v49  ;;  %5215 = vrot.lane.b32.xlu1 %v4729_v2, %s11252_s25  ;;  %v4732_v57 = vld [vmem:[#allocation2 + $0xd1] sm:$0xff]  ;;  %v10356_v2 = vunpack.i.h.bf16 %v16536_v33  ;;  %v10476_v33 = vunpack.i.h.bf16 %v10474_v45 }
 0x4c1   :  { %4578 = vst.msk [vmem:[#allocation2 + $0x368] sm:$0xff] %vm49_vm1, %v4561_v7  ;;  %v5331_v18 = vsel %vm1337_vm6, %v5315_v12, %v16708_v39  ;;  %5213 = vrot.lane.b32.xlu0 %v4728_v44, %s11252_s25  ;;  %v4731_v7 = vld [vmem:[#allocation2 + $0xc9] sm:$0xff] }
 0x4c2   :  { %5443 = vmatmul.f32.vlgmr.msrb.gmra.mxu2 %v5331_v18  ;;  %5217 = vrot.lane.b32.xlu2 %v4730_v63, %s11252_s25  ;;  %v4733_v12 = vld [vmem:[#allocation2 + $0xe9] sm:$0xff]  ;;  %v10316_v18 = vunpack.i.h.bf16 %v16484_v22 }
 0x4c3   :  { %v16744_v1 = vpop.permute.xlu1 %10493 }
 0x4c4   :  { %v4516_v14 = vpop.f32.mrf.mxu1 }
 0x4c5   :  { %v4517_v17 = vadd.f32 %v4516_v14, %v4451_v42  ;;  %v16742_v34 = vpop.permute.xlu0 %10488  ;;  %v16748_v10 = vpop.permute.xlu2 %5087  ;;  %v4595_v42 = vld [vmem:[#allocation2 + $0xf] sm:$0xff] }
 0x4c6   :  { %20150 = vst [vmem:[#allocation14_spill] sm:$0xff] %v16748_v10 }
 0x4c7   :  { %v4562_v49 = vmax.f32 %v4517_v17, 0.0  ;;  %v16764_v37 = vpop.f32.mrf.mxu0 }
 0x4c8   :  { %5221 = vrot.lane.b32.xlu1 %v4732_v57, %s11252_s25  ;;  %v5252_v57 = vsel %vm49_vm1, %v4595_v42, %v10316_v18 }
 0x4c9   :  { %4579 = vst.msk [vmem:[#allocation2 + $0x370] sm:$0xff] %vm49_vm1, %v4562_v49  ;;  %5219 = vrot.lane.b32.xlu0 %v4731_v7, %s11252_s25  ;;  %v5268_v22 = vsel %vm1270_vm2, %v5252_v57, %v10356_v2  ;;  %v10436_v7 = vunpack.i.h.bf16 %v16677_v31  ;;  %v10360_v31 = vunpack.i.l.bf16 %v16538_v62 }
 0x4ca   :  { %5223 = vrot.lane.b32.xlu2 %v4733_v12, %s11252_s25  ;;  %v10396_v12 = vunpack.i.h.bf16 %v16513_v25 }
 0x4cb   :  { %v16758_v17 = vpop.permute.xlu1 %10508 }
 0x4cc   :  { %v4519_v44 = vpop.f32.mrf.mxu1  ;;  %20151 = vst [vmem:[#allocation28_spill] sm:$0xff] %v16758_v17  ;;  %v5284_v18 = vsel %vm1287_vm4, %v5268_v22, %v10396_v12  ;;  %v20154_v22 = vld [vmem:[#allocation7_spill] sm:$0xff] }
 0x4cd   :  { %v4520_v63 = vadd.f32 %v4519_v44, %v4454_v60  ;;  %v16756_v14 = vpop.permute.xlu0 %10503  ;;  %v16760_v49 = vpop.permute.xlu2 %5093  ;;  %v4734_v60 = vld [vmem:[#allocation2 + $0xf1] sm:$0xff]  ;;  %v10320_v44 = vunpack.i.l.bf16 %v16384_v61  ;;  %v5300_v25 = vsel %vm279_vm0, %v5284_v18, %v10436_v7 }
 0x4ce   :  { %20152 = vst [vmem:[#allocation19_spill] sm:$0xff] %v16760_v49 }
 0x4cf   :  { %v4563_v56 = vmax.f32 %v4520_v63, 0.0  ;;  %v5316_v63 = vsel %vm1320_vm5, %v5300_v25, %v10476_v33  ;;  %v5253_v12 = vsel %vm49_vm1, %v20154_v22, %v10320_v44  ;;  %v16795_v33 = vld [vmem:[#allocation2 + $0x131] sm:$0xff]  ;;  %v10361_v25 = vunpack.i.h.bf16 %v16538_v62  ;;  %v16799_v17 = vpop.f32.mrf.mxu0  ;;  %v16803_v44 = vld [vmem:[#allocation2 + $0x129] sm:$0xff] }
 0x4d0   :  { %5227 = vrot.lane.b32.xlu1 %v16428_v51, %s11252_s25  ;;  %v5269_v7 = vsel %vm1270_vm2, %v5253_v12, %v10360_v31 }
 0x4d1   :  { %4580 = vst.msk [vmem:[#allocation2 + $0x388] sm:$0xff] %vm49_vm1, %v4563_v56  ;;  %5225 = vrot.lane.b32.xlu0 %v4734_v60, %s11252_s25  ;;  %v10400_v56 = vunpack.i.l.bf16 %v16624_v59 }
 0x4d2   :  { %5229 = vrot.lane.b32.xlu2 %v16430_v35, %s11252_s25 }
 0x4d3   :  { %v16781_v51 = vpop.permute.xlu1 %5079  ;;  %v5285_v18 = vsel %vm1287_vm4, %v5269_v7, %v10400_v56  ;;  %v20155_v56 = vld [vmem:[#allocation33_spill] sm:$0xff] }
 0x4d4   :  { %v4522_v42 = vpop.f32.mrf.mxu1  ;;  %20153 = vst [vmem:[#allocation6_spill] sm:$0xff] %v16781_v51 }
 0x4d5   :  { %v4523_v45 = vadd.f32 %v4522_v42, %v4457_v30  ;;  %v16779_v2 = vpop.permute.xlu0 %5077  ;;  %v16784_v57 = vpop.permute.xlu2 %5099  ;;  %v10321_v30 = vunpack.i.h.bf16 %v16384_v61  ;;  %v10480_v42 = vunpack.i.l.bf16 %v16729_v50  ;;  %v10401_v61 = vunpack.i.h.bf16 %v16624_v59 }
 0x4d6   :  { %v5332_v35 = vsel %vm1337_vm6, %v5316_v63, %v16779_v2  ;;  %v10440_v63 = vunpack.i.l.bf16 %v16586_v11 }
 0x4d7   :  { %v4564_v60 = vmax.f32 %v4523_v45, 0.0  ;;  %5446 = vmatmul.f32.gmra.mxu2 %v5332_v35  ;;  %v5254_v45 = vsel %vm49_vm1, %v20155_v56, %v10321_v30  ;;  %v10325_v56 = vunpack.i.l.bf16 %v16502_v55 }
 0x4d8   :  { %5233 = vrot.lane.b32.xlu1 %v16795_v33, %s11252_s25  ;;  %v5301_v62 = vsel %vm279_vm0, %v5285_v18, %v10440_v63  ;;  %v5270_v7 = vsel %vm1270_vm2, %v5254_v45, %v10361_v25  ;;  %v16826_v18 = vld [vmem:[#allocation2 + $0x170] sm:$0xff] }
 0x4d9   :  { %4581 = vst.msk [vmem:[#allocation2 + $0x390] sm:$0xff] %vm49_vm1, %v4564_v60  ;;  %5231 = vrot.lane.b32.xlu0 %v16803_v44, %s11252_s25  ;;  %v5317_v59 = vsel %vm1320_vm5, %v5301_v62, %v10480_v42  ;;  %v16819_v60 = vld [vmem:[#allocation2 + $0x150] sm:$0xff]  ;;  %v5286_v30 = vsel %vm1287_vm4, %v5270_v7, %v10401_v61  ;;  %v10441_v42 = vunpack.i.h.bf16 %v16586_v11  ;;  %v16837_v62 = vld [vmem:[#allocation2 + $0x168] sm:$0xff]  ;;  %v16843_v61 = vpack.i.bf16 %v16703_v32, %v16682_v26 }
 0x4da   :  { %10513 = vrot.lane.b32.xlu2 %v16341_v28, %s11245_s21  ;;  %20158 = vst [vmem:[#allocation36_spill] sm:$0xff] %v16819_v60  ;;  %v5333_v28 = vsel %vm1337_vm6, %v5317_v59, %v16781_v51  ;;  %v5255_v32 = vsel %vm49_vm1, %v16190_v40, %v10325_v56  ;;  %v10405_v59 = vunpack.i.l.bf16 %v16626_v6  ;;  %v16875_v40 = vld [vmem:[#allocation2 + $0x190] sm:$0xff]  ;;  %v10326_v51 = vunpack.i.h.bf16 %v16502_v55 }
 0x4db   :  { %v16816_v12 = vpop.permute.xlu1 %5085  ;;  %20160 = vst [vmem:[#allocation12_spill] sm:$0xff] %v16826_v18  ;;  %v5302_v11 = vsel %vm279_vm0, %v5286_v30, %v10441_v42  ;;  %v10365_v42 = vunpack.i.l.bf16 %v16477_v20  ;;  %v5651_v56 = vld [vmem:[#allocation2 + $0x1d0] sm:$0xff] }
 0x4dc   :  { %v4525_v31 = vpop.f32.mrf.mxu1  ;;  %20157 = vst [vmem:[#allocation38_spill] sm:$0xff] %v16816_v12 }
 0x4dd   :  { %v4526_v35 = vadd.f32 %v4525_v31, %v16746_v53  ;;  %v16814_v22 = vpop.permute.xlu0 %5083  ;;  %v16822_v54 = vpop.permute.xlu2 %5105  ;;  %v10481_v53 = vunpack.i.h.bf16 %v16729_v50  ;;  %v16830_v31 = vld [vmem:[#allocation2 + $0x148] sm:$0xff]  ;;  %20162 = vst [vmem:[#allocation35_spill] sm:$0xff] %v16837_v62  ;;  %v16847_v50 = vpack.i.bf16 %v16826_v18, %v16837_v62 }
 0x4de   :  { %20156 = vst [vmem:[#allocation34_spill] sm:$0xff] %v16814_v22  ;;  %v16835_v25 = vpack.i.bf16 %v16819_v60, %v16830_v31  ;;  %v16880_v60 = vld [vmem:[#allocation2 + $0x188] sm:$0xff] }
 0x4df   :  { %20159 = vst [vmem:[#allocation32_spill] sm:$0xff] %v16822_v54  ;;  %v4565_v63 = vmax.f32 %v4526_v35, 0.0  ;;  %5449 = vmatmul.f32.gmra.mxu2 %v5333_v28  ;;  %v5318_v45 = vsel %vm1320_vm5, %v5302_v11, %v10481_v53  ;;  %v16857_v35 = vpop.f32.mrf.mxu0  ;;  %v10445_v53 = vunpack.i.l.bf16 %v16695_v9  ;;  %v5650_v54 = vld [vmem:[#allocation2 + $0x1c8] sm:$0xff] }
 0x4e0   :  { %20161 = vst [vmem:[#allocation9_spill] sm:$0xff] %v16830_v31  ;;  %10523 = vrot.lane.b32.xlu1 %v16835_v25, %s11245_s21  ;;  %v5334_v62 = vsel %vm1337_vm6, %v5318_v45, %v16732_v58 }
 0x4e1   :  { %4582 = vst.msk [vmem:[#allocation2 + $0x3a8] sm:$0xff] %vm49_vm1, %v4565_v63  ;;  %10518 = vrot.lane.b32.xlu0 %v16843_v61, %s11245_s21  ;;  %v16867_v63 = vld [vmem:[#allocation2 + $0x1b0] sm:$0xff] }
 0x4e2   :  { %10528 = vrot.lane.b32.xlu2 %v16847_v50, %s11245_s21  ;;  %20165 = vst [vmem:[#allocation10_spill] sm:$0xff] %v16867_v63 }
 0x4e3   :  { %v16865_v30 = vpop.permute.xlu1 %5091  ;;  %20166 = vst [vmem:[#allocation24_spill] sm:$0xff] %v16875_v40 }
 0x4e4   :  { %v4528_v26 = vpop.f32.mrf.mxu1  ;;  %20164 = vst [vmem:[#allocation30_spill] sm:$0xff] %v16865_v30 }
 0x4e5   :  { %v4529_v7 = vadd.f32 %v4528_v26, %v16764_v37  ;;  %v16863_v28 = vpop.permute.xlu0 %5089  ;;  %v16871_v11 = vpop.permute.xlu2 %5143  ;;  %v16877_v37 = vld [vmem:[#allocation2 + $0x1a8] sm:$0xff]  ;;  %v5271_v26 = vsel %vm1270_vm2, %v5255_v32, %v10365_v42  ;;  %20168 = vst [vmem:[#allocation8_spill] sm:$0xff] %v16880_v60  ;;  %v5426_v32 = vld [vmem:[%s19717_s4 + $0xf8] sm:$0xff]  ;;  %v5425_v42 = vld [vmem:[%s19717_s4 + $0xf0] sm:$0xff] }
 0x4e6   :  { %20163 = vst [vmem:[#allocation39_spill] sm:$0xff] %v16863_v28  ;;  %v16884_v31 = vpack.i.bf16 %v16867_v63, %v16877_v37  ;;  %v5287_v45 = vsel %vm1287_vm4, %v5271_v26, %v10405_v59  ;;  %5492 = vmatpush.msrb.mxu3 %v5426_v32  ;;  %v11188_v59 = vld [vmem:[#allocation2 + $0x4f] sm:$0xff]  ;;  %v10406_v26 = vunpack.i.h.bf16 %v16626_v6  ;;  %v10366_v32 = vunpack.i.h.bf16 %v16477_v20 }
 0x4e7   :  { %v4566_v18 = vmax.f32 %v4529_v7, 0.0  ;;  %5452 = vmatmul.f32.gmra.mxu2 %v5334_v62  ;;  %20167 = vst [vmem:[#allocation40_spill] sm:$0xff] %v16877_v37  ;;  %v16891_v62 = vpack.i.bf16 %v16875_v40, %v16880_v60  ;;  %v16893_v7 = vpack.i.bf16 %v5651_v56, %v5650_v54  ;;  %v5303_v55 = vsel %vm279_vm0, %v5287_v45, %v10445_v53  ;;  %v16918_v37 = vpop.f32.mrf.mxu0  ;;  %v5653_v6 = vld [vmem:[#allocation2 + $0x1f0] sm:$0xff] }
 0x4e8   :  { %10538 = vrot.lane.b32.xlu1 %v16884_v31, %s11245_s21  ;;  %5493 = vmatpush.msrb.mxu3 %v5425_v42  ;;  %v5256_v56 = vsel %vm49_vm1, %v11188_v59, %v10326_v51  ;;  %v10446_v60 = vunpack.i.h.bf16 %v16695_v9  ;;  %v16933_v9 = vpack.i.bf16 %v16795_v33, %v16803_v44  ;;  %v10486_v33 = vunpack.i.h.bf16 %v16667_v36  ;;  %v5422_v44 = vld [vmem:[%s19717_s4 + $0xd8] sm:$0xff] }
 0x4e9   :  { %4583 = vst.msk [vmem:[#allocation2 + $0x3b0] sm:$0xff] %vm49_vm1, %v4566_v18  ;;  %v10485_v18 = vunpack.i.l.bf16 %v16667_v36  ;;  %10533 = vrot.lane.b32.xlu0 %v16891_v62, %s11245_s21 }
 0x4ea   :  { %10543 = vrot.lane.b32.xlu2 %v16893_v7, %s11245_s21 }
 0x4eb   :  { %v16914_v53 = vpop.permute.xlu1 %5097  ;;  %v5319_v45 = vsel %vm1320_vm5, %v5303_v55, %v10485_v18  ;;  %v10330_v55 = vunpack.i.l.bf16 %v16500_v41 }
 0x4ec   :  { %v4531_v54 = vpop.f32.mrf.mxu1  ;;  %v5335_v51 = vsel %vm1337_vm6, %v5319_v45, %v16814_v22  ;;  %v10370_v45 = vunpack.i.l.bf16 %v16564_v16 }
 0x4ed   :  { %v4532_v40 = vadd.f32 %v4531_v54, %v16799_v17  ;;  %v16912_v63 = vpop.permute.xlu0 %5095  ;;  %v16921_v42 = vpop.permute.xlu2 %5149  ;;  %v5272_v17 = vsel %vm1270_vm2, %v5256_v56, %v10366_v32  ;;  %v16926_v54 = vld [vmem:[#allocation2 + $0x1e8] sm:$0xff]  ;;  %v5423_v56 = vld [vmem:[%s19717_s4 + $0xe0] sm:$0xff] }
 0x4ee   :  { %20169 = vst [vmem:[#allocation11_spill] sm:$0xff] %v16921_v42  ;;  %v5288_v20 = vsel %vm1287_vm4, %v5272_v17, %v10406_v26  ;;  %v16936_v18 = vpack.i.bf16 %v5653_v6, %v16926_v54  ;;  %v11189_v6 = vld [vmem:[#allocation2 + $0x67] sm:$0xff] }
 0x4ef   :  { %v4567_v59 = vmax.f32 %v4532_v40, 0.0  ;;  %5455 = vmatmul.f32.gmra.mxu2 %v5335_v51  ;;  %20170 = vst [vmem:[#allocation16_spill] sm:$0xff] %v16926_v54  ;;  %v5424_v40 = vld [vmem:[%s19717_s4 + $0xe8] sm:$0xff]  ;;  %v5304_v26 = vsel %vm279_vm0, %v5288_v20, %v10446_v60  ;;  %v5421_v54 = vld [vmem:[%s19717_s4 + $0xd0] sm:$0xff]  ;;  %v4475_v58 = vpop.f32.mrf.mxu0 }
 0x4f0   :  { %10553 = vrot.lane.b32.xlu1 %v16445_v4, %s11246_s26  ;;  %5494 = vmatpush.msrb.mxu3 %v5424_v40  ;;  %v5658_v51 = vld [vmem:[#allocation2 + $0x149] sm:$0xff]  ;;  %v5257_v4 = vsel %vm49_vm1, %v11189_v6, %v10330_v55  ;;  %v5320_v17 = vsel %vm1320_vm5, %v5304_v26, %v10486_v33  ;;  %v5661_v40 = vld [vmem:[#allocation2 + $0x171] sm:$0xff]  ;;  %v10410_v26 = vunpack.i.l.bf16 %v16531_v52  ;;  %v10490_v33 = vunpack.i.l.bf16 %v16742_v34 }
 0x4f1   :  { %4584 = vst.msk [vmem:[#allocation2 + $0x3c8] sm:$0xff] %vm49_vm1, %v4567_v59  ;;  %10548 = vrot.lane.b32.xlu0 %v16936_v18, %s11245_s21  ;;  %v5660_v20 = vld [vmem:[#allocation2 + $0x169] sm:$0xff]  ;;  %v5273_v42 = vsel %vm1270_vm2, %v5257_v4, %v10370_v45  ;;  %v5659_v6 = vld [vmem:[#allocation2 + $0x151] sm:$0xff] }
 0x4f2   :  { %10558 = vrot.lane.b32.xlu2 %v16933_v9, %s11246_s26  ;;  %5495 = vmatpush.msrb.mxu3 %v5423_v56  ;;  %v10450_v56 = vunpack.i.l.bf16 %v16697_v48  ;;  %v5662_v55 = vld [vmem:[#allocation2 + $0x189] sm:$0xff]  ;;  %v16979_v4 = vpack.i.bf16 %v5659_v6, %v5658_v51  ;;  %v5418_v51 = vld [vmem:[%s19717_s4 + $0xb8] sm:$0xff] }
 0x4f3   :  { %v16960_v36 = vpop.permute.xlu1 %5103  ;;  %v5667_v6 = vld [vmem:[#allocation2 + $0x1d1] sm:$0xff] }
 0x4f4   :  { %v4534_v32 = vpop.f32.mrf.mxu1  ;;  %20172 = vst [vmem:[#allocation31_spill] sm:$0xff] %v16960_v36  ;;  %5496 = vmatpush.msrb.mxu3 %v5422_v44  ;;  %v5420_v44 = vld [vmem:[%s19717_s4 + $0xc8] sm:$0xff] }
 0x4f5   :  { %v4535_v60 = vadd.f32 %v4534_v32, %v16857_v35  ;;  %v16958_v59 = vpop.permute.xlu0 %5101  ;;  %v16968_v22 = vpop.permute.xlu2 %5155  ;;  %v5336_v35 = vsel %vm1337_vm6, %v5320_v17, %v16816_v12  ;;  %v5663_v32 = vld [vmem:[#allocation2 + $0x191] sm:$0xff]  ;;  %v5289_v17 = vsel %vm1287_vm4, %v5273_v42, %v10410_v26  ;;  %v10451_v12 = vunpack.i.h.bf16 %v16697_v48  ;;  %v5415_v48 = vld [vmem:[%s19717_s4 + $0xa0] sm:$0xff] }
 0x4f6   :  { %20171 = vst [vmem:[#allocation18_spill] sm:$0xff] %v16958_v59  ;;  %v16974_v59 = vpack.i.bf16 %v5661_v40, %v5660_v20  ;;  %5497 = vmatpush.msrb.mxu3 %v5421_v54  ;;  %v16977_v45 = vpack.i.bf16 %v5663_v32, %v5662_v55  ;;  %v5305_v54 = vsel %vm279_vm0, %v5289_v17, %v10450_v56  ;;  %v10371_v20 = vunpack.i.h.bf16 %v16564_v16  ;;  %v5666_v32 = vld [vmem:[#allocation2 + $0x1c9] sm:$0xff] }
 0x4f7   :  { %20173 = vst [vmem:[#allocation42_spill] sm:$0xff] %v16968_v22  ;;  %v4568_v36 = vmax.f32 %v4535_v60, 0.0  ;;  %5458 = vmatmul.f32.gmra.mxu2 %v5336_v35  ;;  %v5419_v60 = vld [vmem:[%s19717_s4 + $0xc0] sm:$0xff]  ;;  %v5321_v42 = vsel %vm1320_vm5, %v5305_v54, %v10490_v33  ;;  %v5664_v35 = vld [vmem:[#allocation2 + $0x1a9] sm:$0xff] }
 0x4f8   :  { %20174 = vst [vmem:[#allocation27_spill] sm:$0xff] %v16974_v59  ;;  %10568 = vrot.lane.b32.xlu1 %v16974_v59, %s11246_s26  ;;  %5498 = vmatpush.msrb.mxu3 %v5420_v44  ;;  %v5417_v26 = vld [vmem:[%s19717_s4 + $0xb0] sm:$0xff]  ;;  %v5337_v16 = vsel %vm1337_vm6, %v5321_v42, %v16748_v10  ;;  %v17016_v59 = vpack.i.bf16 %v5667_v6, %v5666_v32  ;;  %v10491_v42 = vunpack.i.h.bf16 %v16742_v34 }
 0x4f9   :  { %4585 = vst.msk [vmem:[#allocation2 + $0x3d0] sm:$0xff] %vm49_vm1, %v4568_v36  ;;  %v10331_v36 = vunpack.i.h.bf16 %v16500_v41  ;;  %10563 = vrot.lane.b32.xlu0 %v16979_v4, %s11246_s26  ;;  %v5668_v17 = vld [vmem:[#allocation2 + $0x1e9] sm:$0xff]  ;;  %v5669_v44 = vld [vmem:[#allocation2 + $0x1f1] sm:$0xff] }
 0x4fa   :  { %10573 = vrot.lane.b32.xlu2 %v16977_v45, %s11246_s26  ;;  %5499 = vmatpush.msrb.mxu3 %v5419_v60  ;;  %v5665_v60 = vld [vmem:[#allocation2 + $0x1b1] sm:$0xff]  ;;  %v17021_v10 = vpack.i.bf16 %v5669_v44, %v5668_v17 }
 0x4fb   :  { %v17004_v55 = vpop.permute.xlu1 %5141 }
 0x4fc   :  { %v4537_v40 = vpop.f32.mrf.mxu1  ;;  %5500 = vmatpush.msrb.mxu3 %v5418_v51  ;;  %v17023_v51 = vpack.i.bf16 %v5665_v60, %v5664_v35  ;;  %v5414_v35 = vld [vmem:[%s19717_s4 + $0x98] sm:$0xff] }
 0x4fd   :  { %v4538_v56 = vadd.f32 %v4537_v40, %v16918_v37  ;;  %v17002_v41 = vpop.permute.xlu0 %5139  ;;  %v17009_v33 = vpop.permute.xlu2 %5161  ;;  %v11190_v37 = vld [vmem:[#allocation2 + $0x6f] sm:$0xff] }
 0x4fe   :  { %20175 = vst [vmem:[#allocation17_spill] sm:$0xff] %v17009_v33  ;;  %v5258_v54 = vsel %vm49_vm1, %v11190_v37, %v10331_v36  ;;  %5501 = vmatpush.msrb.mxu3 %v5417_v26  ;;  %v10411_v33 = vunpack.i.h.bf16 %v16531_v52  ;;  %v5416_v36 = vld [vmem:[%s19717_s4 + $0xa8] sm:$0xff]  ;;  %v10335_v52 = vunpack.i.l.bf16 %v16417_v47  ;;  %v10415_v26 = vunpack.i.l.bf16 %v16651_v15 }
 0x4ff   :  { %v4569_v40 = vmax.f32 %v4538_v56, 0.0  ;;  %5461 = vmatmul.f32.gmra.mxu2 %v5337_v16  ;;  %v5274_v22 = vsel %vm1270_vm2, %v5258_v54, %v10371_v20  ;;  %v4478_v20 = vpop.f32.mrf.mxu0  ;;  %v10375_v56 = vunpack.i.l.bf16 %v16566_v5  ;;  %v17059_v54 = vld [vmem:[#allocation2 + $0x16f] sm:$0xff] }
 0x500   :  { %10583 = vrot.lane.b32.xlu1 %v17016_v59, %s11246_s26  ;;  %5502 = vmatpush.msrb.mxu3 %v5416_v36  ;;  %v5290_v34 = vsel %vm1287_vm4, %v5274_v22, %v10411_v33  ;;  %v17050_v22 = vld [vmem:[#allocation2 + $0x14f] sm:$0xff] }
 0x501   :  { %4586 = vst.msk [vmem:[#allocation2 + $0x3e8] sm:$0xff] %vm49_vm1, %v4569_v40  ;;  %10578 = vrot.lane.b32.xlu0 %v17023_v51, %s11246_s26  ;;  %v5306_v6 = vsel %vm279_vm0, %v5290_v34, %v10451_v12  ;;  %v5413_v33 = vld [vmem:[%s19717_s4 + $0x90] sm:$0xff] }
 0x502   :  { %10588 = vrot.lane.b32.xlu2 %v17021_v10, %s11246_s26  ;;  %5503 = vmatpush.msrb.mxu3 %v5415_v48  ;;  %v5322_v60 = vsel %vm1320_vm5, %v5306_v6, %v10491_v42  ;;  %v17062_v42 = vld [vmem:[#allocation2 + $0x147] sm:$0xff] }
 0x503   :  { %v17047_v44 = vpop.permute.xlu1 %5147  ;;  %v5338_v12 = vsel %vm1337_vm6, %v5322_v60, %v16863_v28  ;;  %v10597_v34 = vpack.i.bf16 %v17050_v22, %v17062_v42  ;;  %v10495_v60 = vunpack.i.l.bf16 %v16744_v1  ;;  %v11193_v28 = vld [vmem:[#allocation2 + $0xa7] sm:$0xff] }
 0x504   :  { %v4540_v32 = vpop.f32.mrf.mxu1  ;;  %5504 = vmatpush.msrb.mxu3 %v5414_v35  ;;  %v10592_v35 = vpack.i.bf16 %v16548_v27, %v16546_v19  ;;  %v10376_v19 = vunpack.i.h.bf16 %v16566_v5 }
 0x505   :  { %v4541_v16 = vadd.f32 %v4540_v32, %v4475_v58  ;;  %v17045_v17 = vpop.permute.xlu0 %5145  ;;  %v17055_v37 = vpop.permute.xlu2 %5167  ;;  %v11191_v58 = vld [vmem:[#allocation2 + $0x87] sm:$0xff] }
 0x506   :  { %20176 = vst [vmem:[#allocation26_spill] sm:$0xff] %v17055_v37  ;;  %v5259_v40 = vsel %vm49_vm1, %v11191_v58, %v10335_v52  ;;  %v17067_v32 = vld [vmem:[#allocation2 + $0x167] sm:$0xff]  ;;  %5505 = vmatpush.msrb.mxu3 %v5413_v33  ;;  %v10336_v33 = vunpack.i.h.bf16 %v16417_v47 }
 0x507   :  { %v4570_v36 = vmax.f32 %v4541_v16, 0.0  ;;  %5464 = vmatmul.f32.gmra.mxu2 %v5338_v12  ;;  %v5275_v48 = vsel %vm1270_vm2, %v5259_v40, %v10375_v56  ;;  %v10602_v52 = vpack.i.bf16 %v17059_v54, %v17067_v32  ;;  %v5412_v56 = vld [vmem:[%s19717_s4 + $0x88] sm:$0xff]  ;;  %v5411_v16 = vld [vmem:[%s19717_s4 + $0x80] sm:$0xff]  ;;  %v4481_v27 = vpop.f32.mrf.mxu0  ;;  %v10416_v40 = vunpack.i.h.bf16 %v16651_v15 }
 0x508   :  { %v5291_v6 = vsel %vm1287_vm4, %v5275_v48, %v10415_v26  ;;  %v10455_v26 = vunpack.i.l.bf16 %v16616_v29  ;;  %10598 = vrot.lane.b32.xlu1 %v10597_v34, %s11247_s24  ;;  %5506 = vmatpush.msrb.mxu3 %v5412_v56  ;;  %v17095_v56 = vld [vmem:[#allocation2 + $0x1af] sm:$0xff]  ;;  %v17113_v37 = vld [vmem:[#allocation2 + $0x1c7] sm:$0xff] }
 0x509   :  { %4587 = vst.msk [vmem:[#allocation2 + $0x3f0] sm:$0xff] %vm49_vm1, %v4570_v36  ;;  %10593 = vrot.lane.b32.xlu0 %v10592_v35, %s11247_s24 }
 0x50a   :  { %10603 = vrot.lane.b32.xlu2 %v10602_v52, %s11247_s24  ;;  %v5307_v58 = vsel %vm279_vm0, %v5291_v6, %v10455_v26  ;;  %5507 = vmatpush.msrb.mxu3 %v5411_v16  ;;  %v17097_v52 = vld [vmem:[#allocation2 + $0x18f] sm:$0xff]  ;;  %v17106_v26 = vld [vmem:[#allocation2 + $0x1a7] sm:$0xff] }
 0x50b   :  { %v17092_v34 = vpop.permute.xlu1 %5153  ;;  %v5323_v47 = vsel %vm1320_vm5, %v5307_v58, %v10495_v60  ;;  %v17103_v6 = vld [vmem:[#allocation2 + $0x1cf] sm:$0xff]  ;;  %v10612_v58 = vpack.i.bf16 %v17095_v56, %v17106_v26 }
 0x50c   :  { %v4543_v12 = vpop.f32.mrf.mxu1  ;;  %20177 = vst [vmem:[#allocation41_spill] sm:$0xff] %v17092_v34  ;;  %v5339_v5 = vsel %vm1337_vm6, %v5323_v47, %v16865_v30  ;;  %v11192_v16 = vld [vmem:[#allocation2 + $0x8f] sm:$0xff]  ;;  %v10340_v30 = vunpack.i.l.bf16 %v16520_v46 }
 0x50d   :  { %v4544_v36 = vadd.f32 %v4543_v12, %v4478_v20  ;;  %v17090_v48 = vpop.permute.xlu0 %5151  ;;  %v17099_v35 = vpop.permute.xlu2 %5205  ;;  %20178 = vst [vmem:[#allocation20_spill] sm:$0xff] %v17103_v6  ;;  %v5260_v15 = vsel %vm49_vm1, %v11192_v16, %v10336_v33  ;;  %v17108_v12 = vld [vmem:[#allocation2 + $0x187] sm:$0xff] }
 0x50e   :  { %v5276_v60 = vsel %vm1270_vm2, %v5260_v15, %v10376_v19  ;;  %v10607_v47 = vpack.i.bf16 %v17097_v52, %v17108_v12  ;;  %v10456_v19 = vunpack.i.h.bf16 %v16616_v29 }
 0x50f   :  { %v4571_v20 = vmax.f32 %v4544_v36, 0.0  ;;  %5467 = vmatmul.f32.gmra.mxu2 %v5339_v5  ;;  %v5292_v33 = vsel %vm1287_vm4, %v5276_v60, %v10416_v40  ;;  %v10496_v36 = vunpack.i.h.bf16 %v16744_v1  ;;  %v10617_v5 = vpack.i.bf16 %v17103_v6, %v17113_v37  ;;  %v4484_v34 = vpop.f32.mrf.mxu0 }
 0x510   :  { %10613 = vrot.lane.b32.xlu1 %v10612_v58, %s11247_s24  ;;  %v5308_v15 = vsel %vm279_vm0, %v5292_v33, %v10456_v19  ;;  %v5261_v40 = vsel %vm49_vm1, %v11193_v28, %v10340_v30  ;;  %v10420_v1 = vunpack.i.l.bf16 %v16653_v13  ;;  %v17135_v58 = vld [vmem:[#allocation2 + $0x20f] sm:$0xff]  ;;  %v17145_v19 = vld [vmem:[#allocation2 + $0x207] sm:$0xff] }
 0x511   :  { %4588 = vst.msk [vmem:[#allocation2 + $0x408] sm:$0xff] %vm49_vm1, %v4571_v20  ;;  %10608 = vrot.lane.b32.xlu0 %v10607_v47, %s11247_s24  ;;  %v5324_v29 = vsel %vm1320_vm5, %v5308_v15, %v10496_v36  ;;  %v10460_v47 = vunpack.i.l.bf16 %v16713_v3  ;;  %v17143_v30 = vld [vmem:[#allocation2 + $0x1ef] sm:$0xff]  ;;  %v10627_v15 = vpack.i.bf16 %v17135_v58, %v17145_v19 }
 0x512   :  { %10618 = vrot.lane.b32.xlu2 %v10617_v5, %s11247_s24  ;;  %v10380_v5 = vunpack.i.l.bf16 %v16495_v0  ;;  %v5340_v28 = vsel %vm1337_vm6, %v5324_v29, %v16760_v49  ;;  %20181 = vst [vmem:[#allocation21_spill] sm:$0xff] %v17145_v19 }
 0x513   :  { %v17132_v6 = vpop.permute.xlu1 %5159 }
 0x514   :  { %v4546_v16 = vpop.f32.mrf.mxu1  ;;  %20180 = vst [vmem:[#allocation22_spill] sm:$0xff] %v17132_v6  ;;  %v5277_v36 = vsel %vm1270_vm2, %v5261_v40, %v10380_v5  ;;  %v10341_v6 = vunpack.i.h.bf16 %v16520_v46  ;;  %v10500_v40 = vunpack.i.l.bf16 %v16690_v43  ;;  %v11194_v46 = vld [vmem:[#allocation2 + $0xaf] sm:$0xff] }
 0x515   :  { %v4547_v20 = vadd.f32 %v4546_v16, %v4481_v27  ;;  %v17130_v60 = vpop.permute.xlu0 %5157  ;;  %v17139_v33 = vpop.permute.xlu2 %5211  ;;  %v17148_v16 = vld [vmem:[#allocation2 + $0x1e7] sm:$0xff] }
 0x516   :  { %20179 = vst [vmem:[#allocation37_spill] sm:$0xff] %v17130_v60  ;;  %v5293_v60 = vsel %vm1287_vm4, %v5277_v36, %v10420_v1  ;;  %v10622_v29 = vpack.i.bf16 %v17143_v30, %v17148_v16  ;;  %v5262_v1 = vsel %vm49_vm1, %v11194_v46, %v10341_v6 }
 0x517   :  { %v4572_v27 = vmax.f32 %v4547_v20, 0.0  ;;  %5470 = vmatmul.f32.gmra.mxu2 %v5340_v28  ;;  %v5309_v20 = vsel %vm279_vm0, %v5293_v60, %v10460_v47  ;;  %v10421_v28 = vunpack.i.h.bf16 %v16653_v13  ;;  %v10381_v47 = vunpack.i.h.bf16 %v16495_v0 }
 0x518   :  { %10628 = vrot.lane.b32.xlu1 %v10627_v15, %s11247_s24  ;;  %v5325_v60 = vsel %vm1320_vm5, %v5309_v20, %v10500_v40  ;;  %v10461_v15 = vunpack.i.h.bf16 %v16713_v3  ;;  %v10345_v3 = vunpack.i.l.bf16 %v16518_v23  ;;  %v10501_v20 = vunpack.i.h.bf16 %v16690_v43 }
 0x519   :  { %4589 = vst.msk [vmem:[#allocation2 + $0x410] sm:$0xff] %vm49_vm1, %v4572_v27  ;;  %10623 = vrot.lane.b32.xlu0 %v10622_v29, %s11247_s24  ;;  %v5341_v29 = vsel %vm1337_vm6, %v5325_v60, %v16912_v63  ;;  %v5278_v13 = vsel %vm1270_vm2, %v5262_v1, %v10381_v47  ;;  %v10385_v40 = vunpack.i.l.bf16 %v16594_v21 }
 0x51a   :  { %10633 = vrot.lane.b32.xlu2 %v16843_v61, %s11248_s11  ;;  %v5294_v6 = vsel %vm1287_vm4, %v5278_v13, %v10421_v28 }
 0x51b   :  { %v17167_v49 = vpop.permute.xlu1 %5165  ;;  %v5310_v0 = vsel %vm279_vm0, %v5294_v6, %v10461_v15  ;;  %v10425_v15 = vunpack.i.l.bf16 %v16556_v38 }
 0x51c   :  { %v4549_v5 = vpop.f32.mrf.mxu1  ;;  %v5326_v28 = vsel %vm1320_vm5, %v5310_v0, %v10501_v20  ;;  %v10386_v0 = vunpack.i.h.bf16 %v16594_v21 }
 0x51d   :  { %v4550_v27 = vadd.f32 %v4549_v5, %v4484_v34  ;;  %v17165_v36 = vpop.permute.xlu0 %5163  ;;  %v17172_v61 = vpop.permute.xlu2 %5217 }
 0x51e   :  { %v4487_v34 = vpop.f32.mrf.mxu0 }
 0x51f   :  { %v4573_v19 = vmax.f32 %v4550_v27, 0.0  ;;  %5473 = vmatmul.f32.gmra.mxu2 %v5341_v29  ;;  %v10505_v29 = vunpack.i.l.bf16 %v16756_v14 }
 0x520   :  { %10643 = vrot.lane.b32.xlu1 %v16847_v50, %s11248_s11 }
 0x521   :  { %4590 = vst.msk [vmem:[#allocation2 + $0x428] sm:$0xff] %vm49_vm1, %v4573_v19  ;;  %10638 = vrot.lane.b32.xlu0 %v16835_v25, %s11248_s11  ;;  %v5347_v19 = vsel %vm1354_vm8, %v16708_v39, %v17002_v41  ;;  %v5342_v25 = vsel %vm1337_vm6, %v5326_v28, %v16914_v53  ;;  %v10465_v41 = vunpack.i.l.bf16 %v16715_v8 }
 0x522   :  { %10648 = vrot.lane.b32.xlu2 %v16891_v62, %s11248_s11  ;;  %v11195_v62 = vld [vmem:[#allocation2 + $0xc7] sm:$0xff] }
 0x523   :  { %v5204_v46 = vpop.permute.xlu1 %5203  ;;  %v5263_v60 = vsel %vm49_vm1, %v11195_v62, %v10345_v3  ;;  %v10506_v62 = vunpack.i.h.bf16 %v16756_v14 }
 0x524   :  { %v4552_v5 = vpop.f32.mrf.mxu1  ;;  %v5363_v43 = vsel %vm1371_vm10, %v5347_v19, %v5204_v46  ;;  %v5279_v39 = vsel %vm1270_vm2, %v5263_v60, %v10385_v40  ;;  %v5348_v40 = vsel %vm1354_vm8, %v16779_v2, %v17004_v55  ;;  %v11196_v46 = vld [vmem:[#allocation2 + $0xcf] sm:$0xff]  ;;  %v10466_v55 = vunpack.i.h.bf16 %v16715_v8 }
 0x525   :  { %v4553_v50 = vadd.f32 %v4552_v5, %v4487_v34  ;;  %v17192_v1 = vpop.permute.xlu0 %5169  ;;  %v17196_v27 = vpop.permute.xlu2 %5223  ;;  %9359 = vmatmul.msk.f32.vlgmr.msrb.gmra.mxu3 %vm1388_vm9, %v5363_v43  ;;  %v10346_v34 = vunpack.i.h.bf16 %v16518_v23  ;;  %v5295_v6 = vsel %vm1287_vm4, %v5279_v39, %v10425_v15 }
 0x526   :  { %v4490_v13 = vpop.f32.mrf.mxu0  ;;  %v5311_v20 = vsel %vm279_vm0, %v5295_v6, %v10465_v41 }
 0x527   :  { %v4574_v47 = vmax.f32 %v4553_v50, 0.0  ;;  %5476 = vmatmul.f32.gmra.mxu2 %v5342_v25  ;;  %v5327_v19 = vsel %vm1320_vm5, %v5311_v20, %v10505_v29  ;;  %v17227_v50 = vld [vmem:[#allocation2 + $0x210] sm:$0xff]  ;;  %v5264_v28 = vsel %vm49_vm1, %v11196_v46, %v10346_v34  ;;  %v17233_v25 = vld [vmem:[#allocation2 + $0x208] sm:$0xff]  ;;  %v20183_v29 = vld [vmem:[#allocation29_spill] sm:$0xff] }
 0x528   :  { %10658 = vrot.lane.b32.xlu1 %v16893_v7, %s11248_s11  ;;  %v5343_v21 = vsel %vm1337_vm6, %v5327_v19, %v16784_v57  ;;  %v5280_v2 = vsel %vm1270_vm2, %v5264_v28, %v10386_v0  ;;  %v10667_v60 = vpack.i.bf16 %v17227_v50, %v17233_v25  ;;  %v20184_v34 = vld [vmem:[#allocation6_spill] sm:$0xff] }
 0x529   :  { %4591 = vst.msk [vmem:[#allocation2 + $0x430] sm:$0xff] %vm49_vm1, %v4574_v47  ;;  %10653 = vrot.lane.b32.xlu0 %v16884_v31, %s11248_s11  ;;  %v10350_v47 = vunpack.i.l.bf16 %v16455_v24 }
 0x52a   :  { %10663 = vrot.lane.b32.xlu2 %v16936_v18, %s11248_s11  ;;  %v5364_v18 = vsel %vm1371_vm10, %v5348_v40, %v17099_v35  ;;  %v10426_v35 = vunpack.i.h.bf16 %v16556_v38  ;;  %v20182_v38 = vld [vmem:[#allocation25_spill] sm:$0xff] }
 0x52b   :  { %v5210_v5 = vpop.permute.xlu1 %5209  ;;  %v10390_v39 = vunpack.i.l.bf16 %v20182_v38 }
 0x52c   :  { %v4555_v3 = vpop.f32.mrf.mxu1  ;;  %v5296_v8 = vsel %vm1287_vm4, %v5280_v2, %v10426_v35  ;;  %v10351_v35 = vunpack.i.h.bf16 %v16455_v24 }
 0x52d   :  { %v4556_v7 = vadd.f32 %v4555_v3, %v4490_v13  ;;  %v5208_v23 = vpop.permute.xlu0 %5207  ;;  %v17223_v31 = vpop.permute.xlu2 %5229  ;;  %9360 = vmatmul.msk.f32.gmra.mxu3 %vm1388_vm9, %v5364_v18  ;;  %v5312_v15 = vsel %vm279_vm0, %v5296_v8, %v10466_v55  ;;  %v10430_v13 = vunpack.i.l.bf16 %v20183_v29  ;;  %v11197_v18 = vld [vmem:[#allocation2 + $0xe7] sm:$0xff]  ;;  %v10431_v8 = vunpack.i.h.bf16 %v20183_v29  ;;  %v11198_v29 = vld [vmem:[#allocation2 + $0xef] sm:$0xff] }
 0x52e   :  { %v4493_v14 = vpop.f32.mrf.mxu0  ;;  %v5328_v3 = vsel %vm1320_vm5, %v5312_v15, %v10506_v62  ;;  %v20188_v62 = vld [vmem:[#allocation27_spill] sm:$0xff] }
 0x52f   :  { %v4575_v43 = vmax.f32 %v4556_v7, 0.0  ;;  %5479 = vmatmul.f32.gmra.mxu2 %v5343_v21  ;;  %v20185_v7 = vld [vmem:[#allocation18_spill] sm:$0xff]  ;;  %v5265_v21 = vsel %vm49_vm1, %v11197_v18, %v10350_v47 }
 0x530   :  { %10673 = vrot.lane.b32.xlu1 %v16933_v9, %s11249_s16  ;;  %v5349_v9 = vsel %vm1354_vm8, %v20184_v34, %v16871_v11  ;;  %v5344_v19 = vsel %vm1337_vm6, %v5328_v3, %v20185_v7  ;;  %v5281_v11 = vsel %vm1270_vm2, %v5265_v21, %v10390_v39  ;;  %v20189_v39 = vld [vmem:[#allocation15_spill] sm:$0xff]  ;;  %v20191_v21 = vld [vmem:[#allocation34_spill] sm:$0xff] }
 0x531   :  { %4592 = vst.msk [vmem:[#allocation2 + $0x448] sm:$0xff] %vm49_vm1, %v4575_v43  ;;  %10668 = vrot.lane.b32.xlu0 %v10667_v60, %s11248_s11  ;;  %v5365_v20 = vsel %vm1371_vm10, %v5349_v9, %v5208_v23  ;;  %v5297_v28 = vsel %vm1287_vm4, %v5281_v11, %v10430_v13  ;;  %v20186_v43 = vld [vmem:[#allocation28_spill] sm:$0xff]  ;;  %v20187_v23 = vld [vmem:[#allocation23_spill] sm:$0xff]  ;;  %v10391_v60 = vunpack.i.h.bf16 %v20182_v38 }
 0x532   :  { %10678 = vrot.lane.b32.xlu2 %v16979_v4, %s11249_s16  ;;  %v10510_v2 = vunpack.i.l.bf16 %v20186_v43  ;;  %v10470_v55 = vunpack.i.l.bf16 %v20187_v23  ;;  %v20190_v13 = vld [vmem:[#allocation31_spill] sm:$0xff]  ;;  %v17291_v9 = vld [vmem:[#allocation2 + $0x211] sm:$0xff] }
 0x533   :  { %v17253_v0 = vpop.permute.xlu1 %5215  ;;  %v17289_v34 = vld [vmem:[#allocation2 + $0x209] sm:$0xff] }
 0x534   :  { %v4558_v41 = vpop.f32.mrf.mxu1  ;;  %v5313_v47 = vsel %vm279_vm0, %v5297_v28, %v10470_v55 }
 0x535   :  { %v4559_v6 = vadd.f32 %v4558_v41, %v4493_v14  ;;  %v5214_v4 = vpop.permute.xlu0 %5213  ;;  %v17257_v40 = vpop.permute.xlu2 %10513  ;;  %9361 = vmatmul.msk.f32.gmra.mxu3 %vm1388_vm9, %v5365_v20  ;;  %v5350_v14 = vsel %vm1354_vm8, %v20189_v39, %v17045_v17  ;;  %v5329_v24 = vsel %vm1320_vm5, %v5313_v47, %v10510_v2  ;;  %v10707_v20 = vpack.i.bf16 %v17291_v9, %v17289_v34 }
 0x536   :  { %v5345_v38 = vsel %vm1337_vm6, %v5329_v24, %v20190_v13 }
 0x537   :  { %v4576_v46 = vmax.f32 %v4559_v6, 0.0  ;;  %5482 = vmatmul.f32.gmra.mxu2 %v5344_v19  ;;  %v5266_v6 = vsel %vm49_vm1, %v11198_v29, %v10351_v35  ;;  %v10471_v19 = vunpack.i.h.bf16 %v20187_v23  ;;  %v20192_v23 = vld [vmem:[#allocation32_spill] sm:$0xff] }
 0x538   :  { %10688 = vrot.lane.b32.xlu1 %v16977_v45, %s11249_s16  ;;  %v5282_v17 = vsel %vm1270_vm2, %v5266_v6, %v10391_v60 }
 0x539   :  { %4593 = vst.msk [vmem:[#allocation2 + $0x450] sm:$0xff] %vm49_vm1, %v4576_v46  ;;  %10683 = vrot.lane.b32.xlu0 %v20188_v62, %s11249_s16  ;;  %v5298_v3 = vsel %vm1287_vm4, %v5282_v17, %v10431_v8  ;;  %v5351_v46 = vsel %vm1354_vm8, %v20191_v21, %v17047_v44  ;;  %v20193_v44 = vld [vmem:[#allocation11_spill] sm:$0xff]  ;;  %v20204_v17 = vld [vmem:[#allocation37_spill] sm:$0xff] }
 0x53a   :  { %10693 = vrot.lane.b32.xlu2 %v17023_v51, %s11249_s16  ;;  %v5366_v51 = vsel %vm1371_vm10, %v5350_v14, %v5210_v5  ;;  %v10511_v5 = vunpack.i.h.bf16 %v20186_v43  ;;  %v5314_v18 = vsel %vm279_vm0, %v5298_v3, %v10471_v19  ;;  %v5367_v43 = vsel %vm1371_vm10, %v5351_v46, %v17139_v33  ;;  %v20194_v33 = vld [vmem:[#allocation38_spill] sm:$0xff]  ;;  %v20205_v3 = vld [vmem:[#allocation19_spill] sm:$0xff]  ;;  %v20206_v21 = vld [vmem:[#allocation9_spill] sm:$0xff] }
 0x53b   :  { %v17281_v41 = vpop.permute.xlu1 %5221  ;;  %v5352_v55 = vsel %vm1354_vm8, %v20194_v33, %v20193_v44  ;;  %v20207_v46 = vld [vmem:[#allocation36_spill] sm:$0xff] }
 0x53c   :  { %v5330_v28 = vsel %vm1320_vm5, %v5314_v18, %v10511_v5  ;;  %v5368_v62 = vsel %vm1371_vm10, %v5352_v55, %v5214_v4  ;;  %v5356_v5 = vsel %vm1354_vm8, %v20205_v3, %v20204_v17  ;;  %v20209_v55 = vld [vmem:[#allocation12_spill] sm:$0xff]  ;;  %v6435_v17 = vld [vmem:[%s19717_s4 + $0x60] sm:$0xff]  ;;  %v5743_v3 = vld [vmem:[#allocation2 + $0x1c8] sm:$0xff] }
 0x53d   :  { %v5220_v45 = vpop.permute.xlu0 %5219  ;;  %v17285_v15 = vpop.permute.xlu2 %10528  ;;  %9362 = vmatmul.msk.f32.gmra.mxu3 %vm1388_vm9, %v5366_v51 }
 0x53f   :  { %5485 = vmatmul.f32.gmra.mxu2 %v5345_v38 }
 0x540   :  { %10703 = vrot.lane.b32.xlu1 %v17021_v10, %s11249_s16 }
 0x541   :  { %10698 = vrot.lane.b32.xlu0 %v17016_v59, %s11249_s16  ;;  %v5346_v59 = vsel %vm1337_vm6, %v5330_v28, %v20192_v23  ;;  %v20208_v28 = vld [vmem:[#allocation22_spill] sm:$0xff] }
 0x542   :  { %10708 = vrot.lane.b32.xlu2 %v10707_v20, %s11249_s16  ;;  %v5372_v20 = vsel %vm1371_vm10, %v5356_v5, %v17281_v41  ;;  %v5360_v5 = vsel %vm1354_vm8, %v20185_v7, %v17167_v49  ;;  %v6432_v49 = vld [vmem:[%s19717_s4 + $0x48] sm:$0xff]  ;;  %v5746_v7 = vld [vmem:[#allocation2 + $0x1f0] sm:$0xff] }
 0x543   :  { %v17310_v11 = vpop.permute.xlu1 %5227 }
 0x545   :  { %v17315_v2 = vpop.permute.xlu0 %5225  ;;  %v17317_v10 = vpop.permute.xlu2 %10543  ;;  %9363 = vmatmul.msk.f32.gmra.mxu3 %vm1388_vm9, %v5367_v43  ;;  %v5357_v43 = vsel %vm1354_vm8, %v16912_v63, %v20208_v28  ;;  %v20212_v63 = vld [vmem:[#allocation17_spill] sm:$0xff] }
 0x547   :  { %5488 = vmatmul.f32.gmra.mxu2 %v5346_v59  ;;  %v5373_v59 = vsel %vm1371_vm10, %v5357_v43, %v17196_v27  ;;  %v6433_v43 = vld [vmem:[%s19717_s4 + $0x50] sm:$0xff] }
 0x548   :  { %6105 = vrot.lane.b32.xlu1 %v17050_v22, %s11250_s22  ;;  %v20195_v22 = vld [vmem:[#allocation14_spill] sm:$0xff] }
 0x549   :  { %6103 = vrot.lane.b32.xlu0 %v17062_v42, %s11250_s22  ;;  %v5353_v42 = vsel %vm1354_vm8, %v20195_v22, %v17090_v48  ;;  %v20197_v48 = vld [vmem:[#allocation39_spill] sm:$0xff] }
 0x54a   :  { %6107 = vrot.lane.b32.xlu2 %v17067_v32, %s11250_s22  ;;  %v5369_v4 = vsel %vm1371_vm10, %v5353_v42, %v17253_v0  ;;  %v20211_v22 = vld [vmem:[#allocation35_spill] sm:$0xff]  ;;  %v5358_v42 = vsel %vm1354_vm8, %v16914_v53, %v20212_v63  ;;  %v6437_v53 = vld [vmem:[%s19717_s4 + $0x70] sm:$0xff] }
 0x54b   :  { %v17331_v35 = vpop.permute.xlu1 %5233 }
 0x54d   :  { %v17334_v60 = vpop.permute.xlu0 %5231  ;;  %v17336_v47 = vpop.permute.xlu2 %10558  ;;  %9364 = vmatmul.msk.f32.gmra.mxu3 %vm1388_vm9, %v5368_v62  ;;  %v20210_v62 = vld [vmem:[#allocation8_spill] sm:$0xff] }
 0x550   :  { %6111 = vrot.lane.b32.xlu1 %v17108_v12, %s11250_s22 }
 0x551   :  { %6109 = vrot.lane.b32.xlu0 %v17059_v54, %s11250_s22  ;;  %v20196_v54 = vld [vmem:[#allocation41_spill] sm:$0xff] }
 0x552   :  { %6113 = vrot.lane.b32.xlu2 %v17097_v52, %s11250_s22  ;;  %v5354_v52 = vsel %vm1354_vm8, %v20197_v48, %v20196_v54 }
 0x553   :  { %v17348_v32 = vpop.permute.xlu1 %10523  ;;  %v5370_v0 = vsel %vm1371_vm10, %v5354_v52, %v17172_v61  ;;  %v6438_v52 = vld [vmem:[%s19717_s4 + $0x78] sm:$0xff] }
 0x554   :  { %6455 = vmatpush.msrb.mxu0 %v6438_v52  ;;  %v6429_v52 = vld [vmem:[%s19717_s4 + $0x30] sm:$0xff] }
 0x555   :  { %v17352_v8 = vpop.permute.xlu0 %10518  ;;  %v17354_v39 = vpop.permute.xlu2 %10573  ;;  %9365 = vmatmul.msk.f32.gmra.mxu3 %vm1388_vm9, %v5369_v4  ;;  %v5374_v4 = vsel %vm1371_vm10, %v5358_v42, %v17315_v2  ;;  %v20214_v2 = vld [vmem:[#allocation10_spill] sm:$0xff] }
 0x556   :  { %6456 = vmatpush.msrb.mxu0 %v6437_v53  ;;  %v5751_v53 = vld [vmem:[#allocation2 + $0x149] sm:$0xff] }
 0x558   :  { %6117 = vrot.lane.b32.xlu1 %v17095_v56, %s11250_s22  ;;  %v20200_v56 = vld [vmem:[#allocation42_spill] sm:$0xff] }
 0x559   :  { %6115 = vrot.lane.b32.xlu0 %v17106_v26, %s11250_s22  ;;  %v20201_v26 = vld [vmem:[#allocation30_spill] sm:$0xff] }
 0x55a   :  { %6119 = vrot.lane.b32.xlu2 %v17113_v37, %s11250_s22  ;;  %v20199_v37 = vld [vmem:[#allocation20_spill] sm:$0xff]  ;;  %v5355_v51 = vsel %vm1354_vm8, %v20201_v26, %v20200_v56  ;;  %v6436_v56 = vld [vmem:[%s19717_s4 + $0x68] sm:$0xff]  ;;  %v5359_v26 = vsel %vm1354_vm8, %v16784_v57, %v17165_v36  ;;  %v6434_v57 = vld [vmem:[%s19717_s4 + $0x58] sm:$0xff] }
 0x55b   :  { %v17366_v12 = vpop.permute.xlu1 %10538  ;;  %v5371_v38 = vsel %vm1371_vm10, %v5355_v51, %v5220_v45  ;;  %6457 = vmatpush.msrb.mxu0 %v6436_v56  ;;  %v5744_v36 = vld [vmem:[#allocation2 + $0x1d0] sm:$0xff]  ;;  %v6426_v56 = vld [vmem:[%s19717_s4 + $0x18] sm:$0xff] }
 0x55d   :  { %v17370_v14 = vpop.permute.xlu0 %10533  ;;  %v17372_v24 = vpop.permute.xlu2 %10588  ;;  %9366 = vmatmul.msk.f32.gmra.mxu3 %vm1388_vm9, %v5370_v0  ;;  %v20213_v0 = vld [vmem:[#allocation40_spill] sm:$0xff]  ;;  %6458 = vmatpush.msrb.mxu0 %v6435_v17 }
 0x55e   :  { %20198 = vst [vmem:[#allocation13_spill] sm:$0xff] %v17372_v24 }
 0x55f   :  { %6459 = vmatpush.msrb.mxu0 %v6434_v57 }
 0x560   :  { %6123 = vrot.lane.b32.xlu1 %v17148_v16, %s11250_s22  ;;  %v5733_v16 = vld [vmem:[#allocation2 + $0x227] sm:$0xff] }
 0x561   :  { %6121 = vrot.lane.b32.xlu0 %v20199_v37, %s11250_s22  ;;  %v20215_v37 = vld [vmem:[#allocation24_spill] sm:$0xff]  ;;  %6460 = vmatpush.msrb.mxu0 %v6433_v43 }
 0x562   :  { %6125 = vrot.lane.b32.xlu2 %v17143_v30, %s11250_s22  ;;  %v20203_v30 = vld [vmem:[#allocation21_spill] sm:$0xff] }
 0x563   :  { %v17384_v61 = vpop.permute.xlu1 %10553  ;;  %6461 = vmatpush.msrb.mxu0 %v6432_v49 }
 0x565   :  { %v17387_v29 = vpop.permute.xlu2 %10603  ;;  %v17389_v6 = vpop.permute.xlu0 %10548  ;;  %9367 = vmatmul.msk.f32.gmra.mxu3 %vm1388_vm9, %v5371_v38  ;;  %v5375_v38 = vsel %vm1371_vm10, %v5359_v26, %v17310_v11  ;;  %v20217_v11 = vld [vmem:[#allocation16_spill] sm:$0xff] }
 0x566   :  { %20202 = vst [vmem:[#allocation7_spill] sm:$0xff] %v17389_v6  ;;  %v11199_v6 = vld [vmem:[#allocation2 + $0x147] sm:$0xff] }
 0x568   :  { %6129 = vrot.lane.b32.xlu1 %v17135_v58, %s11250_s22  ;;  %v5734_v58 = vld [vmem:[#allocation2 + $0x22f] sm:$0xff] }
 0x569   :  { %6127 = vrot.lane.b32.xlu0 %v20203_v30, %s11250_s22 }
 0x56a   :  { %6131 = vrot.lane.b32.xlu2 %v5733_v16, %s11250_s22 }
 0x56b   :  { %v17400_v45 = vpop.permute.xlu1 %10568 }
 0x56d   :  { %v17404_v19 = vpop.permute.xlu2 %10618  ;;  %v17406_v18 = vpop.permute.xlu0 %10563  ;;  %9368 = vmatmul.msk.f32.gmra.mxu3 %vm1388_vm9, %v5372_v20 }
 0x56e   :  { %v17484_v20 = vpop.f32.mrf.mxu2 }
 0x570   :  { %6167 = vrot.lane.b32.xlu1 %v20206_v21, %s11251_s20  ;;  %v5376_v21 = vsel %vm1371_vm10, %v5360_v5, %v17223_v31  ;;  %v6431_v31 = vld [vmem:[%s19717_s4 + $0x40] sm:$0xff] }
 0x571   :  { %6133 = vrot.lane.b32.xlu0 %v5734_v58, %s11250_s22  ;;  %6462 = vmatpush.msrb.mxu0 %v6431_v31 }
 0x572   :  { %6169 = vrot.lane.b32.xlu2 %v20207_v46, %s11251_s20 }
 0x573   :  { %v17417_v41 = vpop.permute.xlu1 %10583 }
 0x575   :  { %v17421_v44 = vpop.permute.xlu2 %10633  ;;  %v17423_v33 = vpop.permute.xlu0 %10578  ;;  %9369 = vmatmul.msk.f32.gmra.mxu3 %vm1388_vm9, %v5373_v59  ;;  %v20219_v59 = vld [vmem:[#allocation26_spill] sm:$0xff] }
 0x578   :  { %6173 = vrot.lane.b32.xlu1 %v20209_v55, %s11251_s20  ;;  %v5361_v55 = vsel %vm1354_vm8, %v20190_v13, %v20219_v59  ;;  %v5749_v13 = vld [vmem:[#allocation2 + $0x228] sm:$0xff] }
 0x579   :  { %6171 = vrot.lane.b32.xlu0 %v20211_v22, %s11251_s20  ;;  %v5757_v59 = vld [vmem:[#allocation2 + $0x1a9] sm:$0xff] }
 0x57a   :  { %6175 = vrot.lane.b32.xlu2 %v20210_v62, %s11251_s20  ;;  %v17512_v62 = vpop.f32.mrf.mxu2 }
 0x57b   :  { %v17435_v27 = vpop.permute.xlu1 %10598 }
 0x57d   :  { %v17439_v54 = vpop.permute.xlu2 %10648  ;;  %v17441_v48 = vpop.permute.xlu0 %10593  ;;  %9370 = vmatmul.msk.f32.gmra.mxu3 %vm1388_vm9, %v5374_v4  ;;  %v5750_v4 = vld [vmem:[#allocation2 + $0x230] sm:$0xff] }
 0x580   :  { %6179 = vrot.lane.b32.xlu1 %v20213_v0, %s11251_s20  ;;  %v6428_v0 = vld [vmem:[%s19717_s4 + $0x28] sm:$0xff] }
 0x581   :  { %6177 = vrot.lane.b32.xlu0 %v20215_v37, %s11251_s20 }
 0x582   :  { %6181 = vrot.lane.b32.xlu2 %v20214_v2, %s11251_s20  ;;  %v5362_v2 = vsel %vm1354_vm8, %v20192_v23, %v17192_v1  ;;  %v17552_v57 = vpop.f32.mrf.mxu2  ;;  %v5753_v1 = vld [vmem:[#allocation2 + $0x169] sm:$0xff] }
 0x583   :  { %v17462_v51 = vpop.permute.xlu1 %10613  ;;  %v5378_v26 = vsel %vm1371_vm10, %v5362_v2, %v17331_v35  ;;  %v6425_v23 = vld [vmem:[%s19717_s4 + $0x10] sm:$0xff] }
 0x584   :  { %v5754_v35 = vld [vmem:[#allocation2 + $0x171] sm:$0xff] }
 0x585   :  { %v17466_v16 = vpop.permute.xlu2 %10663  ;;  %v17468_v30 = vpop.permute.xlu0 %10608  ;;  %9371 = vmatmul.msk.f32.gmra.mxu3 %vm1388_vm9, %v5375_v38  ;;  %v5760_v2 = vld [vmem:[#allocation2 + $0x1d1] sm:$0xff] }
 0x586   :  { %20216 = vst [vmem:[#allocation33_spill] sm:$0xff] %v17466_v16  ;;  %v6679_v16 = vld [vmem:[#allocation2 + $0x308] sm:$0xff] }
 0x588   :  { %6185 = vrot.lane.b32.xlu1 %v5744_v36, %s11251_s20  ;;  %v6424_v36 = vld [vmem:[%s19717_s4 + $0x8] sm:$0xff] }
 0x589   :  { %6183 = vrot.lane.b32.xlu0 %v5743_v3, %s11251_s20  ;;  %v5752_v3 = vld [vmem:[#allocation2 + $0x151] sm:$0xff] }
 0x58a   :  { %6187 = vrot.lane.b32.xlu2 %v20217_v11, %s11251_s20  ;;  %v6423_v11 = vld [vmem:[%s19717_s4] sm:$0xff]  ;;  %v17573_v49 = vpop.f32.mrf.mxu2 }
 0x58b   :  { %v17486_v58 = vpop.permute.xlu1 %10628 }
 0x58c   :  { %20218 = vst [vmem:[#allocation25_spill] sm:$0xff] %v17486_v58 }
 0x58d   :  { %v17490_v46 = vpop.permute.xlu2 %10678  ;;  %v17492_v28 = vpop.permute.xlu0 %10623  ;;  %9372 = vmatmul.msk.f32.gmra.mxu3 %vm1388_vm9, %v5376_v21 }
 0x590   :  { %6191 = vrot.lane.b32.xlu1 %v17233_v25, %s11251_s20  ;;  %v6430_v25 = vld [vmem:[%s19717_s4 + $0x38] sm:$0xff] }
 0x591   :  { %6189 = vrot.lane.b32.xlu0 %v5746_v7, %s11251_s20  ;;  %6463 = vmatpush.msrb.mxu0 %v6430_v25  ;;  %v5756_v7 = vld [vmem:[#allocation2 + $0x191] sm:$0xff] }
 0x592   :  { %6193 = vrot.lane.b32.xlu2 %v17227_v50, %s11251_s20  ;;  %v5377_v50 = vsel %vm1371_vm10, %v5361_v55, %v17334_v60  ;;  %v6427_v60 = vld [vmem:[%s19717_s4 + $0x20] sm:$0xff]  ;;  %v5755_v55 = vld [vmem:[#allocation2 + $0x189] sm:$0xff] }
 0x593   :  { %v17514_v22 = vpop.permute.xlu1 %10643  ;;  %6464 = vmatpush.msrb.mxu0 %v6429_v52 }
 0x595   :  { %v17521_v63 = vpop.permute.xlu2 %10693  ;;  %v17523_v42 = vpop.permute.xlu0 %10638  ;;  %9373 = vmatmul.msk.f32.gmra.mxu3 %vm1388_vm9, %v5377_v50  ;;  %6465 = vmatpush.msrb.mxu0 %v6428_v0  ;;  %v9375_v50 = vld [vmem:[%s19713_s0 + $0x19] sm:$0xff] }
 0x597   :  { %6466 = vmatpush.msrb.mxu0 %v6427_v60  ;;  %v5759_v60 = vld [vmem:[#allocation2 + $0x1c9] sm:$0xff] }
 0x598   :  { %6197 = vrot.lane.b32.xlu1 %v5750_v4, %s11251_s20 }
 0x599   :  { %6195 = vrot.lane.b32.xlu0 %v5749_v13, %s11251_s20  ;;  %6467 = vmatpush.msrb.mxu0 %v6426_v56  ;;  %v5758_v56 = vld [vmem:[#allocation2 + $0x1b1] sm:$0xff] }
 0x59a   :  { %6231 = vrot.lane.b32.xlu2 %v5751_v53, %s11252_s25 }
 0x59b   :  { %v17541_v37 = vpop.permute.xlu1 %10658  ;;  %6468 = vmatpush.msrb.mxu0 %v6425_v23  ;;  %v10515_v23 = vunpack.i.l.bf16 %v17257_v40 }
 0x59d   :  { %v17548_v38 = vpop.permute.xlu0 %10653  ;;  %v17550_v17 = vpop.permute.xlu2 %10708  ;;  %9374 = vmatmul.msk.f32.gmra.mxu3 %vm1388_vm9, %v5378_v26  ;;  %6469 = vmatpush.msrb.mxu0 %v6424_v36  ;;  %v9376_v36 = vld [vmem:[%s19713_s0 + $0x21] sm:$0xff] }
 0x59e   :  { %20220 = vst [vmem:[#allocation29_spill] sm:$0xff] %v17550_v17  ;;  %v17590_v26 = vpop.f32.mrf.mxu2 }
 0x59f   :  { %6470 = vmatpush.msrb.mxu0 %v6423_v11 }
 0x5a0   :  { %6235 = vrot.lane.b32.xlu1 %v5753_v1, %s11252_s25 }
 0x5a1   :  { %6233 = vrot.lane.b32.xlu0 %v5752_v3, %s11252_s25 }
 0x5a2   :  { %6237 = vrot.lane.b32.xlu2 %v5754_v35, %s11252_s25  ;;  %v10555_v35 = vunpack.i.l.bf16 %v17384_v61 }
 0x5a3   :  { %v17567_v5 = vpop.permute.xlu1 %10673 }
 0x5a5   :  { %v17569_v21 = vpop.permute.xlu2 %6107  ;;  %v17571_v43 = vpop.permute.xlu0 %10668 }
 0x5a6   :  { %20221 = vst [vmem:[#allocation6_spill] sm:$0xff] %v17569_v21 }
 0x5a7   :  { %20222 = vst [vmem:[#allocation18_spill] sm:$0xff] %v17571_v43 }
 0x5a8   :  { %v5509_v31 = vpop.f32.mrf.mxu3  ;;  %6241 = vrot.lane.b32.xlu1 %v5756_v7, %s11252_s25  ;;  %v10595_v7 = vunpack.i.l.bf16 %v17441_v48 }
 0x5a9   :  { %v5510_v25 = vadd.f32 %v5509_v31, %v17484_v20  ;;  %6239 = vrot.lane.b32.xlu0 %v5755_v55, %s11252_s25 }
 0x5aa   :  { %6243 = vrot.lane.b32.xlu2 %v5757_v59, %s11252_s25  ;;  %v5622_v59 = vld [vmem:[#allocation2 + $0x107] sm:$0xff] }
 0x5ab   :  { %v5573_v4 = vmax.f32 %v5510_v25, 0.0  ;;  %v17582_v13 = vpop.permute.xlu1 %10688  ;;  %v6279_v25 = vsel %vm49_vm1, %v5622_v59, %v10515_v23 }
 0x5ad   :  { %v17584_v52 = vpop.permute.xlu2 %6113  ;;  %v17586_v0 = vpop.permute.xlu0 %10683  ;;  %v5589_v53 = vadd.f32 %v9375_v50, %v5573_v4  ;;  %v6295_v50 = vsel %vm1270_vm2, %v6279_v25, %v10555_v35  ;;  %v5762_v4 = vld [vmem:[#allocation2 + $0x1f1] sm:$0xff] }
 0x5ae   :  { %20223 = vst [vmem:[#allocation28_spill] sm:$0xff] %v17584_v52  ;;  %v9377_v35 = vld [vmem:[%s19713_s0 + $0x31] sm:$0xff] }
 0x5af   :  { %5605 = vst.msk [vmem:[#allocation3] sm:$0xff] %vm49_vm1, %v5589_v53  ;;  %v6454_v53 = vld [vmem:[%s19717_s4 + $0xf8] sm:$0xff] }
 0x5b0   :  { %v5512_v20 = vpop.f32.mrf.mxu3  ;;  %6247 = vrot.lane.b32.xlu1 %v5759_v60, %s11252_s25  ;;  %v6311_v60 = vsel %vm1287_vm4, %v6295_v50, %v10595_v7  ;;  %6520 = vmatpush.msrb.mxu1 %v6454_v53  ;;  %v17626_v7 = vpop.f32.mrf.mxu2 }
 0x5b1   :  { %v5513_v1 = vadd.f32 %v5512_v20, %v17512_v62  ;;  %6245 = vrot.lane.b32.xlu0 %v5758_v56, %s11252_s25  ;;  %v10675_v20 = vunpack.i.l.bf16 %v17567_v5  ;;  %v5761_v56 = vld [vmem:[#allocation2 + $0x1e9] sm:$0xff] }
 0x5b2   :  { %6249 = vrot.lane.b32.xlu2 %v5760_v2, %s11252_s25 }
 0x5b3   :  { %v5574_v3 = vmax.f32 %v5513_v1, 0.0  ;;  %v17600_v11 = vpop.permute.xlu1 %10703  ;;  %v10635_v1 = vunpack.i.l.bf16 %v17421_v44 }
 0x5b4   :  { %20224 = vst [vmem:[#allocation23_spill] sm:$0xff] %v17600_v11 }
 0x5b5   :  { %v17603_v31 = vpop.permute.xlu2 %6119  ;;  %v17605_v62 = vpop.permute.xlu0 %10698  ;;  %v5590_v55 = vadd.f32 %v9376_v36, %v5574_v3  ;;  %v10516_v36 = vunpack.i.h.bf16 %v17257_v40  ;;  %v10556_v3 = vunpack.i.h.bf16 %v17384_v61 }
 0x5b7   :  { %5606 = vst.msk [vmem:[#allocation3 + $0x8] sm:$0xff] %vm49_vm1, %v5590_v55  ;;  %v6327_v55 = vsel %vm279_vm0, %v6311_v60, %v10635_v1  ;;  %v5766_v60 = vld [vmem:[#allocation2 + $0x231] sm:$0xff] }
 0x5b8   :  { %v5515_v2 = vpop.f32.mrf.mxu3  ;;  %6253 = vrot.lane.b32.xlu1 %v5762_v4, %s11252_s25  ;;  %v6343_v40 = vsel %vm1320_vm5, %v6327_v55, %v10675_v20  ;;  %v5623_v4 = vld [vmem:[#allocation2 + $0x10f] sm:$0xff]  ;;  %v10520_v20 = vunpack.i.l.bf16 %v17352_v8 }
 0x5b9   :  { %v5516_v23 = vadd.f32 %v5515_v2, %v17552_v57  ;;  %6251 = vrot.lane.b32.xlu0 %v5761_v56, %s11252_s25  ;;  %v10596_v57 = vunpack.i.h.bf16 %v17441_v48  ;;  %v5765_v2 = vld [vmem:[#allocation2 + $0x229] sm:$0xff]  ;;  %v6280_v56 = vsel %vm49_vm1, %v5623_v4, %v10516_v36 }
 0x5ba   :  { %6255 = vrot.lane.b32.xlu2 %v17289_v34, %s11252_s25  ;;  %v6296_v1 = vsel %vm1270_vm2, %v6280_v56, %v10556_v3  ;;  %v6453_v48 = vld [vmem:[%s19717_s4 + $0xf0] sm:$0xff]  ;;  %v6452_v36 = vld [vmem:[%s19717_s4 + $0xe8] sm:$0xff]  ;;  %v10636_v3 = vunpack.i.h.bf16 %v17421_v44  ;;  %v10560_v56 = vunpack.i.l.bf16 %v17336_v47 }
 0x5bb   :  { %v5575_v59 = vmax.f32 %v5516_v23, 0.0  ;;  %v17629_v25 = vpop.permute.xlu1 %6105  ;;  %v6312_v23 = vsel %vm1287_vm4, %v6296_v1, %v10596_v57  ;;  %6521 = vmatpush.msrb.mxu1 %v6453_v48  ;;  %v9378_v57 = vld [vmem:[%s19713_s0 + $0x39] sm:$0xff]  ;;  %v6668_v4 = vld [vmem:[#allocation2 + $0x250] sm:$0xff]  ;;  %v10600_v1 = vunpack.i.l.bf16 %v17435_v27 }
 0x5bd   :  { %v17632_v34 = vpop.permute.xlu2 %6125  ;;  %v17634_v50 = vpop.permute.xlu0 %6103  ;;  %v5591_v53 = vadd.f32 %v9377_v35, %v5575_v59  ;;  %v10676_v35 = vunpack.i.h.bf16 %v17567_v5  ;;  %v6451_v5 = vld [vmem:[%s19717_s4 + $0xe0] sm:$0xff]  ;;  %6522 = vmatpush.msrb.mxu1 %v6452_v36 }
 0x5be   :  { %v6359_v61 = vsel %vm1337_vm6, %v6343_v40, %v17634_v50  ;;  %v6667_v40 = vld [vmem:[#allocation2 + $0x248] sm:$0xff] }
 0x5bf   :  { %6471 = vmatmul.f32.vlgmr.msrb.gmra.mxu0 %v6359_v61  ;;  %5607 = vst.msk [vmem:[#allocation3 + $0x10] sm:$0xff] %vm49_vm1, %v5591_v53  ;;  %v5624_v53 = vld [vmem:[#allocation2 + $0x127] sm:$0xff]  ;;  %6523 = vmatpush.msrb.mxu1 %v6451_v5  ;;  %v10712_v58 = vpack.i.bf16 %v6668_v4, %v6667_v40  ;;  %v10521_v40 = vunpack.i.h.bf16 %v17352_v8 }
 0x5c0   :  { %v5518_v59 = vpop.f32.mrf.mxu3  ;;  %6259 = vrot.lane.b32.xlu1 %v5765_v2, %s11252_s25  ;;  %v6670_v2 = vld [vmem:[#allocation2 + $0x270] sm:$0xff]  ;;  %v6447_v8 = vld [vmem:[%s19717_s4 + $0xc0] sm:$0xff] }
 0x5c1   :  { %v5519_v55 = vadd.f32 %v5518_v59, %v17573_v49  ;;  %6257 = vrot.lane.b32.xlu0 %v17291_v9, %s11252_s25  ;;  %v6328_v49 = vsel %vm279_vm0, %v6312_v23, %v10636_v3  ;;  %v6450_v9 = vld [vmem:[%s19717_s4 + $0xd8] sm:$0xff]  ;;  %v17677_v23 = vpop.f32.mrf.mxu2  ;;  %v10640_v3 = vunpack.i.l.bf16 %v17523_v42 }
 0x5c2   :  { %6261 = vrot.lane.b32.xlu2 %v5766_v60, %s11252_s25  ;;  %v6281_v60 = vsel %vm49_vm1, %v5624_v53, %v10520_v20  ;;  %v6344_v36 = vsel %vm1320_vm5, %v6328_v49, %v10676_v35  ;;  %v6669_v20 = vld [vmem:[#allocation2 + $0x268] sm:$0xff]  ;;  %6524 = vmatpush.msrb.mxu1 %v6450_v9 }
 0x5c3   :  { %v5576_v44 = vmax.f32 %v5519_v55, 0.0  ;;  %v17663_v61 = vpop.permute.xlu1 %6111  ;;  %v6672_v55 = vld [vmem:[#allocation2 + $0x290] sm:$0xff]  ;;  %v6360_v43 = vsel %vm1337_vm6, %v6344_v36, %v17629_v25  ;;  %v17682_v53 = vld [vmem:[#allocation2 + $0x288] sm:$0xff]  ;;  %v6297_v35 = vsel %vm1270_vm2, %v6281_v60, %v10560_v56 }
 0x5c4   :  { %20225 = vst [vmem:[#allocation27_spill] sm:$0xff] %v17663_v61  ;;  %v17689_v5 = vpack.i.bf16 %v6672_v55, %v17682_v53  ;;  %v6313_v4 = vsel %vm1287_vm4, %v6297_v35, %v10600_v1  ;;  %v9379_v9 = vld [vmem:[%s19713_s0 + $0x49] sm:$0xff]  ;;  %v10601_v55 = vunpack.i.h.bf16 %v17435_v27 }
 0x5c5   :  { %v17672_v48 = vpop.permute.xlu2 %6131  ;;  %v17674_v59 = vpop.permute.xlu0 %6109  ;;  %v5592_v17 = vadd.f32 %v9378_v57, %v5576_v44  ;;  %20228 = vst [vmem:[#allocation34_spill] sm:$0xff] %v17682_v53  ;;  %v6449_v57 = vld [vmem:[%s19717_s4 + $0xd0] sm:$0xff]  ;;  %v6329_v49 = vsel %vm279_vm0, %v6313_v4, %v10640_v3  ;;  %v10561_v4 = vunpack.i.h.bf16 %v17336_v47  ;;  %v6677_v27 = vld [vmem:[#allocation2 + $0x2e8] sm:$0xff] }
 0x5c6   :  { %20226 = vst [vmem:[#allocation15_spill] sm:$0xff] %v17672_v48  ;;  %v17684_v48 = vpack.i.bf16 %v6670_v2, %v6669_v20  ;;  %6525 = vmatpush.msrb.mxu1 %v6449_v57  ;;  %v10680_v2 = vunpack.i.l.bf16 %v17490_v46  ;;  %v5625_v56 = vld [vmem:[#allocation2 + $0x12f] sm:$0xff] }
 0x5c7   :  { %20227 = vst [vmem:[#allocation31_spill] sm:$0xff] %v17674_v59  ;;  %6474 = vmatmul.f32.gmra.mxu0 %v6360_v43  ;;  %v6448_v43 = vld [vmem:[%s19717_s4 + $0xc8] sm:$0xff]  ;;  %v6676_v1 = vld [vmem:[#allocation2 + $0x2d0] sm:$0xff]  ;;  %v6282_v36 = vsel %vm49_vm1, %v5625_v56, %v10521_v40 }
 0x5c8   :  { %5608 = vst.msk [vmem:[#allocation3 + $0x18] sm:$0xff] %vm49_vm1, %v5592_v17  ;;  %v5521_v44 = vpop.f32.mrf.mxu3  ;;  %10718 = vrot.lane.b32.xlu1 %v17684_v48, %s11245_s21  ;;  %6526 = vmatpush.msrb.mxu1 %v6448_v43  ;;  %v6345_v35 = vsel %vm1320_vm5, %v6329_v49, %v10680_v2  ;;  %v6678_v57 = vld [vmem:[#allocation2 + $0x2f0] sm:$0xff]  ;;  %v6675_v56 = vld [vmem:[#allocation2 + $0x2c8] sm:$0xff]  ;;  %v6298_v49 = vsel %vm1270_vm2, %v6282_v36, %v10561_v4 }
 0x5c9   :  { %v5522_v17 = vadd.f32 %v5521_v44, %v17590_v26  ;;  %10713 = vrot.lane.b32.xlu0 %v10712_v58, %s11245_s21  ;;  %v6446_v58 = vld [vmem:[%s19717_s4 + $0xb8] sm:$0xff]  ;;  %v17725_v43 = vld [vmem:[#allocation2 + $0x2b0] sm:$0xff]  ;;  %v10641_v44 = vunpack.i.h.bf16 %v17523_v42  ;;  %v6361_v40 = vsel %vm1337_vm6, %v6345_v35, %v17569_v21  ;;  %v17731_v53 = vld [vmem:[#allocation2 + $0x2a8] sm:$0xff]  ;;  %v17733_v24 = vpack.i.bf16 %v6676_v1, %v6675_v56  ;;  %v17736_v2 = vpop.f32.mrf.mxu2 }
 0x5ca   :  { %10723 = vrot.lane.b32.xlu2 %v17689_v5, %s11245_s21  ;;  %20230 = vst [vmem:[#allocation11_spill] sm:$0xff] %v17725_v43  ;;  %6527 = vmatpush.msrb.mxu1 %v6447_v8  ;;  %v17739_v47 = vpack.i.bf16 %v6678_v57, %v6677_v27  ;;  %v17743_v42 = vpack.i.bf16 %v17725_v43, %v17731_v53  ;;  %v6445_v8 = vld [vmem:[%s19717_s4 + $0xb0] sm:$0xff]  ;;  %v6443_v35 = vld [vmem:[%s19717_s4 + $0xa0] sm:$0xff]  ;;  %v10681_v57 = vunpack.i.h.bf16 %v17490_v46 }
 0x5cb   :  { %v5577_v26 = vmax.f32 %v5522_v17, 0.0  ;;  %v17713_v60 = vpop.permute.xlu1 %6117  ;;  %20231 = vst [vmem:[#allocation38_spill] sm:$0xff] %v17731_v53  ;;  %v6683_v4 = vld [vmem:[#allocation2 + $0x249] sm:$0xff] }
 0x5cc   :  { %20229 = vst [vmem:[#allocation32_spill] sm:$0xff] %v17713_v60  ;;  %6528 = vmatpush.msrb.mxu1 %v6446_v58  ;;  %v6681_v53 = vld [vmem:[#allocation2 + $0x328] sm:$0xff] }
 0x5cd   :  { %v17720_v3 = vpop.permute.xlu2 %6169  ;;  %v17722_v20 = vpop.permute.xlu0 %6115  ;;  %v5593_v17 = vadd.f32 %v9379_v9, %v5577_v26  ;;  %v6444_v9 = vld [vmem:[%s19717_s4 + $0xa8] sm:$0xff]  ;;  %v6314_v26 = vsel %vm1287_vm4, %v6298_v49, %v10601_v55  ;;  %v10525_v55 = vunpack.i.l.bf16 %v17348_v32  ;;  %v6442_v49 = vld [vmem:[%s19717_s4 + $0x98] sm:$0xff] }
 0x5ce   :  { %6529 = vmatpush.msrb.mxu1 %v6445_v8  ;;  %v6330_v36 = vsel %vm279_vm0, %v6314_v26, %v10641_v44  ;;  %v6682_v44 = vld [vmem:[#allocation2 + $0x330] sm:$0xff] }
 0x5cf   :  { %6477 = vmatmul.f32.gmra.mxu0 %v6361_v40  ;;  %5609 = vst.msk [vmem:[#allocation3 + $0x20] sm:$0xff] %vm49_vm1, %v5593_v17  ;;  %v6684_v17 = vld [vmem:[#allocation2 + $0x251] sm:$0xff]  ;;  %v10565_v40 = vunpack.i.l.bf16 %v17406_v18  ;;  %v6346_v26 = vsel %vm1320_vm5, %v6330_v36, %v10681_v57  ;;  %v6283_v21 = vsel %vm49_vm1, %v11199_v6, %v10525_v55  ;;  %v17782_v11 = vpack.i.bf16 %v6682_v44, %v6681_v53  ;;  %v6440_v6 = vld [vmem:[%s19717_s4 + $0x88] sm:$0xff] }
 0x5d0   :  { %v5524_v1 = vpop.f32.mrf.mxu3  ;;  %10733 = vrot.lane.b32.xlu1 %v17733_v24, %s11245_s21  ;;  %6530 = vmatpush.msrb.mxu1 %v6444_v9  ;;  %v6362_v9 = vsel %vm1337_vm6, %v6346_v26, %v17674_v59  ;;  %v10645_v36 = vunpack.i.l.bf16 %v17514_v22  ;;  %v6441_v57 = vld [vmem:[%s19717_s4 + $0x90] sm:$0xff]  ;;  %v10526_v53 = vunpack.i.h.bf16 %v17348_v32  ;;  %v10605_v55 = vunpack.i.l.bf16 %v17387_v29  ;;  %v6439_v32 = vld [vmem:[%s19717_s4 + $0x80] sm:$0xff] }
 0x5d1   :  { %v5525_v58 = vadd.f32 %v5524_v1, %v17626_v7  ;;  %10728 = vrot.lane.b32.xlu0 %v17743_v42, %s11245_s21  ;;  %v9380_v7 = vld [vmem:[%s19713_s0 + $0x51] sm:$0xff]  ;;  %v6685_v44 = vld [vmem:[#allocation2 + $0x269] sm:$0xff] }
 0x5d2   :  { %10738 = vrot.lane.b32.xlu2 %v17739_v47, %s11245_s21  ;;  %v6680_v1 = vld [vmem:[#allocation2 + $0x310] sm:$0xff]  ;;  %6531 = vmatpush.msrb.mxu1 %v6443_v35 }
 0x5d3   :  { %v5578_v56 = vmax.f32 %v5525_v58, 0.0  ;;  %v17769_v27 = vpop.permute.xlu1 %6123  ;;  %v10752_v58 = vpack.i.bf16 %v6684_v17, %v6683_v4  ;;  %v17787_v35 = vpack.i.bf16 %v6680_v1, %v6679_v16  ;;  %v10566_v16 = vunpack.i.h.bf16 %v17406_v18  ;;  %v9381_v17 = vld [vmem:[%s19713_s0 + $0x61] sm:$0xff]  ;;  %v6688_v26 = vld [vmem:[#allocation2 + $0x291] sm:$0xff]  ;;  %v6689_v59 = vld [vmem:[#allocation2 + $0x2a9] sm:$0xff] }
 0x5d4   :  { %6532 = vmatpush.msrb.mxu1 %v6442_v49  ;;  %v6687_v49 = vld [vmem:[#allocation2 + $0x289] sm:$0xff] }
 0x5d5   :  { %v17774_v8 = vpop.permute.xlu2 %6175  ;;  %v17776_v46 = vpop.permute.xlu0 %6121  ;;  %v5594_v43 = vadd.f32 %v9380_v7, %v5578_v56  ;;  %v11200_v1 = vld [vmem:[#allocation2 + $0x14f] sm:$0xff] }
 0x5d6   :  { %20232 = vst [vmem:[#allocation14_spill] sm:$0xff] %v17774_v8  ;;  %v6299_v8 = vsel %vm1270_vm2, %v6283_v21, %v10565_v40  ;;  %v10685_v21 = vunpack.i.l.bf16 %v17586_v0  ;;  %6533 = vmatpush.msrb.mxu1 %v6441_v57 }
 0x5d7   :  { %6480 = vmatmul.f32.gmra.mxu0 %v6362_v9  ;;  %5610 = vst.msk [vmem:[#allocation3 + $0x28] sm:$0xff] %vm49_vm1, %v5594_v43  ;;  %v17801_v43 = vpop.f32.mrf.mxu2  ;;  %v6315_v40 = vsel %vm1287_vm4, %v6299_v8, %v10605_v55  ;;  %v6284_v9 = vsel %vm49_vm1, %v11200_v1, %v10526_v53  ;;  %v6690_v8 = vld [vmem:[#allocation2 + $0x2b1] sm:$0xff]  ;;  %v10606_v53 = vunpack.i.h.bf16 %v17387_v29  ;;  %v10686_v1 = vunpack.i.h.bf16 %v17586_v0 }
 0x5d8   :  { %v5527_v7 = vpop.f32.mrf.mxu3  ;;  %10748 = vrot.lane.b32.xlu1 %v17782_v11, %s11245_s21  ;;  %6534 = vmatpush.msrb.mxu1 %v6440_v6  ;;  %v6686_v6 = vld [vmem:[#allocation2 + $0x271] sm:$0xff]  ;;  %v6300_v55 = vsel %vm1270_vm2, %v6284_v9, %v10566_v16  ;;  %v10530_v0 = vunpack.i.l.bf16 %v17285_v15  ;;  %v6693_v9 = vld [vmem:[#allocation2 + $0x2e9] sm:$0xff] }
 0x5d9   :  { %v5528_v4 = vadd.f32 %v5527_v7, %v17677_v23  ;;  %10743 = vrot.lane.b32.xlu0 %v17787_v35, %s11245_s21  ;;  %v6331_v23 = vsel %vm279_vm0, %v6315_v40, %v10645_v36  ;;  %v10646_v36 = vunpack.i.h.bf16 %v17514_v22  ;;  %v6316_v22 = vsel %vm1287_vm4, %v6300_v55, %v10606_v53 }
 0x5da   :  { %10753 = vrot.lane.b32.xlu2 %v10752_v58, %s11246_s26  ;;  %v6347_v7 = vsel %vm1320_vm5, %v6331_v23, %v10685_v21  ;;  %6535 = vmatpush.msrb.mxu1 %v6439_v32  ;;  %v17832_v21 = vpack.i.bf16 %v6690_v8, %v6689_v59  ;;  %v17834_v32 = vpack.i.bf16 %v6686_v6, %v6685_v44  ;;  %v9382_v59 = vld [vmem:[%s19713_s0 + $0x69] sm:$0xff]  ;;  %v10570_v23 = vunpack.i.l.bf16 %v17400_v45 }
 0x5db   :  { %v5579_v18 = vmax.f32 %v5528_v4, 0.0  ;;  %v17814_v56 = vpop.permute.xlu1 %6129  ;;  %v6363_v40 = vsel %vm1337_vm6, %v6347_v7, %v17663_v61  ;;  %v6332_v29 = vsel %vm279_vm0, %v6316_v22, %v10646_v36  ;;  %v6694_v7 = vld [vmem:[#allocation2 + $0x2f1] sm:$0xff]  ;;  %v10610_v8 = vunpack.i.l.bf16 %v17468_v30  ;;  %v6695_v36 = vld [vmem:[#allocation2 + $0x309] sm:$0xff] }
 0x5dd   :  { %v17818_v58 = vpop.permute.xlu2 %6181  ;;  %v17820_v57 = vpop.permute.xlu0 %6127  ;;  %v5595_v4 = vadd.f32 %v9381_v17, %v5579_v18  ;;  %v6348_v18 = vsel %vm1320_vm5, %v6332_v29, %v10686_v1 }
 0x5de   :  { %20233 = vst [vmem:[#allocation41_spill] sm:$0xff] %v17818_v58  ;;  %v17829_v58 = vpack.i.bf16 %v6688_v26, %v6687_v49  ;;  %v6691_v26 = vld [vmem:[#allocation2 + $0x2c9] sm:$0xff]  ;;  %v6364_v1 = vsel %vm1337_vm6, %v6348_v18, %v17584_v52 }
 0x5df   :  { %6483 = vmatmul.f32.gmra.mxu0 %v6363_v40  ;;  %5611 = vst.msk [vmem:[#allocation3 + $0x30] sm:$0xff] %vm49_vm1, %v5595_v4  ;;  %v17851_v44 = vpop.f32.mrf.mxu2  ;;  %v6696_v4 = vld [vmem:[#allocation2 + $0x311] sm:$0xff] }
 0x5e0   :  { %v5530_v16 = vpop.f32.mrf.mxu3  ;;  %10763 = vrot.lane.b32.xlu1 %v17829_v58, %s11246_s26  ;;  %v6692_v40 = vld [vmem:[#allocation2 + $0x2d1] sm:$0xff] }
 0x5e1   :  { %v5531_v17 = vadd.f32 %v5530_v16, %v17736_v2  ;;  %10758 = vrot.lane.b32.xlu0 %v17834_v32, %s11246_s26  ;;  %v11201_v16 = vld [vmem:[#allocation2 + $0x167] sm:$0xff] }
 0x5e2   :  { %10768 = vrot.lane.b32.xlu2 %v17832_v21, %s11246_s26  ;;  %v6285_v22 = vsel %vm49_vm1, %v11201_v16, %v10530_v0  ;;  %v10650_v0 = vunpack.i.l.bf16 %v17439_v54  ;;  %v6697_v16 = vld [vmem:[#allocation2 + $0x329] sm:$0xff] }
 0x5e3   :  { %v5580_v2 = vmax.f32 %v5531_v17, 0.0  ;;  %v17853_v49 = vpop.permute.xlu1 %6167  ;;  %v17863_v17 = vpack.i.bf16 %v6694_v7, %v6693_v9  ;;  %v6301_v29 = vsel %vm1270_vm2, %v6285_v22, %v10570_v23  ;;  %v10531_v23 = vunpack.i.h.bf16 %v17285_v15  ;;  %v6698_v22 = vld [vmem:[#allocation2 + $0x331] sm:$0xff] }
 0x5e4   :  { %v6317_v61 = vsel %vm1287_vm4, %v6301_v29, %v10610_v8  ;;  %v10571_v9 = vunpack.i.h.bf16 %v17400_v45 }
 0x5e5   :  { %v17856_v6 = vpop.permute.xlu2 %6187  ;;  %v17858_v55 = vpop.permute.xlu0 %6133  ;;  %v5596_v53 = vadd.f32 %v9382_v59, %v5580_v2  ;;  %v10690_v59 = vunpack.i.l.bf16 %v17582_v13 }
 0x5e6   :  { %20234 = vst [vmem:[#allocation39_spill] sm:$0xff] %v17856_v6  ;;  %v17867_v6 = vpack.i.bf16 %v6696_v4, %v6695_v36  ;;  %v6333_v36 = vsel %vm279_vm0, %v6317_v61, %v10650_v0  ;;  %v10611_v4 = vunpack.i.h.bf16 %v17468_v30  ;;  %v11202_v61 = vld [vmem:[#allocation2 + $0x16f] sm:$0xff]  ;;  %v17900_v30 = vld [vmem:[#allocation2 + $0x287] sm:$0xff] }
 0x5e7   :  { %20235 = vst [vmem:[#allocation20_spill] sm:$0xff] %v17858_v55  ;;  %6486 = vmatmul.f32.gmra.mxu0 %v6364_v1  ;;  %v17869_v55 = vpack.i.bf16 %v6692_v40, %v6691_v26  ;;  %v9383_v26 = vld [vmem:[%s19713_s0 + $0x79] sm:$0xff]  ;;  %v6349_v15 = vsel %vm1320_vm5, %v6333_v36, %v10690_v59  ;;  %v17895_v1 = vld [vmem:[#allocation2 + $0x28f] sm:$0xff]  ;;  %v5474_v29 = vpop.f32.mrf.mxu2  ;;  %v6286_v0 = vsel %vm49_vm1, %v11202_v61, %v10531_v23 }
 0x5e8   :  { %5612 = vst.msk [vmem:[#allocation3 + $0x38] sm:$0xff] %vm49_vm1, %v5596_v53  ;;  %v5533_v2 = vpop.f32.mrf.mxu3  ;;  %10778 = vrot.lane.b32.xlu1 %v17863_v17, %s11246_s26  ;;  %v6302_v52 = vsel %vm1270_vm2, %v6286_v0, %v10571_v9  ;;  %v10797_v59 = vpack.i.bf16 %v17895_v1, %v17900_v30  ;;  %v17906_v36 = vpack.i.bf16 %v6698_v22, %v6697_v16  ;;  %v9384_v16 = vld [vmem:[%s19713_s0 + $0x81] sm:$0xff]  ;;  %v17924_v22 = vld [vmem:[#allocation2 + $0x2cf] sm:$0xff] }
 0x5e9   :  { %v5534_v18 = vadd.f32 %v5533_v2, %v17801_v43  ;;  %10773 = vrot.lane.b32.xlu0 %v17869_v55, %s11246_s26  ;;  %v6700_v43 = vld [vmem:[#allocation2 + $0x26f] sm:$0xff]  ;;  %v6365_v2 = vsel %vm1337_vm6, %v6349_v15, %v17722_v20  ;;  %v10691_v15 = vunpack.i.h.bf16 %v17582_v13  ;;  %20237 = vst [vmem:[#allocation30_spill] sm:$0xff] %v17924_v22 }
 0x5ea   :  { %10783 = vrot.lane.b32.xlu2 %v17867_v6, %s11246_s26 }
 0x5eb   :  { %v5581_v7 = vmax.f32 %v5534_v18, 0.0  ;;  %v17886_v8 = vpop.permute.xlu1 %6173  ;;  %v6699_v18 = vld [vmem:[#allocation2 + $0x267] sm:$0xff] }
 0x5ed   :  { %v17890_v40 = vpop.permute.xlu2 %6193  ;;  %v17892_v53 = vpop.permute.xlu0 %6171  ;;  %v5597_v45 = vadd.f32 %v9383_v26, %v5581_v7  ;;  %v10535_v26 = vunpack.i.l.bf16 %v17370_v14  ;;  %v6318_v7 = vsel %vm1287_vm4, %v6302_v52, %v10611_v4  ;;  %v10575_v52 = vunpack.i.l.bf16 %v17354_v39 }
 0x5ee   :  { %20236 = vst [vmem:[#allocation42_spill] sm:$0xff] %v17890_v40  ;;  %v10792_v40 = vpack.i.bf16 %v6700_v43, %v6699_v18  ;;  %v10651_v43 = vunpack.i.h.bf16 %v17439_v54  ;;  %v11203_v54 = vld [vmem:[#allocation2 + $0x187] sm:$0xff] }
 0x5ef   :  { %6489 = vmatmul.f32.gmra.mxu0 %v6365_v2  ;;  %5613 = vst.msk [vmem:[#allocation3 + $0x40] sm:$0xff] %vm49_vm1, %v5597_v45  ;;  %v10615_v45 = vunpack.i.l.bf16 %v17462_v51  ;;  %v6375_v2 = vsel %vm1354_vm8, %v17634_v50, %v17853_v49  ;;  %v17945_v50 = vld [vmem:[#allocation2 + $0x2e7] sm:$0xff] }
 0x5f0   :  { %v5536_v23 = vpop.f32.mrf.mxu3  ;;  %10793 = vrot.lane.b32.xlu1 %v10792_v40, %s11247_s24  ;;  %v6334_v40 = vsel %vm279_vm0, %v6318_v7, %v10651_v43  ;;  %v10655_v7 = vunpack.i.l.bf16 %v17548_v38  ;;  %v17947_v49 = vld [vmem:[#allocation2 + $0x2a7] sm:$0xff] }
 0x5f1   :  { %v5537_v9 = vadd.f32 %v5536_v23, %v17851_v44  ;;  %10788 = vrot.lane.b32.xlu0 %v17906_v36, %s11246_s26  ;;  %v6287_v44 = vsel %vm49_vm1, %v11203_v54, %v10535_v26  ;;  %v6350_v0 = vsel %vm1320_vm5, %v6334_v40, %v10691_v15  ;;  %v17936_v23 = vld [vmem:[#allocation2 + $0x2af] sm:$0xff]  ;;  %v17942_v54 = vld [vmem:[#allocation2 + $0x2c7] sm:$0xff] }
 0x5f2   :  { %10798 = vrot.lane.b32.xlu2 %v10797_v59, %s11247_s24  ;;  %v17934_v59 = vld [vmem:[#allocation2 + $0x2ef] sm:$0xff]  ;;  %v10807_v15 = vpack.i.bf16 %v17924_v22, %v17942_v54  ;;  %v6303_v40 = vsel %vm1270_vm2, %v6287_v44, %v10575_v52  ;;  %v10695_v44 = vunpack.i.l.bf16 %v17521_v63 }
 0x5f3   :  { %v5582_v4 = vmax.f32 %v5537_v9, 0.0  ;;  %v17921_v13 = vpop.permute.xlu1 %6179  ;;  %v6366_v9 = vsel %vm1337_vm6, %v6350_v0, %v17713_v60  ;;  %v6319_v0 = vsel %vm1287_vm4, %v6303_v40, %v10615_v45  ;;  %v17969_v45 = vld [vmem:[#allocation2 + $0x32f] sm:$0xff] }
 0x5f4   :  { %v6335_v52 = vsel %vm279_vm0, %v6319_v0, %v10655_v7  ;;  %20239 = vst [vmem:[#allocation37_spill] sm:$0xff] %v17969_v45  ;;  %v11204_v40 = vld [vmem:[#allocation2 + $0x18f] sm:$0xff] }
 0x5f5   :  { %v6232_v18 = vpop.permute.xlu2 %6231  ;;  %v17931_v61 = vpop.permute.xlu0 %6177  ;;  %v5598_v43 = vadd.f32 %v9384_v16, %v5582_v4  ;;  %v10812_v4 = vpack.i.bf16 %v17934_v59, %v17945_v50  ;;  %v6351_v7 = vsel %vm1320_vm5, %v6335_v52, %v10695_v44  ;;  %v17978_v0 = vld [vmem:[#allocation2 + $0x34f] sm:$0xff] }
 0x5f6   :  { %v6391_v26 = vsel %vm1371_vm10, %v6375_v2, %v6232_v18  ;;  %v5477_v16 = vpop.f32.mrf.mxu2  ;;  %v10802_v2 = vpack.i.bf16 %v17936_v23, %v17947_v49  ;;  %v10536_v18 = vunpack.i.h.bf16 %v17370_v14  ;;  %20241 = vst [vmem:[#allocation9_spill] sm:$0xff] %v17978_v0 }
 0x5f7   :  { %6492 = vmatmul.f32.gmra.mxu0 %v6366_v9  ;;  %9391 = vmatmul.msk.f32.vlgmr.msrb.gmra.mxu1 %vm1388_vm9, %v6391_v26  ;;  %5614 = vst.msk [vmem:[#allocation3 + $0x48] sm:$0xff] %vm49_vm1, %v5598_v43  ;;  %v9385_v43 = vld [vmem:[%s19713_s0 + $0x91] sm:$0xff] }
 0x5f8   :  { %v5539_v26 = vpop.f32.mrf.mxu3  ;;  %10808 = vrot.lane.b32.xlu1 %v10807_v15, %s11247_s24  ;;  %v10616_v15 = vunpack.i.h.bf16 %v17462_v51  ;;  %v17988_v51 = vld [vmem:[#allocation2 + $0x347] sm:$0xff] }
 0x5f9   :  { %v5540_v9 = vadd.f32 %v5539_v26, %v5474_v29  ;;  %10803 = vrot.lane.b32.xlu0 %v10802_v2, %s11247_s24  ;;  %v6288_v29 = vsel %vm49_vm1, %v11204_v40, %v10536_v18  ;;  %v17980_v26 = vld [vmem:[#allocation2 + $0x30f] sm:$0xff]  ;;  %v6367_v18 = vsel %vm1337_vm6, %v6351_v7, %v17603_v31  ;;  %v17986_v40 = vld [vmem:[#allocation2 + $0x327] sm:$0xff]  ;;  %20242 = vst [vmem:[#allocation36_spill] sm:$0xff] %v17988_v51 }
 0x5fa   :  { %10813 = vrot.lane.b32.xlu2 %v10812_v4, %s11247_s24  ;;  %v10822_v52 = vpack.i.bf16 %v17969_v45, %v17986_v40  ;;  %v9386_v45 = vld [vmem:[%s19713_s0 + $0x99] sm:$0xff] }
 0x5fb   :  { %v5583_v60 = vmax.f32 %v5540_v9, 0.0  ;;  %v17967_v14 = vpop.permute.xlu1 %6185  ;;  %v10576_v9 = vunpack.i.h.bf16 %v17354_v39  ;;  %v10827_v39 = vpack.i.bf16 %v17978_v0, %v17988_v51 }
 0x5fc   :  { %20238 = vst [vmem:[#allocation21_spill] sm:$0xff] %v17967_v14  ;;  %v10656_v14 = vunpack.i.h.bf16 %v17548_v38 }
 0x5fd   :  { %v17973_v4 = vpop.permute.xlu2 %6237  ;;  %v17975_v2 = vpop.permute.xlu0 %6183  ;;  %v5599_v22 = vadd.f32 %v9385_v43, %v5583_v60  ;;  %v6304_v44 = vsel %vm1270_vm2, %v6288_v29, %v10576_v9  ;;  %v10696_v9 = vunpack.i.h.bf16 %v17521_v63  ;;  %v11205_v63 = vld [vmem:[#allocation2 + $0x1a7] sm:$0xff] }
 0x5fe   :  { %20240 = vst [vmem:[#allocation19_spill] sm:$0xff] %v17975_v2  ;;  %v17990_v2 = vld [vmem:[#allocation2 + $0x307] sm:$0xff]  ;;  %v6320_v60 = vsel %vm1287_vm4, %v6304_v44, %v10616_v15  ;;  %v5480_v7 = vpop.f32.mrf.mxu2  ;;  %v10580_v15 = vunpack.i.l.bf16 %v17423_v33 }
 0x5ff   :  { %6495 = vmatmul.f32.gmra.mxu0 %v6367_v18  ;;  %5615 = vst.msk [vmem:[#allocation3 + $0x50] sm:$0xff] %vm49_vm1, %v5599_v22  ;;  %v10817_v38 = vpack.i.bf16 %v17980_v26, %v17990_v2  ;;  %v6336_v29 = vsel %vm279_vm0, %v6320_v60, %v10656_v14  ;;  %v10540_v22 = vunpack.i.l.bf16 %v17366_v12 }
 0x600   :  { %v5542_v43 = vpop.f32.mrf.mxu3  ;;  %10823 = vrot.lane.b32.xlu1 %v10822_v52, %s11247_s24 }
 0x601   :  { %v5543_v18 = vadd.f32 %v5542_v43, %v5477_v16  ;;  %10818 = vrot.lane.b32.xlu0 %v10817_v38, %s11247_s24  ;;  %v6352_v38 = vsel %vm1320_vm5, %v6336_v29, %v10696_v9  ;;  %v6289_v43 = vsel %vm49_vm1, %v11205_v63, %v10540_v22  ;;  %v10541_v29 = vunpack.i.h.bf16 %v17366_v12  ;;  %v9387_v22 = vld [vmem:[%s19713_s0 + $0xa9] sm:$0xff] }
 0x602   :  { %10828 = vrot.lane.b32.xlu2 %v10827_v39, %s11247_s24  ;;  %v6368_v60 = vsel %vm1337_vm6, %v6352_v38, %v17776_v46  ;;  %v6305_v0 = vsel %vm1270_vm2, %v6289_v43, %v10580_v15  ;;  %v10581_v15 = vunpack.i.h.bf16 %v17423_v33  ;;  %v10621_v63 = vunpack.i.h.bf16 %v17404_v19 }
 0x603   :  { %v5584_v44 = vmax.f32 %v5543_v18, 0.0  ;;  %v18011_v52 = vpop.permute.xlu1 %6191  ;;  %v10660_v18 = vunpack.i.l.bf16 %v17541_v37  ;;  %v10701_v43 = vunpack.i.h.bf16 %v17605_v62 }
 0x604   :  { %20243 = vst [vmem:[#allocation22_spill] sm:$0xff] %v18011_v52  ;;  %v10620_v52 = vunpack.i.l.bf16 %v17404_v19 }
 0x605   :  { %v18013_v16 = vpop.permute.xlu2 %6243  ;;  %v18015_v39 = vpop.permute.xlu0 %6189  ;;  %v5600_v14 = vadd.f32 %v9386_v45, %v5584_v44 }
 0x606   :  { %20244 = vst [vmem:[#allocation12_spill] sm:$0xff] %v18015_v39  ;;  %v10700_v39 = vunpack.i.l.bf16 %v17605_v62  ;;  %v6321_v9 = vsel %vm1287_vm4, %v6305_v0, %v10620_v52  ;;  %v5483_v44 = vpop.f32.mrf.mxu2  ;;  %v10661_v52 = vunpack.i.h.bf16 %v17541_v37  ;;  %v9388_v37 = vld [vmem:[%s19713_s0 + $0xb1] sm:$0xff]  ;;  %v10585_v62 = vunpack.i.l.bf16 %v17417_v41 }
 0x607   :  { %6498 = vmatmul.f32.gmra.mxu0 %v6368_v60  ;;  %5616 = vst.msk [vmem:[#allocation3 + $0x58] sm:$0xff] %vm49_vm1, %v5600_v14  ;;  %v11206_v60 = vld [vmem:[#allocation2 + $0x1af] sm:$0xff] }
 0x608   :  { %v5545_v51 = vpop.f32.mrf.mxu3  ;;  %10838 = vrot.lane.b32.xlu1 %v17689_v5, %s11248_s11  ;;  %v6290_v0 = vsel %vm49_vm1, %v11206_v60, %v10541_v29  ;;  %v11207_v60 = vld [vmem:[#allocation2 + $0x1c7] sm:$0xff] }
 0x609   :  { %v5546_v45 = vadd.f32 %v5545_v51, %v5480_v7  ;;  %10833 = vrot.lane.b32.xlu0 %v17684_v48, %s11248_s11  ;;  %v6337_v51 = vsel %vm279_vm0, %v6321_v9, %v10660_v18  ;;  %v6306_v33 = vsel %vm1270_vm2, %v6290_v0, %v10581_v15  ;;  %v18067_v9 = vld [vmem:[#allocation2 + $0x350] sm:$0xff] }
 0x60a   :  { %10843 = vrot.lane.b32.xlu2 %v17743_v42, %s11248_s11  ;;  %v6353_v12 = vsel %vm1320_vm5, %v6337_v51, %v10700_v39  ;;  %v6322_v19 = vsel %vm1287_vm4, %v6306_v33, %v10621_v63  ;;  %v20245_v63 = vld [vmem:[#allocation23_spill] sm:$0xff] }
 0x60b   :  { %v5585_v38 = vmax.f32 %v5546_v45, 0.0  ;;  %v18038_v5 = vpop.permute.xlu1 %6197  ;;  %v6369_v14 = vsel %vm1337_vm6, %v6353_v12, %v17769_v27  ;;  %v10545_v45 = vunpack.i.l.bf16 %v17317_v10 }
 0x60d   :  { %v18041_v42 = vpop.permute.xlu2 %6249  ;;  %v18043_v7 = vpop.permute.xlu0 %6195  ;;  %v5601_v48 = vadd.f32 %v9387_v22, %v5585_v38  ;;  %v6291_v0 = vsel %vm49_vm1, %v11207_v60, %v10545_v45  ;;  %v11208_v60 = vld [vmem:[#allocation2 + $0x1cf] sm:$0xff] }
 0x60e   :  { %v5486_v33 = vpop.f32.mrf.mxu2 }
 0x60f   :  { %6501 = vmatmul.f32.gmra.mxu0 %v6369_v14  ;;  %5617 = vst.msk [vmem:[#allocation3 + $0x60] sm:$0xff] %vm49_vm1, %v5601_v48  ;;  %v18079_v14 = vld [vmem:[#allocation2 + $0x348] sm:$0xff] }
 0x610   :  { %v5548_v18 = vpop.f32.mrf.mxu3  ;;  %10853 = vrot.lane.b32.xlu1 %v17739_v47, %s11248_s11  ;;  %v6338_v47 = vsel %vm279_vm0, %v6322_v19, %v10661_v52  ;;  %v10546_v19 = vunpack.i.h.bf16 %v17317_v10 }
 0x611   :  { %v5549_v39 = vadd.f32 %v5548_v18, %v5483_v44  ;;  %10848 = vrot.lane.b32.xlu0 %v17733_v24, %s11248_s11  ;;  %v6376_v24 = vsel %vm1354_vm8, %v17629_v25, %v17720_v3  ;;  %v6354_v38 = vsel %vm1320_vm5, %v6338_v47, %v10701_v43  ;;  %v18085_v25 = vpack.i.bf16 %v18067_v9, %v18079_v14 }
 0x612   :  { %10858 = vrot.lane.b32.xlu2 %v17787_v35, %s11248_s11  ;;  %v10625_v35 = vunpack.i.l.bf16 %v17492_v28  ;;  %v6370_v48 = vsel %vm1337_vm6, %v6354_v38, %v17632_v34  ;;  %v6307_v3 = vsel %vm1270_vm2, %v6291_v0, %v10585_v62  ;;  %v10705_v43 = vunpack.i.l.bf16 %v20245_v63  ;;  %v9389_v62 = vld [vmem:[%s19713_s0 + $0xc1] sm:$0xff] }
 0x613   :  { %v5586_v29 = vmax.f32 %v5549_v39, 0.0  ;;  %v6236_v22 = vpop.permute.xlu1 %6235  ;;  %v20246_v39 = vld [vmem:[#allocation33_spill] sm:$0xff]  ;;  %v6292_v0 = vsel %vm49_vm1, %v11208_v60, %v10546_v19 }
 0x614   :  { %v6323_v52 = vsel %vm1287_vm4, %v6307_v3, %v10625_v35  ;;  %v10665_v45 = vunpack.i.l.bf16 %v20246_v39  ;;  %v20249_v19 = vld [vmem:[#allocation13_spill] sm:$0xff] }
 0x615   :  { %v18073_v15 = vpop.permute.xlu2 %6255  ;;  %v6234_v44 = vpop.permute.xlu0 %6233  ;;  %v5602_v51 = vadd.f32 %v9388_v37, %v5586_v29  ;;  %v10586_v29 = vunpack.i.h.bf16 %v17417_v41 }
 0x616   :  { %v6392_v12 = vsel %vm1371_vm10, %v6376_v24, %v6234_v44  ;;  %v6339_v24 = vsel %vm279_vm0, %v6323_v52, %v10665_v45  ;;  %v10626_v44 = vunpack.i.h.bf16 %v17492_v28  ;;  %v5489_v52 = vpop.f32.mrf.mxu2 }
 0x617   :  { %6504 = vmatmul.f32.gmra.mxu0 %v6370_v48  ;;  %9392 = vmatmul.msk.f32.gmra.mxu1 %vm1388_vm9, %v6392_v12  ;;  %5618 = vst.msk [vmem:[#allocation3 + $0x68] sm:$0xff] %vm49_vm1, %v5602_v51  ;;  %v6355_v51 = vsel %vm1320_vm5, %v6339_v24, %v10705_v43  ;;  %v6308_v28 = vsel %vm1270_vm2, %v6292_v0, %v10586_v29  ;;  %v20250_v24 = vld [vmem:[#allocation25_spill] sm:$0xff] }
 0x618   :  { %v5551_v18 = vpop.f32.mrf.mxu3  ;;  %10868 = vrot.lane.b32.xlu1 %v18085_v25, %s11248_s11  ;;  %v6371_v41 = vsel %vm1337_vm6, %v6355_v51, %v17820_v57  ;;  %v6324_v3 = vsel %vm1287_vm4, %v6308_v28, %v10626_v44  ;;  %v10630_v44 = vunpack.i.l.bf16 %v20250_v24 }
 0x619   :  { %v5552_v37 = vadd.f32 %v5551_v18, %v5486_v33  ;;  %10863 = vrot.lane.b32.xlu0 %v17782_v11, %s11248_s11  ;;  %v10666_v18 = vunpack.i.h.bf16 %v20246_v39 }
 0x61a   :  { %10873 = vrot.lane.b32.xlu2 %v17834_v32, %s11249_s16  ;;  %v20247_v32 = vld [vmem:[#allocation6_spill] sm:$0xff] }
 0x61b   :  { %v5587_v47 = vmax.f32 %v5552_v37, 0.0  ;;  %v18103_v35 = vpop.permute.xlu1 %6241  ;;  %v6377_v38 = vsel %vm1354_vm8, %v20247_v32, %v17892_v53  ;;  %v20248_v53 = vld [vmem:[#allocation7_spill] sm:$0xff] }
 0x61c   :  { %v6393_v12 = vsel %vm1371_vm10, %v6377_v38, %v6236_v22  ;;  %v10550_v33 = vunpack.i.l.bf16 %v20248_v53  ;;  %v10706_v22 = vunpack.i.h.bf16 %v20245_v63  ;;  %v9390_v37 = vld [vmem:[%s19713_s0 + $0xc9] sm:$0xff]  ;;  %v10590_v63 = vunpack.i.l.bf16 %v20249_v19 }
 0x61d   :  { %v18110_v11 = vpop.permute.xlu2 %6261  ;;  %v6240_v10 = vpop.permute.xlu0 %6239  ;;  %v5603_v48 = vadd.f32 %v9389_v62, %v5587_v47  ;;  %v11209_v47 = vld [vmem:[#allocation2 + $0x1e7] sm:$0xff]  ;;  %v10551_v28 = vunpack.i.h.bf16 %v20248_v53 }
 0x61e   :  { %v6293_v39 = vsel %vm49_vm1, %v11209_v47, %v10550_v33  ;;  %v10591_v47 = vunpack.i.h.bf16 %v20249_v19 }
 0x61f   :  { %6507 = vmatmul.f32.gmra.mxu0 %v6371_v41  ;;  %9393 = vmatmul.msk.f32.gmra.mxu1 %vm1388_vm9, %v6393_v12  ;;  %5619 = vst.msk [vmem:[#allocation3 + $0x70] sm:$0xff] %vm49_vm1, %v5603_v48  ;;  %v20252_v12 = vld [vmem:[#allocation18_spill] sm:$0xff] }
 0x620   :  { %v5554_v43 = vpop.f32.mrf.mxu3  ;;  %10883 = vrot.lane.b32.xlu1 %v17832_v21, %s11249_s16  ;;  %v6340_v21 = vsel %vm279_vm0, %v6324_v3, %v10666_v18  ;;  %v10670_v48 = vunpack.i.l.bf16 %v20252_v12  ;;  %v20253_v3 = vld [vmem:[#allocation29_spill] sm:$0xff]  ;;  %v10631_v18 = vunpack.i.h.bf16 %v20250_v24 }
 0x621   :  { %v5555_v45 = vadd.f32 %v5554_v43, %v5489_v52  ;;  %10878 = vrot.lane.b32.xlu0 %v17829_v58, %s11249_s16  ;;  %v6356_v51 = vsel %vm1320_vm5, %v6340_v21, %v10706_v22  ;;  %v10710_v22 = vunpack.i.l.bf16 %v20253_v3  ;;  %v11210_v43 = vld [vmem:[#allocation2 + $0x1ef] sm:$0xff]  ;;  %v10711_v19 = vunpack.i.h.bf16 %v20253_v3 }
 0x622   :  { %10888 = vrot.lane.b32.xlu2 %v17869_v55, %s11249_s16  ;;  %v20251_v55 = vld [vmem:[#allocation31_spill] sm:$0xff]  ;;  %v6372_v0 = vsel %vm1337_vm6, %v6356_v51, %v17814_v56  ;;  %v6294_v53 = vsel %vm49_vm1, %v11210_v43, %v10551_v28  ;;  %v18179_v21 = vld [vmem:[#allocation2 + $0x351] sm:$0xff] }
 0x623   :  { %v5588_v62 = vmax.f32 %v5555_v45, 0.0  ;;  %v18134_v29 = vpop.permute.xlu1 %6247  ;;  %v6378_v58 = vsel %vm1354_vm8, %v20251_v55, %v17886_v8  ;;  %v6309_v8 = vsel %vm1270_vm2, %v6293_v39, %v10590_v63  ;;  %v20254_v45 = vld [vmem:[#allocation14_spill] sm:$0xff]  ;;  %v10671_v39 = vunpack.i.h.bf16 %v20252_v12  ;;  %v20258_v28 = vld [vmem:[#allocation20_spill] sm:$0xff] }
 0x624   :  { %v6394_v41 = vsel %vm1371_vm10, %v6378_v58, %v17973_v4  ;;  %v6325_v33 = vsel %vm1287_vm4, %v6309_v8, %v10630_v44  ;;  %v20256_v44 = vld [vmem:[#allocation15_spill] sm:$0xff]  ;;  %v6310_v58 = vsel %vm1270_vm2, %v6294_v53, %v10591_v47  ;;  %v20264_v47 = vld [vmem:[#allocation36_spill] sm:$0xff] }
 0x625   :  { %v18142_v32 = vpop.permute.xlu2 %10723  ;;  %v18144_v38 = vpop.permute.xlu0 %6245  ;;  %v5604_v60 = vadd.f32 %v9390_v37, %v5588_v62  ;;  %v6341_v4 = vsel %vm279_vm0, %v6325_v33, %v10670_v48  ;;  %v20255_v37 = vld [vmem:[#allocation27_spill] sm:$0xff]  ;;  %v6326_v48 = vsel %vm1287_vm4, %v6310_v58, %v10631_v18 }
 0x626   :  { %v18177_v62 = vld [vmem:[#allocation2 + $0x349] sm:$0xff] }
 0x627   :  { %6510 = vmatmul.f32.gmra.mxu0 %v6372_v0  ;;  %9394 = vmatmul.msk.f32.gmra.mxu1 %vm1388_vm9, %v6394_v41  ;;  %5620 = vst.msk [vmem:[#allocation3 + $0x78] sm:$0xff] %vm49_vm1, %v5604_v60  ;;  %v18190_v51 = vpack.i.bf16 %v18179_v21, %v18177_v62  ;;  %v20257_v41 = vld [vmem:[#allocation28_spill] sm:$0xff] }
 0x628   :  { %10898 = vrot.lane.b32.xlu1 %v17867_v6, %s11249_s16  ;;  %v6379_v6 = vsel %vm1354_vm8, %v20255_v37, %v20254_v45  ;;  %v6380_v60 = vsel %vm1354_vm8, %v20257_v41, %v17931_v61  ;;  %v20263_v45 = vld [vmem:[#allocation19_spill] sm:$0xff] }
 0x629   :  { %10893 = vrot.lane.b32.xlu0 %v17863_v17, %s11249_s16  ;;  %v6357_v17 = vsel %vm1320_vm5, %v6341_v4, %v10710_v22  ;;  %v6395_v24 = vsel %vm1371_vm10, %v6379_v6, %v6240_v10  ;;  %v6342_v10 = vsel %vm279_vm0, %v6326_v48, %v10671_v39  ;;  %v6383_v37 = vsel %vm1354_vm8, %v17603_v31, %v20263_v45  ;;  %v20265_v39 = vld [vmem:[#allocation9_spill] sm:$0xff]  ;;  %v18290_v41 = vld [vmem:[#allocation2 + $0x367] sm:$0xff] }
 0x62a   :  { %10903 = vrot.lane.b32.xlu2 %v17906_v36, %s11249_s16  ;;  %v6373_v55 = vsel %vm1337_vm6, %v6357_v17, %v20256_v44  ;;  %v6399_v17 = vsel %vm1371_vm10, %v6383_v37, %v18134_v29  ;;  %v20267_v31 = vld [vmem:[#allocation21_spill] sm:$0xff] }
 0x62b   :  { %v18165_v52 = vpop.permute.xlu1 %6253  ;;  %v6384_v58 = vsel %vm1354_vm8, %v17776_v46, %v20267_v31  ;;  %v7467_v37 = vld [vmem:[%s19717_s4 + $0x78] sm:$0xff]  ;;  %v7465_v31 = vld [vmem:[%s19717_s4 + $0x68] sm:$0xff] }
 0x62c   :  { %7484 = vmatpush.msra.mxu2 %v7467_v37  ;;  %8513 = vmatpush.msra.mxu0 %v7467_v37 }
 0x62d   :  { %v18172_v63 = vpop.permute.xlu2 %10738  ;;  %v18174_v36 = vpop.permute.xlu0 %6251 }
 0x62f   :  { %6513 = vmatmul.f32.gmra.mxu0 %v6373_v55  ;;  %9395 = vmatmul.msk.f32.gmra.mxu1 %vm1388_vm9, %v6395_v24  ;;  %v20266_v24 = vld [vmem:[#allocation37_spill] sm:$0xff] }
 0x630   :  { %7132 = vrot.lane.b32.xlu1 %v17900_v30, %s11250_s22  ;;  %v6358_v30 = vsel %vm1320_vm5, %v6342_v10, %v10711_v19  ;;  %v6400_v10 = vsel %vm1371_vm10, %v6384_v58, %v18041_v42  ;;  %v18288_v19 = vld [vmem:[#allocation2 + $0x36f] sm:$0xff]  ;;  %v20275_v58 = vld [vmem:[#allocation22_spill] sm:$0xff] }
 0x631   :  { %10908 = vrot.lane.b32.xlu0 %v18190_v51, %s11249_s16  ;;  %v6374_v33 = vsel %vm1337_vm6, %v6358_v30, %v20258_v28  ;;  %v20270_v30 = vld [vmem:[#allocation39_spill] sm:$0xff] }
 0x632   :  { %7134 = vrot.lane.b32.xlu2 %v17895_v1, %s11250_s22  ;;  %v6396_v1 = vsel %vm1371_vm10, %v6380_v60, %v18103_v35  ;;  %v6381_v35 = vsel %vm1354_vm8, %v17722_v20, %v17921_v13  ;;  %v20261_v20 = vld [vmem:[#allocation41_spill] sm:$0xff]  ;;  %v20262_v13 = vld [vmem:[#allocation32_spill] sm:$0xff]  ;;  %v20269_v60 = vld [vmem:[#allocation34_spill] sm:$0xff]  ;;  %v6385_v42 = vsel %vm1354_vm8, %v17769_v27, %v20270_v30 }
 0x633   :  { %v18201_v12 = vpop.permute.xlu1 %6259  ;;  %v6397_v22 = vsel %vm1371_vm10, %v6381_v35, %v18013_v16  ;;  %v6401_v35 = vsel %vm1371_vm10, %v6385_v42, %v18174_v36  ;;  %v20274_v27 = vld [vmem:[#allocation12_spill] sm:$0xff] }
 0x635   :  { %v18206_v0 = vpop.permute.xlu2 %10753  ;;  %v18208_v8 = vpop.permute.xlu0 %6257 }
 0x637   :  { %6516 = vmatmul.f32.gmra.mxu0 %v6374_v33  ;;  %9396 = vmatmul.msk.f32.gmra.mxu1 %vm1388_vm9, %v6396_v1 }
 0x638   :  { %7138 = vrot.lane.b32.xlu1 %v17936_v23, %s11250_s22  ;;  %v20259_v23 = vld [vmem:[#allocation30_spill] sm:$0xff] }
 0x639   :  { %7136 = vrot.lane.b32.xlu0 %v17947_v49, %s11250_s22  ;;  %v6382_v49 = vsel %vm1354_vm8, %v20262_v13, %v20261_v20  ;;  %v20273_v20 = vld [vmem:[#allocation11_spill] sm:$0xff] }
 0x63a   :  { %7140 = vrot.lane.b32.xlu2 %v17942_v54, %s11250_s22  ;;  %v6398_v53 = vsel %vm1371_vm10, %v6382_v49, %v18144_v38  ;;  %v6386_v49 = vsel %vm1354_vm8, %v17632_v34, %v20274_v27  ;;  %v6770_v34 = vld [vmem:[#allocation2 + $0x2e8] sm:$0xff]  ;;  %v6771_v27 = vld [vmem:[#allocation2 + $0x2f0] sm:$0xff] }
 0x63b   :  { %v18222_v61 = vpop.permute.xlu1 %10718  ;;  %v6402_v45 = vsel %vm1371_vm10, %v6386_v49, %v18165_v52 }
 0x63d   :  { %v18227_v4 = vpop.permute.xlu2 %10768  ;;  %v18229_v3 = vpop.permute.xlu0 %10713 }
 0x63f   :  { %9397 = vmatmul.msk.f32.gmra.mxu1 %vm1388_vm9, %v6397_v22  ;;  %v6765_v22 = vld [vmem:[#allocation2 + $0x290] sm:$0xff] }
 0x640   :  { %7144 = vrot.lane.b32.xlu1 %v17945_v50, %s11250_s22 }
 0x641   :  { %7142 = vrot.lane.b32.xlu0 %v20259_v23, %s11250_s22  ;;  %v20272_v23 = vld [vmem:[#allocation38_spill] sm:$0xff] }
 0x642   :  { %7146 = vrot.lane.b32.xlu2 %v17934_v59, %s11250_s22 }
 0x643   :  { %v18240_v54 = vpop.permute.xlu1 %10733 }
 0x644   :  { %20260 = vst [vmem:[#allocation8_spill] sm:$0xff] %v18240_v54  ;;  %v6791_v54 = vld [vmem:[#allocation2 + $0x331] sm:$0xff] }
 0x645   :  { %v18245_v43 = vpop.permute.xlu2 %10783  ;;  %v18247_v16 = vpop.permute.xlu0 %10728 }
 0x647   :  { %9398 = vmatmul.msk.f32.gmra.mxu1 %vm1388_vm9, %v6398_v53 }
 0x648   :  { %7150 = vrot.lane.b32.xlu1 %v17980_v26, %s11250_s22 }
 0x649   :  { %7148 = vrot.lane.b32.xlu0 %v17990_v2, %s11250_s22 }
 0x64a   :  { %7152 = vrot.lane.b32.xlu2 %v17986_v40, %s11250_s22 }
 0x64b   :  { %v18258_v18 = vpop.permute.xlu1 %10748 }
 0x64d   :  { %v18263_v6 = vpop.permute.xlu2 %10798  ;;  %v18265_v38 = vpop.permute.xlu0 %10743 }
 0x64f   :  { %9399 = vmatmul.msk.f32.gmra.mxu1 %vm1388_vm9, %v6399_v17  ;;  %v6769_v17 = vld [vmem:[#allocation2 + $0x2d0] sm:$0xff] }
 0x650   :  { %7156 = vrot.lane.b32.xlu1 %v20264_v47, %s11250_s22  ;;  %v7466_v47 = vld [vmem:[%s19717_s4 + $0x70] sm:$0xff] }
 0x651   :  { %7154 = vrot.lane.b32.xlu0 %v20266_v24, %s11250_s22  ;;  %7485 = vmatpush.msra.mxu2 %v7466_v47 }
 0x652   :  { %7158 = vrot.lane.b32.xlu2 %v20265_v39, %s11250_s22  ;;  %v6768_v39 = vld [vmem:[#allocation2 + $0x2c8] sm:$0xff] }
 0x653   :  { %v18276_v55 = vpop.permute.xlu1 %10763  ;;  %7486 = vmatpush.msra.mxu2 %v7465_v31  ;;  %v9407_v31 = vld [vmem:[%s19713_s0 + $0xd9] sm:$0xff] }
 0x655   :  { %v18281_v48 = vpop.permute.xlu2 %10813  ;;  %v18283_v29 = vpop.permute.xlu0 %10758 }
 0x656   :  { %20268 = vst [vmem:[#allocation35_spill] sm:$0xff] %v18281_v48 }
 0x657   :  { %9400 = vmatmul.msk.f32.gmra.mxu1 %vm1388_vm9, %v6400_v10  ;;  %v6387_v10 = vsel %vm1354_vm8, %v17820_v57, %v20275_v58  ;;  %v7463_v57 = vld [vmem:[%s19717_s4 + $0x58] sm:$0xff] }
 0x658   :  { %7162 = vrot.lane.b32.xlu1 %v18288_v19, %s11250_s22  ;;  %v6403_v42 = vsel %vm1371_vm10, %v6387_v10, %v18073_v15  ;;  %v7462_v15 = vld [vmem:[%s19717_s4 + $0x50] sm:$0xff] }
 0x659   :  { %7160 = vrot.lane.b32.xlu0 %v18290_v41, %s11250_s22 }
 0x65a   :  { %7196 = vrot.lane.b32.xlu2 %v20269_v60, %s11251_s20 }
 0x65b   :  { %v18298_v46 = vpop.permute.xlu1 %10778 }
 0x65d   :  { %v18303_v1 = vpop.permute.xlu2 %10828  ;;  %v18305_v33 = vpop.permute.xlu0 %10773 }
 0x65e   :  { %20271 = vst [vmem:[#allocation17_spill] sm:$0xff] %v18305_v33 }
 0x65f   :  { %9401 = vmatmul.msk.f32.gmra.mxu1 %vm1388_vm9, %v6401_v35  ;;  %v6472_v35 = vpop.f32.mrf.mxu0 }
 0x660   :  { %7200 = vrot.lane.b32.xlu1 %v20272_v23, %s11251_s20  ;;  %v6772_v23 = vld [vmem:[#allocation2 + $0x308] sm:$0xff] }
 0x661   :  { %7198 = vrot.lane.b32.xlu0 %v6765_v22, %s11251_s20  ;;  %v7464_v22 = vld [vmem:[%s19717_s4 + $0x60] sm:$0xff] }
 0x662   :  { %7202 = vrot.lane.b32.xlu2 %v20273_v20, %s11251_s20  ;;  %7487 = vmatpush.msra.mxu2 %v7464_v22  ;;  %v6773_v20 = vld [vmem:[#allocation2 + $0x310] sm:$0xff]  ;;  %v6774_v22 = vld [vmem:[#allocation2 + $0x328] sm:$0xff] }
 0x663   :  { %v18315_v13 = vpop.permute.xlu1 %10793 }
 0x664   :  { %7488 = vmatpush.msra.mxu2 %v7463_v57  ;;  %v6389_v57 = vsel %vm1354_vm8, %v20256_v44, %v18043_v7  ;;  %v7458_v7 = vld [vmem:[%s19717_s4 + $0x30] sm:$0xff] }
 0x665   :  { %v18320_v53 = vpop.permute.xlu2 %10843  ;;  %v18322_v36 = vpop.permute.xlu0 %10788  ;;  %v18411_v44 = vld [vmem:[#allocation2 + $0x370] sm:$0xff] }
 0x666   :  { %7489 = vmatpush.msra.mxu2 %v7462_v15  ;;  %v6405_v15 = vsel %vm1371_vm10, %v6389_v57, %v18201_v12  ;;  %v7457_v12 = vld [vmem:[%s19717_s4 + $0x28] sm:$0xff] }
 0x667   :  { %9402 = vmatmul.msk.f32.gmra.mxu1 %vm1388_vm9, %v6402_v45  ;;  %v20276_v45 = vld [vmem:[#allocation42_spill] sm:$0xff]  ;;  %v7453_v57 = vld [vmem:[%s19717_s4 + $0x8] sm:$0xff] }
 0x668   :  { %7206 = vrot.lane.b32.xlu1 %v6769_v17, %s11251_s20  ;;  %v6388_v37 = vsel %vm1354_vm8, %v17814_v56, %v20276_v45  ;;  %v6775_v56 = vld [vmem:[#allocation2 + $0x330] sm:$0xff]  ;;  %v18406_v45 = vld [vmem:[#allocation2 + $0x368] sm:$0xff] }
 0x669   :  { %7204 = vrot.lane.b32.xlu0 %v6768_v39, %s11251_s20  ;;  %v6404_v39 = vsel %vm1371_vm10, %v6388_v37, %v18208_v8  ;;  %v7461_v8 = vld [vmem:[%s19717_s4 + $0x48] sm:$0xff] }
 0x66a   :  { %7208 = vrot.lane.b32.xlu2 %v6770_v34, %s11251_s20  ;;  %7490 = vmatpush.msra.mxu2 %v7461_v8  ;;  %v6780_v8 = vld [vmem:[#allocation2 + $0x289] sm:$0xff] }
 0x66b   :  { %v18336_v52 = vpop.permute.xlu1 %10808 }
 0x66d   :  { %v18344_v60 = vpop.permute.xlu2 %10858  ;;  %v18346_v30 = vpop.permute.xlu0 %10803 }
 0x66f   :  { %9403 = vmatmul.msk.f32.gmra.mxu1 %vm1388_vm9, %v6403_v42  ;;  %v18378_v42 = vpop.f32.mrf.mxu0 }
 0x670   :  { %7212 = vrot.lane.b32.xlu1 %v6772_v23, %s11251_s20  ;;  %v7460_v23 = vld [vmem:[%s19717_s4 + $0x40] sm:$0xff] }
 0x671   :  { %7210 = vrot.lane.b32.xlu0 %v6771_v27, %s11251_s20  ;;  %v7459_v27 = vld [vmem:[%s19717_s4 + $0x38] sm:$0xff]  ;;  %7491 = vmatpush.msra.mxu2 %v7460_v23  ;;  %v10745_v23 = vunpack.i.l.bf16 %v18265_v38 }
 0x672   :  { %7214 = vrot.lane.b32.xlu2 %v6773_v20, %s11251_s20 }
 0x673   :  { %v18375_v58 = vpop.permute.xlu1 %10823  ;;  %7492 = vmatpush.msra.mxu2 %v7459_v27 }
 0x674   :  { %v6537_v49 = vpop.f32.mrf.mxu1 }
 0x675   :  { %v6538_v17 = vadd.f32 %v6537_v49, %v6472_v35  ;;  %v18366_v47 = vpop.permute.xlu2 %10873  ;;  %v18368_v34 = vpop.permute.xlu0 %10818  ;;  %7493 = vmatpush.msra.mxu2 %v7458_v7 }
 0x677   :  { %v6601_v10 = vmax.f32 %v6538_v17, 0.0  ;;  %9404 = vmatmul.msk.f32.gmra.mxu1 %vm1388_vm9, %v6404_v39  ;;  %v18415_v37 = vpop.f32.mrf.mxu0  ;;  %v7456_v17 = vld [vmem:[%s19717_s4 + $0x20] sm:$0xff]  ;;  %v6390_v39 = vsel %vm1354_vm8, %v20258_v28, %v18038_v5  ;;  %7494 = vmatpush.msra.mxu2 %v7457_v12  ;;  %v7454_v5 = vld [vmem:[%s19717_s4 + $0x10] sm:$0xff] }
 0x678   :  { %7218 = vrot.lane.b32.xlu1 %v6775_v56, %s11251_s20  ;;  %v6782_v28 = vld [vmem:[#allocation2 + $0x2a9] sm:$0xff] }
 0x679   :  { %v6617_v35 = vadd.f32 %v9407_v31, %v6601_v10  ;;  %7216 = vrot.lane.b32.xlu0 %v6774_v22, %s11251_s20  ;;  %7495 = vmatpush.msra.mxu2 %v7456_v17  ;;  %v6781_v22 = vld [vmem:[#allocation2 + $0x291] sm:$0xff]  ;;  %v7320_v17 = vsel %vm49_vm1, %v17990_v2, %v10745_v23 }
 0x67a   :  { %7220 = vrot.lane.b32.xlu2 %v18079_v14, %s11251_s20  ;;  %v6783_v2 = vld [vmem:[#allocation2 + $0x2b1] sm:$0xff] }
 0x67b   :  { %6634 = vst.msk [vmem:[#allocation3 + $0x80] sm:$0xff] %vm49_vm1, %v6617_v35  ;;  %v18403_v49 = vpop.permute.xlu1 %10838  ;;  %v7455_v35 = vld [vmem:[%s19717_s4 + $0x18] sm:$0xff] }
 0x67c   :  { %7496 = vmatpush.msra.mxu2 %v7455_v35 }
 0x67d   :  { %v18394_v20 = vpop.permute.xlu2 %10888  ;;  %v18396_v14 = vpop.permute.xlu0 %10833 }
 0x67e   :  { %7497 = vmatpush.msra.mxu2 %v7454_v5  ;;  %v10785_v5 = vunpack.i.l.bf16 %v18245_v43 }
 0x67f   :  { %9405 = vmatmul.msk.f32.gmra.mxu1 %vm1388_vm9, %v6405_v15  ;;  %v18451_v27 = vpop.f32.mrf.mxu0  ;;  %v7452_v15 = vld [vmem:[%s19717_s4] sm:$0xff] }
 0x680   :  { %7224 = vrot.lane.b32.xlu1 %v18406_v45, %s11251_s20  ;;  %7498 = vmatpush.msra.mxu2 %v7453_v57  ;;  %v6784_v57 = vld [vmem:[#allocation2 + $0x2c9] sm:$0xff]  ;;  %v7336_v48 = vsel %vm1270_vm2, %v7320_v17, %v10785_v5 }
 0x681   :  { %7222 = vrot.lane.b32.xlu0 %v18067_v9, %s11251_s20  ;;  %v6406_v9 = vsel %vm1371_vm10, %v6390_v39, %v18110_v11  ;;  %v10746_v11 = vunpack.i.h.bf16 %v18265_v38  ;;  %v10826_v39 = vunpack.i.h.bf16 %v18375_v58 }
 0x682   :  { %7226 = vrot.lane.b32.xlu2 %v18411_v44, %s11251_s20  ;;  %7499 = vmatpush.msra.mxu2 %v7452_v15 }
 0x683   :  { %v18434_v56 = vpop.permute.xlu1 %10853  ;;  %v7321_v38 = vsel %vm49_vm1, %v17980_v26, %v10746_v11  ;;  %v6785_v11 = vld [vmem:[#allocation2 + $0x2d1] sm:$0xff] }
 0x684   :  { %20277 = vst [vmem:[#allocation40_spill] sm:$0xff] %v18434_v56 }
 0x685   :  { %v10904_v31 = vpop.permute.xlu2 %10903  ;;  %v18430_v10 = vpop.permute.xlu0 %10848 }
 0x686   :  { %v10906_v56 = vunpack.i.h.bf16 %v10904_v31  ;;  %v10905_v33 = vunpack.i.l.bf16 %v10904_v31 }
 0x687   :  { %9406 = vmatmul.msk.f32.gmra.mxu1 %vm1388_vm9, %v6406_v9  ;;  %v10825_v9 = vunpack.i.l.bf16 %v18375_v58 }
 0x688   :  { %7262 = vrot.lane.b32.xlu1 %v6781_v22, %s11252_s25  ;;  %v10786_v22 = vunpack.i.h.bf16 %v18245_v43 }
 0x689   :  { %7260 = vrot.lane.b32.xlu0 %v6780_v8, %s11252_s25  ;;  %v7352_v23 = vsel %vm1287_vm4, %v7336_v48, %v10825_v9  ;;  %v18488_v9 = vpop.f32.mrf.mxu0 }
 0x68a   :  { %7264 = vrot.lane.b32.xlu2 %v6782_v28, %s11252_s25  ;;  %v7337_v26 = vsel %vm1270_vm2, %v7321_v38, %v10786_v22  ;;  %v9408_v22 = vld [vmem:[%s19713_s0 + $0xe1] sm:$0xff] }
 0x68b   :  { %v18464_v35 = vpop.permute.xlu1 %10868  ;;  %v7353_v58 = vsel %vm1287_vm4, %v7337_v26, %v10826_v39  ;;  %v10780_v26 = vunpack.i.l.bf16 %v18298_v46 }
 0x68d   :  { %v18456_v7 = vpop.permute.xlu2 %7134  ;;  %v10864_v12 = vpop.permute.xlu0 %10863 }
 0x68e   :  { %v10866_v28 = vunpack.i.h.bf16 %v10864_v12  ;;  %v10865_v8 = vunpack.i.l.bf16 %v10864_v12 }
 0x690   :  { %7268 = vrot.lane.b32.xlu1 %v6784_v57, %s11252_s25  ;;  %v7368_v43 = vsel %vm279_vm0, %v7352_v23, %v10865_v8  ;;  %v7369_v15 = vsel %vm279_vm0, %v7353_v58, %v10866_v28  ;;  %v6787_v8 = vld [vmem:[#allocation2 + $0x2f1] sm:$0xff]  ;;  %v10781_v57 = vunpack.i.h.bf16 %v18298_v46  ;;  %v6786_v58 = vld [vmem:[#allocation2 + $0x2e9] sm:$0xff] }
 0x691   :  { %7266 = vrot.lane.b32.xlu0 %v6783_v2, %s11252_s25  ;;  %v18478_v38 = vsel %vm1320_vm5, %v7368_v43, %v10905_v33  ;;  %v18481_v17 = vsel %vm1320_vm5, %v7369_v15, %v10906_v56  ;;  %v10741_v33 = vunpack.i.h.bf16 %v18172_v63  ;;  %v10740_v56 = vunpack.i.l.bf16 %v18172_v63  ;;  %v6788_v2 = vld [vmem:[#allocation2 + $0x309] sm:$0xff] }
 0x692   :  { %7270 = vrot.lane.b32.xlu2 %v6785_v11, %s11252_s25  ;;  %20278 = vst [vmem:[#allocation10_spill] sm:$0xff] %v18481_v17  ;;  %v6651_v23 = vld [vmem:[#allocation2 + $0x247] sm:$0xff]  ;;  %v10821_v43 = vunpack.i.h.bf16 %v18368_v34  ;;  %v10820_v15 = vunpack.i.l.bf16 %v18368_v34  ;;  %v18530_v17 = vpop.f32.mrf.mxu0 }
 0x693   :  { %v18493_v5 = vpop.permute.xlu1 %10883  ;;  %v7319_v63 = vsel %vm49_vm1, %v17934_v59, %v10741_v33  ;;  %v7318_v46 = vsel %vm49_vm1, %v17945_v50, %v10740_v56  ;;  %v10751_v50 = vunpack.i.h.bf16 %v18258_v18  ;;  %v10795_v33 = vunpack.i.l.bf16 %v18315_v13 }
 0x694   :  { %v6540_v12 = vpop.f32.mrf.mxu1 }
 0x695   :  { %v6541_v39 = vadd.f32 %v6540_v12, %v18378_v42  ;;  %v18484_v48 = vpop.permute.xlu2 %7140  ;;  %v18486_v31 = vpop.permute.xlu0 %10878  ;;  %v10715_v42 = vunpack.i.l.bf16 %v18229_v3  ;;  %v10755_v12 = vunpack.i.l.bf16 %v18206_v0 }
 0x696   :  { %20279 = vst [vmem:[#allocation24_spill] sm:$0xff] %v18484_v48 }
 0x697   :  { %v6602_v28 = vmax.f32 %v6541_v39, 0.0  ;;  %v10716_v39 = vunpack.i.h.bf16 %v18229_v3  ;;  %v7308_v34 = vsel %vm49_vm1, %v6651_v23, %v10715_v42  ;;  %v9409_v42 = vld [vmem:[%s19713_s0 + $0xf1] sm:$0xff] }
 0x698   :  { %7274 = vrot.lane.b32.xlu1 %v6787_v8, %s11252_s25  ;;  %v7335_v8 = vsel %vm1270_vm2, %v7319_v63, %v10781_v57 }
 0x699   :  { %v6618_v11 = vadd.f32 %v9408_v22, %v6602_v28  ;;  %7272 = vrot.lane.b32.xlu0 %v6786_v58, %s11252_s25  ;;  %v6652_v28 = vld [vmem:[#allocation2 + $0x24f] sm:$0xff]  ;;  %v7351_v56 = vsel %vm1287_vm4, %v7335_v8, %v10821_v43  ;;  %v10860_v43 = vunpack.i.l.bf16 %v18344_v60 }
 0x69a   :  { %7276 = vrot.lane.b32.xlu2 %v6788_v2, %s11252_s25  ;;  %v7334_v2 = vsel %vm1270_vm2, %v7318_v46, %v10780_v26  ;;  %v10835_v26 = vunpack.i.l.bf16 %v18396_v14  ;;  %v7309_v46 = vsel %vm49_vm1, %v6652_v28, %v10716_v39  ;;  %v6790_v8 = vld [vmem:[#allocation2 + $0x329] sm:$0xff] }
 0x69b   :  { %6635 = vst.msk [vmem:[#allocation3 + $0x88] sm:$0xff] %vm49_vm1, %v6618_v11  ;;  %v7350_v3 = vsel %vm1287_vm4, %v7334_v2, %v10820_v15  ;;  %v10899_v57 = vpop.permute.xlu1 %10898  ;;  %v10861_v15 = vunpack.i.h.bf16 %v18344_v60  ;;  %v10791_v2 = vunpack.i.h.bf16 %v18322_v36 }
 0x69c   :  { %v6543_v22 = vpop.f32.mrf.mxu1  ;;  %v10901_v23 = vunpack.i.h.bf16 %v10899_v57  ;;  %v10900_v63 = vunpack.i.l.bf16 %v10899_v57  ;;  %v6789_v57 = vld [vmem:[#allocation2 + $0x311] sm:$0xff]  ;;  %v7366_v60 = vsel %vm279_vm0, %v7350_v3, %v10860_v43  ;;  %v10875_v3 = vunpack.i.l.bf16 %v18366_v47 }
 0x69d   :  { %v6544_v11 = vadd.f32 %v6543_v22, %v18415_v37  ;;  %v18516_v58 = vpop.permute.xlu2 %7146  ;;  %v18518_v59 = vpop.permute.xlu0 %10893  ;;  %v10750_v22 = vunpack.i.l.bf16 %v18258_v18  ;;  %v10756_v18 = vunpack.i.h.bf16 %v18206_v0  ;;  %v7367_v28 = vsel %vm279_vm0, %v7351_v56, %v10861_v15 }
 0x69e   :  { %20280 = vst [vmem:[#allocation16_spill] sm:$0xff] %v18516_v58  ;;  %v7324_v58 = vsel %vm1270_vm2, %v7308_v34, %v10755_v12  ;;  %v18549_v34 = vsel %vm1320_vm5, %v7366_v60, %v10900_v63  ;;  %v18552_v0 = vsel %vm1320_vm5, %v7367_v28, %v10901_v23  ;;  %v10871_v63 = vunpack.i.h.bf16 %v18464_v35  ;;  %v18584_v60 = vpop.f32.mrf.mxu0 }
 0x69f   :  { %20281 = vst [vmem:[#allocation26_spill] sm:$0xff] %v18518_v59  ;;  %v6603_v37 = vmax.f32 %v6544_v11, 0.0  ;;  %v10790_v59 = vunpack.i.l.bf16 %v18322_v36  ;;  %v7340_v39 = vsel %vm1287_vm4, %v7324_v58, %v10795_v33  ;;  %v7323_v36 = vsel %vm49_vm1, %v20266_v24, %v10751_v50 }
 0x6a0   :  { %7280 = vrot.lane.b32.xlu1 %v6790_v8, %s11252_s25  ;;  %v7356_v12 = vsel %vm279_vm0, %v7340_v39, %v10835_v26  ;;  %v10831_v58 = vunpack.i.h.bf16 %v18303_v1  ;;  %v10830_v33 = vunpack.i.l.bf16 %v18303_v1  ;;  %v7339_v56 = vsel %vm1270_vm2, %v7323_v36, %v10791_v2 }
 0x6a1   :  { %v6619_v11 = vadd.f32 %v9409_v42, %v6603_v37  ;;  %7278 = vrot.lane.b32.xlu0 %v6789_v57, %s11252_s25  ;;  %v10796_v42 = vunpack.i.h.bf16 %v18315_v13  ;;  %v10870_v1 = vunpack.i.l.bf16 %v18464_v35  ;;  %v7372_v15 = vsel %vm1320_vm5, %v7356_v12, %v10875_v3 }
 0x6a2   :  { %7282 = vrot.lane.b32.xlu2 %v6791_v54, %s11252_s25  ;;  %v7322_v54 = vsel %vm49_vm1, %v17986_v40, %v10750_v22  ;;  %v10836_v40 = vunpack.i.h.bf16 %v18396_v14  ;;  %v9410_v22 = vld [vmem:[%s19713_s0 + $0xf9] sm:$0xff]  ;;  %v7325_v14 = vsel %vm1270_vm2, %v7309_v46, %v10756_v18  ;;  %v7355_v57 = vsel %vm1287_vm4, %v7339_v56, %v10831_v58 }
 0x6a3   :  { %6636 = vst.msk [vmem:[#allocation3 + $0x90] sm:$0xff] %vm49_vm1, %v6619_v11  ;;  %v7338_v50 = vsel %vm1270_vm2, %v7322_v54, %v10790_v59  ;;  %v18571_v59 = vpop.permute.xlu1 %7132  ;;  %v18577_v11 = vld [vmem:[#allocation2 + $0x369] sm:$0xff]  ;;  %v7341_v39 = vsel %vm1287_vm4, %v7325_v14, %v10796_v42  ;;  %v7371_v18 = vsel %vm279_vm0, %v7355_v57, %v10871_v63  ;;  %v10720_v12 = vunpack.i.l.bf16 %v18222_v61 }
 0x6a4   :  { %v6546_v24 = vpop.f32.mrf.mxu1  ;;  %v7388_v8 = vsel %vm1337_vm6, %v7372_v15, %v18571_v59  ;;  %v7354_v35 = vsel %vm1287_vm4, %v7338_v50, %v10830_v33  ;;  %v10876_v54 = vunpack.i.h.bf16 %v18366_v47  ;;  %v9411_v50 = vld [vmem:[%s19713_s0 + $0x109] sm:$0xff]  ;;  %v18623_v15 = vld [vmem:[#allocation2 + $0x371] sm:$0xff]  ;;  %v10761_v14 = vunpack.i.h.bf16 %v18283_v29 }
 0x6a5   :  { %v6547_v26 = vadd.f32 %v6546_v24, %v18451_v27  ;;  %v18563_v37 = vpop.permute.xlu2 %7152  ;;  %v10909_v23 = vpop.permute.xlu0 %10908  ;;  %7500 = vmatmul.f32.vlgmr.msra.gmra.mxu2 %v7388_v8  ;;  %v7370_v46 = vsel %vm279_vm0, %v7354_v35, %v10870_v1  ;;  %v10840_v1 = vunpack.i.l.bf16 %v18403_v49 }
 0x6a6   :  { %v10911_v43 = vunpack.i.h.bf16 %v10909_v23  ;;  %v10910_v27 = vunpack.i.l.bf16 %v10909_v23  ;;  %v11211_v23 = vld [vmem:[#allocation2 + $0x267] sm:$0xff] }
 0x6a7   :  { %v6604_v13 = vmax.f32 %v6547_v26, 0.0 }
 0x6a8   :  { %7286 = vrot.lane.b32.xlu1 %v18179_v21, %s11252_s25  ;;  %v7357_v21 = vsel %vm279_vm0, %v7341_v39, %v10836_v40  ;;  %v18595_v28 = vsel %vm1320_vm5, %v7370_v46, %v10910_v27  ;;  %v18598_v36 = vsel %vm1320_vm5, %v7371_v18, %v10911_v43  ;;  %v7310_v40 = vsel %vm49_vm1, %v11211_v23, %v10720_v12  ;;  %v18647_v46 = vld [vmem:[#allocation2 + $0x3d0] sm:$0xff]  ;;  %v18657_v12 = vld [vmem:[#allocation2 + $0x3a8] sm:$0xff] }
 0x6a9   :  { %v6620_v2 = vadd.f32 %v9410_v22, %v6604_v13  ;;  %7284 = vrot.lane.b32.xlu0 %v18177_v62, %s11252_s25  ;;  %v10760_v62 = vunpack.i.l.bf16 %v18283_v29  ;;  %v7373_v42 = vsel %vm1320_vm5, %v7357_v21, %v10876_v54  ;;  %v10800_v13 = vunpack.i.l.bf16 %v18263_v6  ;;  %20282 = vst [vmem:[#allocation23_spill] sm:$0xff] %v18647_v46  ;;  %v9412_v18 = vld [vmem:[%s19713_s0 + $0x111] sm:$0xff] }
 0x6aa   :  { %7288 = vrot.lane.b32.xlu2 %v18577_v11, %s11252_s25  ;;  %v7389_v47 = vsel %vm1337_vm6, %v7373_v42, %v18456_v7  ;;  %v10880_v43 = vunpack.i.l.bf16 %v18486_v31 }
 0x6ab   :  { %6637 = vst.msk [vmem:[#allocation3 + $0x98] sm:$0xff] %vm49_vm1, %v6620_v2  ;;  %v18611_v56 = vpop.permute.xlu1 %7138  ;;  %v7326_v63 = vsel %vm1270_vm2, %v7310_v40, %v10760_v62  ;;  %v18663_v62 = vld [vmem:[#allocation2 + $0x388] sm:$0xff]  ;;  %v10841_v40 = vunpack.i.h.bf16 %v18403_v49  ;;  %v10805_v49 = vunpack.i.l.bf16 %v18346_v30 }
 0x6ac   :  { %v6549_v58 = vpop.f32.mrf.mxu1  ;;  %v7342_v8 = vsel %vm1287_vm4, %v7326_v63, %v10800_v13  ;;  %v10881_v13 = vunpack.i.h.bf16 %v18486_v31 }
 0x6ad   :  { %v6550_v33 = vadd.f32 %v6549_v58, %v18488_v9  ;;  %v18604_v3 = vpop.permute.xlu2 %7158  ;;  %v18606_v24 = vpop.permute.xlu0 %7136  ;;  %7503 = vmatmul.f32.gmra.mxu2 %v7389_v47  ;;  %v18619_v9 = vpack.i.bf16 %v18411_v44, %v18406_v45  ;;  %v10721_v45 = vunpack.i.h.bf16 %v18222_v61  ;;  %v7358_v39 = vsel %vm279_vm0, %v7342_v8, %v10840_v1  ;;  %v18649_v61 = vld [vmem:[#allocation2 + $0x390] sm:$0xff]  ;;  %v18661_v58 = vld [vmem:[#allocation2 + $0x3c8] sm:$0xff] }
 0x6ae   :  { %v18635_v44 = vpop.f32.mrf.mxu0  ;;  %v7374_v29 = vsel %vm1320_vm5, %v7358_v39, %v10880_v43  ;;  %v18676_v47 = vpack.i.bf16 %v18649_v61, %v18663_v62  ;;  %v10725_v1 = vunpack.i.l.bf16 %v18142_v32  ;;  %v10765_v43 = vunpack.i.l.bf16 %v18276_v55  ;;  %v18693_v8 = vld [vmem:[#allocation2 + $0x410] sm:$0xff] }
 0x6af   :  { %v6605_v26 = vmax.f32 %v6550_v33, 0.0  ;;  %v7390_v54 = vsel %vm1337_vm6, %v7374_v29, %v18606_v24  ;;  %20284 = vst [vmem:[#allocation6_spill] sm:$0xff] %v18693_v8  ;;  %v7711_v39 = vld [vmem:[#allocation2 + $0x430] sm:$0xff]  ;;  %v11213_v29 = vld [vmem:[#allocation2 + $0x287] sm:$0xff] }
 0x6b0   :  { %10913 = vrot.lane.b32.xlu1 %v18085_v25, %s11245_s21  ;;  %v18638_v25 = vld [vmem:[#allocation2 + $0x3b0] sm:$0xff] }
 0x6b1   :  { %v6621_v22 = vadd.f32 %v9411_v50, %v6605_v26  ;;  %7290 = vrot.lane.b32.xlu0 %v18623_v15, %s11252_s25  ;;  %v18667_v33 = vpack.i.bf16 %v18638_v25, %v18657_v12  ;;  %v11212_v50 = vld [vmem:[#allocation2 + $0x26f] sm:$0xff]  ;;  %v18672_v26 = vpack.i.bf16 %v18647_v46, %v18661_v58 }
 0x6b2   :  { %10918 = vrot.lane.b32.xlu2 %v18619_v9, %s11245_s21  ;;  %v7311_v42 = vsel %vm49_vm1, %v11212_v50, %v10721_v45  ;;  %v9413_v50 = vld [vmem:[%s19713_s0 + $0x121] sm:$0xff] }
 0x6b3   :  { %6638 = vst.msk [vmem:[#allocation3 + $0xa0] sm:$0xff] %vm49_vm1, %v6621_v22  ;;  %v18654_v21 = vpop.permute.xlu1 %7144  ;;  %v7327_v23 = vsel %vm1270_vm2, %v7311_v42, %v10761_v14  ;;  %v10801_v22 = vunpack.i.h.bf16 %v18263_v6 }
 0x6b4   :  { %v6552_v27 = vpop.f32.mrf.mxu1  ;;  %20283 = vst [vmem:[#allocation33_spill] sm:$0xff] %v18672_v26 }
 0x6b5   :  { %v6553_v2 = vadd.f32 %v6552_v27, %v18530_v17  ;;  %v18642_v35 = vpop.permute.xlu2 %7196  ;;  %v18644_v57 = vpop.permute.xlu0 %7142  ;;  %7506 = vmatmul.f32.gmra.mxu2 %v7390_v54  ;;  %v7343_v27 = vsel %vm1287_vm4, %v7327_v23, %v10801_v22  ;;  %v18712_v23 = vld [vmem:[#allocation2 + $0x408] sm:$0xff] }
 0x6b6   :  { %v18704_v54 = vpop.f32.mrf.mxu0  ;;  %20286 = vst [vmem:[#allocation13_spill] sm:$0xff] %v18712_v23 }
 0x6b7   :  { %v6606_v17 = vmax.f32 %v6553_v2, 0.0  ;;  %v7359_v2 = vsel %vm279_vm0, %v7343_v27, %v10841_v40  ;;  %v10942_v27 = vpack.i.bf16 %v18693_v8, %v18712_v23  ;;  %v18809_v23 = vld [vmem:[#allocation2 + $0x3e9] sm:$0xff] }
 0x6b8   :  { %10928 = vrot.lane.b32.xlu1 %v18667_v33, %s11245_s21  ;;  %20290 = vst [vmem:[#allocation29_spill] sm:$0xff] %v18809_v23 }
 0x6b9   :  { %v6622_v63 = vadd.f32 %v9412_v18, %v6606_v17  ;;  %10923 = vrot.lane.b32.xlu0 %v18676_v47, %s11245_s21  ;;  %v18701_v18 = vld [vmem:[#allocation2 + $0x3f0] sm:$0xff]  ;;  %v7312_v17 = vsel %vm49_vm1, %v11213_v29, %v10725_v1  ;;  %v18717_v1 = vld [vmem:[#allocation2 + $0x3e8] sm:$0xff] }
 0x6ba   :  { %10933 = vrot.lane.b32.xlu2 %v18672_v26, %s11245_s21  ;;  %20285 = vst [vmem:[#allocation7_spill] sm:$0xff] %v18701_v18  ;;  %v7328_v40 = vsel %vm1270_vm2, %v7312_v17, %v10765_v43  ;;  %v10885_v26 = vunpack.i.l.bf16 %v18493_v5  ;;  %v10845_v43 = vunpack.i.l.bf16 %v18320_v53  ;;  %v7482_v17 = vld [vmem:[%s19717_s4 + $0xf0] sm:$0xff] }
 0x6bb   :  { %6639 = vst.msk [vmem:[#allocation3 + $0xa8] sm:$0xff] %vm49_vm1, %v6622_v63  ;;  %v18709_v42 = vpop.permute.xlu1 %7150  ;;  %v7344_v29 = vsel %vm1287_vm4, %v7328_v40, %v10805_v49 }
 0x6bc   :  { %v6555_v45 = vpop.f32.mrf.mxu1  ;;  %20287 = vst [vmem:[#allocation25_spill] sm:$0xff] %v18717_v1  ;;  %v7360_v49 = vsel %vm279_vm0, %v7344_v29, %v10845_v43  ;;  %v18746_v29 = vld [vmem:[#allocation2 + $0x389] sm:$0xff]  ;;  %v10806_v43 = vunpack.i.h.bf16 %v18346_v30 }
 0x6bd   :  { %v6556_v6 = vadd.f32 %v6555_v45, %v18584_v60  ;;  %v18696_v31 = vpop.permute.xlu2 %7202  ;;  %v18698_v14 = vpop.permute.xlu0 %7148  ;;  %v7375_v60 = vsel %vm1320_vm5, %v7359_v2, %v10881_v13  ;;  %v7710_v45 = vld [vmem:[#allocation2 + $0x428] sm:$0xff]  ;;  %v18725_v2 = vpack.i.bf16 %v18701_v18, %v18717_v1  ;;  %v7376_v40 = vsel %vm1320_vm5, %v7360_v49, %v10885_v26  ;;  %v7479_v18 = vld [vmem:[%s19717_s4 + $0xd8] sm:$0xff] }
 0x6be   :  { %v7391_v22 = vsel %vm1337_vm6, %v7375_v60, %v18611_v56  ;;  %v10947_v13 = vpack.i.bf16 %v7711_v39, %v7710_v45  ;;  %v7483_v39 = vld [vmem:[%s19717_s4 + $0xf8] sm:$0xff]  ;;  %v18764_v49 = vpack.i.bf16 %v18623_v15, %v18577_v11  ;;  %v11214_v30 = vld [vmem:[#allocation2 + $0x28f] sm:$0xff] }
 0x6bf   :  { %v6607_v63 = vmax.f32 %v6556_v6, 0.0  ;;  %7509 = vmatmul.f32.gmra.mxu2 %v7391_v22  ;;  %20288 = vst [vmem:[#allocation31_spill] sm:$0xff] %v18725_v2  ;;  %7549 = vmatpush.msra.mxu3 %v7483_v39 }
 0x6c0   :  { %10943 = vrot.lane.b32.xlu1 %v10942_v27, %s11245_s21  ;;  %8578 = vmatpush.msra.mxu1 %v7483_v39 }
 0x6c1   :  { %v6623_v6 = vadd.f32 %v9413_v50, %v6607_v63  ;;  %10938 = vrot.lane.b32.xlu0 %v18725_v2, %s11245_s21  ;;  %v10726_v50 = vunpack.i.h.bf16 %v18142_v32  ;;  %v10766_v63 = vunpack.i.h.bf16 %v18276_v55  ;;  %v9414_v32 = vld [vmem:[%s19713_s0 + $0x129] sm:$0xff]  ;;  %7550 = vmatpush.msra.mxu3 %v7482_v17  ;;  %v18811_v2 = vld [vmem:[#allocation2 + $0x3f1] sm:$0xff] }
 0x6c2   :  { %10948 = vrot.lane.b32.xlu2 %v10947_v13, %s11245_s21  ;;  %v18748_v13 = vld [vmem:[#allocation2 + $0x391] sm:$0xff]  ;;  %8579 = vmatpush.msra.mxu1 %v7482_v17  ;;  %v10730_v17 = vunpack.i.l.bf16 %v18247_v16  ;;  %20291 = vst [vmem:[#allocation14_spill] sm:$0xff] %v18811_v2 }
 0x6c3   :  { %6640 = vst.msk [vmem:[#allocation3 + $0xb0] sm:$0xff] %vm49_vm1, %v6623_v6  ;;  %v18758_v55 = vpop.permute.xlu1 %7156  ;;  %v7392_v6 = vsel %vm1337_vm6, %v7376_v40, %v18484_v48  ;;  %v7313_v39 = vsel %vm49_vm1, %v11214_v30, %v10726_v50  ;;  %v10886_v50 = vunpack.i.h.bf16 %v18493_v5  ;;  %v10846_v40 = vunpack.i.h.bf16 %v18320_v53  ;;  %v7480_v5 = vld [vmem:[%s19717_s4 + $0xe0] sm:$0xff] }
 0x6c4   :  { %v6558_v60 = vpop.f32.mrf.mxu1  ;;  %v18780_v11 = vsel %vm1337_vm6, %v18478_v38, %v18758_v55  ;;  %v7481_v38 = vld [vmem:[%s19717_s4 + $0xe8] sm:$0xff] }
 0x6c5   :  { %v6559_v22 = vadd.f32 %v6558_v60, %v18635_v44  ;;  %v7209_v45 = vpop.permute.xlu2 %7208  ;;  %v18744_v27 = vpop.permute.xlu0 %7154  ;;  %7551 = vmatpush.msra.mxu3 %v7481_v38  ;;  %8580 = vmatpush.msra.mxu1 %v7481_v38  ;;  %v11215_v53 = vld [vmem:[#allocation2 + $0x2a7] sm:$0xff]  ;;  %v10770_v38 = vunpack.i.l.bf16 %v18227_v4 }
 0x6c6   :  { %v18756_v26 = vsel %vm1354_vm8, %v18654_v21, %v7209_v45  ;;  %v18767_v60 = vpop.f32.mrf.mxu0  ;;  %v18771_v45 = vpack.i.bf16 %v18748_v13, %v18746_v29 }
 0x6c7   :  { %20289 = vst [vmem:[#allocation18_spill] sm:$0xff] %v18756_v26  ;;  %v6608_v44 = vmax.f32 %v6559_v22, 0.0  ;;  %7512 = vmatmul.f32.gmra.mxu2 %v7392_v6  ;;  %v7329_v22 = vsel %vm1270_vm2, %v7313_v39, %v10766_v63  ;;  %v18790_v63 = vld [vmem:[#allocation2 + $0x3a9] sm:$0xff]  ;;  %v10810_v26 = vunpack.i.l.bf16 %v18336_v52  ;;  %7552 = vmatpush.msra.mxu3 %v7480_v5 }
 0x6c8   :  { %10958 = vrot.lane.b32.xlu1 %v18764_v49, %s11246_s26  ;;  %v7345_v15 = vsel %vm1287_vm4, %v7329_v22, %v10806_v43  ;;  %8581 = vmatpush.msra.mxu1 %v7480_v5  ;;  %v7478_v5 = vld [vmem:[%s19717_s4 + $0xd0] sm:$0xff] }
 0x6c9   :  { %v6624_v8 = vadd.f32 %v9414_v32, %v6608_v44  ;;  %10953 = vrot.lane.b32.xlu0 %v18190_v51, %s11246_s26  ;;  %v18798_v32 = vld [vmem:[#allocation2 + $0x3b1] sm:$0xff]  ;;  %v18800_v44 = vld [vmem:[#allocation2 + $0x3c9] sm:$0xff]  ;;  %v7361_v22 = vsel %vm279_vm0, %v7345_v15, %v10846_v40  ;;  %7553 = vmatpush.msra.mxu3 %v7479_v18 }
 0x6ca   :  { %10963 = vrot.lane.b32.xlu2 %v18771_v45, %s11246_s26  ;;  %v18802_v51 = vld [vmem:[#allocation2 + $0x3d1] sm:$0xff]  ;;  %v7377_v40 = vsel %vm1320_vm5, %v7361_v22, %v10886_v50  ;;  %v18842_v50 = vpack.i.bf16 %v18798_v32, %v18790_v63  ;;  %8582 = vmatpush.msra.mxu1 %v7479_v18  ;;  %v10731_v22 = vunpack.i.h.bf16 %v18247_v16  ;;  %v10890_v16 = vunpack.i.l.bf16 %v18394_v20  ;;  %v7476_v18 = vld [vmem:[%s19717_s4 + $0xc0] sm:$0xff] }
 0x6cb   :  { %6641 = vst.msk [vmem:[#allocation3 + $0xb8] sm:$0xff] %vm49_vm1, %v6624_v8  ;;  %v7314_v8 = vsel %vm49_vm1, %v11215_v53, %v10730_v17  ;;  %v18825_v15 = vpop.permute.xlu1 %7162  ;;  %v7393_v1 = vsel %vm1337_vm6, %v7377_v40, %v18644_v57  ;;  %v18833_v48 = vpack.i.bf16 %v18802_v51, %v18800_v44  ;;  %7554 = vmatpush.msra.mxu3 %v7478_v5 }
 0x6cc   :  { %v6561_v43 = vpop.f32.mrf.mxu1  ;;  %v7330_v46 = vsel %vm1270_vm2, %v7314_v8, %v10770_v38  ;;  %v18857_v8 = vsel %vm1337_vm6, %v18598_v36, %v18825_v15  ;;  %v7477_v36 = vld [vmem:[%s19717_s4 + $0xc8] sm:$0xff]  ;;  %8583 = vmatpush.msra.mxu1 %v7478_v5 }
 0x6cd   :  { %v6562_v6 = vadd.f32 %v6561_v43, %v18704_v54  ;;  %v7215_v30 = vpop.permute.xlu2 %7214  ;;  %v18806_v39 = vpop.permute.xlu0 %7160  ;;  %v9415_v54 = vld [vmem:[%s19713_s0 + $0x139] sm:$0xff]  ;;  %v10850_v43 = vunpack.i.l.bf16 %v18430_v10  ;;  %v7346_v38 = vsel %vm1287_vm4, %v7330_v46, %v10810_v26  ;;  %7555 = vmatpush.msra.mxu3 %v7477_v36  ;;  %v11216_v5 = vld [vmem:[#allocation2 + $0x2af] sm:$0xff] }
 0x6ce   :  { %v18823_v17 = vsel %vm1354_vm8, %v18709_v42, %v7215_v30  ;;  %v18838_v30 = vpack.i.bf16 %v18811_v2, %v18809_v23  ;;  %v6502_v40 = vpop.f32.mrf.mxu0  ;;  %8584 = vmatpush.msra.mxu1 %v7477_v36 }
 0x6cf   :  { %20292 = vst [vmem:[#allocation27_spill] sm:$0xff] %v18823_v17  ;;  %v6609_v53 = vmax.f32 %v6562_v6, 0.0  ;;  %7515 = vmatmul.f32.gmra.mxu2 %v7393_v1  ;;  %v18852_v1 = vsel %vm1337_vm6, %v18595_v28, %v18806_v39  ;;  %v7362_v28 = vsel %vm279_vm0, %v7346_v38, %v10850_v43  ;;  %v18879_v43 = vld [vmem:[#allocation2 + $0x411] sm:$0xff]  ;;  %v10987_v38 = vpack.i.bf16 %v18288_v19, %v18290_v41 }
 0x6d0   :  { %20293 = vst [vmem:[#allocation15_spill] sm:$0xff] %v18838_v30  ;;  %10973 = vrot.lane.b32.xlu1 %v18833_v48, %s11246_s26  ;;  %v7315_v17 = vsel %vm49_vm1, %v11216_v5, %v10731_v22  ;;  %v7378_v23 = vsel %vm1320_vm5, %v7362_v28, %v10890_v16  ;;  %v7475_v19 = vld [vmem:[%s19717_s4 + $0xb8] sm:$0xff]  ;;  %v10771_v41 = vunpack.i.h.bf16 %v18227_v4  ;;  %7556 = vmatpush.msra.mxu3 %v7476_v18  ;;  %v7474_v28 = vld [vmem:[%s19717_s4 + $0xb0] sm:$0xff] }
 0x6d1   :  { %v6625_v6 = vadd.f32 %v9415_v54, %v6609_v53  ;;  %10968 = vrot.lane.b32.xlu0 %v18842_v50, %s11246_s26  ;;  %20295 = vst [vmem:[#allocation20_spill] sm:$0xff] %v18879_v43  ;;  %v7394_v36 = vsel %vm1337_vm6, %v7378_v23, %v18654_v21  ;;  %8585 = vmatpush.msra.mxu1 %v7476_v18  ;;  %v7473_v23 = vld [vmem:[%s19717_s4 + $0xa8] sm:$0xff] }
 0x6d2   :  { %10978 = vrot.lane.b32.xlu2 %v18838_v30, %s11246_s26  ;;  %v10811_v30 = vunpack.i.h.bf16 %v18336_v52  ;;  %v10851_v52 = vunpack.i.h.bf16 %v18430_v10  ;;  %v7331_v16 = vsel %vm1270_vm2, %v7315_v17, %v10771_v41  ;;  %7557 = vmatpush.msra.mxu3 %v7475_v19  ;;  %v20297_v17 = vld [vmem:[#allocation8_spill] sm:$0xff] }
 0x6d3   :  { %6642 = vst.msk [vmem:[#allocation3 + $0xc0] sm:$0xff] %vm49_vm1, %v6625_v6  ;;  %v18877_v6 = vld [vmem:[#allocation2 + $0x409] sm:$0xff]  ;;  %v18892_v2 = vpop.permute.xlu1 %7200  ;;  %8586 = vmatpush.msra.mxu1 %v7475_v19  ;;  %v10735_v18 = vunpack.i.l.bf16 %v20297_v17  ;;  %v9417_v19 = vld [vmem:[%s19713_s0 + $0x151] sm:$0xff] }
 0x6d4   :  { %v6564_v46 = vpop.f32.mrf.mxu1  ;;  %20294 = vst [vmem:[#allocation28_spill] sm:$0xff] %v18877_v6  ;;  %v7347_v10 = vsel %vm1287_vm4, %v7331_v16, %v10811_v30  ;;  %7558 = vmatpush.msra.mxu3 %v7474_v28  ;;  %v10891_v30 = vunpack.i.h.bf16 %v18394_v20 }
 0x6d5   :  { %v6565_v26 = vadd.f32 %v6564_v46, %v18767_v60  ;;  %v7221_v54 = vpop.permute.xlu2 %7220  ;;  %v18875_v53 = vpop.permute.xlu0 %7198  ;;  %v9416_v60 = vld [vmem:[%s19713_s0 + $0x141] sm:$0xff]  ;;  %v7363_v21 = vsel %vm279_vm0, %v7347_v10, %v10851_v52  ;;  %8587 = vmatpush.msra.mxu1 %v7474_v28  ;;  %v20299_v28 = vld [vmem:[#allocation16_spill] sm:$0xff] }
 0x6d6   :  { %v18890_v46 = vsel %vm1354_vm8, %v18758_v55, %v7221_v54  ;;  %v18904_v55 = vpack.i.bf16 %v18879_v43, %v18877_v6  ;;  %7559 = vmatpush.msra.mxu3 %v7473_v23 }
 0x6d7   :  { %v6610_v22 = vmax.f32 %v6565_v26, 0.0  ;;  %7518 = vmatmul.f32.gmra.mxu2 %v7394_v36  ;;  %v6505_v26 = vpop.f32.mrf.mxu0  ;;  %v7379_v36 = vsel %vm1320_vm5, %v7363_v21, %v10891_v30  ;;  %8588 = vmatpush.msra.mxu1 %v7473_v23  ;;  %v7470_v21 = vld [vmem:[%s19717_s4 + $0x90] sm:$0xff]  ;;  %v20301_v23 = vld [vmem:[#allocation35_spill] sm:$0xff] }
 0x6d8   :  { %20296 = vst [vmem:[#allocation30_spill] sm:$0xff] %v18904_v55  ;;  %10988 = vrot.lane.b32.xlu1 %v10987_v38, %s11247_s24  ;;  %v20298_v38 = vld [vmem:[#allocation17_spill] sm:$0xff]  ;;  %v7395_v10 = vsel %vm1337_vm6, %v7379_v36, %v20299_v28  ;;  %v10815_v36 = vunpack.i.l.bf16 %v20301_v23 }
 0x6d9   :  { %v6626_v4 = vadd.f32 %v9416_v60, %v6610_v22  ;;  %10983 = vrot.lane.b32.xlu0 %v18904_v55, %s11246_s26  ;;  %v10775_v5 = vunpack.i.l.bf16 %v20298_v38  ;;  %v20302_v55 = vld [vmem:[#allocation26_spill] sm:$0xff] }
 0x6da   :  { %10993 = vrot.lane.b32.xlu2 %v18619_v9, %s11248_s11  ;;  %v7472_v9 = vld [vmem:[%s19717_s4 + $0xa0] sm:$0xff] }
 0x6db   :  { %6643 = vst.msk [vmem:[#allocation3 + $0xc8] sm:$0xff] %vm49_vm1, %v6626_v4  ;;  %v7207_v22 = vpop.permute.xlu1 %7206  ;;  %7560 = vmatpush.msra.mxu3 %v7472_v9  ;;  %8589 = vmatpush.msra.mxu1 %v7472_v9 }
 0x6dc   :  { %v6567_v54 = vpop.f32.mrf.mxu1  ;;  %v18942_v4 = vsel %vm1354_vm8, %v18644_v57, %v7207_v22 }
 0x6dd   :  { %v6568_v60 = vadd.f32 %v6567_v54, %v6502_v40  ;;  %v7227_v41 = vpop.permute.xlu2 %7226  ;;  %v18927_v52 = vpop.permute.xlu0 %7204  ;;  %v7471_v40 = vld [vmem:[%s19717_s4 + $0x98] sm:$0xff]  ;;  %v11217_v54 = vld [vmem:[#allocation2 + $0x2c7] sm:$0xff] }
 0x6de   :  { %v18934_v20 = vsel %vm1354_vm8, %v18825_v15, %v7227_v41  ;;  %v7316_v15 = vsel %vm49_vm1, %v11217_v54, %v10735_v18  ;;  %v18947_v41 = vld [vmem:[#allocation2 + $0x387] sm:$0xff]  ;;  %7561 = vmatpush.msra.mxu3 %v7471_v40  ;;  %v10895_v18 = vunpack.i.l.bf16 %v20302_v55  ;;  %v10776_v54 = vunpack.i.h.bf16 %v20298_v38  ;;  %8590 = vmatpush.msra.mxu1 %v7471_v40 }
 0x6df   :  { %v6611_v16 = vmax.f32 %v6568_v60, 0.0  ;;  %7521 = vmatmul.f32.gmra.mxu2 %v7395_v10  ;;  %v7332_v30 = vsel %vm1270_vm2, %v7316_v15, %v10775_v5  ;;  %v20300_v60 = vld [vmem:[#allocation40_spill] sm:$0xff]  ;;  %v7469_v5 = vld [vmem:[%s19717_s4 + $0x88] sm:$0xff]  ;;  %v6508_v9 = vpop.f32.mrf.mxu0 }
 0x6e0   :  { %v10855_v57 = vunpack.i.l.bf16 %v20300_v60  ;;  %8161 = vrot.lane.b32.xlu1 %v18947_v41, %s11250_s22  ;;  %7562 = vmatpush.msra.mxu3 %v7470_v21  ;;  %v7348_v10 = vsel %vm1287_vm4, %v7332_v30, %v10815_v36 }
 0x6e1   :  { %v6627_v22 = vadd.f32 %v9417_v19, %v6611_v16  ;;  %10998 = vrot.lane.b32.xlu0 %v18764_v49, %s11249_s16  ;;  %v10736_v19 = vunpack.i.h.bf16 %v20297_v17  ;;  %v9418_v17 = vld [vmem:[%s19713_s0 + $0x159] sm:$0xff]  ;;  %8591 = vmatpush.msra.mxu1 %v7470_v21 }
 0x6e2   :  { %8225 = vrot.lane.b32.xlu2 %v18663_v62, %s11251_s20  ;;  %v7468_v62 = vld [vmem:[%s19717_s4 + $0x80] sm:$0xff]  ;;  %v7364_v43 = vsel %vm279_vm0, %v7348_v10, %v10855_v57  ;;  %7563 = vmatpush.msra.mxu3 %v7469_v5  ;;  %v11218_v57 = vld [vmem:[#allocation2 + $0x2cf] sm:$0xff] }
 0x6e3   :  { %6644 = vst.msk [vmem:[#allocation3 + $0xd0] sm:$0xff] %vm49_vm1, %v6627_v22  ;;  %v7213_v30 = vpop.permute.xlu1 %7212  ;;  %v7380_v36 = vsel %vm1320_vm5, %v7364_v43, %v10895_v18  ;;  %v7317_v40 = vsel %vm49_vm1, %v11218_v57, %v10736_v19  ;;  %v10856_v43 = vunpack.i.h.bf16 %v20300_v60  ;;  %8592 = vmatpush.msra.mxu1 %v7469_v5 }
 0x6e4   :  { %v6570_v16 = vpop.f32.mrf.mxu1  ;;  %v7396_v38 = vsel %vm1337_vm6, %v7380_v36, %v18698_v14  ;;  %7564 = vmatpush.msra.mxu3 %v7468_v62  ;;  %v7333_v10 = vsel %vm1270_vm2, %v7317_v40, %v10776_v54 }
 0x6e5   :  { %v6571_v49 = vadd.f32 %v6570_v16, %v6505_v26  ;;  %v18972_v15 = vpop.permute.xlu2 %7264  ;;  %v18974_v22 = vpop.permute.xlu0 %7210  ;;  %v18983_v26 = vsel %vm1354_vm8, %v18698_v14, %v7213_v30  ;;  %v18988_v16 = vld [vmem:[#allocation2 + $0x38f] sm:$0xff]  ;;  %v10896_v14 = vunpack.i.h.bf16 %v20302_v55  ;;  %8593 = vmatpush.msra.mxu1 %v7468_v62 }
 0x6e7   :  { %v6612_v6 = vmax.f32 %v6571_v49, 0.0  ;;  %7524 = vmatmul.f32.gmra.mxu2 %v7396_v38  ;;  %v10816_v49 = vunpack.i.h.bf16 %v20301_v23  ;;  %v6511_v30 = vpop.f32.mrf.mxu0 }
 0x6e8   :  { %8163 = vrot.lane.b32.xlu1 %v18988_v16, %s11250_s22 }
 0x6e9   :  { %v6628_v18 = vadd.f32 %v9418_v17, %v6612_v6  ;;  %8289 = vrot.lane.b32.xlu0 %v18746_v29, %s11252_s25  ;;  %v7349_v6 = vsel %vm1287_vm4, %v7333_v10, %v10816_v49  ;;  %v11002_v17 = vpack.i.bf16 %v18988_v16, %v18947_v41  ;;  %v9420_v10 = vld [vmem:[%s19713_s0 + $0x171] sm:$0xff]  ;;  %v19037_v49 = vld [vmem:[#allocation2 + $0x3a7] sm:$0xff] }
 0x6ea   :  { %8227 = vrot.lane.b32.xlu2 %v18649_v61, %s11251_s20  ;;  %v7365_v23 = vsel %vm279_vm0, %v7349_v6, %v10856_v43  ;;  %v9419_v61 = vld [vmem:[%s19713_s0 + $0x169] sm:$0xff] }
 0x6eb   :  { %6645 = vst.msk [vmem:[#allocation3 + $0xd8] sm:$0xff] %vm49_vm1, %v6628_v18  ;;  %v7219_v55 = vpop.permute.xlu1 %7218  ;;  %v7381_v29 = vsel %vm1320_vm5, %v7365_v23, %v10896_v14 }
 0x6ec   :  { %v6573_v21 = vpop.f32.mrf.mxu1  ;;  %v19013_v62 = vsel %vm1354_vm8, %v18744_v27, %v7219_v55 }
 0x6ed   :  { %v6574_v60 = vadd.f32 %v6573_v21, %v6508_v9  ;;  %v19002_v19 = vpop.permute.xlu2 %7270  ;;  %v19004_v5 = vpop.permute.xlu0 %7216  ;;  %v7397_v9 = vsel %vm1337_vm6, %v7381_v29, %v18709_v42 }
 0x6ef   :  { %v6613_v54 = vmax.f32 %v6574_v60, 0.0  ;;  %7527 = vmatmul.f32.gmra.mxu2 %v7397_v9  ;;  %v6514_v21 = vpop.f32.mrf.mxu0  ;;  %v7405_v9 = vsel %vm1354_vm8, %v18456_v7, %v18875_v53  ;;  %v8494_v53 = vld [vmem:[%s19717_s4 + $0x68] sm:$0xff] }
 0x6f0   :  { %11003 = vrot.lane.b32.xlu1 %v11002_v17, %s11247_s24 }
 0x6f1   :  { %v6629_v36 = vadd.f32 %v9419_v61, %v6613_v54  ;;  %8291 = vrot.lane.b32.xlu0 %v18748_v13, %s11252_s25  ;;  %v7398_v13 = vsel %vm1337_vm6, %v18549_v34, %v18563_v37  ;;  %v7404_v34 = vsel %vm1354_vm8, %v18571_v59, %v18642_v35  ;;  %v9421_v61 = vld [vmem:[%s19713_s0 + $0x181] sm:$0xff]  ;;  %v19059_v59 = vld [vmem:[#allocation2 + $0x3af] sm:$0xff] }
 0x6f2   :  { %11008 = vrot.lane.b32.xlu2 %v18676_v47, %s11248_s11  ;;  %v8495_v35 = vld [vmem:[%s19717_s4 + $0x70] sm:$0xff] }
 0x6f3   :  { %6646 = vst.msk [vmem:[#allocation3 + $0xe0] sm:$0xff] %vm49_vm1, %v6629_v36  ;;  %v7225_v43 = vpop.permute.xlu1 %7224  ;;  %8514 = vmatpush.msra.mxu0 %v8495_v35 }
 0x6f4   :  { %v6576_v38 = vpop.f32.mrf.mxu1  ;;  %v7418_v47 = vsel %vm1354_vm8, %v18806_v39, %v7225_v43  ;;  %v11017_v43 = vpack.i.bf16 %v19059_v59, %v19037_v49 }
 0x6f5   :  { %v6577_v57 = vadd.f32 %v6576_v38, %v6511_v30  ;;  %v19025_v40 = vpop.permute.xlu2 %7276  ;;  %v19027_v42 = vpop.permute.xlu0 %7222  ;;  %8515 = vmatpush.msra.mxu0 %v8494_v53  ;;  %v8486_v53 = vld [vmem:[%s19717_s4 + $0x28] sm:$0xff] }
 0x6f7   :  { %v6614_v18 = vmax.f32 %v6577_v57, 0.0  ;;  %7530 = vmatmul.f32.gmra.mxu2 %v7398_v13 }
 0x6f8   :  { %8165 = vrot.lane.b32.xlu1 %v19037_v49, %s11250_s22 }
 0x6f9   :  { %v6630_v14 = vadd.f32 %v9420_v10, %v6614_v18  ;;  %11013 = vrot.lane.b32.xlu0 %v18771_v45, %s11249_s16  ;;  %v7399_v45 = vsel %vm1337_vm6, %v18552_v0, %v18744_v27  ;;  %v6517_v0 = vpop.f32.mrf.mxu0 }
 0x6fa   :  { %8229 = vrot.lane.b32.xlu2 %v18657_v12, %s11251_s20 }
 0x6fb   :  { %6647 = vst.msk [vmem:[#allocation3 + $0xe8] sm:$0xff] %vm49_vm1, %v6630_v14  ;;  %v7263_v55 = vpop.permute.xlu1 %7262 }
 0x6fc   :  { %v6579_v39 = vpop.f32.mrf.mxu1  ;;  %v7421_v38 = vsel %vm1371_vm10, %v7405_v9, %v7263_v55  ;;  %v20307_v9 = vld [vmem:[#allocation25_spill] sm:$0xff] }
 0x6fd   :  { %v6580_v6 = vadd.f32 %v6579_v39, %v6514_v21  ;;  %v19049_v60 = vpop.permute.xlu2 %7282  ;;  %v7261_v23 = vpop.permute.xlu0 %7260 }
 0x6fe   :  { %v7420_v12 = vsel %vm1371_vm10, %v7404_v34, %v7261_v23  ;;  %v19129_v23 = vld [vmem:[#allocation2 + $0x3cf] sm:$0xff] }
 0x6ff   :  { %v6615_v29 = vmax.f32 %v6580_v6, 0.0  ;;  %9423 = vmatmul.msk.f32.vlgmr.msra.gmra.mxu3 %vm1388_vm9, %v7420_v12  ;;  %7533 = vmatmul.f32.gmra.mxu2 %v7399_v45  ;;  %v7417_v12 = vsel %vm1354_vm8, %v18604_v3, %v19027_v42 }
 0x700   :  { %8167 = vrot.lane.b32.xlu1 %v19059_v59, %s11250_s22 }
 0x701   :  { %v6631_v54 = vadd.f32 %v9421_v61, %v6615_v29  ;;  %8293 = vrot.lane.b32.xlu0 %v18790_v63, %s11252_s25 }
 0x702   :  { %8231 = vrot.lane.b32.xlu2 %v18638_v25, %s11251_s20  ;;  %v9422_v25 = vld [vmem:[%s19713_s0 + $0x189] sm:$0xff] }
 0x703   :  { %6648 = vst.msk [vmem:[#allocation3 + $0xf0] sm:$0xff] %vm49_vm1, %v6631_v54  ;;  %v7269_v63 = vpop.permute.xlu1 %7268  ;;  %v7425_v54 = vsel %vm1371_vm10, %v18942_v4, %v19002_v19  ;;  %v8488_v4 = vld [vmem:[%s19717_s4 + $0x38] sm:$0xff] }
 0x704   :  { %v6582_v27 = vpop.f32.mrf.mxu1 }
 0x705   :  { %v6583_v17 = vadd.f32 %v6582_v27, %v6517_v0  ;;  %v7289_v30 = vpop.permute.xlu2 %7288  ;;  %v7267_v36 = vpop.permute.xlu0 %7266  ;;  %v7783_v27 = vld [vmem:[#allocation2 + $0x3e7] sm:$0xff] }
 0x706   :  { %v19079_v57 = vsel %vm1371_vm10, %v7418_v47, %v7289_v30  ;;  %v20308_v30 = vld [vmem:[#allocation18_spill] sm:$0xff] }
 0x707   :  { %v6616_v10 = vmax.f32 %v6583_v17, 0.0  ;;  %9424 = vmatmul.msk.f32.gmra.mxu3 %vm1388_vm9, %v7421_v38  ;;  %7536 = vmatmul.f32.gmra.mxu2 %v18780_v11  ;;  %v7406_v11 = vsel %vm1354_vm8, %v18606_v24, %v18892_v2  ;;  %v8493_v24 = vld [vmem:[%s19717_s4 + $0x60] sm:$0xff]  ;;  %v7407_v2 = vsel %vm1354_vm8, %v18611_v56, %v18696_v31  ;;  %v8492_v56 = vld [vmem:[%s19717_s4 + $0x58] sm:$0xff]  ;;  %v20305_v31 = vld [vmem:[#allocation24_spill] sm:$0xff] }
 0x708   :  { %11018 = vrot.lane.b32.xlu1 %v11017_v43, %s11247_s24  ;;  %v7422_v13 = vsel %vm1371_vm10, %v7406_v11, %v18972_v15  ;;  %8516 = vmatpush.msra.mxu0 %v8493_v24  ;;  %v7423_v34 = vsel %vm1371_vm10, %v7407_v2, %v7267_v36  ;;  %v7411_v2 = vsel %vm1354_vm8, %v20299_v28, %v18974_v22 }
 0x709   :  { %v6632_v7 = vadd.f32 %v9422_v25, %v6616_v10  ;;  %8295 = vrot.lane.b32.xlu0 %v18798_v32, %s11252_s25  ;;  %v19107_v32 = vld [vmem:[#allocation2 + $0x3c7] sm:$0xff]  ;;  %v7784_v10 = vld [vmem:[#allocation2 + $0x3ef] sm:$0xff] }
 0x70a   :  { %11023 = vrot.lane.b32.xlu2 %v18667_v33, %s11248_s11  ;;  %v20303_v33 = vld [vmem:[#allocation10_spill] sm:$0xff]  ;;  %8517 = vmatpush.msra.mxu0 %v8492_v56 }
 0x70b   :  { %6649 = vst.msk [vmem:[#allocation3 + $0xf8] sm:$0xff] %vm49_vm1, %v6632_v7  ;;  %v19101_v14 = vpop.permute.xlu1 %7274  ;;  %v7401_v21 = vsel %vm1337_vm6, %v20303_v33, %v18604_v3  ;;  %v8491_v3 = vld [vmem:[%s19717_s4 + $0x50] sm:$0xff]  ;;  %v20310_v33 = vld [vmem:[#allocation29_spill] sm:$0xff] }
 0x70c   :  { %8518 = vmatpush.msra.mxu0 %v8491_v3  ;;  %v20311_v3 = vld [vmem:[#allocation31_spill] sm:$0xff] }
 0x70d   :  { %v19097_v18 = vpop.permute.xlu2 %10918  ;;  %v7273_v47 = vpop.permute.xlu0 %7272 }
 0x70e   :  { %v7426_v36 = vsel %vm1371_vm10, %v20308_v30, %v7273_v47 }
 0x70f   :  { %9425 = vmatmul.msk.f32.gmra.mxu3 %vm1388_vm9, %v7422_v13  ;;  %7539 = vmatmul.f32.gmra.mxu2 %v7401_v21  ;;  %v20309_v13 = vld [vmem:[#allocation7_spill] sm:$0xff] }
 0x710   :  { %8169 = vrot.lane.b32.xlu1 %v19107_v32, %s11250_s22 }
 0x711   :  { %11028 = vrot.lane.b32.xlu0 %v18842_v50, %s11249_s16  ;;  %v7408_v50 = vsel %vm1354_vm8, %v20305_v31, %v18927_v52  ;;  %v11032_v52 = vpack.i.bf16 %v19129_v23, %v19107_v32 }
 0x712   :  { %8233 = vrot.lane.b32.xlu2 %v18661_v58, %s11251_s20  ;;  %v20304_v58 = vld [vmem:[#allocation23_spill] sm:$0xff]  ;;  %v7424_v55 = vsel %vm1371_vm10, %v7408_v50, %v7269_v63 }
 0x713   :  { %v19126_v6 = vpop.permute.xlu1 %7280 }
 0x715   :  { %v19121_v15 = vpop.permute.xlu2 %10933  ;;  %v19123_v39 = vpop.permute.xlu0 %7278 }
 0x717   :  { %9426 = vmatmul.msk.f32.gmra.mxu3 %vm1388_vm9, %v7423_v34  ;;  %7542 = vmatmul.f32.gmra.mxu2 %v18852_v1 }
 0x718   :  { %8171 = vrot.lane.b32.xlu1 %v19129_v23, %s11250_s22 }
 0x719   :  { %8297 = vrot.lane.b32.xlu0 %v18800_v44, %s11252_s25 }
 0x71a   :  { %8235 = vrot.lane.b32.xlu2 %v20304_v58, %s11251_s20  ;;  %v7427_v58 = vsel %vm1371_vm10, %v7411_v2, %v19101_v14  ;;  %v8482_v14 = vld [vmem:[%s19717_s4 + $0x8] sm:$0xff] }
 0x71b   :  { %v7287_v45 = vpop.permute.xlu1 %7286 }
 0x71c   :  { %v19155_v44 = vsel %vm1371_vm10, %v7417_v12, %v7287_v45  ;;  %v8483_v12 = vld [vmem:[%s19717_s4 + $0x10] sm:$0xff] }
 0x71d   :  { %v19144_v61 = vpop.permute.xlu2 %10948  ;;  %v7285_v1 = vpop.permute.xlu0 %7284 }
 0x71e   :  { %v19152_v29 = vsel %vm1371_vm10, %v18890_v46, %v7285_v1  ;;  %v20306_v46 = vld [vmem:[#allocation33_spill] sm:$0xff] }
 0x71f   :  { %9427 = vmatmul.msk.f32.gmra.mxu3 %vm1388_vm9, %v7424_v55  ;;  %7545 = vmatmul.f32.gmra.mxu2 %v18857_v8  ;;  %v11047_v55 = vpack.i.bf16 %v7784_v10, %v7783_v27 }
 0x720   :  { %11033 = vrot.lane.b32.xlu1 %v11032_v52, %s11247_s24 }
 0x721   :  { %8299 = vrot.lane.b32.xlu0 %v18802_v51, %s11252_s25  ;;  %v8490_v51 = vld [vmem:[%s19717_s4 + $0x48] sm:$0xff] }
 0x722   :  { %11038 = vrot.lane.b32.xlu2 %v20306_v46, %s11248_s11  ;;  %8519 = vmatpush.msra.mxu0 %v8490_v51  ;;  %v20312_v46 = vld [vmem:[#allocation14_spill] sm:$0xff] }
 0x723   :  { %v19176_v0 = vpop.permute.xlu1 %10913 }
 0x725   :  { %v10964_v42 = vpop.permute.xlu2 %10963  ;;  %v7291_v35 = vpop.permute.xlu0 %7290 }
 0x726   :  { %v19174_v8 = vsel %vm1371_vm10, %v18934_v20, %v7291_v35  ;;  %v8489_v20 = vld [vmem:[%s19717_s4 + $0x40] sm:$0xff]  ;;  %v10966_v11 = vunpack.i.h.bf16 %v10964_v42  ;;  %v10965_v47 = vunpack.i.l.bf16 %v10964_v42 }
 0x727   :  { %9428 = vmatmul.msk.f32.gmra.mxu3 %vm1388_vm9, %v7425_v54  ;;  %8520 = vmatpush.msra.mxu0 %v8489_v20  ;;  %v8481_v42 = vld [vmem:[%s19717_s4] sm:$0xff] }
 0x728   :  { %8173 = vrot.lane.b32.xlu1 %v7783_v27, %s11250_s22 }
 0x729   :  { %11043 = vrot.lane.b32.xlu0 %v18833_v48, %s11249_s16  ;;  %v8487_v48 = vld [vmem:[%s19717_s4 + $0x30] sm:$0xff]  ;;  %8521 = vmatpush.msra.mxu0 %v8488_v4  ;;  %v7692_v4 = vld [vmem:[#allocation2 + $0x407] sm:$0xff] }
 0x72a   :  { %8237 = vrot.lane.b32.xlu2 %v20307_v9, %s11251_s20  ;;  %v7428_v9 = vsel %vm1371_vm10, %v18983_v26, %v19025_v40  ;;  %v10935_v26 = vunpack.i.l.bf16 %v19121_v15 }
 0x72b   :  { %v19195_v63 = vpop.permute.xlu1 %10928  ;;  %8522 = vmatpush.msra.mxu0 %v8487_v48  ;;  %v20315_v48 = vld [vmem:[#allocation27_spill] sm:$0xff] }
 0x72c   :  { %v10931_v30 = vunpack.i.h.bf16 %v19195_v63 }
 0x72d   :  { %v10979_v19 = vpop.permute.xlu2 %10978  ;;  %v10924_v17 = vpop.permute.xlu0 %10923  ;;  %8523 = vmatpush.msra.mxu0 %v8486_v53 }
 0x72e   :  { %v10926_v38 = vunpack.i.h.bf16 %v10924_v17  ;;  %v10925_v25 = vunpack.i.l.bf16 %v10924_v17  ;;  %v10981_v45 = vunpack.i.h.bf16 %v10979_v19  ;;  %v10980_v52 = vunpack.i.l.bf16 %v10979_v19  ;;  %v20313_v19 = vld [vmem:[#allocation13_spill] sm:$0xff]  ;;  %v20314_v17 = vld [vmem:[#allocation15_spill] sm:$0xff] }
 0x72f   :  { %9429 = vmatmul.msk.f32.gmra.mxu3 %vm1388_vm9, %v7426_v36  ;;  %v10930_v36 = vunpack.i.l.bf16 %v19195_v63 }
 0x730   :  { %v8342_v43 = vsel %vm49_vm1, %v18988_v16, %v10926_v38  ;;  %v8341_v7 = vsel %vm49_vm1, %v18947_v41, %v10925_v25  ;;  %8175 = vrot.lane.b32.xlu1 %v7784_v10, %s11250_s22  ;;  %v8485_v16 = vld [vmem:[%s19717_s4 + $0x20] sm:$0xff]  ;;  %v8484_v41 = vld [vmem:[%s19717_s4 + $0x18] sm:$0xff]  ;;  %v10936_v38 = vunpack.i.h.bf16 %v19121_v15 }
 0x731   :  { %8301 = vrot.lane.b32.xlu0 %v20310_v33, %s11252_s25  ;;  %v19220_v21 = vsel %vm1270_vm2, %v8341_v7, %v10965_v47  ;;  %v19223_v24 = vsel %vm1270_vm2, %v8342_v43, %v10966_v11  ;;  %8524 = vmatpush.msra.mxu0 %v8485_v16  ;;  %v8344_v11 = vsel %vm49_vm1, %v19059_v59, %v10931_v30  ;;  %v20318_v30 = vld [vmem:[#allocation20_spill] sm:$0xff] }
 0x732   :  { %8239 = vrot.lane.b32.xlu2 %v20309_v13, %s11251_s20  ;;  %v8343_v63 = vsel %vm49_vm1, %v19037_v49, %v10930_v36  ;;  %v8346_v15 = vsel %vm49_vm1, %v19129_v23, %v10936_v38  ;;  %v8345_v33 = vsel %vm49_vm1, %v19107_v32, %v10935_v26  ;;  %v20316_v23 = vld [vmem:[#allocation6_spill] sm:$0xff]  ;;  %v20317_v32 = vld [vmem:[#allocation28_spill] sm:$0xff] }
 0x733   :  { %v19232_v1 = vpop.permute.xlu1 %10943  ;;  %8525 = vmatpush.msra.mxu0 %v8484_v41 }
 0x734   :  { %v10946_v2 = vunpack.i.h.bf16 %v19232_v1 }
 0x735   :  { %v19228_v34 = vpop.permute.xlu2 %10993  ;;  %v10939_v56 = vpop.permute.xlu0 %10938  ;;  %8526 = vmatpush.msra.mxu0 %v8483_v12  ;;  %v7755_v12 = vld [vmem:[#allocation2 + $0x410] sm:$0xff] }
 0x736   :  { %v10941_v31 = vunpack.i.h.bf16 %v10939_v56  ;;  %v10940_v50 = vunpack.i.l.bf16 %v10939_v56  ;;  %v10945_v56 = vunpack.i.l.bf16 %v19232_v1  ;;  %v10995_v38 = vunpack.i.l.bf16 %v19228_v34 }
 0x737   :  { %9430 = vmatmul.msk.f32.gmra.mxu3 %vm1388_vm9, %v7427_v58  ;;  %8527 = vmatpush.msra.mxu0 %v8482_v14  ;;  %v7414_v58 = vsel %vm1354_vm8, %v18563_v37, %v19004_v5  ;;  %v7754_v37 = vld [vmem:[#allocation2 + $0x408] sm:$0xff] }
 0x738   :  { %v8348_v28 = vsel %vm49_vm1, %v7784_v10, %v10941_v31  ;;  %v8347_v22 = vsel %vm49_vm1, %v7783_v27, %v10940_v50  ;;  %11048 = vrot.lane.b32.xlu1 %v11047_v55, %s11247_s24  ;;  %v7429_v10 = vsel %vm1371_vm10, %v20315_v48, %v19123_v39  ;;  %v7693_v39 = vld [vmem:[#allocation2 + $0x40f] sm:$0xff]  ;;  %v7430_v55 = vsel %vm1371_vm10, %v7414_v58, %v19126_v6 }
 0x739   :  { %8303 = vrot.lane.b32.xlu0 %v20312_v46, %s11252_s25  ;;  %v19252_v35 = vsel %vm1270_vm2, %v8347_v22, %v10980_v52  ;;  %v19255_v54 = vsel %vm1270_vm2, %v8348_v28, %v10981_v45  ;;  %8528 = vmatpush.msra.mxu0 %v8481_v42  ;;  %v10915_v28 = vunpack.i.l.bf16 %v19176_v0  ;;  %v8350_v52 = vsel %vm49_vm1, %v7693_v39, %v10946_v2 }
 0x73a   :  { %11053 = vrot.lane.b32.xlu2 %v20311_v3, %s11248_s11  ;;  %v8349_v1 = vsel %vm49_vm1, %v7692_v4, %v10945_v56  ;;  %v11062_v5 = vpack.i.bf16 %v7693_v39, %v7692_v4  ;;  %v7431_v48 = vsel %vm1371_vm10, %v19013_v62, %v19049_v60 }
 0x73b   :  { %v19264_v20 = vpop.permute.xlu1 %10958 }
 0x73d   :  { %v19257_v27 = vpop.permute.xlu2 %8225  ;;  %v19259_v51 = vpop.permute.xlu0 %10953 }
 0x73e   :  { %v10955_v3 = vunpack.i.l.bf16 %v19259_v51 }
 0x73f   :  { %9431 = vmatmul.msk.f32.gmra.mxu3 %vm1388_vm9, %v7428_v9  ;;  %v11067_v9 = vpack.i.bf16 %v7755_v12, %v7754_v37 }
 0x740   :  { %8177 = vrot.lane.b32.xlu1 %v7692_v4, %s11250_s22 }
 0x741   :  { %11058 = vrot.lane.b32.xlu0 %v20314_v17, %s11249_s16 }
 0x742   :  { %8241 = vrot.lane.b32.xlu2 %v20313_v19, %s11251_s20  ;;  %v7680_v19 = vld [vmem:[#allocation2 + $0x347] sm:$0xff] }
 0x743   :  { %v10974_v53 = vpop.permute.xlu1 %10973  ;;  %v8337_v17 = vsel %vm49_vm1, %v7680_v19, %v10915_v28  ;;  %v19366_v28 = vld [vmem:[#allocation2 + $0x42f] sm:$0xff] }
 0x744   :  { %v10976_v47 = vunpack.i.h.bf16 %v10974_v53  ;;  %v10975_v13 = vunpack.i.l.bf16 %v10974_v53  ;;  %v8353_v4 = vsel %vm1270_vm2, %v8337_v17, %v10955_v3  ;;  %v10956_v53 = vunpack.i.h.bf16 %v19259_v51  ;;  %v7682_v17 = vld [vmem:[#allocation2 + $0x367] sm:$0xff] }
 0x745   :  { %v19276_v40 = vpop.permute.xlu2 %8227  ;;  %v10969_v25 = vpop.permute.xlu0 %10968  ;;  %v10920_v3 = vunpack.i.l.bf16 %v19097_v18 }
 0x746   :  { %v10971_v43 = vunpack.i.h.bf16 %v10969_v25  ;;  %v10970_v7 = vunpack.i.l.bf16 %v10969_v25  ;;  %v19297_v59 = vsel %vm1270_vm2, %v8346_v15, %v10976_v47  ;;  %v19300_v49 = vsel %vm1270_vm2, %v8345_v33, %v10975_v13  ;;  %v7681_v15 = vld [vmem:[#allocation2 + $0x34f] sm:$0xff] }
 0x747   :  { %9432 = vmatmul.msk.f32.gmra.mxu3 %vm1388_vm9, %v7429_v10  ;;  %v10916_v10 = vunpack.i.h.bf16 %v19176_v0  ;;  %v20319_v0 = vld [vmem:[#allocation30_spill] sm:$0xff] }
 0x748   :  { %v19291_v16 = vsel %vm1270_vm2, %v8343_v63, %v10970_v7  ;;  %v19294_v41 = vsel %vm1270_vm2, %v8344_v11, %v10971_v43  ;;  %8179 = vrot.lane.b32.xlu1 %v7693_v39, %s11250_s22  ;;  %v19344_v63 = vld [vmem:[#allocation2 + $0x427] sm:$0xff] }
 0x749   :  { %8305 = vrot.lane.b32.xlu0 %v20317_v32, %s11252_s25  ;;  %v7803_v39 = vld [vmem:[#allocation2 + $0x428] sm:$0xff]  ;;  %v8338_v62 = vsel %vm49_vm1, %v7681_v15, %v10916_v10  ;;  %v10996_v32 = vunpack.i.h.bf16 %v19228_v34  ;;  %v10921_v10 = vunpack.i.h.bf16 %v19097_v18 }
 0x74a   :  { %8243 = vrot.lane.b32.xlu2 %v20316_v23, %s11251_s20  ;;  %v8354_v60 = vsel %vm1270_vm2, %v8338_v62, %v10956_v53 }
 0x74b   :  { %v10989_v45 = vpop.permute.xlu1 %10988 }
 0x74c   :  { %v10990_v42 = vunpack.i.l.bf16 %v10989_v45  ;;  %v10991_v47 = vunpack.i.h.bf16 %v10989_v45 }
 0x74d   :  { %v19312_v31 = vpop.permute.xlu2 %11008  ;;  %v10984_v50 = vpop.permute.xlu0 %10983 }
 0x74e   :  { %v10986_v22 = vunpack.i.h.bf16 %v10984_v50  ;;  %v10985_v14 = vunpack.i.l.bf16 %v10984_v50  ;;  %v8369_v36 = vsel %vm1287_vm4, %v8353_v4, %v10990_v42  ;;  %v8370_v51 = vsel %vm1287_vm4, %v8354_v60, %v10991_v47  ;;  %v7820_v4 = vld [vmem:[#allocation2 + $0x431] sm:$0xff]  ;;  %v19406_v60 = vld [vmem:[#allocation2 + $0x448] sm:$0xff] }
 0x74f   :  { %9433 = vmatmul.msk.f32.gmra.mxu3 %vm1388_vm9, %v7430_v55  ;;  %v8385_v11 = vsel %vm279_vm0, %v8369_v36, %v10995_v38  ;;  %v8386_v55 = vsel %vm279_vm0, %v8370_v51, %v10996_v32  ;;  %v10960_v42 = vunpack.i.l.bf16 %v19264_v20  ;;  %v11010_v38 = vunpack.i.l.bf16 %v19312_v31 }
 0x750   :  { %v19322_v46 = vsel %vm1270_vm2, %v8349_v1, %v10985_v14  ;;  %v19325_v6 = vsel %vm1270_vm2, %v8350_v52, %v10986_v22  ;;  %11063 = vrot.lane.b32.xlu1 %v11062_v5, %s11247_s24  ;;  %v7819_v14 = vld [vmem:[#allocation2 + $0x429] sm:$0xff] }
 0x751   :  { %8307 = vrot.lane.b32.xlu0 %v20318_v30, %s11252_s25  ;;  %v8339_v30 = vsel %vm49_vm1, %v7682_v17, %v10920_v3  ;;  %v11087_v18 = vpack.i.bf16 %v7820_v4, %v7819_v14 }
 0x752   :  { %11068 = vrot.lane.b32.xlu2 %v11067_v9, %s11248_s11  ;;  %v11077_v9 = vpack.i.bf16 %v19366_v28, %v19344_v63  ;;  %v8355_v36 = vsel %vm1270_vm2, %v8339_v30, %v10960_v42  ;;  %v9439_v30 = vld [vmem:[%s19713_s0 + $0x1c9] sm:$0xff] }
 0x753   :  { %v8162_v7 = vpop.permute.xlu1 %8161 }
 0x754   :  { %v8433_v2 = vsel %vm1354_vm8, %v8162_v7, %v19257_v27  ;;  %v7804_v27 = vld [vmem:[#allocation2 + $0x430] sm:$0xff] }
 0x755   :  { %v19335_v26 = vpop.permute.xlu2 %8229  ;;  %v10999_v25 = vpop.permute.xlu0 %10998 }
 0x756   :  { %v11000_v43 = vunpack.i.l.bf16 %v10999_v25  ;;  %v11001_v23 = vunpack.i.h.bf16 %v10999_v25 }
 0x757   :  { %9434 = vmatmul.msk.f32.gmra.mxu3 %vm1388_vm9, %v7431_v48 }
 0x758   :  { %v8401_v13 = vsel %vm1320_vm5, %v8385_v11, %v11000_v43  ;;  %8181 = vrot.lane.b32.xlu1 %v19344_v63, %s11250_s22  ;;  %v8402_v34 = vsel %vm1320_vm5, %v8386_v55, %v11001_v23  ;;  %v10961_v11 = vunpack.i.h.bf16 %v19264_v20  ;;  %v11011_v23 = vunpack.i.h.bf16 %v19312_v31 }
 0x759   :  { %v8417_v33 = vsel %vm1337_vm6, %v8401_v13, %v8162_v7  ;;  %11073 = vrot.lane.b32.xlu0 %v20319_v0, %s11249_s16 }
 0x75a   :  { %8529 = vmatmul.f32.vlgmr.msra.gmra.mxu0 %v8417_v33  ;;  %8245 = vrot.lane.b32.xlu2 %v7803_v39, %s11251_s20  ;;  %v7789_v33 = vld [vmem:[#allocation2 + $0x447] sm:$0xff] }
 0x75b   :  { %v8164_v12 = vpop.permute.xlu1 %8163 }
 0x75c   :  { %v8418_v22 = vsel %vm1337_vm6, %v8402_v34, %v8164_v12  ;;  %v8434_v45 = vsel %vm1354_vm8, %v8164_v12, %v19276_v40  ;;  %v11082_v40 = vpack.i.bf16 %v7804_v27, %v7803_v39  ;;  %v7683_v39 = vld [vmem:[#allocation2 + $0x36f] sm:$0xff] }
 0x75d   :  { %v19359_v56 = vpop.permute.xlu2 %8231  ;;  %v8290_v58 = vpop.permute.xlu0 %8289  ;;  %v8340_v0 = vsel %vm49_vm1, %v7683_v39, %v10921_v10 }
 0x75e   :  { %v8449_v50 = vsel %vm1371_vm10, %v8433_v2, %v8290_v58 }
 0x75f   :  { %9435 = vmatmul.msk.f32.gmra.mxu3 %vm1388_vm9, %v19152_v29  ;;  %9455 = vmatmul.msk.f32.vlgmr.msra.gmra.mxu1 %vm1388_vm9, %v8449_v50  ;;  %v19374_v29 = vpop.f32.mrf.mxu2 }
 0x760   :  { %8183 = vrot.lane.b32.xlu1 %v19366_v28, %s11250_s22 }
 0x761   :  { %8309 = vrot.lane.b32.xlu0 %v7819_v14, %s11252_s25  ;;  %v7821_v14 = vld [vmem:[#allocation2 + $0x449] sm:$0xff] }
 0x762   :  { %8532 = vmatmul.f32.gmra.mxu0 %v8418_v22  ;;  %8247 = vrot.lane.b32.xlu2 %v7804_v27, %s11251_s20  ;;  %v7790_v22 = vld [vmem:[#allocation2 + $0x44f] sm:$0xff] }
 0x763   :  { %v11004_v5 = vpop.permute.xlu1 %11003  ;;  %v7806_v27 = vld [vmem:[#allocation2 + $0x450] sm:$0xff]  ;;  %v11097_v42 = vpack.i.bf16 %v7790_v22, %v7789_v33 }
 0x764   :  { %v11005_v19 = vunpack.i.l.bf16 %v11004_v5  ;;  %v11006_v13 = vunpack.i.h.bf16 %v11004_v5 }
 0x765   :  { %v19378_v52 = vpop.permute.xlu2 %11023  ;;  %v8292_v1 = vpop.permute.xlu0 %8291 }
 0x766   :  { %v8450_v37 = vsel %vm1371_vm10, %v8434_v45, %v8292_v1 }
 0x767   :  { %9436 = vmatmul.msk.f32.gmra.mxu3 %vm1388_vm9, %v19155_v44  ;;  %9456 = vmatmul.msk.f32.gmra.mxu1 %vm1388_vm9, %v8450_v37  ;;  %v8371_v44 = vsel %vm1287_vm4, %v8355_v36, %v11005_v19  ;;  %v19398_v43 = vpop.f32.mrf.mxu2 }
 0x768   :  { %11078 = vrot.lane.b32.xlu1 %v11077_v9, %s11247_s24  ;;  %v8387_v47 = vsel %vm279_vm0, %v8371_v44, %v11010_v38 }
 0x769   :  { %8311 = vrot.lane.b32.xlu0 %v7820_v4, %s11252_s25  ;;  %v11025_v4 = vunpack.i.l.bf16 %v19378_v52 }
 0x76a   :  { %11083 = vrot.lane.b32.xlu2 %v11082_v40, %s11248_s11  ;;  %v7822_v40 = vld [vmem:[#allocation2 + $0x451] sm:$0xff] }
 0x76b   :  { %v8166_v53 = vpop.permute.xlu1 %8165 }
 0x76c   :  { %v8435_v32 = vsel %vm1354_vm8, %v8166_v53, %v19335_v26 }
 0x76d   :  { %v19395_v25 = vpop.permute.xlu2 %8233  ;;  %v11014_v48 = vpop.permute.xlu0 %11013 }
 0x76e   :  { %v11015_v7 = vunpack.i.l.bf16 %v11014_v48  ;;  %v11016_v51 = vunpack.i.h.bf16 %v11014_v48 }
 0x76f   :  { %9437 = vmatmul.msk.f32.gmra.mxu3 %vm1388_vm9, %v19079_v57  ;;  %v8356_v57 = vsel %vm1270_vm2, %v8340_v0, %v10961_v11  ;;  %v19425_v34 = vpop.f32.mrf.mxu2  ;;  %v7791_v11 = vld [vmem:[#allocation2 + $0x467] sm:$0xff] }
 0x770   :  { %v8403_v15 = vsel %vm1320_vm5, %v8387_v47, %v11015_v7  ;;  %8185 = vrot.lane.b32.xlu1 %v7789_v33, %s11250_s22  ;;  %v8372_v20 = vsel %vm1287_vm4, %v8356_v57, %v11006_v13  ;;  %v9440_v57 = vld [vmem:[%s19713_s0 + $0x1d1] sm:$0xff] }
 0x771   :  { %v8419_v62 = vsel %vm1337_vm6, %v8403_v15, %v8166_v53  ;;  %11088 = vrot.lane.b32.xlu0 %v11087_v18, %s11249_s16  ;;  %v8388_v55 = vsel %vm279_vm0, %v8372_v20, %v11011_v23  ;;  %v11107_v53 = vpack.i.bf16 %v7822_v40, %v7821_v14  ;;  %v11102_v15 = vpack.i.bf16 %v7806_v27, %v19406_v60 }
 0x772   :  { %8535 = vmatmul.f32.gmra.mxu0 %v8419_v62  ;;  %8249 = vrot.lane.b32.xlu2 %v19406_v60, %s11251_s20  ;;  %v8404_v31 = vsel %vm1320_vm5, %v8388_v55, %v11016_v51  ;;  %v11026_v60 = vunpack.i.h.bf16 %v19378_v52 }
 0x773   :  { %v8168_v12 = vpop.permute.xlu1 %8167 }
 0x774   :  { %v8420_v26 = vsel %vm1337_vm6, %v8404_v31, %v8168_v12  ;;  %v7807_v31 = vld [vmem:[#allocation2 + $0x468] sm:$0xff] }
 0x775   :  { %v19418_v2 = vpop.permute.xlu2 %8235  ;;  %v8294_v58 = vpop.permute.xlu0 %8293 }
 0x776   :  { %v8451_v50 = vsel %vm1371_vm10, %v8435_v32, %v8294_v58  ;;  %v7823_v58 = vld [vmem:[#allocation2 + $0x469] sm:$0xff] }
 0x777   :  { %9438 = vmatmul.msk.f32.gmra.mxu3 %vm1388_vm9, %v19174_v8  ;;  %9457 = vmatmul.msk.f32.gmra.mxu1 %vm1388_vm9, %v8451_v50  ;;  %v8436_v8 = vsel %vm1354_vm8, %v8168_v12, %v19359_v56  ;;  %v19439_v9 = vpop.f32.mrf.mxu2  ;;  %v7792_v12 = vld [vmem:[#allocation2 + $0x46f] sm:$0xff] }
 0x778   :  { %8187 = vrot.lane.b32.xlu1 %v7790_v22, %s11250_s22 }
 0x779   :  { %8313 = vrot.lane.b32.xlu0 %v7821_v14, %s11252_s25 }
 0x77a   :  { %8538 = vmatmul.f32.gmra.mxu0 %v8420_v26  ;;  %8251 = vrot.lane.b32.xlu2 %v7806_v27, %s11251_s20  ;;  %v9441_v27 = vld [vmem:[%s19713_s0 + $0x1e1] sm:$0xff] }
 0x77b   :  { %v11019_v37 = vpop.permute.xlu1 %11018 }
 0x77c   :  { %v11020_v5 = vunpack.i.l.bf16 %v11019_v37  ;;  %v11021_v47 = vunpack.i.h.bf16 %v11019_v37 }
 0x77d   :  { %v19434_v45 = vpop.permute.xlu2 %11038  ;;  %v8296_v1 = vpop.permute.xlu0 %8295 }
 0x77e   :  { %v8452_v3 = vsel %vm1371_vm10, %v8436_v8, %v8296_v1  ;;  %v8373_v17 = vsel %vm1287_vm4, %v19220_v21, %v11020_v5 }
 0x77f   :  { %9458 = vmatmul.msk.f32.gmra.mxu1 %vm1388_vm9, %v8452_v3  ;;  %v7513_v62 = vpop.f32.mrf.mxu2 }
 0x780   :  { %11093 = vrot.lane.b32.xlu1 %v11087_v18, %s11246_s26  ;;  %v8374_v18 = vsel %vm1287_vm4, %v19223_v24, %v11021_v47 }
 0x781   :  { %8315 = vrot.lane.b32.xlu0 %v7822_v40, %s11252_s25  ;;  %v8390_v24 = vsel %vm279_vm0, %v8374_v18, %v11026_v60  ;;  %v7808_v40 = vld [vmem:[#allocation2 + $0x470] sm:$0xff]  ;;  %v11041_v18 = vunpack.i.h.bf16 %v19434_v45 }
 0x782   :  { %v7566_v19 = vpop.f32.mrf.mxu3  ;;  %11098 = vrot.lane.b32.xlu2 %v11097_v42, %s11247_s24  ;;  %v7824_v42 = vld [vmem:[#allocation2 + $0x471] sm:$0xff] }
 0x783   :  { %v7567_v56 = vadd.f32 %v7566_v19, %v19374_v29  ;;  %v8170_v48 = vpop.permute.xlu1 %8169  ;;  %v8389_v29 = vsel %vm279_vm0, %v8373_v17, %v11025_v4  ;;  %v9442_v4 = vld [vmem:[%s19713_s0 + $0x1e9] sm:$0xff] }
 0x784   :  { %v8437_v20 = vsel %vm1354_vm8, %v8170_v48, %v19395_v25 }
 0x785   :  { %v7630_v36 = vmax.f32 %v7567_v56, 0.0  ;;  %v11029_v44 = vpop.permute.xlu0 %11028  ;;  %v19450_v7 = vpop.permute.xlu2 %8237 }
 0x786   :  { %v11030_v38 = vunpack.i.l.bf16 %v11029_v44  ;;  %v11031_v0 = vunpack.i.h.bf16 %v11029_v44 }
 0x787   :  { %v7646_v10 = vadd.f32 %v9439_v30, %v7630_v36  ;;  %v7516_v3 = vpop.f32.mrf.mxu2  ;;  %v11040_v36 = vunpack.i.l.bf16 %v19434_v45 }
 0x788   :  { %v8405_v21 = vsel %vm1320_vm5, %v8389_v29, %v11030_v38  ;;  %11108 = vrot.lane.b32.xlu1 %v11107_v53, %s11249_s16  ;;  %v8406_v55 = vsel %vm1320_vm5, %v8390_v24, %v11031_v0 }
 0x789   :  { %7663 = vst.msk [vmem:[#allocation3 + $0x100] sm:$0xff] %vm49_vm1, %v7646_v10  ;;  %v8421_v13 = vsel %vm1337_vm6, %v8405_v21, %v8170_v48  ;;  %11103 = vrot.lane.b32.xlu0 %v11102_v15, %s11248_s11  ;;  %s11254_s11 = smov [#allocation3]  }
 0x78a   :  { %v7569_v33 = vpop.f32.mrf.mxu3  ;;  %8541 = vmatmul.f32.gmra.mxu0 %v8421_v13  ;;  %8189 = vrot.lane.b32.xlu2 %v7791_v11, %s11250_s22  ;;  %s8714_s16 = sshll.u32 %s11254_s11, 4  ;;  %s8715_s16 = int_to_ptr.vmem [resolvable:$true] %s8714_s16 }
 0x78b   :  { %v7570_v39 = vadd.f32 %v7569_v33, %v19398_v43  ;;  %v8172_v32 = vpop.permute.xlu1 %8171 }
 0x78c   :  { %v8422_v25 = vsel %vm1337_vm6, %v8406_v55, %v8172_v32  ;;  %v8438_v14 = vsel %vm1354_vm8, %v8172_v32, %v19418_v2 }
 0x78d   :  { %v7631_v51 = vmax.f32 %v7570_v39, 0.0  ;;  %v8298_v23 = vpop.permute.xlu0 %8297  ;;  %v19474_v52 = vpop.permute.xlu2 %8239  ;;  %v9443_v39 = vld [vmem:[%s19713_s0 + $0x1f9] sm:$0xff] }
 0x78e   :  { %v8453_v43 = vsel %vm1371_vm10, %v8437_v20, %v8298_v23 }
 0x78f   :  { %v7647_v50 = vadd.f32 %v9440_v57, %v7631_v51  ;;  %9459 = vmatmul.msk.f32.gmra.mxu1 %vm1388_vm9, %v8453_v43  ;;  %v7519_v11 = vpop.f32.mrf.mxu2 }
 0x790   :  { %8317 = vrot.lane.b32.xlu1 %v7823_v58, %s11252_s25 }
 0x791   :  { %7664 = vst.msk [vmem:[#allocation3 + $0x108] sm:$0xff] %vm49_vm1, %v7647_v50  ;;  %8253 = vrot.lane.b32.xlu0 %v7807_v31, %s11251_s20  ;;  %v9444_v50 = vld [vmem:[%s19713_s0 + $0x201] sm:$0xff] }
 0x792   :  { %v7572_v22 = vpop.f32.mrf.mxu3  ;;  %8544 = vmatmul.f32.gmra.mxu0 %v8422_v25  ;;  %8191 = vrot.lane.b32.xlu2 %v7792_v12, %s11250_s22 }
 0x793   :  { %v7573_v26 = vadd.f32 %v7572_v22, %v19425_v34  ;;  %v11034_v5 = vpop.permute.xlu1 %11033 }
 0x794   :  { %v11035_v34 = vunpack.i.l.bf16 %v11034_v5 }
 0x795   :  { %v7632_v8 = vmax.f32 %v7573_v26, 0.0  ;;  %v8300_v1 = vpop.permute.xlu0 %8299  ;;  %v19490_v17 = vpop.permute.xlu2 %11053 }
 0x796   :  { %v8454_v37 = vsel %vm1371_vm10, %v8438_v14, %v8300_v1  ;;  %v8375_v30 = vsel %vm1287_vm4, %v19291_v16, %v11035_v34 }
 0x797   :  { %v7648_v19 = vadd.f32 %v9441_v27, %v7632_v8  ;;  %9460 = vmatmul.msk.f32.gmra.mxu1 %vm1388_vm9, %v8454_v37  ;;  %v8391_v53 = vsel %vm279_vm0, %v8375_v30, %v11040_v36  ;;  %v7522_v32 = vpop.f32.mrf.mxu2  ;;  %v11055_v37 = vunpack.i.l.bf16 %v19490_v17 }
 0x798   :  { %8319 = vrot.lane.b32.xlu1 %v7824_v42, %s11252_s25 }
 0x799   :  { %7665 = vst.msk [vmem:[#allocation3 + $0x110] sm:$0xff] %vm49_vm1, %v7648_v19  ;;  %8255 = vrot.lane.b32.xlu0 %v7808_v40, %s11251_s20  ;;  %s8716_s20 = sshll.u32 %s19721_s8, 4  ;;  %s8717_s20 = int_to_ptr.hbm [resolvable:$true] %s8716_s20 }
 0x79a   :  { %v7575_v56 = vpop.f32.mrf.mxu3 }
 0x79b   :  { %v7576_v2 = vadd.f32 %v7575_v56, %v19439_v9  ;;  %v8174_v10 = vpop.permute.xlu1 %8173  ;;  %v11036_v9 = vunpack.i.h.bf16 %v11034_v5 }
 0x79c   :  { %v8439_v57 = vsel %vm1354_vm8, %v8174_v10, %v19450_v7 }
 0x79d   :  { %v7633_v44 = vmax.f32 %v7576_v2, 0.0  ;;  %v11044_v38 = vpop.permute.xlu0 %11043  ;;  %v8376_v15 = vsel %vm1287_vm4, %v19294_v41, %v11036_v9  ;;  %v8242_v0 = vpop.permute.xlu2 %8241 }
 0x79e   :  { %v11045_v48 = vunpack.i.l.bf16 %v11044_v38  ;;  %v11046_v33 = vunpack.i.h.bf16 %v11044_v38  ;;  %v8392_v41 = vsel %vm279_vm0, %v8376_v15, %v11041_v18 }
 0x79f   :  { %v7649_v29 = vadd.f32 %v9442_v4, %v7633_v44  ;;  %v7525_v1 = vpop.f32.mrf.mxu2 }
 0x7a0   :  { %v8407_v47 = vsel %vm1320_vm5, %v8391_v53, %v11045_v48  ;;  %v8408_v43 = vsel %vm1320_vm5, %v8392_v41, %v11046_v33 }
 0x7a1   :  { %7666 = vst.msk [vmem:[#allocation3 + $0x118] sm:$0xff] %vm49_vm1, %v7649_v29  ;;  %v8423_v16 = vsel %vm1337_vm6, %v8407_v47, %v8174_v10  ;;  %v9446_v10 = vld [vmem:[%s19713_s0 + $0x219] sm:$0xff]  ;;  %v11056_v29 = vunpack.i.h.bf16 %v19490_v17 }
 0x7a2   :  { %v7578_v21 = vpop.f32.mrf.mxu3  ;;  %8547 = vmatmul.f32.gmra.mxu0 %v8423_v16 }
 0x7a3   :  { %v7579_v13 = vadd.f32 %v7578_v21, %v7513_v62  ;;  %v8176_v23 = vpop.permute.xlu1 %8175 }
 0x7a4   :  { %v8424_v45 = vsel %vm1337_vm6, %v8408_v43, %v8176_v23  ;;  %v8440_v24 = vsel %vm1354_vm8, %v8176_v23, %v19474_v52  ;;  %v9445_v52 = vld [vmem:[%s19713_s0 + $0x211] sm:$0xff] }
 0x7a5   :  { %v7634_v60 = vmax.f32 %v7579_v13, 0.0  ;;  %v8302_v20 = vpop.permute.xlu0 %8301  ;;  %v8244_v22 = vpop.permute.xlu2 %8243 }
 0x7a6   :  { %v8455_v51 = vsel %vm1371_vm10, %v8439_v57, %v8302_v20 }
 0x7a7   :  { %v7650_v62 = vadd.f32 %v9443_v39, %v7634_v60  ;;  %9461 = vmatmul.msk.f32.gmra.mxu1 %vm1388_vm9, %v8455_v51  ;;  %v7528_v47 = vpop.f32.mrf.mxu2 }
 0x7a9   :  { %7667 = vst.msk [vmem:[#allocation3 + $0x120] sm:$0xff] %vm49_vm1, %v7650_v62 }
 0x7aa   :  { %v7581_v58 = vpop.f32.mrf.mxu3  ;;  %8550 = vmatmul.f32.gmra.mxu0 %v8424_v45 }
 0x7ab   :  { %v7582_v7 = vadd.f32 %v7581_v58, %v7516_v3  ;;  %v11049_v25 = vpop.permute.xlu1 %11048 }
 0x7ac   :  { %v11050_v27 = vunpack.i.l.bf16 %v11049_v25  ;;  %v11051_v2 = vunpack.i.h.bf16 %v11049_v25 }
 0x7ad   :  { %v7635_v12 = vmax.f32 %v7582_v7, 0.0  ;;  %v8304_v55 = vpop.permute.xlu0 %8303  ;;  %v19534_v4 = vpop.permute.xlu2 %11068  ;;  %v9448_v7 = vld [vmem:[%s19713_s0 + $0x231] sm:$0xff] }
 0x7ae   :  { %v8456_v31 = vsel %vm1371_vm10, %v8440_v24, %v8304_v55  ;;  %v8377_v3 = vsel %vm1287_vm4, %v19300_v49, %v11050_v27  ;;  %v8378_v38 = vsel %vm1287_vm4, %v19297_v59, %v11051_v2 }
 0x7af   :  { %v7651_v26 = vadd.f32 %v9444_v50, %v7635_v12  ;;  %9462 = vmatmul.msk.f32.gmra.mxu1 %vm1388_vm9, %v8456_v31  ;;  %v8393_v56 = vsel %vm279_vm0, %v8377_v3, %v11055_v37  ;;  %v8394_v59 = vsel %vm279_vm0, %v8378_v38, %v11056_v29  ;;  %v7531_v41 = vpop.f32.mrf.mxu2  ;;  %v11070_v50 = vunpack.i.l.bf16 %v19534_v4  ;;  %v9450_v29 = vld [vmem:[%s19713_s0 + $0x249] sm:$0xff] }
 0x7b1   :  { %7668 = vst.msk [vmem:[#allocation3 + $0x128] sm:$0xff] %vm49_vm1, %v7651_v26 }
 0x7b2   :  { %v7584_v14 = vpop.f32.mrf.mxu3 }
 0x7b3   :  { %v7585_v8 = vadd.f32 %v7584_v14, %v7519_v11  ;;  %v8178_v34 = vpop.permute.xlu1 %8177 }
 0x7b4   :  { %v8441_v53 = vsel %vm1354_vm8, %v8178_v34, %v8242_v0  ;;  %v9447_v0 = vld [vmem:[%s19713_s0 + $0x229] sm:$0xff] }
 0x7b5   :  { %v7636_v5 = vmax.f32 %v7585_v8, 0.0  ;;  %v11059_v42 = vpop.permute.xlu0 %11058  ;;  %v8246_v39 = vpop.permute.xlu2 %8245 }
 0x7b6   :  { %v11060_v19 = vunpack.i.l.bf16 %v11059_v42  ;;  %v11061_v48 = vunpack.i.h.bf16 %v11059_v42  ;;  %v11071_v42 = vunpack.i.h.bf16 %v19534_v4 }
 0x7b7   :  { %v7652_v40 = vadd.f32 %v9445_v52, %v7636_v5  ;;  %v7534_v8 = vpop.f32.mrf.mxu2  ;;  %v9449_v5 = vld [vmem:[%s19713_s0 + $0x241] sm:$0xff] }
 0x7b8   :  { %v8409_v30 = vsel %vm1320_vm5, %v8393_v56, %v11060_v19  ;;  %v8410_v15 = vsel %vm1320_vm5, %v8394_v59, %v11061_v48 }
 0x7b9   :  { %7669 = vst.msk [vmem:[#allocation3 + $0x130] sm:$0xff] %vm49_vm1, %v7652_v40  ;;  %v8425_v49 = vsel %vm1337_vm6, %v8409_v30, %v8178_v34 }
 0x7ba   :  { %v7587_v36 = vpop.f32.mrf.mxu3  ;;  %8553 = vmatmul.f32.gmra.mxu0 %v8425_v49 }
 0x7bb   :  { %v7588_v44 = vadd.f32 %v7587_v36, %v7522_v32  ;;  %v8180_v21 = vpop.permute.xlu1 %8179 }
 0x7bc   :  { %v8426_v33 = vsel %vm1337_vm6, %v8410_v15, %v8180_v21  ;;  %v8442_v57 = vsel %vm1354_vm8, %v8180_v21, %v8244_v22  ;;  %v9471_v21 = vld [vmem:[%s19713_s0 + $0x289] sm:$0xff] }
 0x7bd   :  { %v7637_v11 = vmax.f32 %v7588_v44, 0.0  ;;  %v8306_v9 = vpop.permute.xlu0 %8305  ;;  %v8248_v24 = vpop.permute.xlu2 %8247 }
 0x7be   :  { %v8457_v16 = vsel %vm1371_vm10, %v8441_v53, %v8306_v9 }
 0x7bf   :  { %v7653_v13 = vadd.f32 %v9446_v10, %v7637_v11  ;;  %9463 = vmatmul.msk.f32.gmra.mxu1 %vm1388_vm9, %v8457_v16  ;;  %v7537_v10 = vpop.f32.mrf.mxu2 }
 0x7c1   :  { %7670 = vst.msk [vmem:[#allocation3 + $0x138] sm:$0xff] %vm49_vm1, %v7653_v13 }
 0x7c2   :  { %v7590_v17 = vpop.f32.mrf.mxu3  ;;  %8556 = vmatmul.f32.gmra.mxu0 %v8426_v33 }
 0x7c3   :  { %v7591_v18 = vadd.f32 %v7590_v17, %v7525_v1  ;;  %v11064_v23 = vpop.permute.xlu1 %11063 }
 0x7c4   :  { %v11065_v43 = vunpack.i.l.bf16 %v11064_v23  ;;  %v11066_v27 = vunpack.i.h.bf16 %v11064_v23 }
 0x7c5   :  { %v7638_v60 = vmax.f32 %v7591_v18, 0.0  ;;  %v8308_v20 = vpop.permute.xlu0 %8307  ;;  %v19576_v30 = vpop.permute.xlu2 %11083 }
 0x7c6   :  { %v8458_v51 = vsel %vm1371_vm10, %v8442_v57, %v8308_v20  ;;  %v8379_v58 = vsel %vm1287_vm4, %v19252_v35, %v11065_v43  ;;  %v8380_v52 = vsel %vm1287_vm4, %v19255_v54, %v11066_v27 }
 0x7c7   :  { %v7654_v62 = vadd.f32 %v9447_v0, %v7638_v60  ;;  %9464 = vmatmul.msk.f32.gmra.mxu1 %vm1388_vm9, %v8458_v51  ;;  %v8395_v26 = vsel %vm279_vm0, %v8379_v58, %v11070_v50  ;;  %v8396_v54 = vsel %vm279_vm0, %v8380_v52, %v11071_v42  ;;  %v9451_v51 = vld [vmem:[%s19713_s0 + $0x259] sm:$0xff]  ;;  %v9472_v58 = vld [vmem:[%s19713_s0 + $0x291] sm:$0xff] }
 0x7c9   :  { %7671 = vst.msk [vmem:[#allocation3 + $0x140] sm:$0xff] %vm49_vm1, %v7654_v62  ;;  %v11085_v62 = vunpack.i.l.bf16 %v19576_v30 }
 0x7ca   :  { %v7593_v45 = vpop.f32.mrf.mxu3 }
 0x7cb   :  { %v7594_v32 = vadd.f32 %v7593_v45, %v7528_v47  ;;  %v8182_v25 = vpop.permute.xlu1 %8181 }
 0x7cc   :  { %v8443_v19 = vsel %vm1354_vm8, %v8182_v25, %v8246_v39 }
 0x7cd   :  { %v7639_v12 = vmax.f32 %v7594_v32, 0.0  ;;  %v11074_v55 = vpop.permute.xlu0 %11073  ;;  %v8250_v39 = vpop.permute.xlu2 %8249 }
 0x7ce   :  { %v11075_v31 = vunpack.i.l.bf16 %v11074_v55  ;;  %v11076_v37 = vunpack.i.h.bf16 %v11074_v55  ;;  %v7540_v32 = vpop.f32.mrf.mxu2 }
 0x7cf   :  { %v7655_v22 = vadd.f32 %v9448_v7, %v7639_v12 }
 0x7d0   :  { %v8411_v14 = vsel %vm1320_vm5, %v8395_v26, %v11075_v31  ;;  %v8412_v36 = vsel %vm1320_vm5, %v8396_v54, %v11076_v37 }
 0x7d1   :  { %7672 = vst.msk [vmem:[#allocation3 + $0x148] sm:$0xff] %vm49_vm1, %v7655_v22  ;;  %v8427_v35 = vsel %vm1337_vm6, %v8411_v14, %v8182_v25 }
 0x7d2   :  { %v7596_v1 = vpop.f32.mrf.mxu3  ;;  %8559 = vmatmul.f32.gmra.mxu0 %v8427_v35 }
 0x7d3   :  { %v7597_v3 = vadd.f32 %v7596_v1, %v7531_v41  ;;  %v8184_v2 = vpop.permute.xlu1 %8183  ;;  %v9452_v1 = vld [vmem:[%s19713_s0 + $0x261] sm:$0xff] }
 0x7d4   :  { %v8428_v4 = vsel %vm1337_vm6, %v8412_v36, %v8184_v2  ;;  %v8444_v11 = vsel %vm1354_vm8, %v8184_v2, %v8248_v24  ;;  %v9453_v36 = vld [vmem:[%s19713_s0 + $0x271] sm:$0xff] }
 0x7d5   :  { %v7640_v34 = vmax.f32 %v7597_v3, 0.0  ;;  %v8310_v40 = vpop.permute.xlu0 %8309  ;;  %v8252_v27 = vpop.permute.xlu2 %8251  ;;  %v11086_v3 = vunpack.i.h.bf16 %v19576_v30 }
 0x7d6   :  { %v8459_v56 = vsel %vm1371_vm10, %v8443_v19, %v8310_v40 }
 0x7d7   :  { %v7656_v49 = vadd.f32 %v9449_v5, %v7640_v34  ;;  %9465 = vmatmul.msk.f32.gmra.mxu1 %vm1388_vm9, %v8459_v56  ;;  %v8530_v44 = vpop.f32.mrf.mxu0 }
 0x7d9   :  { %7673 = vst.msk [vmem:[#allocation3 + $0x150] sm:$0xff] %vm49_vm1, %v7656_v49 }
 0x7da   :  { %v7599_v38 = vpop.f32.mrf.mxu3  ;;  %8562 = vmatmul.f32.gmra.mxu0 %v8428_v4 }
 0x7db   :  { %v7600_v48 = vadd.f32 %v7599_v38, %v7534_v8  ;;  %v11079_v59 = vpop.permute.xlu1 %11078 }
 0x7dc   :  { %v8595_v53 = vpop.f32.mrf.mxu1  ;;  %v11080_v17 = vunpack.i.l.bf16 %v11079_v59  ;;  %v11081_v55 = vunpack.i.h.bf16 %v11079_v59 }
 0x7dd   :  { %v7641_v9 = vmax.f32 %v7600_v48, 0.0  ;;  %v8596_v47 = vadd.f32 %v8595_v53, %v8530_v44  ;;  %v8312_v16 = vpop.permute.xlu0 %8311  ;;  %v11099_v44 = vpop.permute.xlu2 %11098  ;;  %v9473_v53 = vld [vmem:[%s19713_s0 + $0x2a1] sm:$0xff] }
 0x7de   :  { %v8460_v13 = vsel %vm1371_vm10, %v8444_v11, %v8312_v16  ;;  %v8381_v60 = vsel %vm1287_vm4, %v19322_v46, %v11080_v17  ;;  %v8382_v35 = vsel %vm1287_vm4, %v19325_v6, %v11081_v55  ;;  %v7543_v6 = vpop.f32.mrf.mxu2 }
 0x7df   :  { %v7657_v15 = vadd.f32 %v9450_v29, %v7641_v9  ;;  %v8659_v33 = vmax.f32 %v8596_v47, 0.0  ;;  %9466 = vmatmul.msk.f32.gmra.mxu1 %vm1388_vm9, %v8460_v13  ;;  %v8533_v20 = vpop.f32.mrf.mxu0  ;;  %v8397_v12 = vsel %vm279_vm0, %v8381_v60, %v11085_v62  ;;  %v8398_v40 = vsel %vm279_vm0, %v8382_v35, %v11086_v3 }
 0x7e0   :  { %v10950_v47 = vunpack.i.l.bf16 %v19144_v61 }
 0x7e1   :  { %7674 = vst.msk [vmem:[#allocation3 + $0x158] sm:$0xff] %vm49_vm1, %v7657_v15  ;;  %v8675_v18 = vadd.f32 %v9471_v21, %v8659_v33  ;;  %v10951_v15 = vunpack.i.h.bf16 %v19144_v61 }
 0x7e2   :  { %v7602_v0 = vpop.f32.mrf.mxu3 }
 0x7e3   :  { %8692 = vst.msk [vmem:[#allocation3 + $0x180] sm:$0xff] %vm49_vm1, %v8675_v18  ;;  %v7603_v57 = vadd.f32 %v7602_v0, %v7537_v10  ;;  %v8186_v50 = vpop.permute.xlu1 %8185 }
 0x7e4   :  { %v8598_v23 = vpop.f32.mrf.mxu1  ;;  %v8445_v52 = vsel %vm1354_vm8, %v8186_v50, %v8250_v39  ;;  %v8351_v39 = vsel %vm49_vm1, %v19344_v63, %v10950_v47  ;;  %v8352_v63 = vsel %vm49_vm1, %v19366_v28, %v10951_v15  ;;  %v9477_v47 = vld [vmem:[%s19713_s0 + $0x2d1] sm:$0xff] }
 0x7e5   :  { %v7642_v41 = vmax.f32 %v7603_v57, 0.0  ;;  %v8599_v43 = vadd.f32 %v8598_v23, %v8533_v20  ;;  %v11089_v45 = vpop.permute.xlu0 %11088  ;;  %v9454_v20 = vld [vmem:[%s19713_s0 + $0x279] sm:$0xff]  ;;  %v11100_v23 = vunpack.i.l.bf16 %v11099_v44  ;;  %v8190_v62 = vpop.permute.xlu2 %8189 }
 0x7e6   :  { %v11090_v7 = vunpack.i.l.bf16 %v11089_v45  ;;  %v11091_v8 = vunpack.i.h.bf16 %v11089_v45  ;;  %v7546_v33 = vpop.f32.mrf.mxu2  ;;  %v9474_v45 = vld [vmem:[%s19713_s0 + $0x2a9] sm:$0xff] }
 0x7e7   :  { %v7658_v24 = vadd.f32 %v9451_v51, %v7642_v41  ;;  %v8660_v46 = vmax.f32 %v8599_v43, 0.0 }
 0x7e8   :  { %v8413_v31 = vsel %vm1320_vm5, %v8397_v12, %v11090_v7  ;;  %v8414_v56 = vsel %vm1320_vm5, %v8398_v40, %v11091_v8 }
 0x7e9   :  { %7675 = vst.msk [vmem:[#allocation3 + $0x160] sm:$0xff] %vm49_vm1, %v7658_v24  ;;  %v8676_v25 = vadd.f32 %v9472_v58, %v8660_v46  ;;  %v8429_v22 = vsel %vm1337_vm6, %v8413_v31, %v8186_v50 }
 0x7ea   :  { %v7605_v26 = vpop.f32.mrf.mxu3  ;;  %8565 = vmatmul.f32.gmra.mxu0 %v8429_v22 }
 0x7eb   :  { %8693 = vst.msk [vmem:[#allocation3 + $0x188] sm:$0xff] %vm49_vm1, %v8676_v25  ;;  %v7606_v14 = vadd.f32 %v7605_v26, %v7540_v32  ;;  %v8188_v19 = vpop.permute.xlu1 %8187  ;;  %v11101_v25 = vunpack.i.h.bf16 %v11099_v44 }
 0x7ec   :  { %v8430_v2 = vsel %vm1337_vm6, %v8414_v56, %v8188_v19  ;;  %v8446_v38 = vsel %vm1354_vm8, %v8188_v19, %v8252_v27  ;;  %v9475_v56 = vld [vmem:[%s19713_s0 + $0x2b9] sm:$0xff] }
 0x7ed   :  { %v7643_v37 = vmax.f32 %v7606_v14, 0.0  ;;  %v8314_v5 = vpop.permute.xlu0 %8313 }
 0x7ee   :  { %v8461_v42 = vsel %vm1371_vm10, %v8445_v52, %v8314_v5  ;;  %v8192_v52 = vpop.permute.xlu2 %8191 }
 0x7ef   :  { %v7659_v34 = vadd.f32 %v9452_v1, %v7643_v37  ;;  %9467 = vmatmul.msk.f32.gmra.mxu1 %vm1388_vm9, %v8461_v42  ;;  %v8536_v30 = vpop.f32.mrf.mxu0 }
 0x7f1   :  { %7676 = vst.msk [vmem:[#allocation3 + $0x168] sm:$0xff] %vm49_vm1, %v7659_v34 }
 0x7f2   :  { %v7608_v49 = vpop.f32.mrf.mxu3  ;;  %8568 = vmatmul.f32.gmra.mxu0 %v8430_v2 }
 0x7f3   :  { %v7609_v54 = vadd.f32 %v7608_v49, %v7543_v6  ;;  %v11094_v9 = vpop.permute.xlu1 %11093 }
 0x7f4   :  { %v8601_v4 = vpop.f32.mrf.mxu1  ;;  %v11095_v13 = vunpack.i.l.bf16 %v11094_v9  ;;  %v11096_v0 = vunpack.i.h.bf16 %v11094_v9 }
 0x7f5   :  { %v7644_v48 = vmax.f32 %v7609_v54, 0.0  ;;  %v8602_v10 = vadd.f32 %v8601_v4, %v8536_v30  ;;  %v8316_v29 = vpop.permute.xlu0 %8315 }
 0x7f6   :  { %v8462_v11 = vsel %vm1371_vm10, %v8446_v38, %v8316_v29  ;;  %v8367_v57 = vsel %vm1270_vm2, %v8351_v39, %v11095_v13  ;;  %v8368_v12 = vsel %vm1270_vm2, %v8352_v63, %v11096_v0 }
 0x7f7   :  { %v7660_v16 = vadd.f32 %v9453_v36, %v7644_v48  ;;  %v8661_v21 = vmax.f32 %v8602_v10, 0.0  ;;  %9468 = vmatmul.msk.f32.gmra.mxu1 %vm1388_vm9, %v8462_v11  ;;  %v8539_v60 = vpop.f32.mrf.mxu0  ;;  %v8383_v46 = vsel %vm1287_vm4, %v8367_v57, %v11100_v23  ;;  %v8384_v14 = vsel %vm1287_vm4, %v8368_v12, %v11101_v25  ;;  %v9476_v48 = vld [vmem:[%s19713_s0 + $0x2c1] sm:$0xff] }
 0x7f9   :  { %7677 = vst.msk [vmem:[#allocation3 + $0x170] sm:$0xff] %vm49_vm1, %v7660_v16  ;;  %v8677_v59 = vadd.f32 %v9473_v53, %v8661_v21 }
 0x7fa   :  { %v7611_v17 = vpop.f32.mrf.mxu3 }
 0x7fb   :  { %8694 = vst.msk [vmem:[#allocation3 + $0x190] sm:$0xff] %vm49_vm1, %v8677_v59  ;;  %v7612_v18 = vadd.f32 %v7611_v17, %v7546_v33  ;;  %v11109_v58 = vpop.permute.xlu1 %11108  ;;  %v9478_v33 = vld [vmem:[%s19713_s0 + $0x2d9] sm:$0xff] }
 0x7fc   :  { %v8604_v51 = vpop.f32.mrf.mxu1  ;;  %v11110_v24 = vunpack.i.l.bf16 %v11109_v58  ;;  %v11111_v27 = vunpack.i.h.bf16 %v11109_v58 }
 0x7fd   :  { %v7645_v61 = vmax.f32 %v7612_v18, 0.0  ;;  %v8605_v41 = vadd.f32 %v8604_v51, %v8539_v60  ;;  %v11104_v43 = vpop.permute.xlu0 %11103  ;;  %v9479_v60 = vld [vmem:[%s19713_s0 + $0x2e9] sm:$0xff] }
 0x7fe   :  { %v11105_v32 = vunpack.i.l.bf16 %v11104_v43  ;;  %v11106_v55 = vunpack.i.h.bf16 %v11104_v43 }
 0x7ff   :  { %v7661_v7 = vadd.f32 %v9454_v20, %v7645_v61  ;;  %v8662_v50 = vmax.f32 %v8605_v41, 0.0  ;;  %v9480_v41 = vld [vmem:[%s19713_s0 + $0x2f1] sm:$0xff] }
 0x800   :  { %v8399_v31 = vsel %vm279_vm0, %v8383_v46, %v11105_v32  ;;  %v8400_v35 = vsel %vm279_vm0, %v8384_v14, %v11106_v55  ;;  %v9483_v14 = vld [vmem:[%s19713_s0 + $0x319] sm:$0xff] }
 0x801   :  { %7678 = vst.msk [vmem:[#allocation3 + $0x178] sm:$0xff] %vm49_vm1, %v7661_v7  ;;  %v8678_v28 = vadd.f32 %v9474_v45, %v8662_v50  ;;  %v8415_v22 = vsel %vm1320_vm5, %v8399_v31, %v11110_v24  ;;  %v8416_v5 = vsel %vm1320_vm5, %v8400_v35, %v11111_v27  ;;  %v9481_v7 = vld [vmem:[%s19713_s0 + $0x301] sm:$0xff]  ;;  %v9482_v31 = vld [vmem:[%s19713_s0 + $0x309] sm:$0xff] }
 0x802   :  { %v8431_v26 = vsel %vm1337_vm6, %v8415_v22, %v8190_v62  ;;  %v8432_v19 = vsel %vm1337_vm6, %v8416_v5, %v8192_v52 }
 0x803   :  { %8695 = vst.msk [vmem:[#allocation3 + $0x198] sm:$0xff] %vm49_vm1, %v8678_v28  ;;  %8571 = vmatmul.f32.gmra.mxu0 %v8431_v26  ;;  %v8318_v3 = vpop.permute.xlu1 %8317 }
 0x805   :  { %v8254_v8 = vpop.permute.xlu0 %8253 }
 0x806   :  { %v8447_v1 = vsel %vm1354_vm8, %v8190_v62, %v8254_v8 }
 0x807   :  { %v8463_v37 = vsel %vm1371_vm10, %v8447_v1, %v8318_v3  ;;  %v8542_v42 = vpop.f32.mrf.mxu0 }
 0x808   :  { %9469 = vmatmul.msk.f32.gmra.mxu1 %vm1388_vm9, %v8463_v37  ;;  %v9484_v37 = vld [vmem:[%s19713_s0 + $0x321] sm:$0xff] }
 0x80b   :  { %8574 = vmatmul.f32.gmra.mxu0 %v8432_v19  ;;  %v8320_v30 = vpop.permute.xlu1 %8319 }
 0x80c   :  { %v8607_v34 = vpop.f32.mrf.mxu1 }
 0x80d   :  { %v8608_v40 = vadd.f32 %v8607_v34, %v8542_v42  ;;  %v8256_v6 = vpop.permute.xlu0 %8255 }
 0x80e   :  { %v8448_v2 = vsel %vm1354_vm8, %v8192_v52, %v8256_v6  ;;  %v9485_v6 = vld [vmem:[%s19713_s0 + $0x331] sm:$0xff] }
 0x80f   :  { %v8663_v49 = vmax.f32 %v8608_v40, 0.0  ;;  %v8464_v54 = vsel %vm1371_vm10, %v8448_v2, %v8320_v30  ;;  %v8545_v4 = vpop.f32.mrf.mxu0 }
 0x810   :  { %9470 = vmatmul.msk.f32.gmra.mxu1 %vm1388_vm9, %v8464_v54 }
 0x811   :  { %v8679_v36 = vadd.f32 %v9475_v56, %v8663_v49 }
 0x813   :  { %8696 = vst.msk [vmem:[#allocation3 + $0x1a0] sm:$0xff] %vm49_vm1, %v8679_v36  ;;  %v9486_v36 = vld [vmem:[%s19713_s0 + $0x339] sm:$0xff] }
 0x814   :  { %v8610_v44 = vpop.f32.mrf.mxu1 }
 0x815   :  { %v8611_v38 = vadd.f32 %v8610_v44, %v8545_v4 }
 0x817   :  { %v8664_v10 = vmax.f32 %v8611_v38, 0.0 }
 0x819   :  { %v8680_v29 = vadd.f32 %v9476_v48, %v8664_v10 }
 0x81b   :  { %8697 = vst.msk [vmem:[#allocation3 + $0x1a8] sm:$0xff] %vm49_vm1, %v8680_v29 }
 0x81f   :  { %v8548_v53 = vpop.f32.mrf.mxu0 }
 0x824   :  { %v8613_v11 = vpop.f32.mrf.mxu1 }
 0x825   :  { %v8614_v9 = vadd.f32 %v8613_v11, %v8548_v53 }
 0x827   :  { %v8665_v16 = vmax.f32 %v8614_v9, 0.0  ;;  %v8551_v13 = vpop.f32.mrf.mxu0 }
 0x829   :  { %v8681_v21 = vadd.f32 %v9477_v47, %v8665_v16 }
 0x82b   :  { %8698 = vst.msk [vmem:[#allocation3 + $0x1b0] sm:$0xff] %vm49_vm1, %v8681_v21 }
 0x82c   :  { %v8616_v59 = vpop.f32.mrf.mxu1 }
 0x82d   :  { %v8617_v15 = vadd.f32 %v8616_v59, %v8551_v13 }
 0x82f   :  { %v8666_v17 = vmax.f32 %v8617_v15, 0.0 }
 0x831   :  { %v8682_v39 = vadd.f32 %v9478_v33, %v8666_v17 }
 0x833   :  { %8699 = vst.msk [vmem:[#allocation3 + $0x1b8] sm:$0xff] %vm49_vm1, %v8682_v39 }
 0x837   :  { %v8554_v18 = vpop.f32.mrf.mxu0 }
 0x83c   :  { %v8619_v0 = vpop.f32.mrf.mxu1 }
 0x83d   :  { %v8620_v57 = vadd.f32 %v8619_v0, %v8554_v18 }
 0x83f   :  { %v8667_v20 = vmax.f32 %v8620_v57, 0.0  ;;  %v8557_v23 = vpop.f32.mrf.mxu0 }
 0x841   :  { %v8683_v51 = vadd.f32 %v9479_v60, %v8667_v20 }
 0x843   :  { %8700 = vst.msk [vmem:[#allocation3 + $0x1c0] sm:$0xff] %vm49_vm1, %v8683_v51 }
 0x844   :  { %v8622_v62 = vpop.f32.mrf.mxu1 }
 0x845   :  { %v8623_v61 = vadd.f32 %v8622_v62, %v8557_v23 }
 0x847   :  { %v8668_v43 = vmax.f32 %v8623_v61, 0.0 }
 0x849   :  { %v8684_v63 = vadd.f32 %v9480_v41, %v8668_v43 }
 0x84b   :  { %8701 = vst.msk [vmem:[#allocation3 + $0x1c8] sm:$0xff] %vm49_vm1, %v8684_v63 }
 0x84f   :  { %v8560_v45 = vpop.f32.mrf.mxu0 }
 0x854   :  { %v8625_v32 = vpop.f32.mrf.mxu1 }
 0x855   :  { %v8626_v58 = vadd.f32 %v8625_v32, %v8560_v45 }
 0x857   :  { %v8669_v50 = vmax.f32 %v8626_v58, 0.0  ;;  %v8563_v46 = vpop.f32.mrf.mxu0 }
 0x859   :  { %v8685_v24 = vadd.f32 %v9481_v7, %v8669_v50 }
 0x85b   :  { %8702 = vst.msk [vmem:[#allocation3 + $0x1d0] sm:$0xff] %vm49_vm1, %v8685_v24 }
 0x85c   :  { %v8628_v12 = vpop.f32.mrf.mxu1 }
 0x85d   :  { %v8629_v55 = vadd.f32 %v8628_v12, %v8563_v46 }
 0x85f   :  { %v8670_v25 = vmax.f32 %v8629_v55, 0.0 }
 0x861   :  { %v8686_v28 = vadd.f32 %v9482_v31, %v8670_v25 }
 0x863   :  { %8703 = vst.msk [vmem:[#allocation3 + $0x1d8] sm:$0xff] %vm49_vm1, %v8686_v28 }
 0x867   :  { %v8566_v22 = vpop.f32.mrf.mxu0 }
 0x86c   :  { %v8631_v26 = vpop.f32.mrf.mxu1 }
 0x86d   :  { %v8632_v27 = vadd.f32 %v8631_v26, %v8566_v22 }
 0x86f   :  { %v8671_v35 = vmax.f32 %v8632_v27, 0.0  ;;  %v8569_v1 = vpop.f32.mrf.mxu0 }
 0x871   :  { %v8687_v8 = vadd.f32 %v9483_v14, %v8671_v35 }
 0x873   :  { %8704 = vst.msk [vmem:[#allocation3 + $0x1e0] sm:$0xff] %vm49_vm1, %v8687_v8 }
 0x874   :  { %v8634_v3 = vpop.f32.mrf.mxu1 }
 0x875   :  { %v8635_v52 = vadd.f32 %v8634_v3, %v8569_v1 }
 0x877   :  { %v8672_v5 = vmax.f32 %v8635_v52, 0.0 }
 0x879   :  { %v8688_v42 = vadd.f32 %v9484_v37, %v8672_v5 }
 0x87b   :  { %8705 = vst.msk [vmem:[#allocation3 + $0x1e8] sm:$0xff] %vm49_vm1, %v8688_v42 }
 0x880   :  { %v8572_v19 = vpop.f32.mrf.mxu0 }
 0x885   :  { %v8637_v34 = vpop.f32.mrf.mxu1 }
 0x886   :  { %v8638_v40 = vadd.f32 %v8637_v34, %v8572_v19 }
 0x888   :  { %v8673_v56 = vmax.f32 %v8638_v40, 0.0  ;;  %v8575_v30 = vpop.f32.mrf.mxu0 }
 0x88a   :  { %v8689_v2 = vadd.f32 %v9485_v6, %v8673_v56 }
 0x88c   :  { %8706 = vst.msk [vmem:[#allocation3 + $0x1f0] sm:$0xff] %vm49_vm1, %v8689_v2 }
 0x88d   :  { %v8640_v49 = vpop.f32.mrf.mxu1 }
 0x88e   :  { %v8641_v54 = vadd.f32 %v8640_v49, %v8575_v30 }
 0x890   :  { %v8674_v4 = vmax.f32 %v8641_v54, 0.0 }
 0x892   :  { %v8690_v44 = vadd.f32 %v9486_v36, %v8674_v4 }
 0x894   :  { %8707 = vst.msk [vmem:[#allocation3 + $0x1f8] sm:$0xff] %vm49_vm1, %v8690_v44 }
 0x895   :  { %8722 = dma.vmem_to_hbm [thread:$0]  %s8715_s16, 8192, %s8717_s20, [#allocation4], %s11255_s27, %s11255_s27, %s11256_s3  }
 0x896   :  { %11243 = dma.done.wait [#allocation4], 8192  }
 0x897   :  { %11244 = vsyncadd [#allocation4], 4294959104 }
 0x898   :  { %8733 = vsyncpa [#allocation4], 1 }

</bundles_post_ra>
